<compile_context>
chip_gen: v5e
topology: v5e:2x2
jax: 0.10.0
libtpu: 0.0.40
codegen_flags: <defaults>
</compile_context>

<pallas_src>
import jax
import jax.numpy as jnp
from jax import lax
from jax.experimental import pallas as pl
from jax.experimental.pallas import tpu as pltpu


# ----------------------------------------------------------------------------
# Kernel: one invocation computes the whole bidirectional LSTM.
#   x_ref:    (B, T, D)    raw input
#   wih_ref:  (D, 8H)      [W_ih_fwd.T | W_ih_bwd.T]   (f32)
#   whh_ref:  (H, 8H)      [W_hh_fwd.T | W_hh_bwd.T]   (bf16)
#   bias_ref: (2B, 4H)     rows [0,B): b_ih_f+b_hh_f, rows [B,2B): b_ih_b+b_hh_b
#   out_ref:  (B, T, 2H)   fwd half [..., :H], bwd half [..., H:]
# ----------------------------------------------------------------------------
def _bilstm_kernel(x_ref, wih_ref, whh_ref, bias_ref, out_ref):
    B, T, D = x_ref.shape
    R, G = bias_ref.shape          # R = 2B merged rows, G = 4H gate width
    H = G // 4

    # Hoisted once (JAX does not CSE broadcasts inside the unrolled loop).
    dir_mask = lax.broadcasted_iota(jnp.int32, (R, G), 0) < B   # fwd rows True
    bias = bias_ref[...]                                        # (2B, 4H) f32

    def select(both):
        # (2B, 8H) -> (2B, 4H): fwd rows take the fwd gate columns,
        # bwd rows take the bwd gate columns.
        return jnp.where(dir_mask, both[:, :G], both[:, G:])

    h = jnp.zeros((R, H), jnp.float32)
    c = jnp.zeros((R, H), jnp.float32)

    # T is a small static constant -> fully unrolled; all indices static.
    for t in range(T):
        tb = T - 1 - t

        # -- input projection for this step: independent of h (off the serial
        #    recurrence path, the scheduler overlaps it with earlier steps) --
        x_t = jnp.concatenate([x_ref[:, t, :], x_ref[:, tb, :]], axis=0)  # (2B, D)
        px = jnp.dot(x_t, wih_ref[...], preferred_element_type=jnp.float32)
        pre = select(px) + bias                                           # (2B, 4H)

        # -- recurrent part (serial path); t = 0 peeled since h == 0 --
        if t == 0:
            gates = pre
        else:
            gb = jnp.dot(h.astype(jnp.bfloat16), whh_ref[...],
                         preferred_element_type=jnp.float32)              # (2B, 8H)
            gates = pre + select(gb)

        # PyTorch LSTM gate order: i, f, g, o (H = 128 -> lane-aligned slices)
        i_g = jax.nn.sigmoid(gates[:, 0 * H:1 * H])
        f_g = jax.nn.sigmoid(gates[:, 1 * H:2 * H])
        g_g = jnp.tanh(gates[:, 2 * H:3 * H])
        o_g = jax.nn.sigmoid(gates[:, 3 * H:4 * H])
        c = f_g * c + i_g * g_g
        h = o_g * jnp.tanh(c)

        # 2-D lane-aligned stores (off the dependency chain).
        out_ref[:, t, 0:H] = h[0:B, :].astype(out_ref.dtype)          # forward
        out_ref[:, tb, H:2 * H] = h[B:R, :].astype(out_ref.dtype)     # backward


# ----------------------------------------------------------------------------
# Wrapper: Pallas equivalent of encoder.forward: (B, T, D) -> (B, T, 2H)
# ----------------------------------------------------------------------------
def encoder_forward(x_btd, params):
    B, T, D = x_btd.shape
    H = params["w_hh_fwd"].shape[1]
    G = 4 * H

    # Direction-fused weight packs (lane axis layout: [fwd 4H | bwd 4H]).
    wih_cat = jnp.concatenate(
        [params["w_ih_fwd"].T, params["w_ih_bwd"].T], axis=1)             # (D, 8H) f32
    whh_cat = jnp.concatenate(
        [params["w_hh_fwd"].T, params["w_hh_bwd"].T],
        axis=1).astype(jnp.bfloat16)                                       # (H, 8H) bf16
    bias_f = params["b_ih_fwd"] + params["b_hh_fwd"]                       # (4H,)
    bias_b = params["b_ih_bwd"] + params["b_hh_bwd"]                       # (4H,)
    bias_rows = jnp.concatenate(
        [jnp.broadcast_to(bias_f, (B, G)),
         jnp.broadcast_to(bias_b, (B, G))], axis=0)                        # (2B, 4H)

    return pl.pallas_call(
        _bilstm_kernel,
        out_shape=jax.ShapeDtypeStruct((B, T, 2 * H), x_btd.dtype),
        grid=(1,),
        in_specs=[
            pl.BlockSpec((B, T, D), lambda i: (0, 0, 0)),
            pl.BlockSpec((D, 2 * G), lambda i: (0, 0)),
            pl.BlockSpec((H, 2 * G), lambda i: (0, 0)),
            pl.BlockSpec((2 * B, G), lambda i: (0, 0)),
        ],
        out_specs=pl.BlockSpec((B, T, 2 * H), lambda i: (0, 0, 0)),
        compiler_params=pltpu.CompilerParams(
            dimension_semantics=("arbitrary",)),
    )(x_btd, wih_cat, whh_cat, bias_rows)


# ----------------------------------------------------------------------------
# Pure-JAX reference (lax.scan, f32) used only to sanity-check the kernel.
# ----------------------------------------------------------------------------
def _lstm_direction_ref(x_tbd, w_ih, w_hh, b_ih, b_hh):
    H = w_hh.shape[1]
    B = x_tbd.shape[1]

    def step(carry, x_t):
        h, c = carry
        gates = (jnp.dot(x_t, w_ih.T, precision=lax.Precision.HIGHEST)
                 + jnp.dot(h, w_hh.T, precision=lax.Precision.HIGHEST)
                 + b_ih + b_hh)
        i = jax.nn.sigmoid(gates[:, 0 * H:1 * H])
        f = jax.nn.sigmoid(gates[:, 1 * H:2 * H])
        g = jnp.tanh(gates[:, 2 * H:3 * H])
        o = jax.nn.sigmoid(gates[:, 3 * H:4 * H])
        c = f * c + i * g
        h = o * jnp.tanh(c)
        return (h, c), h

    init = (jnp.zeros((B, H), jnp.float32), jnp.zeros((B, H), jnp.float32))
    _, hs = lax.scan(step, init, x_tbd)
    return hs


def encoder_forward_ref(x_btd, params):
    x_tbd = jnp.transpose(x_btd, (1, 0, 2))
    fwd = _lstm_direction_ref(x_tbd, params["w_ih_fwd"], params["w_hh_fwd"],
                              params["b_ih_fwd"], params["b_hh_fwd"])
    bwd = _lstm_direction_ref(x_tbd[::-1], params["w_ih_bwd"], params["w_hh_bwd"],
                              params["b_ih_bwd"], params["b_hh_bwd"])[::-1]
    return jnp.transpose(jnp.concatenate([fwd, bwd], axis=-1), (1, 0, 2))


# ----------------------------------------------------------------------------
# Deterministic parameter init (PyTorch LSTM default: U(-1/sqrt(H), 1/sqrt(H)))
# ----------------------------------------------------------------------------
def init_params(key, input_dim, hidden_dim):
    k = 1.0 / jnp.sqrt(hidden_dim)
    names_shapes = [
        ("w_ih_fwd", (4 * hidden_dim, input_dim)),
        ("w_hh_fwd", (4 * hidden_dim, hidden_dim)),
        ("b_ih_fwd", (4 * hidden_dim,)),
        ("b_hh_fwd", (4 * hidden_dim,)),
        ("w_ih_bwd", (4 * hidden_dim, input_dim)),
        ("w_hh_bwd", (4 * hidden_dim, hidden_dim)),
        ("b_ih_bwd", (4 * hidden_dim,)),
        ("b_hh_bwd", (4 * hidden_dim,)),
    ]
    keys = jax.random.split(key, len(names_shapes))
    return {
        name: jax.random.uniform(kk, shape, jnp.float32, -k, k)
        for kk, (name, shape) in zip(keys, names_shapes)
    }


if __name__ == "__main__":
    # Shapes implied by the module: batch=2, input_dim=39, hidden_dim=128.
    batch, time_steps, input_dim, hidden_dim = 2, 8, 39, 128

    root = jax.random.PRNGKey(0)
    kx, kp = jax.random.split(root)
    x = jax.random.normal(kx, (batch, time_steps, input_dim), jnp.float32)
    params = init_params(kp, input_dim, hidden_dim)

    encoder_fn = jax.jit(encoder_forward)
    out = jax.block_until_ready(encoder_fn(x, params))      # (B, T, 2H)

    ref = encoder_forward_ref(x, params)
    assert out.shape == (batch, time_steps, 2 * hidden_dim), out.shape
    # The recurrent matmul now runs with bf16 operands (f32 accumulation);
    # over T=8 steps the bounded (tanh) outputs stay within ~1e-3 of the f32
    # scan reference, so 1e-2 tolerance is comfortable.
    assert jnp.allclose(out, ref, atol=1e-2, rtol=1e-2), "mismatch vs reference"

    print("KERNEL_OK")
</pallas_src>

<mosaic_0001>
module attributes {stable_mosaic.version = 11 : i64} {
  func.func @_bilstm_kernel(%arg0: i32, %arg1: memref<2x8x39xf32, #tpu.memory_space<vmem>>, %arg2: memref<39x1024xf32, #tpu.memory_space<vmem>>, %arg3: memref<128x1024xbf16, #tpu.memory_space<vmem>>, %arg4: memref<4x512xf32, #tpu.memory_space<vmem>>, %arg5: memref<2x8x256xf32, #tpu.memory_space<vmem>>) attributes {dimension_semantics = [#tpu.dimension_semantics<arbitrary>], iteration_bounds = array<i64: 1>, scalar_prefetch = 0 : i64, scratch_operands = 0 : i64, tpu.core_type = #tpu.core_type<tc>, window_params = [{pipeline_mode = #tpu.pipeline_mode<synchronous>, transform_indices = @transform_0, window_bounds = array<i64: 2, 8, 39>}, {pipeline_mode = #tpu.pipeline_mode<synchronous>, transform_indices = @transform_1, window_bounds = array<i64: 39, 1024>}, {pipeline_mode = #tpu.pipeline_mode<synchronous>, transform_indices = @transform_2, window_bounds = array<i64: 128, 1024>}, {pipeline_mode = #tpu.pipeline_mode<synchronous>, transform_indices = @transform_3, window_bounds = array<i64: 4, 512>}, {pipeline_mode = #tpu.pipeline_mode<synchronous>, transform_indices = @transform_4, window_bounds = array<i64: 2, 8, 256>}]} {
    %0 = tpu.iota {dimensions = array<i32: 0>} : vector<4x512xi32>
    %c2_i32 = arith.constant 2 : i32
    %1 = vector.broadcast %c2_i32 : i32 to vector<4x512xi32>
    %2 = arith.cmpi slt, %0, %1 : vector<4x512xi32>
    %c0 = arith.constant 0 : index
    %c0_0 = arith.constant 0 : index
    %3 = vector.load %arg4[%c0, %c0_0] : memref<4x512xf32, #tpu.memory_space<vmem>>, vector<4x512xf32>
    %cst = arith.constant 0.000000e+00 : f32
    %4 = vector.broadcast %cst : f32 to vector<4x128xf32>
    %c0_1 = arith.constant 0 : index
    %c0_2 = arith.constant 0 : index
    %c0_3 = arith.constant 0 : index
    %5 = vector.load %arg1[%c0_1, %c0_2, %c0_3] : memref<2x8x39xf32, #tpu.memory_space<vmem>>, vector<2x1x39xf32>
    %6 = vector.shape_cast %5 : vector<2x1x39xf32> to vector<2x39xf32>
    %c0_4 = arith.constant 0 : index
    %c7 = arith.constant 7 : index
    %c0_5 = arith.constant 0 : index
    %7 = vector.load %arg1[%c0_4, %c7, %c0_5] : memref<2x8x39xf32, #tpu.memory_space<vmem>>, vector<2x1x39xf32>
    %8 = vector.shape_cast %7 : vector<2x1x39xf32> to vector<2x39xf32>
    %9 = tpu.concatenate %6, %8 in 0 : vector<2x39xf32>, vector<2x39xf32> -> vector<4x39xf32>
    %c0_6 = arith.constant 0 : index
    %c0_7 = arith.constant 0 : index
    %10 = vector.load %arg2[%c0_6, %c0_7] : memref<39x1024xf32, #tpu.memory_space<vmem>>, vector<39x1024xf32>
    %cst_8 = arith.constant dense<0.000000e+00> : vector<4x1024xf32>
    %11 = tpu.matmul %9, %10, %cst_8 {dimension_numbers = #tpu.dot_dimension_numbers<[1], [0], [0], [1], [0, 0, 1, 1], [], []>} : vector<4x39xf32>, vector<39x1024xf32>, vector<4x1024xf32> -> vector<4x1024xf32>
    %12 = vector.extract_strided_slice %11 {offsets = [0, 0], sizes = [4, 512], strides = [1, 1]} : vector<4x1024xf32> to vector<4x512xf32>
    %13 = vector.extract_strided_slice %11 {offsets = [0, 512], sizes = [4, 512], strides = [1, 1]} : vector<4x1024xf32> to vector<4x512xf32>
    %14 = arith.select %2, %12, %13 : vector<4x512xi1>, vector<4x512xf32>
    %15 = arith.addf %14, %3 : vector<4x512xf32>
    %16 = vector.extract_strided_slice %15 {offsets = [0, 0], sizes = [4, 128], strides = [1, 1]} : vector<4x512xf32> to vector<4x128xf32>
    %17 = arith.negf %16 : vector<4x128xf32>
    %18 = math.exp %17 : vector<4x128xf32>
    %cst_9 = arith.constant 1.000000e+00 : f32
    %19 = vector.broadcast %cst_9 : f32 to vector<4x128xf32>
    %20 = arith.addf %19, %18 : vector<4x128xf32>
    %21 = arith.divf %19, %20 : vector<4x128xf32>
    %22 = vector.extract_strided_slice %15 {offsets = [0, 128], sizes = [4, 128], strides = [1, 1]} : vector<4x512xf32> to vector<4x128xf32>
    %23 = arith.negf %22 : vector<4x128xf32>
    %24 = math.exp %23 : vector<4x128xf32>
    %cst_10 = arith.constant 1.000000e+00 : f32
    %25 = vector.broadcast %cst_10 : f32 to vector<4x128xf32>
    %26 = arith.addf %25, %24 : vector<4x128xf32>
    %27 = arith.divf %25, %26 : vector<4x128xf32>
    %28 = vector.extract_strided_slice %15 {offsets = [0, 256], sizes = [4, 128], strides = [1, 1]} : vector<4x512xf32> to vector<4x128xf32>
    %29 = math.tanh %28 : vector<4x128xf32>
    %30 = vector.extract_strided_slice %15 {offsets = [0, 384], sizes = [4, 128], strides = [1, 1]} : vector<4x512xf32> to vector<4x128xf32>
    %31 = arith.negf %30 : vector<4x128xf32>
    %32 = math.exp %31 : vector<4x128xf32>
    %cst_11 = arith.constant 1.000000e+00 : f32
    %33 = vector.broadcast %cst_11 : f32 to vector<4x128xf32>
    %34 = arith.addf %33, %32 : vector<4x128xf32>
    %35 = arith.divf %33, %34 : vector<4x128xf32>
    %36 = arith.mulf %27, %4 : vector<4x128xf32>
    %37 = arith.mulf %21, %29 : vector<4x128xf32>
    %38 = arith.addf %36, %37 : vector<4x128xf32>
    %39 = math.tanh %38 : vector<4x128xf32>
    %40 = arith.mulf %35, %39 : vector<4x128xf32>
    %41 = vector.extract_strided_slice %40 {offsets = [0, 0], sizes = [2, 128], strides = [1, 1]} : vector<4x128xf32> to vector<2x128xf32>
    %c0_12 = arith.constant 0 : index
    %c0_13 = arith.constant 0 : index
    %c0_14 = arith.constant 0 : index
    %42 = vector.load %arg5[%c0_12, %c0_13, %c0_14] : memref<2x8x256xf32, #tpu.memory_space<vmem>>, vector<2x1x128xf32>
    %43 = vector.shape_cast %42 : vector<2x1x128xf32> to vector<2x128xf32>
    %44 = vector.shape_cast %41 : vector<2x128xf32> to vector<2x1x128xf32>
    tpu.vector_store %arg5[%c0_12, %c0_13, %c0_14], %44 {strides = array<i32>} : memref<2x8x256xf32, #tpu.memory_space<vmem>>, vector<2x1x128xf32>,
    %45 = vector.extract_strided_slice %40 {offsets = [2, 0], sizes = [2, 128], strides = [1, 1]} : vector<4x128xf32> to vector<2x128xf32>
    %c0_15 = arith.constant 0 : index
    %c7_16 = arith.constant 7 : index
    %c128 = arith.constant 128 : index
    %46 = vector.load %arg5[%c0_15, %c7_16, %c128] : memref<2x8x256xf32, #tpu.memory_space<vmem>>, vector<2x1x128xf32>
    %47 = vector.shape_cast %46 : vector<2x1x128xf32> to vector<2x128xf32>
    %48 = vector.shape_cast %45 : vector<2x128xf32> to vector<2x1x128xf32>
    tpu.vector_store %arg5[%c0_15, %c7_16, %c128], %48 {strides = array<i32>} : memref<2x8x256xf32, #tpu.memory_space<vmem>>, vector<2x1x128xf32>,
    %c0_17 = arith.constant 0 : index
    %c1 = arith.constant 1 : index
    %c0_18 = arith.constant 0 : index
    %49 = vector.load %arg1[%c0_17, %c1, %c0_18] : memref<2x8x39xf32, #tpu.memory_space<vmem>>, vector<2x1x39xf32>
    %50 = vector.shape_cast %49 : vector<2x1x39xf32> to vector<2x39xf32>
    %c0_19 = arith.constant 0 : index
    %c6 = arith.constant 6 : index
    %c0_20 = arith.constant 0 : index
    %51 = vector.load %arg1[%c0_19, %c6, %c0_20] : memref<2x8x39xf32, #tpu.memory_space<vmem>>, vector<2x1x39xf32>
    %52 = vector.shape_cast %51 : vector<2x1x39xf32> to vector<2x39xf32>
    %53 = tpu.concatenate %50, %52 in 0 : vector<2x39xf32>, vector<2x39xf32> -> vector<4x39xf32>
    %c0_21 = arith.constant 0 : index
    %c0_22 = arith.constant 0 : index
    %54 = vector.load %arg2[%c0_21, %c0_22] : memref<39x1024xf32, #tpu.memory_space<vmem>>, vector<39x1024xf32>
    %cst_23 = arith.constant dense<0.000000e+00> : vector<4x1024xf32>
    %55 = tpu.matmul %53, %54, %cst_23 {dimension_numbers = #tpu.dot_dimension_numbers<[1], [0], [0], [1], [0, 0, 1, 1], [], []>} : vector<4x39xf32>, vector<39x1024xf32>, vector<4x1024xf32> -> vector<4x1024xf32>
    %56 = vector.extract_strided_slice %55 {offsets = [0, 0], sizes = [4, 512], strides = [1, 1]} : vector<4x1024xf32> to vector<4x512xf32>
    %57 = vector.extract_strided_slice %55 {offsets = [0, 512], sizes = [4, 512], strides = [1, 1]} : vector<4x1024xf32> to vector<4x512xf32>
    %58 = arith.select %2, %56, %57 : vector<4x512xi1>, vector<4x512xf32>
    %59 = arith.addf %58, %3 : vector<4x512xf32>
    %60 = arith.truncf %40 : vector<4x128xf32> to vector<4x128xbf16>
    %c0_24 = arith.constant 0 : index
    %c0_25 = arith.constant 0 : index
    %61 = vector.load %arg3[%c0_24, %c0_25] : memref<128x1024xbf16, #tpu.memory_space<vmem>>, vector<128x1024xbf16>
    %cst_26 = arith.constant dense<0.000000e+00> : vector<4x1024xf32>
    %62 = tpu.matmul %60, %61, %cst_26 {dimension_numbers = #tpu.dot_dimension_numbers<[1], [0], [0], [1], [0, 0, 1, 1], [], []>} : vector<4x128xbf16>, vector<128x1024xbf16>, vector<4x1024xf32> -> vector<4x1024xf32>
    %63 = vector.extract_strided_slice %62 {offsets = [0, 0], sizes = [4, 512], strides = [1, 1]} : vector<4x1024xf32> to vector<4x512xf32>
    %64 = vector.extract_strided_slice %62 {offsets = [0, 512], sizes = [4, 512], strides = [1, 1]} : vector<4x1024xf32> to vector<4x512xf32>
    %65 = arith.select %2, %63, %64 : vector<4x512xi1>, vector<4x512xf32>
    %66 = arith.addf %59, %65 : vector<4x512xf32>
    %67 = vector.extract_strided_slice %66 {offsets = [0, 0], sizes = [4, 128], strides = [1, 1]} : vector<4x512xf32> to vector<4x128xf32>
    %68 = arith.negf %67 : vector<4x128xf32>
    %69 = math.exp %68 : vector<4x128xf32>
    %cst_27 = arith.constant 1.000000e+00 : f32
    %70 = vector.broadcast %cst_27 : f32 to vector<4x128xf32>
    %71 = arith.addf %70, %69 : vector<4x128xf32>
    %72 = arith.divf %70, %71 : vector<4x128xf32>
    %73 = vector.extract_strided_slice %66 {offsets = [0, 128], sizes = [4, 128], strides = [1, 1]} : vector<4x512xf32> to vector<4x128xf32>
    %74 = arith.negf %73 : vector<4x128xf32>
    %75 = math.exp %74 : vector<4x128xf32>
    %cst_28 = arith.constant 1.000000e+00 : f32
    %76 = vector.broadcast %cst_28 : f32 to vector<4x128xf32>
    %77 = arith.addf %76, %75 : vector<4x128xf32>
    %78 = arith.divf %76, %77 : vector<4x128xf32>
    %79 = vector.extract_strided_slice %66 {offsets = [0, 256], sizes = [4, 128], strides = [1, 1]} : vector<4x512xf32> to vector<4x128xf32>
    %80 = math.tanh %79 : vector<4x128xf32>
    %81 = vector.extract_strided_slice %66 {offsets = [0, 384], sizes = [4, 128], strides = [1, 1]} : vector<4x512xf32> to vector<4x128xf32>
    %82 = arith.negf %81 : vector<4x128xf32>
    %83 = math.exp %82 : vector<4x128xf32>
    %cst_29 = arith.constant 1.000000e+00 : f32
    %84 = vector.broadcast %cst_29 : f32 to vector<4x128xf32>
    %85 = arith.addf %84, %83 : vector<4x128xf32>
    %86 = arith.divf %84, %85 : vector<4x128xf32>
    %87 = arith.mulf %78, %38 : vector<4x128xf32>
    %88 = arith.mulf %72, %80 : vector<4x128xf32>
    %89 = arith.addf %87, %88 : vector<4x128xf32>
    %90 = math.tanh %89 : vector<4x128xf32>
    %91 = arith.mulf %86, %90 : vector<4x128xf32>
    %92 = vector.extract_strided_slice %91 {offsets = [0, 0], sizes = [2, 128], strides = [1, 1]} : vector<4x128xf32> to vector<2x128xf32>
    %c0_30 = arith.constant 0 : index
    %c1_31 = arith.constant 1 : index
    %c0_32 = arith.constant 0 : index
    %93 = vector.load %arg5[%c0_30, %c1_31, %c0_32] : memref<2x8x256xf32, #tpu.memory_space<vmem>>, vector<2x1x128xf32>
    %94 = vector.shape_cast %93 : vector<2x1x128xf32> to vector<2x128xf32>
    %95 = vector.shape_cast %92 : vector<2x128xf32> to vector<2x1x128xf32>
    tpu.vector_store %arg5[%c0_30, %c1_31, %c0_32], %95 {strides = array<i32>} : memref<2x8x256xf32, #tpu.memory_space<vmem>>, vector<2x1x128xf32>,
    %96 = vector.extract_strided_slice %91 {offsets = [2, 0], sizes = [2, 128], strides = [1, 1]} : vector<4x128xf32> to vector<2x128xf32>
    %c0_33 = arith.constant 0 : index
    %c6_34 = arith.constant 6 : index
    %c128_35 = arith.constant 128 : index
    %97 = vector.load %arg5[%c0_33, %c6_34, %c128_35] : memref<2x8x256xf32, #tpu.memory_space<vmem>>, vector<2x1x128xf32>
    %98 = vector.shape_cast %97 : vector<2x1x128xf32> to vector<2x128xf32>
    %99 = vector.shape_cast %96 : vector<2x128xf32> to vector<2x1x128xf32>
    tpu.vector_store %arg5[%c0_33, %c6_34, %c128_35], %99 {strides = array<i32>} : memref<2x8x256xf32, #tpu.memory_space<vmem>>, vector<2x1x128xf32>,
    %c0_36 = arith.constant 0 : index
    %c2 = arith.constant 2 : index
    %c0_37 = arith.constant 0 : index
    %100 = vector.load %arg1[%c0_36, %c2, %c0_37] : memref<2x8x39xf32, #tpu.memory_space<vmem>>, vector<2x1x39xf32>
    %101 = vector.shape_cast %100 : vector<2x1x39xf32> to vector<2x39xf32>
    %c0_38 = arith.constant 0 : index
    %c5 = arith.constant 5 : index
    %c0_39 = arith.constant 0 : index
    %102 = vector.load %arg1[%c0_38, %c5, %c0_39] : memref<2x8x39xf32, #tpu.memory_space<vmem>>, vector<2x1x39xf32>
    %103 = vector.shape_cast %102 : vector<2x1x39xf32> to vector<2x39xf32>
    %104 = tpu.concatenate %101, %103 in 0 : vector<2x39xf32>, vector<2x39xf32> -> vector<4x39xf32>
    %c0_40 = arith.constant 0 : index
    %c0_41 = arith.constant 0 : index
    %105 = vector.load %arg2[%c0_40, %c0_41] : memref<39x1024xf32, #tpu.memory_space<vmem>>, vector<39x1024xf32>
    %cst_42 = arith.constant dense<0.000000e+00> : vector<4x1024xf32>
    %106 = tpu.matmul %104, %105, %cst_42 {dimension_numbers = #tpu.dot_dimension_numbers<[1], [0], [0], [1], [0, 0, 1, 1], [], []>} : vector<4x39xf32>, vector<39x1024xf32>, vector<4x1024xf32> -> vector<4x1024xf32>
    %107 = vector.extract_strided_slice %106 {offsets = [0, 0], sizes = [4, 512], strides = [1, 1]} : vector<4x1024xf32> to vector<4x512xf32>
    %108 = vector.extract_strided_slice %106 {offsets = [0, 512], sizes = [4, 512], strides = [1, 1]} : vector<4x1024xf32> to vector<4x512xf32>
    %109 = arith.select %2, %107, %108 : vector<4x512xi1>, vector<4x512xf32>
    %110 = arith.addf %109, %3 : vector<4x512xf32>
    %111 = arith.truncf %91 : vector<4x128xf32> to vector<4x128xbf16>
    %c0_43 = arith.constant 0 : index
    %c0_44 = arith.constant 0 : index
    %112 = vector.load %arg3[%c0_43, %c0_44] : memref<128x1024xbf16, #tpu.memory_space<vmem>>, vector<128x1024xbf16>
    %cst_45 = arith.constant dense<0.000000e+00> : vector<4x1024xf32>
    %113 = tpu.matmul %111, %112, %cst_45 {dimension_numbers = #tpu.dot_dimension_numbers<[1], [0], [0], [1], [0, 0, 1, 1], [], []>} : vector<4x128xbf16>, vector<128x1024xbf16>, vector<4x1024xf32> -> vector<4x1024xf32>
    %114 = vector.extract_strided_slice %113 {offsets = [0, 0], sizes = [4, 512], strides = [1, 1]} : vector<4x1024xf32> to vector<4x512xf32>
    %115 = vector.extract_strided_slice %113 {offsets = [0, 512], sizes = [4, 512], strides = [1, 1]} : vector<4x1024xf32> to vector<4x512xf32>
    %116 = arith.select %2, %114, %115 : vector<4x512xi1>, vector<4x512xf32>
    %117 = arith.addf %110, %116 : vector<4x512xf32>
    %118 = vector.extract_strided_slice %117 {offsets = [0, 0], sizes = [4, 128], strides = [1, 1]} : vector<4x512xf32> to vector<4x128xf32>
    %119 = arith.negf %118 : vector<4x128xf32>
    %120 = math.exp %119 : vector<4x128xf32>
    %cst_46 = arith.constant 1.000000e+00 : f32
    %121 = vector.broadcast %cst_46 : f32 to vector<4x128xf32>
    %122 = arith.addf %121, %120 : vector<4x128xf32>
    %123 = arith.divf %121, %122 : vector<4x128xf32>
    %124 = vector.extract_strided_slice %117 {offsets = [0, 128], sizes = [4, 128], strides = [1, 1]} : vector<4x512xf32> to vector<4x128xf32>
    %125 = arith.negf %124 : vector<4x128xf32>
    %126 = math.exp %125 : vector<4x128xf32>
    %cst_47 = arith.constant 1.000000e+00 : f32
    %127 = vector.broadcast %cst_47 : f32 to vector<4x128xf32>
    %128 = arith.addf %127, %126 : vector<4x128xf32>
    %129 = arith.divf %127, %128 : vector<4x128xf32>
    %130 = vector.extract_strided_slice %117 {offsets = [0, 256], sizes = [4, 128], strides = [1, 1]} : vector<4x512xf32> to vector<4x128xf32>
    %131 = math.tanh %130 : vector<4x128xf32>
    %132 = vector.extract_strided_slice %117 {offsets = [0, 384], sizes = [4, 128], strides = [1, 1]} : vector<4x512xf32> to vector<4x128xf32>
    %133 = arith.negf %132 : vector<4x128xf32>
    %134 = math.exp %133 : vector<4x128xf32>
    %cst_48 = arith.constant 1.000000e+00 : f32
    %135 = vector.broadcast %cst_48 : f32 to vector<4x128xf32>
    %136 = arith.addf %135, %134 : vector<4x128xf32>
    %137 = arith.divf %135, %136 : vector<4x128xf32>
    %138 = arith.mulf %129, %89 : vector<4x128xf32>
    %139 = arith.mulf %123, %131 : vector<4x128xf32>
    %140 = arith.addf %138, %139 : vector<4x128xf32>
    %141 = math.tanh %140 : vector<4x128xf32>
    %142 = arith.mulf %137, %141 : vector<4x128xf32>
    %143 = vector.extract_strided_slice %142 {offsets = [0, 0], sizes = [2, 128], strides = [1, 1]} : vector<4x128xf32> to vector<2x128xf32>
    %c0_49 = arith.constant 0 : index
    %c2_50 = arith.constant 2 : index
    %c0_51 = arith.constant 0 : index
    %144 = vector.load %arg5[%c0_49, %c2_50, %c0_51] : memref<2x8x256xf32, #tpu.memory_space<vmem>>, vector<2x1x128xf32>
    %145 = vector.shape_cast %144 : vector<2x1x128xf32> to vector<2x128xf32>
    %146 = vector.shape_cast %143 : vector<2x128xf32> to vector<2x1x128xf32>
    tpu.vector_store %arg5[%c0_49, %c2_50, %c0_51], %146 {strides = array<i32>} : memref<2x8x256xf32, #tpu.memory_space<vmem>>, vector<2x1x128xf32>,
    %147 = vector.extract_strided_slice %142 {offsets = [2, 0], sizes = [2, 128], strides = [1, 1]} : vector<4x128xf32> to vector<2x128xf32>
    %c0_52 = arith.constant 0 : index
    %c5_53 = arith.constant 5 : index
    %c128_54 = arith.constant 128 : index
    %148 = vector.load %arg5[%c0_52, %c5_53, %c128_54] : memref<2x8x256xf32, #tpu.memory_space<vmem>>, vector<2x1x128xf32>
    %149 = vector.shape_cast %148 : vector<2x1x128xf32> to vector<2x128xf32>
    %150 = vector.shape_cast %147 : vector<2x128xf32> to vector<2x1x128xf32>
    tpu.vector_store %arg5[%c0_52, %c5_53, %c128_54], %150 {strides = array<i32>} : memref<2x8x256xf32, #tpu.memory_space<vmem>>, vector<2x1x128xf32>,
    %c0_55 = arith.constant 0 : index
    %c3 = arith.constant 3 : index
    %c0_56 = arith.constant 0 : index
    %151 = vector.load %arg1[%c0_55, %c3, %c0_56] : memref<2x8x39xf32, #tpu.memory_space<vmem>>, vector<2x1x39xf32>
    %152 = vector.shape_cast %151 : vector<2x1x39xf32> to vector<2x39xf32>
    %c0_57 = arith.constant 0 : index
    %c4 = arith.constant 4 : index
    %c0_58 = arith.constant 0 : index
    %153 = vector.load %arg1[%c0_57, %c4, %c0_58] : memref<2x8x39xf32, #tpu.memory_space<vmem>>, vector<2x1x39xf32>
    %154 = vector.shape_cast %153 : vector<2x1x39xf32> to vector<2x39xf32>
    %155 = tpu.concatenate %152, %154 in 0 : vector<2x39xf32>, vector<2x39xf32> -> vector<4x39xf32>
    %c0_59 = arith.constant 0 : index
    %c0_60 = arith.constant 0 : index
    %156 = vector.load %arg2[%c0_59, %c0_60] : memref<39x1024xf32, #tpu.memory_space<vmem>>, vector<39x1024xf32>
    %cst_61 = arith.constant dense<0.000000e+00> : vector<4x1024xf32>
    %157 = tpu.matmul %155, %156, %cst_61 {dimension_numbers = #tpu.dot_dimension_numbers<[1], [0], [0], [1], [0, 0, 1, 1], [], []>} : vector<4x39xf32>, vector<39x1024xf32>, vector<4x1024xf32> -> vector<4x1024xf32>
    %158 = vector.extract_strided_slice %157 {offsets = [0, 0], sizes = [4, 512], strides = [1, 1]} : vector<4x1024xf32> to vector<4x512xf32>
    %159 = vector.extract_strided_slice %157 {offsets = [0, 512], sizes = [4, 512], strides = [1, 1]} : vector<4x1024xf32> to vector<4x512xf32>
    %160 = arith.select %2, %158, %159 : vector<4x512xi1>, vector<4x512xf32>
    %161 = arith.addf %160, %3 : vector<4x512xf32>
    %162 = arith.truncf %142 : vector<4x128xf32> to vector<4x128xbf16>
    %c0_62 = arith.constant 0 : index
    %c0_63 = arith.constant 0 : index
    %163 = vector.load %arg3[%c0_62, %c0_63] : memref<128x1024xbf16, #tpu.memory_space<vmem>>, vector<128x1024xbf16>
    %cst_64 = arith.constant dense<0.000000e+00> : vector<4x1024xf32>
    %164 = tpu.matmul %162, %163, %cst_64 {dimension_numbers = #tpu.dot_dimension_numbers<[1], [0], [0], [1], [0, 0, 1, 1], [], []>} : vector<4x128xbf16>, vector<128x1024xbf16>, vector<4x1024xf32> -> vector<4x1024xf32>
    %165 = vector.extract_strided_slice %164 {offsets = [0, 0], sizes = [4, 512], strides = [1, 1]} : vector<4x1024xf32> to vector<4x512xf32>
    %166 = vector.extract_strided_slice %164 {offsets = [0, 512], sizes = [4, 512], strides = [1, 1]} : vector<4x1024xf32> to vector<4x512xf32>
    %167 = arith.select %2, %165, %166 : vector<4x512xi1>, vector<4x512xf32>
    %168 = arith.addf %161, %167 : vector<4x512xf32>
    %169 = vector.extract_strided_slice %168 {offsets = [0, 0], sizes = [4, 128], strides = [1, 1]} : vector<4x512xf32> to vector<4x128xf32>
    %170 = arith.negf %169 : vector<4x128xf32>
    %171 = math.exp %170 : vector<4x128xf32>
    %cst_65 = arith.constant 1.000000e+00 : f32
    %172 = vector.broadcast %cst_65 : f32 to vector<4x128xf32>
    %173 = arith.addf %172, %171 : vector<4x128xf32>
    %174 = arith.divf %172, %173 : vector<4x128xf32>
    %175 = vector.extract_strided_slice %168 {offsets = [0, 128], sizes = [4, 128], strides = [1, 1]} : vector<4x512xf32> to vector<4x128xf32>
    %176 = arith.negf %175 : vector<4x128xf32>
    %177 = math.exp %176 : vector<4x128xf32>
    %cst_66 = arith.constant 1.000000e+00 : f32
    %178 = vector.broadcast %cst_66 : f32 to vector<4x128xf32>
    %179 = arith.addf %178, %177 : vector<4x128xf32>
    %180 = arith.divf %178, %179 : vector<4x128xf32>
    %181 = vector.extract_strided_slice %168 {offsets = [0, 256], sizes = [4, 128], strides = [1, 1]} : vector<4x512xf32> to vector<4x128xf32>
    %182 = math.tanh %181 : vector<4x128xf32>
    %183 = vector.extract_strided_slice %168 {offsets = [0, 384], sizes = [4, 128], strides = [1, 1]} : vector<4x512xf32> to vector<4x128xf32>
    %184 = arith.negf %183 : vector<4x128xf32>
    %185 = math.exp %184 : vector<4x128xf32>
    %cst_67 = arith.constant 1.000000e+00 : f32
    %186 = vector.broadcast %cst_67 : f32 to vector<4x128xf32>
    %187 = arith.addf %186, %185 : vector<4x128xf32>
    %188 = arith.divf %186, %187 : vector<4x128xf32>
    %189 = arith.mulf %180, %140 : vector<4x128xf32>
    %190 = arith.mulf %174, %182 : vector<4x128xf32>
    %191 = arith.addf %189, %190 : vector<4x128xf32>
    %192 = math.tanh %191 : vector<4x128xf32>
    %193 = arith.mulf %188, %192 : vector<4x128xf32>
    %194 = vector.extract_strided_slice %193 {offsets = [0, 0], sizes = [2, 128], strides = [1, 1]} : vector<4x128xf32> to vector<2x128xf32>
    %c0_68 = arith.constant 0 : index
    %c3_69 = arith.constant 3 : index
    %c0_70 = arith.constant 0 : index
    %195 = vector.load %arg5[%c0_68, %c3_69, %c0_70] : memref<2x8x256xf32, #tpu.memory_space<vmem>>, vector<2x1x128xf32>
    %196 = vector.shape_cast %195 : vector<2x1x128xf32> to vector<2x128xf32>
    %197 = vector.shape_cast %194 : vector<2x128xf32> to vector<2x1x128xf32>
    tpu.vector_store %arg5[%c0_68, %c3_69, %c0_70], %197 {strides = array<i32>} : memref<2x8x256xf32, #tpu.memory_space<vmem>>, vector<2x1x128xf32>,
    %198 = vector.extract_strided_slice %193 {offsets = [2, 0], sizes = [2, 128], strides = [1, 1]} : vector<4x128xf32> to vector<2x128xf32>
    %c0_71 = arith.constant 0 : index
    %c4_72 = arith.constant 4 : index
    %c128_73 = arith.constant 128 : index
    %199 = vector.load %arg5[%c0_71, %c4_72, %c128_73] : memref<2x8x256xf32, #tpu.memory_space<vmem>>, vector<2x1x128xf32>
    %200 = vector.shape_cast %199 : vector<2x1x128xf32> to vector<2x128xf32>
    %201 = vector.shape_cast %198 : vector<2x128xf32> to vector<2x1x128xf32>
    tpu.vector_store %arg5[%c0_71, %c4_72, %c128_73], %201 {strides = array<i32>} : memref<2x8x256xf32, #tpu.memory_space<vmem>>, vector<2x1x128xf32>,
    %c0_74 = arith.constant 0 : index
    %c4_75 = arith.constant 4 : index
    %c0_76 = arith.constant 0 : index
    %202 = vector.load %arg1[%c0_74, %c4_75, %c0_76] : memref<2x8x39xf32, #tpu.memory_space<vmem>>, vector<2x1x39xf32>
    %203 = vector.shape_cast %202 : vector<2x1x39xf32> to vector<2x39xf32>
    %c0_77 = arith.constant 0 : index
    %c3_78 = arith.constant 3 : index
    %c0_79 = arith.constant 0 : index
    %204 = vector.load %arg1[%c0_77, %c3_78, %c0_79] : memref<2x8x39xf32, #tpu.memory_space<vmem>>, vector<2x1x39xf32>
    %205 = vector.shape_cast %204 : vector<2x1x39xf32> to vector<2x39xf32>
    %206 = tpu.concatenate %203, %205 in 0 : vector<2x39xf32>, vector<2x39xf32> -> vector<4x39xf32>
    %c0_80 = arith.constant 0 : index
    %c0_81 = arith.constant 0 : index
    %207 = vector.load %arg2[%c0_80, %c0_81] : memref<39x1024xf32, #tpu.memory_space<vmem>>, vector<39x1024xf32>
    %cst_82 = arith.constant dense<0.000000e+00> : vector<4x1024xf32>
    %208 = tpu.matmul %206, %207, %cst_82 {dimension_numbers = #tpu.dot_dimension_numbers<[1], [0], [0], [1], [0, 0, 1, 1], [], []>} : vector<4x39xf32>, vector<39x1024xf32>, vector<4x1024xf32> -> vector<4x1024xf32>
    %209 = vector.extract_strided_slice %208 {offsets = [0, 0], sizes = [4, 512], strides = [1, 1]} : vector<4x1024xf32> to vector<4x512xf32>
    %210 = vector.extract_strided_slice %208 {offsets = [0, 512], sizes = [4, 512], strides = [1, 1]} : vector<4x1024xf32> to vector<4x512xf32>
    %211 = arith.select %2, %209, %210 : vector<4x512xi1>, vector<4x512xf32>
    %212 = arith.addf %211, %3 : vector<4x512xf32>
    %213 = arith.truncf %193 : vector<4x128xf32> to vector<4x128xbf16>
    %c0_83 = arith.constant 0 : index
    %c0_84 = arith.constant 0 : index
    %214 = vector.load %arg3[%c0_83, %c0_84] : memref<128x1024xbf16, #tpu.memory_space<vmem>>, vector<128x1024xbf16>
    %cst_85 = arith.constant dense<0.000000e+00> : vector<4x1024xf32>
    %215 = tpu.matmul %213, %214, %cst_85 {dimension_numbers = #tpu.dot_dimension_numbers<[1], [0], [0], [1], [0, 0, 1, 1], [], []>} : vector<4x128xbf16>, vector<128x1024xbf16>, vector<4x1024xf32> -> vector<4x1024xf32>
    %216 = vector.extract_strided_slice %215 {offsets = [0, 0], sizes = [4, 512], strides = [1, 1]} : vector<4x1024xf32> to vector<4x512xf32>
    %217 = vector.extract_strided_slice %215 {offsets = [0, 512], sizes = [4, 512], strides = [1, 1]} : vector<4x1024xf32> to vector<4x512xf32>
    %218 = arith.select %2, %216, %217 : vector<4x512xi1>, vector<4x512xf32>
    %219 = arith.addf %212, %218 : vector<4x512xf32>
    %220 = vector.extract_strided_slice %219 {offsets = [0, 0], sizes = [4, 128], strides = [1, 1]} : vector<4x512xf32> to vector<4x128xf32>
    %221 = arith.negf %220 : vector<4x128xf32>
    %222 = math.exp %221 : vector<4x128xf32>
    %cst_86 = arith.constant 1.000000e+00 : f32
    %223 = vector.broadcast %cst_86 : f32 to vector<4x128xf32>
    %224 = arith.addf %223, %222 : vector<4x128xf32>
    %225 = arith.divf %223, %224 : vector<4x128xf32>
    %226 = vector.extract_strided_slice %219 {offsets = [0, 128], sizes = [4, 128], strides = [1, 1]} : vector<4x512xf32> to vector<4x128xf32>
    %227 = arith.negf %226 : vector<4x128xf32>
    %228 = math.exp %227 : vector<4x128xf32>
    %cst_87 = arith.constant 1.000000e+00 : f32
    %229 = vector.broadcast %cst_87 : f32 to vector<4x128xf32>
    %230 = arith.addf %229, %228 : vector<4x128xf32>
    %231 = arith.divf %229, %230 : vector<4x128xf32>
    %232 = vector.extract_strided_slice %219 {offsets = [0, 256], sizes = [4, 128], strides = [1, 1]} : vector<4x512xf32> to vector<4x128xf32>
    %233 = math.tanh %232 : vector<4x128xf32>
    %234 = vector.extract_strided_slice %219 {offsets = [0, 384], sizes = [4, 128], strides = [1, 1]} : vector<4x512xf32> to vector<4x128xf32>
    %235 = arith.negf %234 : vector<4x128xf32>
    %236 = math.exp %235 : vector<4x128xf32>
    %cst_88 = arith.constant 1.000000e+00 : f32
    %237 = vector.broadcast %cst_88 : f32 to vector<4x128xf32>
    %238 = arith.addf %237, %236 : vector<4x128xf32>
    %239 = arith.divf %237, %238 : vector<4x128xf32>
    %240 = arith.mulf %231, %191 : vector<4x128xf32>
    %241 = arith.mulf %225, %233 : vector<4x128xf32>
    %242 = arith.addf %240, %241 : vector<4x128xf32>
    %243 = math.tanh %242 : vector<4x128xf32>
    %244 = arith.mulf %239, %243 : vector<4x128xf32>
    %245 = vector.extract_strided_slice %244 {offsets = [0, 0], sizes = [2, 128], strides = [1, 1]} : vector<4x128xf32> to vector<2x128xf32>
    %c0_89 = arith.constant 0 : index
    %c4_90 = arith.constant 4 : index
    %c0_91 = arith.constant 0 : index
    %246 = vector.load %arg5[%c0_89, %c4_90, %c0_91] : memref<2x8x256xf32, #tpu.memory_space<vmem>>, vector<2x1x128xf32>
    %247 = vector.shape_cast %246 : vector<2x1x128xf32> to vector<2x128xf32>
    %248 = vector.shape_cast %245 : vector<2x128xf32> to vector<2x1x128xf32>
    tpu.vector_store %arg5[%c0_89, %c4_90, %c0_91], %248 {strides = array<i32>} : memref<2x8x256xf32, #tpu.memory_space<vmem>>, vector<2x1x128xf32>,
    %249 = vector.extract_strided_slice %244 {offsets = [2, 0], sizes = [2, 128], strides = [1, 1]} : vector<4x128xf32> to vector<2x128xf32>
    %c0_92 = arith.constant 0 : index
    %c3_93 = arith.constant 3 : index
    %c128_94 = arith.constant 128 : index
    %250 = vector.load %arg5[%c0_92, %c3_93, %c128_94] : memref<2x8x256xf32, #tpu.memory_space<vmem>>, vector<2x1x128xf32>
    %251 = vector.shape_cast %250 : vector<2x1x128xf32> to vector<2x128xf32>
    %252 = vector.shape_cast %249 : vector<2x128xf32> to vector<2x1x128xf32>
    tpu.vector_store %arg5[%c0_92, %c3_93, %c128_94], %252 {strides = array<i32>} : memref<2x8x256xf32, #tpu.memory_space<vmem>>, vector<2x1x128xf32>,
    %c0_95 = arith.constant 0 : index
    %c5_96 = arith.constant 5 : index
    %c0_97 = arith.constant 0 : index
    %253 = vector.load %arg1[%c0_95, %c5_96, %c0_97] : memref<2x8x39xf32, #tpu.memory_space<vmem>>, vector<2x1x39xf32>
    %254 = vector.shape_cast %253 : vector<2x1x39xf32> to vector<2x39xf32>
    %c0_98 = arith.constant 0 : index
    %c2_99 = arith.constant 2 : index
    %c0_100 = arith.constant 0 : index
    %255 = vector.load %arg1[%c0_98, %c2_99, %c0_100] : memref<2x8x39xf32, #tpu.memory_space<vmem>>, vector<2x1x39xf32>
    %256 = vector.shape_cast %255 : vector<2x1x39xf32> to vector<2x39xf32>
    %257 = tpu.concatenate %254, %256 in 0 : vector<2x39xf32>, vector<2x39xf32> -> vector<4x39xf32>
    %c0_101 = arith.constant 0 : index
    %c0_102 = arith.constant 0 : index
    %258 = vector.load %arg2[%c0_101, %c0_102] : memref<39x1024xf32, #tpu.memory_space<vmem>>, vector<39x1024xf32>
    %cst_103 = arith.constant dense<0.000000e+00> : vector<4x1024xf32>
    %259 = tpu.matmul %257, %258, %cst_103 {dimension_numbers = #tpu.dot_dimension_numbers<[1], [0], [0], [1], [0, 0, 1, 1], [], []>} : vector<4x39xf32>, vector<39x1024xf32>, vector<4x1024xf32> -> vector<4x1024xf32>
    %260 = vector.extract_strided_slice %259 {offsets = [0, 0], sizes = [4, 512], strides = [1, 1]} : vector<4x1024xf32> to vector<4x512xf32>
    %261 = vector.extract_strided_slice %259 {offsets = [0, 512], sizes = [4, 512], strides = [1, 1]} : vector<4x1024xf32> to vector<4x512xf32>
    %262 = arith.select %2, %260, %261 : vector<4x512xi1>, vector<4x512xf32>
    %263 = arith.addf %262, %3 : vector<4x512xf32>
    %264 = arith.truncf %244 : vector<4x128xf32> to vector<4x128xbf16>
    %c0_104 = arith.constant 0 : index
    %c0_105 = arith.constant 0 : index
    %265 = vector.load %arg3[%c0_104, %c0_105] : memref<128x1024xbf16, #tpu.memory_space<vmem>>, vector<128x1024xbf16>
    %cst_106 = arith.constant dense<0.000000e+00> : vector<4x1024xf32>
    %266 = tpu.matmul %264, %265, %cst_106 {dimension_numbers = #tpu.dot_dimension_numbers<[1], [0], [0], [1], [0, 0, 1, 1], [], []>} : vector<4x128xbf16>, vector<128x1024xbf16>, vector<4x1024xf32> -> vector<4x1024xf32>
    %267 = vector.extract_strided_slice %266 {offsets = [0, 0], sizes = [4, 512], strides = [1, 1]} : vector<4x1024xf32> to vector<4x512xf32>
    %268 = vector.extract_strided_slice %266 {offsets = [0, 512], sizes = [4, 512], strides = [1, 1]} : vector<4x1024xf32> to vector<4x512xf32>
    %269 = arith.select %2, %267, %268 : vector<4x512xi1>, vector<4x512xf32>
    %270 = arith.addf %263, %269 : vector<4x512xf32>
    %271 = vector.extract_strided_slice %270 {offsets = [0, 0], sizes = [4, 128], strides = [1, 1]} : vector<4x512xf32> to vector<4x128xf32>
    %272 = arith.negf %271 : vector<4x128xf32>
    %273 = math.exp %272 : vector<4x128xf32>
    %cst_107 = arith.constant 1.000000e+00 : f32
    %274 = vector.broadcast %cst_107 : f32 to vector<4x128xf32>
    %275 = arith.addf %274, %273 : vector<4x128xf32>
    %276 = arith.divf %274, %275 : vector<4x128xf32>
    %277 = vector.extract_strided_slice %270 {offsets = [0, 128], sizes = [4, 128], strides = [1, 1]} : vector<4x512xf32> to vector<4x128xf32>
    %278 = arith.negf %277 : vector<4x128xf32>
    %279 = math.exp %278 : vector<4x128xf32>
    %cst_108 = arith.constant 1.000000e+00 : f32
    %280 = vector.broadcast %cst_108 : f32 to vector<4x128xf32>
    %281 = arith.addf %280, %279 : vector<4x128xf32>
    %282 = arith.divf %280, %281 : vector<4x128xf32>
    %283 = vector.extract_strided_slice %270 {offsets = [0, 256], sizes = [4, 128], strides = [1, 1]} : vector<4x512xf32> to vector<4x128xf32>
    %284 = math.tanh %283 : vector<4x128xf32>
    %285 = vector.extract_strided_slice %270 {offsets = [0, 384], sizes = [4, 128], strides = [1, 1]} : vector<4x512xf32> to vector<4x128xf32>
    %286 = arith.negf %285 : vector<4x128xf32>
    %287 = math.exp %286 : vector<4x128xf32>
    %cst_109 = arith.constant 1.000000e+00 : f32
    %288 = vector.broadcast %cst_109 : f32 to vector<4x128xf32>
    %289 = arith.addf %288, %287 : vector<4x128xf32>
    %290 = arith.divf %288, %289 : vector<4x128xf32>
    %291 = arith.mulf %282, %242 : vector<4x128xf32>
    %292 = arith.mulf %276, %284 : vector<4x128xf32>
    %293 = arith.addf %291, %292 : vector<4x128xf32>
    %294 = math.tanh %293 : vector<4x128xf32>
    %295 = arith.mulf %290, %294 : vector<4x128xf32>
    %296 = vector.extract_strided_slice %295 {offsets = [0, 0], sizes = [2, 128], strides = [1, 1]} : vector<4x128xf32> to vector<2x128xf32>
    %c0_110 = arith.constant 0 : index
    %c5_111 = arith.constant 5 : index
    %c0_112 = arith.constant 0 : index
    %297 = vector.load %arg5[%c0_110, %c5_111, %c0_112] : memref<2x8x256xf32, #tpu.memory_space<vmem>>, vector<2x1x128xf32>
    %298 = vector.shape_cast %297 : vector<2x1x128xf32> to vector<2x128xf32>
    %299 = vector.shape_cast %296 : vector<2x128xf32> to vector<2x1x128xf32>
    tpu.vector_store %arg5[%c0_110, %c5_111, %c0_112], %299 {strides = array<i32>} : memref<2x8x256xf32, #tpu.memory_space<vmem>>, vector<2x1x128xf32>,
    %300 = vector.extract_strided_slice %295 {offsets = [2, 0], sizes = [2, 128], strides = [1, 1]} : vector<4x128xf32> to vector<2x128xf32>
    %c0_113 = arith.constant 0 : index
    %c2_114 = arith.constant 2 : index
    %c128_115 = arith.constant 128 : index
    %301 = vector.load %arg5[%c0_113, %c2_114, %c128_115] : memref<2x8x256xf32, #tpu.memory_space<vmem>>, vector<2x1x128xf32>
    %302 = vector.shape_cast %301 : vector<2x1x128xf32> to vector<2x128xf32>
    %303 = vector.shape_cast %300 : vector<2x128xf32> to vector<2x1x128xf32>
    tpu.vector_store %arg5[%c0_113, %c2_114, %c128_115], %303 {strides = array<i32>} : memref<2x8x256xf32, #tpu.memory_space<vmem>>, vector<2x1x128xf32>,
    %c0_116 = arith.constant 0 : index
    %c6_117 = arith.constant 6 : index
    %c0_118 = arith.constant 0 : index
    %304 = vector.load %arg1[%c0_116, %c6_117, %c0_118] : memref<2x8x39xf32, #tpu.memory_space<vmem>>, vector<2x1x39xf32>
    %305 = vector.shape_cast %304 : vector<2x1x39xf32> to vector<2x39xf32>
    %c0_119 = arith.constant 0 : index
    %c1_120 = arith.constant 1 : index
    %c0_121 = arith.constant 0 : index
    %306 = vector.load %arg1[%c0_119, %c1_120, %c0_121] : memref<2x8x39xf32, #tpu.memory_space<vmem>>, vector<2x1x39xf32>
    %307 = vector.shape_cast %306 : vector<2x1x39xf32> to vector<2x39xf32>
    %308 = tpu.concatenate %305, %307 in 0 : vector<2x39xf32>, vector<2x39xf32> -> vector<4x39xf32>
    %c0_122 = arith.constant 0 : index
    %c0_123 = arith.constant 0 : index
    %309 = vector.load %arg2[%c0_122, %c0_123] : memref<39x1024xf32, #tpu.memory_space<vmem>>, vector<39x1024xf32>
    %cst_124 = arith.constant dense<0.000000e+00> : vector<4x1024xf32>
    %310 = tpu.matmul %308, %309, %cst_124 {dimension_numbers = #tpu.dot_dimension_numbers<[1], [0], [0], [1], [0, 0, 1, 1], [], []>} : vector<4x39xf32>, vector<39x1024xf32>, vector<4x1024xf32> -> vector<4x1024xf32>
    %311 = vector.extract_strided_slice %310 {offsets = [0, 0], sizes = [4, 512], strides = [1, 1]} : vector<4x1024xf32> to vector<4x512xf32>
    %312 = vector.extract_strided_slice %310 {offsets = [0, 512], sizes = [4, 512], strides = [1, 1]} : vector<4x1024xf32> to vector<4x512xf32>
    %313 = arith.select %2, %311, %312 : vector<4x512xi1>, vector<4x512xf32>
    %314 = arith.addf %313, %3 : vector<4x512xf32>
    %315 = arith.truncf %295 : vector<4x128xf32> to vector<4x128xbf16>
    %c0_125 = arith.constant 0 : index
    %c0_126 = arith.constant 0 : index
    %316 = vector.load %arg3[%c0_125, %c0_126] : memref<128x1024xbf16, #tpu.memory_space<vmem>>, vector<128x1024xbf16>
    %cst_127 = arith.constant dense<0.000000e+00> : vector<4x1024xf32>
    %317 = tpu.matmul %315, %316, %cst_127 {dimension_numbers = #tpu.dot_dimension_numbers<[1], [0], [0], [1], [0, 0, 1, 1], [], []>} : vector<4x128xbf16>, vector<128x1024xbf16>, vector<4x1024xf32> -> vector<4x1024xf32>
    %318 = vector.extract_strided_slice %317 {offsets = [0, 0], sizes = [4, 512], strides = [1, 1]} : vector<4x1024xf32> to vector<4x512xf32>
    %319 = vector.extract_strided_slice %317 {offsets = [0, 512], sizes = [4, 512], strides = [1, 1]} : vector<4x1024xf32> to vector<4x512xf32>
    %320 = arith.select %2, %318, %319 : vector<4x512xi1>, vector<4x512xf32>
    %321 = arith.addf %314, %320 : vector<4x512xf32>
    %322 = vector.extract_strided_slice %321 {offsets = [0, 0], sizes = [4, 128], strides = [1, 1]} : vector<4x512xf32> to vector<4x128xf32>
    %323 = arith.negf %322 : vector<4x128xf32>
    %324 = math.exp %323 : vector<4x128xf32>
    %cst_128 = arith.constant 1.000000e+00 : f32
    %325 = vector.broadcast %cst_128 : f32 to vector<4x128xf32>
    %326 = arith.addf %325, %324 : vector<4x128xf32>
    %327 = arith.divf %325, %326 : vector<4x128xf32>
    %328 = vector.extract_strided_slice %321 {offsets = [0, 128], sizes = [4, 128], strides = [1, 1]} : vector<4x512xf32> to vector<4x128xf32>
    %329 = arith.negf %328 : vector<4x128xf32>
    %330 = math.exp %329 : vector<4x128xf32>
    %cst_129 = arith.constant 1.000000e+00 : f32
    %331 = vector.broadcast %cst_129 : f32 to vector<4x128xf32>
    %332 = arith.addf %331, %330 : vector<4x128xf32>
    %333 = arith.divf %331, %332 : vector<4x128xf32>
    %334 = vector.extract_strided_slice %321 {offsets = [0, 256], sizes = [4, 128], strides = [1, 1]} : vector<4x512xf32> to vector<4x128xf32>
    %335 = math.tanh %334 : vector<4x128xf32>
    %336 = vector.extract_strided_slice %321 {offsets = [0, 384], sizes = [4, 128], strides = [1, 1]} : vector<4x512xf32> to vector<4x128xf32>
    %337 = arith.negf %336 : vector<4x128xf32>
    %338 = math.exp %337 : vector<4x128xf32>
    %cst_130 = arith.constant 1.000000e+00 : f32
    %339 = vector.broadcast %cst_130 : f32 to vector<4x128xf32>
    %340 = arith.addf %339, %338 : vector<4x128xf32>
    %341 = arith.divf %339, %340 : vector<4x128xf32>
    %342 = arith.mulf %333, %293 : vector<4x128xf32>
    %343 = arith.mulf %327, %335 : vector<4x128xf32>
    %344 = arith.addf %342, %343 : vector<4x128xf32>
    %345 = math.tanh %344 : vector<4x128xf32>
    %346 = arith.mulf %341, %345 : vector<4x128xf32>
    %347 = vector.extract_strided_slice %346 {offsets = [0, 0], sizes = [2, 128], strides = [1, 1]} : vector<4x128xf32> to vector<2x128xf32>
    %c0_131 = arith.constant 0 : index
    %c6_132 = arith.constant 6 : index
    %c0_133 = arith.constant 0 : index
    %348 = vector.load %arg5[%c0_131, %c6_132, %c0_133] : memref<2x8x256xf32, #tpu.memory_space<vmem>>, vector<2x1x128xf32>
    %349 = vector.shape_cast %348 : vector<2x1x128xf32> to vector<2x128xf32>
    %350 = vector.shape_cast %347 : vector<2x128xf32> to vector<2x1x128xf32>
    tpu.vector_store %arg5[%c0_131, %c6_132, %c0_133], %350 {strides = array<i32>} : memref<2x8x256xf32, #tpu.memory_space<vmem>>, vector<2x1x128xf32>,
    %351 = vector.extract_strided_slice %346 {offsets = [2, 0], sizes = [2, 128], strides = [1, 1]} : vector<4x128xf32> to vector<2x128xf32>
    %c0_134 = arith.constant 0 : index
    %c1_135 = arith.constant 1 : index
    %c128_136 = arith.constant 128 : index
    %352 = vector.load %arg5[%c0_134, %c1_135, %c128_136] : memref<2x8x256xf32, #tpu.memory_space<vmem>>, vector<2x1x128xf32>
    %353 = vector.shape_cast %352 : vector<2x1x128xf32> to vector<2x128xf32>
    %354 = vector.shape_cast %351 : vector<2x128xf32> to vector<2x1x128xf32>
    tpu.vector_store %arg5[%c0_134, %c1_135, %c128_136], %354 {strides = array<i32>} : memref<2x8x256xf32, #tpu.memory_space<vmem>>, vector<2x1x128xf32>,
    %c0_137 = arith.constant 0 : index
    %c7_138 = arith.constant 7 : index
    %c0_139 = arith.constant 0 : index
    %355 = vector.load %arg1[%c0_137, %c7_138, %c0_139] : memref<2x8x39xf32, #tpu.memory_space<vmem>>, vector<2x1x39xf32>
    %356 = vector.shape_cast %355 : vector<2x1x39xf32> to vector<2x39xf32>
    %c0_140 = arith.constant 0 : index
    %c0_141 = arith.constant 0 : index
    %c0_142 = arith.constant 0 : index
    %357 = vector.load %arg1[%c0_140, %c0_141, %c0_142] : memref<2x8x39xf32, #tpu.memory_space<vmem>>, vector<2x1x39xf32>
    %358 = vector.shape_cast %357 : vector<2x1x39xf32> to vector<2x39xf32>
    %359 = tpu.concatenate %356, %358 in 0 : vector<2x39xf32>, vector<2x39xf32> -> vector<4x39xf32>
    %c0_143 = arith.constant 0 : index
    %c0_144 = arith.constant 0 : index
    %360 = vector.load %arg2[%c0_143, %c0_144] : memref<39x1024xf32, #tpu.memory_space<vmem>>, vector<39x1024xf32>
    %cst_145 = arith.constant dense<0.000000e+00> : vector<4x1024xf32>
    %361 = tpu.matmul %359, %360, %cst_145 {dimension_numbers = #tpu.dot_dimension_numbers<[1], [0], [0], [1], [0, 0, 1, 1], [], []>} : vector<4x39xf32>, vector<39x1024xf32>, vector<4x1024xf32> -> vector<4x1024xf32>
    %362 = vector.extract_strided_slice %361 {offsets = [0, 0], sizes = [4, 512], strides = [1, 1]} : vector<4x1024xf32> to vector<4x512xf32>
    %363 = vector.extract_strided_slice %361 {offsets = [0, 512], sizes = [4, 512], strides = [1, 1]} : vector<4x1024xf32> to vector<4x512xf32>
    %364 = arith.select %2, %362, %363 : vector<4x512xi1>, vector<4x512xf32>
    %365 = arith.addf %364, %3 : vector<4x512xf32>
    %366 = arith.truncf %346 : vector<4x128xf32> to vector<4x128xbf16>
    %c0_146 = arith.constant 0 : index
    %c0_147 = arith.constant 0 : index
    %367 = vector.load %arg3[%c0_146, %c0_147] : memref<128x1024xbf16, #tpu.memory_space<vmem>>, vector<128x1024xbf16>
    %cst_148 = arith.constant dense<0.000000e+00> : vector<4x1024xf32>
    %368 = tpu.matmul %366, %367, %cst_148 {dimension_numbers = #tpu.dot_dimension_numbers<[1], [0], [0], [1], [0, 0, 1, 1], [], []>} : vector<4x128xbf16>, vector<128x1024xbf16>, vector<4x1024xf32> -> vector<4x1024xf32>
    %369 = vector.extract_strided_slice %368 {offsets = [0, 0], sizes = [4, 512], strides = [1, 1]} : vector<4x1024xf32> to vector<4x512xf32>
    %370 = vector.extract_strided_slice %368 {offsets = [0, 512], sizes = [4, 512], strides = [1, 1]} : vector<4x1024xf32> to vector<4x512xf32>
    %371 = arith.select %2, %369, %370 : vector<4x512xi1>, vector<4x512xf32>
    %372 = arith.addf %365, %371 : vector<4x512xf32>
    %373 = vector.extract_strided_slice %372 {offsets = [0, 0], sizes = [4, 128], strides = [1, 1]} : vector<4x512xf32> to vector<4x128xf32>
    %374 = arith.negf %373 : vector<4x128xf32>
    %375 = math.exp %374 : vector<4x128xf32>
    %cst_149 = arith.constant 1.000000e+00 : f32
    %376 = vector.broadcast %cst_149 : f32 to vector<4x128xf32>
    %377 = arith.addf %376, %375 : vector<4x128xf32>
    %378 = arith.divf %376, %377 : vector<4x128xf32>
    %379 = vector.extract_strided_slice %372 {offsets = [0, 128], sizes = [4, 128], strides = [1, 1]} : vector<4x512xf32> to vector<4x128xf32>
    %380 = arith.negf %379 : vector<4x128xf32>
    %381 = math.exp %380 : vector<4x128xf32>
    %cst_150 = arith.constant 1.000000e+00 : f32
    %382 = vector.broadcast %cst_150 : f32 to vector<4x128xf32>
    %383 = arith.addf %382, %381 : vector<4x128xf32>
    %384 = arith.divf %382, %383 : vector<4x128xf32>
    %385 = vector.extract_strided_slice %372 {offsets = [0, 256], sizes = [4, 128], strides = [1, 1]} : vector<4x512xf32> to vector<4x128xf32>
    %386 = math.tanh %385 : vector<4x128xf32>
    %387 = vector.extract_strided_slice %372 {offsets = [0, 384], sizes = [4, 128], strides = [1, 1]} : vector<4x512xf32> to vector<4x128xf32>
    %388 = arith.negf %387 : vector<4x128xf32>
    %389 = math.exp %388 : vector<4x128xf32>
    %cst_151 = arith.constant 1.000000e+00 : f32
    %390 = vector.broadcast %cst_151 : f32 to vector<4x128xf32>
    %391 = arith.addf %390, %389 : vector<4x128xf32>
    %392 = arith.divf %390, %391 : vector<4x128xf32>
    %393 = arith.mulf %384, %344 : vector<4x128xf32>
    %394 = arith.mulf %378, %386 : vector<4x128xf32>
    %395 = arith.addf %393, %394 : vector<4x128xf32>
    %396 = math.tanh %395 : vector<4x128xf32>
    %397 = arith.mulf %392, %396 : vector<4x128xf32>
    %398 = vector.extract_strided_slice %397 {offsets = [0, 0], sizes = [2, 128], strides = [1, 1]} : vector<4x128xf32> to vector<2x128xf32>
    %c0_152 = arith.constant 0 : index
    %c7_153 = arith.constant 7 : index
    %c0_154 = arith.constant 0 : index
    %399 = vector.load %arg5[%c0_152, %c7_153, %c0_154] : memref<2x8x256xf32, #tpu.memory_space<vmem>>, vector<2x1x128xf32>
    %400 = vector.shape_cast %399 : vector<2x1x128xf32> to vector<2x128xf32>
    %401 = vector.shape_cast %398 : vector<2x128xf32> to vector<2x1x128xf32>
    tpu.vector_store %arg5[%c0_152, %c7_153, %c0_154], %401 {strides = array<i32>} : memref<2x8x256xf32, #tpu.memory_space<vmem>>, vector<2x1x128xf32>,
    %402 = vector.extract_strided_slice %397 {offsets = [2, 0], sizes = [2, 128], strides = [1, 1]} : vector<4x128xf32> to vector<2x128xf32>
    %c0_155 = arith.constant 0 : index
    %c0_156 = arith.constant 0 : index
    %c128_157 = arith.constant 128 : index
    %403 = vector.load %arg5[%c0_155, %c0_156, %c128_157] : memref<2x8x256xf32, #tpu.memory_space<vmem>>, vector<2x1x128xf32>
    %404 = vector.shape_cast %403 : vector<2x1x128xf32> to vector<2x128xf32>
    %405 = vector.shape_cast %402 : vector<2x128xf32> to vector<2x1x128xf32>
    tpu.vector_store %arg5[%c0_155, %c0_156, %c128_157], %405 {strides = array<i32>} : memref<2x8x256xf32, #tpu.memory_space<vmem>>, vector<2x1x128xf32>,
    return
  }
  func.func @transform_0(%arg0: i32) -> (i32, i32, i32) {
    %c0_i32 = arith.constant 0 : i32
    %c0_i32_0 = arith.constant 0 : i32
    %c0_i32_1 = arith.constant 0 : i32
    %c0_i32_2 = arith.constant 0 : i32
    return %c0_i32, %c0_i32_0, %c0_i32_1 : i32, i32, i32
  }
  func.func @transform_1(%arg0: i32) -> (i32, i32) {
    %c0_i32 = arith.constant 0 : i32
    %c0_i32_0 = arith.constant 0 : i32
    %c0_i32_1 = arith.constant 0 : i32
    return %c0_i32, %c0_i32_0 : i32, i32
  }
  func.func @transform_2(%arg0: i32) -> (i32, i32) {
    %c0_i32 = arith.constant 0 : i32
    %c0_i32_0 = arith.constant 0 : i32
    %c0_i32_1 = arith.constant 0 : i32
    return %c0_i32, %c0_i32_0 : i32, i32
  }
  func.func @transform_3(%arg0: i32) -> (i32, i32) {
    %c0_i32 = arith.constant 0 : i32
    %c0_i32_0 = arith.constant 0 : i32
    %c0_i32_1 = arith.constant 0 : i32
    return %c0_i32, %c0_i32_0 : i32, i32
  }
  func.func @transform_4(%arg0: i32) -> (i32, i32, i32) {
    %c0_i32 = arith.constant 0 : i32
    %c0_i32_0 = arith.constant 0 : i32
    %c0_i32_1 = arith.constant 0 : i32
    %c0_i32_2 = arith.constant 0 : i32
    return %c0_i32, %c0_i32_0, %c0_i32_1 : i32, i32, i32
  }
}

</mosaic_0001>

<bundles_post_ra>
// kernel: encoder_forward.1
= control target key start
LH: loop header
LB: loop body
LE: loop exit
PB: predicated region body
PF: predicated region fallthrough
CT: control target
= control target key end

     0   :  { %vm86_vm0 = vcmask 1046528   ;;  %vm30_vm1 = vcmask 1041409   ;;  %vm37_vm2 = vcmask 1043459   ;;  %vm40_vm3 = vcmask 1041408   ;;  %s13664_s0 = inlined_call_operand.vmem [shape: f32[2,8,39], index: 0, kind: input, shape index: {}]   ;;  %s13665_s1 = inlined_call_operand.vmem [shape: f32[39,1024], index: 1, kind: input, shape index: {}]   ;;  %s13666_s2 = inlined_call_operand.vmem [shape: bf16[128,1024], index: 2, kind: input, shape index: {}]   ;;  %s13667_s3 = inlined_call_operand.vmem [shape: f32[4,512], index: 3, kind: input, shape index: {}]   ;;  %s13668_s4 = inlined_call_operand.hbm [shape: f32[2,8,256], index: 4, kind: output, shape index: {}]  }
   0x1   :  { %v74_v0 = vld [vmem:[%s13665_s1 + $0x100] sm:$0x7f]  ;;  %v75_v1 = vld [vmem:[%s13665_s1 + $0x108] sm:$0x7f]  ;;  %v77_v3 = vld [vmem:[%s13665_s1 + $0x118] sm:$0x7f] }
   0x2   :  { %v8825_v2 = vld [vmem:[%s13665_s1 + $0xc0] sm:$0xff]  ;;  %6239 = vmatpush.msk.msra.mxu0 %vm86_vm0, %v74_v0  ;;  %6241 = vmatpush.msk.msra.mxu1 %vm86_vm0, %v75_v1  ;;  %v8835_v4 = vld [vmem:[%s13665_s1 + $0xc8] sm:$0xff]  ;;  %v8840_v5 = vld [vmem:[%s13665_s1 + $0xd8] sm:$0xff]  ;;  %vm82_vm4 = vcmask 318464  }
   0x3   :  { %6245 = vmatpush.msk.msra.mxu3 %vm86_vm0, %v77_v3  ;;  %v8846_v6 = vld [vmem:[%s13665_s1 + $0x80] sm:$0xff]  ;;  %v8851_v7 = vld [vmem:[%s13665_s1 + $0x88] sm:$0xff]  ;;  %v8858_v8 = vld [vmem:[%s13665_s1 + $0x98] sm:$0xff] }
   0x4   :  { %123 = vmatpush.msra.mxu0 %v8825_v2  ;;  %143 = vmatpush.msra.mxu1 %v8835_v4  ;;  %v8863_v9 = vld [vmem:[%s13665_s1 + $0x40] sm:$0xff]  ;;  %v8868_v10 = vld [vmem:[%s13665_s1 + $0x48] sm:$0xff]  ;;  %v8874_v11 = vld [vmem:[%s13665_s1 + $0x58] sm:$0xff] }
   0x5   :  { %183 = vmatpush.msra.mxu3 %v8840_v5  ;;  %v76_v12 = vld [vmem:[%s13665_s1 + $0x110] sm:$0x7f]  ;;  %v8882_v13 = vld [vmem:[%s13665_s1] sm:$0xff]  ;;  %v8889_v14 = vld [vmem:[%s13665_s1 + $0x8] sm:$0xff] }
   0x6   :  { %124 = vmatpush.msra.mxu0 %v8846_v6  ;;  %144 = vmatpush.msra.mxu1 %v8851_v7  ;;  %v8894_v15 = vld [vmem:[%s13665_s1 + $0x18] sm:$0xff]  ;;  %v8899_v16 = vld [vmem:[%s13665_s1 + $0xd0] sm:$0xff]  ;;  %v78_v17 = vld [vmem:[%s13665_s1 + $0x120] sm:$0x7f] }
   0x7   :  { %184 = vmatpush.msra.mxu3 %v8858_v8  ;;  %6243 = vmatpush.msk.msra.mxu2 %vm86_vm0, %v76_v12  ;;  %v79_v18 = vld [vmem:[%s13665_s1 + $0x128] sm:$0x7f]  ;;  %v23_v19 = vld [vmem:[%s13664_s0] sm:$0x1]  ;;  %v25_v21 = vld [vmem:[%s13664_s0 + $0x7] sm:$0x1] }
   0x8   :  { %125 = vmatpush.msra.mxu0 %v8863_v9  ;;  %145 = vmatpush.msra.mxu1 %v8868_v10  ;;  %v24_v20 = vld [vmem:[%s13664_s0 + $0x8] sm:$0x1]  ;;  %v26_v22 = vld [vmem:[%s13664_s0 + $0xf] sm:$0x1]  ;;  %v81_v23 = vld [vmem:[%s13665_s1 + $0x138] sm:$0x7f] }
   0x9   :  { %185 = vmatpush.msra.mxu3 %v8874_v11  ;;  %163 = vmatpush.msra.mxu2 %v8899_v16  ;;  %v29_v24 = vrot.slane %v24_v20, 7  ;;  %v35_v25 = vrot.slane %v25_v21, 6  ;;  %v36_v26 = vrot.slane %v26_v22, 5  ;;  %v8937_v29 = vld [vmem:[%s13665_s1 + $0x90] sm:$0xff]  ;;  %v8947_v31 = vld [vmem:[%s13665_s1 + $0xe0] sm:$0xff]  ;;  %v8952_v32 = vld [vmem:[%s13665_s1 + $0xe8] sm:$0xff] }
   0xa   :  { %126 = vmatpush.msra.mxu0 %v8882_v13  ;;  %146 = vmatpush.msra.mxu1 %v8889_v14  ;;  %v8961_v33 = vld [vmem:[%s13665_s1 + $0xf8] sm:$0xff]  ;;  %v8966_v34 = vld [vmem:[%s13665_s1 + $0x50] sm:$0xff]  ;;  %v8974_v35 = vld [vmem:[%s13665_s1 + $0xa0] sm:$0xff] }
   0xb   :  { %186 = vmatpush.msra.mxu3 %v8894_v15  ;;  %v31_v27 = vsel %vm30_vm1, %v29_v24, %v23_v19  ;;  %v38_v28 = vsel %vm37_vm2, %v36_v26, %v35_v25  ;;  %164 = vmatpush.msra.mxu2 %v8937_v29  ;;  %v8979_v36 = vld [vmem:[%s13665_s1 + $0xa8] sm:$0xff]  ;;  %v8986_v37 = vld [vmem:[%s13665_s1 + $0xb8] sm:$0xff]  ;;  %v8991_v38 = vld [vmem:[%s13665_s1 + $0x10] sm:$0xff] }
   0xc   :  { %6247 = vmatpush.msk.msrb.mxu0 %vm86_vm0, %v78_v17  ;;  %6249 = vmatpush.msk.msrb.mxu1 %vm86_vm0, %v79_v18  ;;  %v8942_v30 = vsel %vm40_vm3, %v31_v27, %v38_v28  ;;  %v8998_v39 = vld [vmem:[%s13665_s1 + $0x60] sm:$0xff]  ;;  %v9003_v40 = vld [vmem:[%s13665_s1 + $0x68] sm:$0xff]  ;;  %v9010_v41 = vld [vmem:[%s13665_s1 + $0x78] sm:$0xff] }
   0xd   :  { %6253 = vmatpush.msk.msrb.mxu3 %vm86_vm0, %v81_v23  ;;  %6240 = vmatmul.msk.f32.vlgmr.msra.gmra.mxu0 %vm82_vm4, %v8942_v30  ;;  %v80_v42 = vld [vmem:[%s13665_s1 + $0x130] sm:$0x7f]  ;;  %v9020_v43 = vld [vmem:[%s13665_s1 + $0x20] sm:$0xff]  ;;  %v9027_v44 = vld [vmem:[%s13665_s1 + $0x28] sm:$0xff] }
   0xe   :  { %6242 = vmatmul.msk.f32.vlgmr.msra.gmra.mxu1 %vm82_vm4, %v8942_v30  ;;  %6246 = vmatmul.msk.f32.vlgmr.msra.gmra.mxu3 %vm82_vm4, %v8942_v30  ;;  %v9032_v45 = vld [vmem:[%s13665_s1 + $0x38] sm:$0xff] }
   0xf   :  { %203 = vmatpush.msrb.mxu0 %v8947_v31  ;;  %223 = vmatpush.msrb.mxu1 %v8952_v32 }
  0x10   :  { %263 = vmatpush.msrb.mxu3 %v8961_v33  ;;  %165 = vmatpush.msra.mxu2 %v8966_v34 }
  0x11   :  { %204 = vmatpush.msrb.mxu0 %v8974_v35  ;;  %224 = vmatpush.msrb.mxu1 %v8979_v36 }
  0x12   :  { %264 = vmatpush.msrb.mxu3 %v8986_v37  ;;  %166 = vmatpush.msra.mxu2 %v8991_v38 }
  0x13   :  { %205 = vmatpush.msrb.mxu0 %v8998_v39  ;;  %225 = vmatpush.msrb.mxu1 %v9003_v40 }
  0x14   :  { %9 = vsyncpa [#allocation3], 0  ;;  %265 = vmatpush.msrb.mxu3 %v9010_v41  ;;  %6251 = vmatpush.msk.msrb.mxu2 %vm86_vm0, %v80_v42  ;;  %v9042_v46 = vld [vmem:[%s13665_s1 + $0xf0] sm:$0xff]  ;;  %v417_v47 = vld [vmem:[%s13665_s1 + $0x100] sm:$0x7f]  ;;  %s6227_s7 = sshll.u32 %s13668_s4, 4  ;;  %s6228_s7 = int_to_ptr.hbm [resolvable:$true] %s6227_s7 }
  0x15   :  { %6244 = vmatmul.msk.f32.vlgmr.msra.gmra.mxu2 %vm82_vm4, %v8942_v30  ;;  %206 = vmatpush.msrb.mxu0 %v9020_v43  ;;  %v370_v48 = vld [vmem:[%s13664_s0 + $0x9] sm:$0x1]  ;;  %v371_v49 = vld [vmem:[%s13664_s0 + $0x6] sm:$0x1]  ;;  %v372_v50 = vld [vmem:[%s13664_s0 + $0xe] sm:$0x1] }
  0x16   :  { %226 = vmatpush.msrb.mxu1 %v9027_v44  ;;  %266 = vmatpush.msrb.mxu3 %v9032_v45  ;;  %v418_v51 = vld [vmem:[%s13665_s1 + $0x108] sm:$0x7f]  ;;  %v64_v52 = vld [vmem:[%s13665_s1 + $0xb0] sm:$0xff]  ;;  %v420_v53 = vld [vmem:[%s13665_s1 + $0x118] sm:$0x7f]  ;;  %v375_v55 = vrot.slane %v370_v48, 7 }
  0x17   :  { %6248 = vmatmul.msk.f32.vlgmr.msrb.gmra.mxu0 %vm82_vm4, %v8942_v30  ;;  %6250 = vmatmul.msk.f32.vlgmr.msrb.gmra.mxu1 %vm82_vm4, %v8942_v30  ;;  %v56_v54 = vld [vmem:[%s13665_s1 + $0x70] sm:$0xff]  ;;  %v380_v56 = vrot.slane %v371_v49, 6  ;;  %v381_v57 = vrot.slane %v372_v50, 5  ;;  %v369_v58 = vld [vmem:[%s13664_s0 + $0x1] sm:$0x1]  ;;  %s8789_s8 = smov 256  }
  0x18   :  { %243 = vmatpush.msrb.mxu2 %v9042_v46  ;;  %6254 = vmatmul.msk.f32.vlgmr.msrb.gmra.mxu3 %vm82_vm4, %v8942_v30  ;;  %v48_v59 = vld [vmem:[%s13665_s1 + $0x30] sm:$0xff]  ;;  %v376_v60 = vsel %vm30_vm1, %v375_v55, %v369_v58  ;;  %v421_v63 = vld [vmem:[%s13665_s1 + $0x120] sm:$0x7f]  ;;  %v422_v1 = vld [vmem:[%s13665_s1 + $0x128] sm:$0x7f] }
  0x19   :  { %6258 = vmatpush.msk.msra.mxu0 %vm86_vm0, %v417_v47  ;;  %6260 = vmatpush.msk.msra.mxu1 %vm86_vm0, %v418_v51  ;;  %v382_v61 = vsel %vm37_vm2, %v381_v57, %v380_v56  ;;  %v419_v62 = vld [vmem:[%s13665_s1 + $0x110] sm:$0x7f]  ;;  %v424_v3 = vld [vmem:[%s13665_s1 + $0x138] sm:$0x7f]  ;;  %v6468_v18 = vld [vmem:[%s13666_s2 + $0x180] sm:$0xf] }
  0x1a   :  { %244 = vmatpush.msrb.mxu2 %v64_v52  ;;  %6264 = vmatpush.msk.msra.mxu3 %vm86_vm0, %v420_v53  ;;  %v384_v0 = vsel %vm40_vm3, %v376_v60, %v382_v61  ;;  %v8235_v19 = vld [vmem:[%s13666_s2 + $0x19c] sm:$0xf0]  ;;  %v8231_v20 = vld [vmem:[%s13666_s2 + $0x184] sm:$0xf]  ;;  %v6476_v23 = vld [vmem:[%s13666_s2 + $0x188] sm:$0xf] }
  0x1b   :  { %464 = vmatpush.msra.mxu0 %v8825_v2  ;;  %484 = vmatpush.msra.mxu1 %v8835_v4  ;;  %v423_v2 = vld [vmem:[%s13665_s1 + $0x130] sm:$0x7f]  ;;  %v9142_v4 = vld [vmem:[%s13667_s3] sm:$0xff]  ;;  %v6469_v21 = vor.u32 %v8235_v19, %v6468_v18  ;;  %v8236_v24 = vld [vmem:[%s13666_s2 + $0x1a4] sm:$0xf0] }
  0x1c   :  { %245 = vmatpush.msrb.mxu2 %v56_v54  ;;  %524 = vmatpush.msra.mxu3 %v8840_v5  ;;  %277 = vst [vmem:[#allocation1] ss:$2 sm:$0xff] %v9142_v4  ;;  %v6500_v5 = vld [vmem:[%s13666_s2 + $0x1c0] sm:$0xf]  ;;  %v6470_v22 = vld [vmem:[%s13666_s2 + $0x1a0] sm:$0xf0]  ;;  %v6477_v26 = vor.u32 %v8236_v24, %v6476_v23 }
  0x1d   :  { %465 = vmatpush.msra.mxu0 %v8846_v6  ;;  %485 = vmatpush.msra.mxu1 %v8851_v7  ;;  %v8243_v6 = vld [vmem:[%s13666_s2 + $0x1dc] sm:$0xf0]  ;;  %v6473_v25 = vor.u32 %v8231_v20, %v6470_v22  ;;  %v8232_v27 = vld [vmem:[%s13666_s2 + $0x18c] sm:$0xf]  ;;  %v6406_v47 = vld [vmem:[%s13666_s2 + $0x120] sm:$0xf0] }
  0x1e   :  { %246 = vmatpush.msrb.mxu2 %v48_v59  ;;  %525 = vmatpush.msra.mxu3 %v8858_v8  ;;  %v6501_v7 = vor.u32 %v8243_v6, %v6500_v5  ;;  %v9163_v8 = vld [vmem:[%s13667_s3 + $0x8] sm:$0xff]  ;;  %v6404_v42 = vld [vmem:[%s13666_s2 + $0x100] sm:$0xf]  ;;  %v8207_v58 = vld [vmem:[%s13666_s2 + $0xc4] sm:$0xf] }
  0x1f   :  { %6252 = vmatmul.msk.f32.vlgmr.msrb.gmra.mxu2 %vm82_vm4, %v8942_v30  ;;  %466 = vmatpush.msra.mxu0 %v8863_v9  ;;  %v8239_v9 = vld [vmem:[%s13666_s2 + $0x1c4] sm:$0xf]  ;;  %279 = vst [vmem:[#allocation1 + $0x10] ss:$2 sm:$0xff] %v9163_v8  ;;  %v6478_v28 = vld [vmem:[%s13666_s2 + $0x1a8] sm:$0xf0] }
  0x20   :  { %6262 = vmatpush.msk.msra.mxu2 %vm86_vm0, %v419_v62  ;;  %486 = vmatpush.msra.mxu1 %v8868_v10  ;;  %v6502_v10 = vld [vmem:[%s13666_s2 + $0x1e0] sm:$0xf0]  ;;  %v6436_v30 = vld [vmem:[%s13666_s2 + $0x140] sm:$0xf]  ;;  %v6412_v48 = vld [vmem:[%s13666_s2 + $0x108] sm:$0xf] }
  0x21   :  { %467 = vmatpush.msra.mxu0 %v8882_v13  ;;  %526 = vmatpush.msra.mxu3 %v8874_v11  ;;  %v6508_v11 = vld [vmem:[%s13666_s2 + $0x1c8] sm:$0xf]  ;;  %v6505_v12 = vor.u32 %v8239_v9, %v6502_v10  ;;  %v6414_v53 = vld [vmem:[%s13666_s2 + $0x128] sm:$0xf0]  ;;  %v6372_v56 = vld [vmem:[%s13666_s2 + $0xc0] sm:$0xf] }
  0x22   :  { %504 = vmatpush.msra.mxu2 %v8899_v16  ;;  %6259 = vmatmul.msk.f32.vlgmr.msra.gmra.mxu0 %vm82_vm4, %v384_v0  ;;  %v8244_v13 = vld [vmem:[%s13666_s2 + $0x1e4] sm:$0xf0]  ;;  %v8211_v57 = vld [vmem:[%s13666_s2 + $0xdc] sm:$0xf0]  ;;  %v6374_v62 = vld [vmem:[%s13666_s2 + $0xe0] sm:$0xf0] }
  0x23   :  { %6266 = vmatpush.msk.msrb.mxu0 %vm86_vm0, %v421_v63  ;;  %487 = vmatpush.msra.mxu1 %v8889_v14  ;;  %v8240_v14 = vld [vmem:[%s13666_s2 + $0x1cc] sm:$0xf]  ;;  %v6509_v16 = vor.u32 %v8244_v13, %v6508_v11  ;;  %v8220_v49 = vld [vmem:[%s13666_s2 + $0x124] sm:$0xf0]  ;;  %v6373_v61 = vor.u32 %v8211_v57, %v6372_v56  ;;  %v6340_v9 = vld [vmem:[%s13666_s2 + $0x80] sm:$0xf] }
  0x24   :  { %505 = vmatpush.msra.mxu2 %v8937_v29  ;;  %527 = vmatpush.msra.mxu3 %v8894_v15  ;;  %v6510_v15 = vld [vmem:[%s13666_s2 + $0x1e8] sm:$0xf0]  ;;  %v6481_v29 = vor.u32 %v8232_v27, %v6478_v28  ;;  %v6413_v51 = vor.u32 %v8220_v49, %v6412_v48  ;;  %v6380_v63 = vld [vmem:[%s13666_s2 + $0xc8] sm:$0xf]  ;;  %v8203_v10 = vld [vmem:[%s13666_s2 + $0x9c] sm:$0xf0] }
  0x25   :  { %544 = vmatpush.msrb.mxu0 %v8947_v31  ;;  %6261 = vmatmul.msk.f32.vlgmr.msra.gmra.mxu1 %vm82_vm4, %v384_v0  ;;  %v6513_v17 = vor.u32 %v8240_v14, %v6510_v15  ;;  %v8227_v31 = vld [vmem:[%s13666_s2 + $0x15c] sm:$0xf0]  ;;  %v6382_v5 = vld [vmem:[%s13666_s2 + $0xe8] sm:$0xf0]  ;;  %v8199_v11 = vld [vmem:[%s13666_s2 + $0x84] sm:$0xf] }
  0x26   :  { %506 = vmatpush.msra.mxu2 %v8966_v34  ;;  %6265 = vmatmul.msk.f32.vlgmr.msra.gmra.mxu3 %vm82_vm4, %v384_v0  ;;  %v6438_v34 = vld [vmem:[%s13666_s2 + $0x160] sm:$0xf0]  ;;  %v6348_v14 = vld [vmem:[%s13666_s2 + $0x88] sm:$0xf]  ;;  %v8200_v18 = vld [vmem:[%s13666_s2 + $0x8c] sm:$0xf] }
  0x27   :  { %545 = vmatpush.msrb.mxu0 %v8974_v35  ;;  %6268 = vmatpush.msk.msrb.mxu1 %vm86_vm0, %v422_v1  ;;  %v6444_v35 = vld [vmem:[%s13666_s2 + $0x148] sm:$0xf]  ;;  %v6377_v1 = vor.u32 %v8207_v58, %v6374_v62  ;;  %v6342_v13 = vld [vmem:[%s13666_s2 + $0xa0] sm:$0xf0]  ;;  %v6350_v19 = vld [vmem:[%s13666_s2 + $0xa8] sm:$0xf0] }
  0x28   :  { %507 = vmatpush.msra.mxu2 %v8991_v38  ;;  %6272 = vmatpush.msk.msrb.mxu3 %vm86_vm0, %v424_v3  ;;  %v8208_v3 = vld [vmem:[%s13666_s2 + $0xcc] sm:$0xf]  ;;  %v8204_v15 = vld [vmem:[%s13666_s2 + $0xa4] sm:$0xf0]  ;;  %v6353_v20 = vor.u32 %v8200_v18, %v6350_v19  ;;  %v6308_v24 = vld [vmem:[%s13666_s2 + $0x40] sm:$0xf] }
  0x29   :  { %546 = vmatpush.msrb.mxu0 %v8998_v39  ;;  %6263 = vmatmul.msk.f32.vlgmr.msra.gmra.mxu2 %vm82_vm4, %v384_v0  ;;  %v8224_v39 = vld [vmem:[%s13666_s2 + $0x14c] sm:$0xf]  ;;  %v280_v22 = vld.sshfl [vmem:[#allocation1] sm:$0xff pattern:$0x75316420] }
  0x2a   :  { %6270 = vmatpush.msk.msrb.mxu2 %vm86_vm0, %v423_v2  ;;  %564 = vmatpush.msrb.mxu1 %v8952_v32  ;;  %v8223_v32 = vld [vmem:[%s13666_s2 + $0x144] sm:$0xf]  ;;  %v281_v23 = vld.sshfl [vmem:[#allocation1 + $0x8] sm:$0xff pattern:$0x75316420] }
  0x2b   :  { %547 = vmatpush.msrb.mxu0 %v9020_v43  ;;  %604 = vmatpush.msrb.mxu3 %v8961_v33  ;;  %v6437_v33 = vor.u32 %v8227_v31, %v6436_v30  ;;  %v6310_v28 = vld [vmem:[%s13666_s2 + $0x60] sm:$0xf0]  ;;  %v8196_v30 = vld [vmem:[%s13666_s2 + $0x64] sm:$0xf0]  ;;  %v8241_v62 = vld [vmem:[%s13666_s2 + $0x1d4] sm:$0xf] }
  0x2c   :  { %6267 = vmatmul.msk.f32.vlgmr.msrb.gmra.mxu0 %vm82_vm4, %v384_v0  ;;  %584 = vmatpush.msrb.mxu2 %v9042_v46  ;;  %v6284_v48 = vld [vmem:[%s13666_s2 + $0x8] sm:$0xf]  ;;  %v283_v57 = vld.sshfl [vmem:[#allocation1 + $0x18] sm:$0xff pattern:$0x75316420] }
  0x2d   :  { %565 = vmatpush.msrb.mxu1 %v8979_v36  ;;  %605 = vmatpush.msrb.mxu3 %v8986_v37  ;;  %v8228_v36 = vld [vmem:[%s13666_s2 + $0x164] sm:$0xf0]  ;;  %v6441_v37 = vor.u32 %v8223_v32, %v6438_v34  ;;  %v6318_v34 = vld [vmem:[%s13666_s2 + $0x68] sm:$0xf0]  ;;  %v8238_v18 = vld [vmem:[%s13666_s2 + $0x1b4] sm:$0xf0] }
  0x2e   :  { %585 = vmatpush.msrb.mxu2 %v64_v52  ;;  %1016 = vmatpush.bf16.msra.mxu0 %v6501_v7  ;;  %v6445_v38 = vor.u32 %v8228_v36, %v6444_v35  ;;  %v8216_v52 = vld [vmem:[%s13666_s2 + $0x10c] sm:$0xf]  ;;  %v6385_v7 = vor.u32 %v8208_v3, %v6382_v5  ;;  %v8188_v49 = vld [vmem:[%s13666_s2 + $0x24] sm:$0xf0]  ;;  %v8242_v3 = vld [vmem:[%s13666_s2 + $0x1dc] sm:$0xf] }
  0x2f   :  { %566 = vmatpush.msrb.mxu1 %v9003_v40  ;;  %606 = vmatpush.msrb.mxu3 %v9010_v41  ;;  %v6446_v40 = vld [vmem:[%s13666_s2 + $0x168] sm:$0xf0]  ;;  %v6417_v55 = vor.u32 %v8216_v52, %v6414_v53  ;;  %v6526_v5 = vld [vmem:[%s13666_s2 + $0x1f8] sm:$0xf0] }
  0x30   :  { %586 = vmatpush.msrb.mxu2 %v56_v54  ;;  %v6449_v41 = vor.u32 %v8224_v39, %v6446_v40  ;;  %v18_v54 = vlaneseq  ;;  %v6276_v40 = vld [vmem:[%s13666_s2] sm:$0xf]  ;;  %v8184_v52 = vld [vmem:[%s13666_s2 + $0xc] sm:$0xf] }
  0x31   :  { %567 = vmatpush.msrb.mxu1 %v9027_v44  ;;  %607 = vmatpush.msrb.mxu3 %v9032_v45  ;;  %v8219_v44 = vld [vmem:[%s13666_s2 + $0x11c] sm:$0xf0]  ;;  %v8215_v45 = vld [vmem:[%s13666_s2 + $0x104] sm:$0xf]  ;;  %v6286_v53 = vld [vmem:[%s13666_s2 + $0x28] sm:$0xf0] }
  0x32   :  { %587 = vmatpush.msrb.mxu2 %v48_v59  ;;  %6269 = vmatmul.msk.f32.vlgmr.msrb.gmra.mxu1 %vm82_vm4, %v384_v0  ;;  %v6405_v46 = vor.u32 %v8219_v44, %v6404_v42  ;;  %v6409_v50 = vor.u32 %v8215_v45, %v6406_v47  ;;  %v9280_v6 = vshrl.u32 %v18_v54, 7  ;;  %v8183_v42 = vld [vmem:[%s13666_s2 + $0x4] sm:$0xf]  ;;  %v6516_v54 = vld [vmem:[%s13666_s2 + $0x1d0] sm:$0xf]  ;;  %v6289_v58 = vor.u32 %v8184_v52, %v6286_v53 }
  0x33   :  { %6273 = vmatmul.msk.f32.vlgmr.msrb.gmra.mxu3 %vm82_vm4, %v384_v0  ;;  %6271 = vmatmul.msk.f32.vlgmr.msrb.gmra.mxu2 %vm82_vm4, %v384_v0  ;;  %v8212_v0 = vld [vmem:[%s13666_s2 + $0xe4] sm:$0xf0]  ;;  %v6278_v47 = vld [vmem:[%s13666_s2 + $0x20] sm:$0xf0]  ;;  %v8218_v52 = vld [vmem:[%s13666_s2 + $0x11c] sm:$0xf] }
  0x34   :  { %1029 = vmatpush.bf16.msra.mxu1 %v6505_v12  ;;  %1042 = vmatpush.bf16.msra.mxu2 %v6509_v16  ;;  %v6381_v2 = vor.u32 %v8212_v0, %v6380_v63  ;;  %v6341_v12 = vor.u32 %v8203_v10, %v6340_v9  ;;  %v6345_v16 = vor.u32 %v8199_v11, %v6342_v13  ;;  %vm20_vm5 = vcmp.lt.s32.totalorder %v9280_v6, 2  ;;  %v6518_v63 = vld [vmem:[%s13666_s2 + $0x1f0] sm:$0xf0]  ;;  %v6524_v0 = vld [vmem:[%s13666_s2 + $0x1d8] sm:$0xf] }
  0x35   :  { %1055 = vmatpush.bf16.msra.mxu3 %v6513_v17  ;;  %1017 = vmatpush.bf16.msra.mxu0 %v6469_v21  ;;  %v6349_v17 = vor.u32 %v8204_v15, %v6348_v14  ;;  %v6529_v10 = vor.u32 %v8242_v3, %v6526_v5  ;;  %v6484_v11 = vld [vmem:[%s13666_s2 + $0x190] sm:$0xf]  ;;  %v8233_v13 = vld [vmem:[%s13666_s2 + $0x194] sm:$0xf] }
  0x38   :  { %1030 = vmatpush.bf16.msra.mxu1 %v6473_v25  ;;  %1043 = vmatpush.bf16.msra.mxu2 %v6477_v26  ;;  %v8195_v25 = vld [vmem:[%s13666_s2 + $0x5c] sm:$0xf0]  ;;  %v8191_v26 = vld [vmem:[%s13666_s2 + $0x44] sm:$0xf] }
  0x39   :  { %1056 = vmatpush.bf16.msra.mxu3 %v6481_v29  ;;  %1018 = vmatpush.bf16.msra.mxu0 %v6437_v33  ;;  %v6309_v27 = vor.u32 %v8195_v25, %v6308_v24  ;;  %v6316_v29 = vld [vmem:[%s13666_s2 + $0x48] sm:$0xf]  ;;  %v6313_v31 = vor.u32 %v8191_v26, %v6310_v28  ;;  %v8192_v33 = vld [vmem:[%s13666_s2 + $0x4c] sm:$0xf]  ;;  %v6452_v25 = vld [vmem:[%s13666_s2 + $0x150] sm:$0xf] }
  0x3a   :  { %v6317_v32 = vor.u32 %v8196_v30, %v6316_v29  ;;  %v8229_v26 = vld [vmem:[%s13666_s2 + $0x16c] sm:$0xf0]  ;;  %v6454_v30 = vld [vmem:[%s13666_s2 + $0x170] sm:$0xf0] }
  0x3b   :  { %v6453_v29 = vor.u32 %v8229_v26, %v6452_v25  ;;  %v6364_v25 = vld [vmem:[%s13666_s2 + $0x98] sm:$0xf] }
  0x3c   :  { %1031 = vmatpush.bf16.msra.mxu1 %v6441_v37  ;;  %1044 = vmatpush.bf16.msra.mxu2 %v6445_v38  ;;  %v6321_v37 = vor.u32 %v8192_v33, %v6318_v34  ;;  %v8230_v34 = vld [vmem:[%s13666_s2 + $0x174] sm:$0xf0] }
  0x3d   :  { %1057 = vmatpush.bf16.msra.mxu3 %v6449_v41  ;;  %1019 = vmatpush.bf16.msra.mxu0 %v6405_v46  ;;  %v8187_v41 = vld [vmem:[%s13666_s2 + $0x1c] sm:$0xf0]  ;;  %v8206_v26 = vld [vmem:[%s13666_s2 + $0xb4] sm:$0xf0] }
  0x3e   :  { %v6277_v46 = vor.u32 %v8187_v41, %v6276_v40 }
  0x40   :  { %1032 = vmatpush.bf16.msra.mxu1 %v6409_v50  ;;  %1045 = vmatpush.bf16.msra.mxu2 %v6413_v51  ;;  %v6281_v50 = vor.u32 %v8183_v42, %v6278_v47  ;;  %v6285_v51 = vor.u32 %v8188_v49, %v6284_v48  ;;  %v6420_v42 = vld [vmem:[%s13666_s2 + $0x110] sm:$0xf]  ;;  %v6422_v47 = vld [vmem:[%s13666_s2 + $0x130] sm:$0xf0]  ;;  %v6428_v48 = vld [vmem:[%s13666_s2 + $0x118] sm:$0xf] }
  0x41   :  { %1058 = vmatpush.bf16.msra.mxu3 %v6417_v55  ;;  %1020 = vmatpush.bf16.msra.mxu0 %v6373_v61  ;;  %v8222_v49 = vld [vmem:[%s13666_s2 + $0x134] sm:$0xf0] }
  0x44   :  { %1033 = vmatpush.bf16.msra.mxu1 %v6377_v1  ;;  %1046 = vmatpush.bf16.msra.mxu2 %v6381_v2  ;;  %v6521_v1 = vor.u32 %v8241_v62, %v6518_v63  ;;  %v8246_v2 = vld [vmem:[%s13666_s2 + $0x1f4] sm:$0xf0]  ;;  %v8213_v62 = vld [vmem:[%s13666_s2 + $0xec] sm:$0xf0] }
  0x45   :  { %1059 = vmatpush.bf16.msra.mxu3 %v6385_v7  ;;  %1021 = vmatpush.bf16.msra.mxu0 %v6341_v12  ;;  %v6525_v9 = vor.u32 %v8246_v2, %v6524_v0  ;;  %v8237_v12 = vld [vmem:[%s13666_s2 + $0x1ac] sm:$0xf0]  ;;  %v6396_v2 = vld [vmem:[%s13666_s2 + $0xd8] sm:$0xf] }
  0x46   :  { %v6485_v15 = vor.u32 %v8237_v12, %v6484_v11  ;;  %v6398_v11 = vld [vmem:[%s13666_s2 + $0xf8] sm:$0xf0] }
  0x48   :  { %1034 = vmatpush.bf16.msra.mxu1 %v6345_v16  ;;  %1047 = vmatpush.bf16.msra.mxu2 %v6349_v17  ;;  %v6486_v16 = vld [vmem:[%s13666_s2 + $0x1b0] sm:$0xf0]  ;;  %v6492_v17 = vld [vmem:[%s13666_s2 + $0x198] sm:$0xf] }
  0x49   :  { %1060 = vmatpush.bf16.msra.mxu3 %v6353_v20  ;;  %1022 = vmatpush.bf16.msra.mxu0 %v6309_v27  ;;  %v6489_v20 = vor.u32 %v8233_v13, %v6486_v16  ;;  %v8225_v27 = vld [vmem:[%s13666_s2 + $0x154] sm:$0xf]  ;;  %v8205_v16 = vld [vmem:[%s13666_s2 + $0xac] sm:$0xf0] }
  0x4a   :  { %v6457_v33 = vor.u32 %v8225_v27, %v6454_v30  ;;  %v8202_v30 = vld [vmem:[%s13666_s2 + $0x9c] sm:$0xf] }
  0x4c   :  { %1035 = vmatpush.bf16.msra.mxu1 %v6313_v31  ;;  %1048 = vmatpush.bf16.msra.mxu2 %v6317_v32  ;;  %v6460_v31 = vld [vmem:[%s13666_s2 + $0x158] sm:$0xf] }
  0x4d   :  { %1061 = vmatpush.bf16.msra.mxu3 %v6321_v37  ;;  %1023 = vmatpush.bf16.msra.mxu0 %v6277_v46  ;;  %v8217_v46 = vld [vmem:[%s13666_s2 + $0x114] sm:$0xf] }
  0x50   :  { %1036 = vmatpush.bf16.msra.mxu1 %v6281_v50  ;;  %1049 = vmatpush.bf16.msra.mxu2 %v6285_v51  ;;  %v282_v50 = vld.sshfl [vmem:[#allocation1 + $0x10] sm:$0xff pattern:$0x75316420] }
  0x51   :  { %1062 = vmatpush.bf16.msra.mxu3 %v6289_v58 }
  0x54   :  { %1081 = vmatpush.bf16.msrb.mxu1 %v6521_v1  ;;  %1094 = vmatpush.bf16.msrb.mxu2 %v6525_v9  ;;  %v6390_v1 = vld [vmem:[%s13666_s2 + $0xf0] sm:$0xf0]  ;;  %v8214_v9 = vld [vmem:[%s13666_s2 + $0xf4] sm:$0xf0] }
  0x55   :  { %1107 = vmatpush.bf16.msrb.mxu3 %v6529_v10  ;;  %v8210_v10 = vld [vmem:[%s13666_s2 + $0xdc] sm:$0xf] }
  0x58   :  { %1082 = vmatpush.bf16.msrb.mxu1 %v6489_v20  ;;  %v6358_v20 = vld [vmem:[%s13666_s2 + $0xb0] sm:$0xf0] }
  0x5c   :  { %1083 = vmatpush.bf16.msrb.mxu1 %v6457_v33  ;;  %v6365_v33 = vor.u32 %v8206_v26, %v6364_v25 }
  0x8a   :  { %v128_v59 = vpop.f32.mrf.mxu0 }
  0x8b   :  { %v148_v60 = vpop.f32.mrf.mxu1 }
  0x91   :  { %v9307_v21 = vpop.f32.mrf.mxu3 }
  0x94   :  { %v208_v35 = vpop.f32.mrf.mxu0  ;;  %v228_v36 = vpop.f32.mrf.mxu1 }
  0x95   :  { %v271_v38 = vsel %vm20_vm5, %v128_v59, %v208_v35  ;;  %v272_v39 = vsel %vm20_vm5, %v148_v60, %v228_v36  ;;  %v8245_v59 = vld [vmem:[%s13666_s2 + $0x1ec] sm:$0xf0]  ;;  %v8226_v35 = vld [vmem:[%s13666_s2 + $0x15c] sm:$0xf] }
  0x96   :  { %v288_v44 = vadd.f32 %v280_v22, %v271_v38  ;;  %v289_v45 = vadd.f32 %v281_v23, %v272_v39  ;;  %v6517_v61 = vor.u32 %v8245_v59, %v6516_v54  ;;  %v6493_v22 = vor.u32 %v8238_v18, %v6492_v17  ;;  %v6494_v23 = vld [vmem:[%s13666_s2 + $0x1b8] sm:$0xf0] }
  0x97   :  { %v6462_v36 = vld [vmem:[%s13666_s2 + $0x178] sm:$0xf0]  ;;  %v6461_v39 = vor.u32 %v8230_v34, %v6460_v31  ;;  %v6425_v54 = vor.u32 %v8217_v46, %v6422_v47 }
  0x98   :  { %v6255_v55 = vmul.f32 -1.442695, %v288_v44  ;;  %v6256_v56 = vmul.f32 -1.442695, %v289_v45  ;;  %v9367_v60 = vpop.f32.mrf.mxu2  ;;  %1068 = vmatpush.bf16.msrb.mxu0 %v6517_v61  ;;  %1095 = vmatpush.bf16.msrb.mxu2 %v6493_v22  ;;  %v6465_v40 = vor.u32 %v8226_v35, %v6462_v36  ;;  %v8221_v44 = vld [vmem:[%s13666_s2 + $0x12c] sm:$0xf0] }
  0x99   :  { %v6421_v51 = vor.u32 %v8221_v44, %v6420_v42  ;;  %1084 = vmatpush.bf16.msrb.mxu1 %v6425_v54  ;;  %v6366_v31 = vld [vmem:[%s13666_s2 + $0xb8] sm:$0xf0]  ;;  %v6324_v35 = vld [vmem:[%s13666_s2 + $0x50] sm:$0xf]  ;;  %v6326_v42 = vld [vmem:[%s13666_s2 + $0x70] sm:$0xf0] }
  0x9a   :  { %8634 = vpow2.f32 %v6255_v55  ;;  %v6429_v55 = vor.u32 %v8222_v49, %v6428_v48  ;;  %v6369_v34 = vor.u32 %v8202_v30, %v6366_v31  ;;  %v8197_v36 = vld [vmem:[%s13666_s2 + $0x6c] sm:$0xf0]  ;;  %v6332_v44 = vld [vmem:[%s13666_s2 + $0x58] sm:$0xf]  ;;  %v9629_v30 = vld [vmem:[%s13665_s1 + $0x80] sm:$0xff] }
  0x9b   :  { %8636 = vpow2.f32 %v6256_v56  ;;  %v268_v7 = vpop.f32.mrf.mxu3  ;;  %v6430_v56 = vld [vmem:[%s13666_s2 + $0x138] sm:$0xf0]  ;;  %v9635_v31 = vld [vmem:[%s13665_s1 + $0x40] sm:$0xff] }
  0x9c   :  { %v274_v14 = vsel %vm20_vm5, %v9307_v21, %v268_v7  ;;  %v8234_v21 = vld [vmem:[%s13666_s2 + $0x19c] sm:$0xf]  ;;  %1069 = vmatpush.bf16.msrb.mxu0 %v6485_v15  ;;  %1096 = vmatpush.bf16.msrb.mxu2 %v6461_v39  ;;  %v6433_v61 = vor.u32 %v8218_v52, %v6430_v56  ;;  %v6356_v15 = vld [vmem:[%s13666_s2 + $0x90] sm:$0xf]  ;;  %v1205_v48 = vld [vmem:[%s13664_s0 + $0x2] sm:$0x1] }
  0x9d   :  { %v291_v19 = vadd.f32 %v283_v57, %v274_v14  ;;  %v6497_v24 = vor.u32 %v8234_v21, %v6494_v23  ;;  %v6388_v57 = vld [vmem:[%s13666_s2 + $0xd0] sm:$0xf]  ;;  %v6397_v23 = vor.u32 %v8214_v9, %v6396_v2  ;;  %v8185_v2 = vld [vmem:[%s13666_s2 + $0x14] sm:$0xf]  ;;  %v9721_v56 = vld [vmem:[%s13665_s1 + $0x88] sm:$0xff] }
  0x9e   :  { %v6389_v0 = vor.u32 %v8213_v62, %v6388_v57 }
  0x9f   :  { %v6257_v28 = vmul.f32 -1.442695, %v291_v19  ;;  %1108 = vmatpush.bf16.msrb.mxu3 %v6497_v24  ;;  %v8201_v19 = vld [vmem:[%s13666_s2 + $0x94] sm:$0xf]  ;;  %v6401_v24 = vor.u32 %v8210_v10, %v6398_v11  ;;  %v6300_v10 = vld [vmem:[%s13666_s2 + $0x18] sm:$0xf] }
  0xa0   :  { %v8635_v32 = vpop.eup %8634  ;;  %1070 = vmatpush.bf16.msrb.mxu0 %v6453_v29  ;;  %1097 = vmatpush.bf16.msrb.mxu2 %v6429_v55  ;;  %v6361_v29 = vor.u32 %v8201_v19, %v6358_v20  ;;  %v8190_v11 = vld [vmem:[%s13666_s2 + $0x34] sm:$0xf0] }
  0xa1   :  { %v8637_v37 = vpop.eup %8636  ;;  %v9438_v38 = vadd.f32 1.0, %v8635_v32  ;;  %8638 = vpow2.f32 %v6257_v28  ;;  %v6357_v28 = vor.u32 %v8205_v16, %v6356_v15  ;;  %v6302_v15 = vld [vmem:[%s13666_s2 + $0x38] sm:$0xf0]  ;;  %v6301_v16 = vor.u32 %v8190_v11, %v6300_v10  ;;  %v9806_v10 = vpop.f32.mrf.mxu0 }
  0xa2   :  { %v9440_v41 = vadd.f32 1.0, %v8637_v37  ;;  %v248_v45 = vpop.f32.mrf.mxu2  ;;  %v8193_v37 = vld [vmem:[%s13666_s2 + $0x54] sm:$0xf]  ;;  %v9808_v11 = vpop.f32.mrf.mxu1 }
  0xa3   :  { %8640 = vrcp.f32 %v9438_v38  ;;  %1109 = vmatpush.bf16.msrb.mxu3 %v6465_v40  ;;  %v273_v53 = vsel %vm20_vm5, %v9367_v60, %v248_v45  ;;  %v305_v59 = vand.u32 2147483647, %v9438_v38  ;;  %v8209_v60 = vld [vmem:[%s13666_s2 + $0xd4] sm:$0xf]  ;;  %v307_v21 = vand.u32 2147483648, %v9438_v38 }
  0xa4   :  { %8642 = vrcp.f32 %v9440_v41  ;;  %1071 = vmatpush.bf16.msrb.mxu0 %v6421_v51  ;;  %v290_v5 = vadd.f32 %v282_v50, %v273_v53  ;;  %v6393_v7 = vor.u32 %v8209_v60, %v6390_v1  ;;  %v326_v14 = vand.u32 2147483648, %v9440_v41  ;;  %1098 = vmatpush.bf16.msrb.mxu2 %v6397_v23  ;;  %v8198_v45 = vld [vmem:[%s13666_s2 + $0x74] sm:$0xf0]  ;;  %v8194_v50 = vld [vmem:[%s13666_s2 + $0x5c] sm:$0xf] }
  0xa5   :  { %v324_v18 = vand.u32 2147483647, %v9440_v41  ;;  %vm301_vm7 = vweird.f32 %v9438_v38  ;;  %v6325_v40 = vor.u32 %v8197_v36, %v6324_v35  ;;  %vm320_vm9 = vweird.f32 %v9440_v41  ;;  %v6334_v51 = vld [vmem:[%s13666_s2 + $0x78] sm:$0xf0]  ;;  %v1257_v35 = vld [vmem:[%s13665_s1 + $0x120] sm:$0x7f] }
  0xa6   :  { %1085 = vmatpush.bf16.msrb.mxu1 %v6393_v7  ;;  %vm9559_vm10 = vcmp.eq.f32.partialorder %v305_v59, 8.507059e+37  ;;  %v6329_v49 = vor.u32 %v8193_v37, %v6326_v42  ;;  %v327_v52 = vor.u32 1.1754944e-38, %v326_v14  ;;  %v6333_v57 = vor.u32 %v8198_v45, %v6332_v44  ;;  %v8189_v59 = vld [vmem:[%s13666_s2 + $0x2c] sm:$0xf0]  ;;  %v9653_v36 = vld [vmem:[%s13665_s1 + $0xe0] sm:$0xff] }
  0xa7   :  { %v8639_v58 = vpop.eup %8638  ;;  %1110 = vmatpush.bf16.msrb.mxu3 %v6433_v61  ;;  %vm325_vm13 = vcmp.eq.f32.partialorder %v324_v18, 8.507059e+37  ;;  %v1206_v37 = vld [vmem:[%s13664_s0 + $0xa] sm:$0x1]  ;;  %v9668_v42 = vld [vmem:[%s13665_s1 + $0xa0] sm:$0xff] }
  0xa8   :  { %v9481_v63 = vadd.f32 1.0, %v8639_v58  ;;  %1072 = vmatpush.bf16.msrb.mxu0 %v6389_v0  ;;  %1099 = vmatpush.bf16.msrb.mxu2 %v6365_v33  ;;  %v6337_v58 = vor.u32 %v8194_v50, %v6334_v51  ;;  %v9674_v44 = vld [vmem:[%s13665_s1 + $0x60] sm:$0xff]  ;;  %v1211_v45 = vrot.slane %v1206_v37, 7  ;;  %v8304_v37 = vld [vmem:[%s13666_s2 + $0x1cc] sm:$0xf] }
  0xa9   :  { %v9489_v3 = vpop.eup %8640 }
  0xaa   :  { %v9500_v12 = vpop.eup %8642  ;;  %v297_v13 = vmul.f32 %v9489_v3, %v9438_v38  ;;  %8644 = vrcp.f32 %v9481_v63  ;;  %vm302_vm6 = vweird.f32 %v9489_v3  ;;  %1086 = vmatpush.bf16.msrb.mxu1 %v6361_v29  ;;  %v6292_v38 = vld [vmem:[%s13666_s2 + $0x10] sm:$0xf]  ;;  %v346_v20 = vand.u32 2147483648, %v9481_v63  ;;  %v1253_v29 = vld [vmem:[%s13665_s1 + $0x100] sm:$0x7f] }
  0xab   :  { %v316_v17 = vmul.f32 %v9500_v12, %v9440_v41  ;;  %8646 = vtanh.f32 %v290_v5  ;;  %1111 = vmatpush.bf16.msrb.mxu3 %v6401_v24  ;;  %vm321_vm8 = vweird.f32 %v9500_v12  ;;  %vm303_vm11 = vmor %vm301_vm7, %vm302_vm6  ;;  %v308_v41 = vor.u32 1.1754944e-38, %v307_v21 }
  0xac   :  { %v298_v22 = vsub.f32 1.0, %v297_v13  ;;  %1073 = vmatpush.bf16.msrb.mxu0 %v6357_v28  ;;  %vm9578_vm12 = vmor %vm320_vm9, %vm321_vm8  ;;  %v6293_v1 = vor.u32 %v8189_v59, %v6292_v38  ;;  %1100 = vmatpush.bf16.msrb.mxu2 %v6333_v57  ;;  %vm340_vm15 = vweird.f32 %v9481_v63  ;;  %v347_v23 = vor.u32 1.1754944e-38, %v346_v20  ;;  %v9726_v57 = vld [vmem:[%s13665_s1 + $0x90] sm:$0xff]  ;;  %v9742_v38 = vld [vmem:[%s13665_s1 + $0x48] sm:$0xff] }
  0xad   :  { %v317_v27 = vsub.f32 1.0, %v316_v17  ;;  %v9747_v59 = vld [vmem:[%s13665_s1 + $0x50] sm:$0xff]  ;;  %v8307_v20 = vld [vmem:[%s13666_s2 + $0x1dc] sm:$0xf0] }
  0xae   :  { %v299_v32 = vmul.f32 %v9489_v3, %v298_v22  ;;  %1087 = vmatpush.bf16.msrb.mxu1 %v6329_v49  ;;  %v344_v22 = vand.u32 2147483647, %v9481_v63  ;;  %v1212_v49 = vsel %vm30_vm1, %v1211_v45, %v1205_v48  ;;  %v8299_v48 = vld [vmem:[%s13666_s2 + $0x19c] sm:$0xf0] }
  0xaf   :  { %v318_v39 = vmul.f32 %v9500_v12, %v317_v27  ;;  %1112 = vmatpush.bf16.msrb.mxu3 %v6369_v34  ;;  %v9641_v34 = vld [vmem:[%s13665_s1] sm:$0xff]  ;;  %v9901_v45 = vpop.f32.mrf.mxu1 }
  0xb0   :  { %v8645_v46 = vpop.eup %8644  ;;  %v300_v47 = vadd.f32 %v9489_v3, %v299_v32  ;;  %1074 = vmatpush.bf16.msrb.mxu0 %v6325_v40  ;;  %1101 = vmatpush.bf16.msrb.mxu2 %v6301_v16  ;;  %vm345_vm7 = vcmp.eq.f32.partialorder %v344_v22, 8.507059e+37  ;;  %v1208_v40 = vld [vmem:[%s13664_s0 + $0xd] sm:$0x1]  ;;  %v9841_v16 = vld [vmem:[%s13665_s1 + $0x70] sm:$0xff]  ;;  %v8303_v22 = vld [vmem:[%s13666_s2 + $0x1c4] sm:$0xf] }
  0xb1   :  { %v336_v53 = vmul.f32 %v8645_v46, %v9481_v63  ;;  %v319_v54 = vadd.f32 %v9500_v12, %v318_v39  ;;  %v8647_v61 = vpop.eup %8646  ;;  %vm341_vm14 = vweird.f32 %v8645_v46  ;;  %v9623_v63 = vld [vmem:[%s13665_s1 + $0xc0] sm:$0xff] }
  0xb2   :  { %v304_v55 = vsel %vm303_vm11, %v9489_v3, %v300_v47  ;;  %v6294_v3 = vld [vmem:[%s13666_s2 + $0x30] sm:$0xf0]  ;;  %vm342_vm6 = vmor %vm340_vm15, %vm341_vm14  ;;  %v1207_v39 = vld [vmem:[%s13664_s0 + $0x5] sm:$0x1]  ;;  %v1217_v47 = vrot.slane %v1208_v40, 5  ;;  %v9899_v40 = vpop.f32.mrf.mxu0 }
  0xb3   :  { %v337_v62 = vsub.f32 1.0, %v336_v53  ;;  %v309_v60 = vsel %vm9559_vm10, %v308_v41, %v304_v55  ;;  %v323_v0 = vsel %vm9578_vm12, %v9500_v12, %v319_v54  ;;  %v6297_v9 = vor.u32 %v8185_v2, %v6294_v3  ;;  %v8186_v12 = vld [vmem:[%s13666_s2 + $0x1c] sm:$0xf]  ;;  %1113 = vmatpush.bf16.msrb.mxu3 %v6337_v58  ;;  %v1255_v53 = vld [vmem:[%s13665_s1 + $0x110] sm:$0x7f]  ;;  %v9705_v41 = vld [vmem:[%s13665_s1 + $0xc8] sm:$0xff] }
  0xb4   :  { %v328_v5 = vsel %vm325_vm13, %v327_v52, %v323_v0  ;;  %v351_v7 = vmul.f32 %v8647_v61, %v309_v60  ;;  %v6305_v17 = vor.u32 %v8186_v12, %v6302_v15  ;;  %1075 = vmatpush.bf16.msrb.mxu0 %v6293_v1  ;;  %v1254_v52 = vld [vmem:[%s13665_s1 + $0x108] sm:$0x7f]  ;;  %v9710_v54 = vld [vmem:[%s13665_s1 + $0xd0] sm:$0xff]  ;;  %v9715_v55 = vld [vmem:[%s13665_s1 + $0xd8] sm:$0xff] }
  0xb5   :  { %v338_v13 = vmul.f32 %v8645_v46, %v337_v62  ;;  %v350_v14 = vmul.f32 0.0, %v328_v5  ;;  %1088 = vmatpush.bf16.msrb.mxu1 %v6297_v9  ;;  %v9733_v58 = vld [vmem:[%s13665_s1 + $0x98] sm:$0xff]  ;;  %v9759_v62 = vld [vmem:[%s13665_s1 + $0x8] sm:$0xff]  ;;  %v9764_v60 = vld [vmem:[%s13665_s1 + $0x10] sm:$0xff] }
  0xb6   :  { %v9752_v61 = vld [vmem:[%s13665_s1 + $0x58] sm:$0xff]  ;;  %v1258_v1 = vld [vmem:[%s13665_s1 + $0x128] sm:$0x7f]  ;;  %v1259_v2 = vld [vmem:[%s13665_s1 + $0x130] sm:$0x7f] }
  0xb7   :  { %v9611_v18 = vadd.f32 %v351_v7, %v350_v14  ;;  %v339_v19 = vadd.f32 %v8645_v46, %v338_v13  ;;  %1114 = vmatpush.bf16.msrb.mxu3 %v6305_v17  ;;  %v9769_v0 = vld [vmem:[%s13665_s1 + $0x18] sm:$0xff]  ;;  %v9788_v5 = vld [vmem:[%s13665_s1 + $0xe8] sm:$0xff]  ;;  %v9793_v7 = vld [vmem:[%s13665_s1 + $0xf0] sm:$0xff] }
  0xb8   :  { %v1260_v3 = vld [vmem:[%s13665_s1 + $0x138] sm:$0x7f]  ;;  %v9816_v12 = vld [vmem:[%s13665_s1 + $0xa8] sm:$0xff]  ;;  %v9821_v13 = vld [vmem:[%s13665_s1 + $0xb0] sm:$0xff] }
  0xb9   :  { %8648 = vtanh.f32 %v9611_v18  ;;  %v343_v21 = vsel %vm342_vm6, %v8645_v46, %v339_v19  ;;  %v1216_v46 = vrot.slane %v1207_v39, 6  ;;  %v9800_v9 = vld [vmem:[%s13665_s1 + $0xf8] sm:$0xff]  ;;  %v9836_v15 = vld [vmem:[%s13665_s1 + $0x68] sm:$0xff]  ;;  %v6775_v19 = vld [vmem:[%s13666_s2 + $0x1c0] sm:$0xf] }
  0xba   :  { %v348_v25 = vsel %vm345_vm7, %v347_v23, %v343_v21  ;;  %v9826_v14 = vld [vmem:[%s13665_s1 + $0xb8] sm:$0xff]  ;;  %v9859_v21 = vpop.f32.mrf.mxu3  ;;  %v9861_v23 = vpop.f32.mrf.mxu2  ;;  %v6785_v39 = vld [vmem:[%s13666_s2 + $0x1e8] sm:$0xf0] }
  0xbb   :  { %v1218_v50 = vsel %vm37_vm2, %v1217_v47, %v1216_v46  ;;  %v9846_v17 = vld [vmem:[%s13665_s1 + $0x78] sm:$0xff]  ;;  %v6788_v46 = vor.u32 %v8304_v37, %v6785_v39  ;;  %v6743_v47 = vld [vmem:[%s13666_s2 + $0x180] sm:$0xf]  ;;  %v8288_v39 = vld [vmem:[%s13666_s2 + $0x14c] sm:$0xf] }
  0xbc   :  { %v9685_v51 = vsel %vm40_vm3, %v1212_v49, %v1218_v50  ;;  %v8295_v49 = vld [vmem:[%s13666_s2 + $0x184] sm:$0xf]  ;;  %v6744_v50 = vor.u32 %v8299_v48, %v6743_v47 }
  0xbf   :  { %v8649_v24 = vpop.eup %8648 }
  0xc0   :  { %v354_v26 = vmul.f32 %v8649_v24, %v348_v25  ;;  %v9867_v24 = vld [vmem:[%s13665_s1 + $0x28] sm:$0xff]  ;;  %v9872_v25 = vld [vmem:[%s13665_s1 + $0x30] sm:$0xff] }
  0xc2   :  { %v356_v27 = vrot.slane %v354_v26, 1  ;;  %358 = vst [vmem:[#allocation2] sm:$0x1] %v354_v26  ;;  %v631_v28 = vpack.c.bf16 %v354_v26, %v354_v26  ;;  %v9955_v47 = vpop.f32.mrf.mxu3  ;;  %v9957_v48 = vpop.f32.mrf.mxu2 }
  0xc3   :  { %360 = vst [vmem:[#allocation1] sm:$0xff] %v354_v26  ;;  %v9877_v26 = vld [vmem:[%s13665_s1 + $0x38] sm:$0xff] }
  0xc4   :  { %359 = vst [vmem:[#allocation2 + $0x10] sm:$0x1] %v356_v27  ;;  %1024 = vmatmul.bf16.vlgmr.msra.gmra.mxu0 %v631_v28  ;;  %1037 = vmatmul.bf16.vlgmr.msra.gmra.mxu1 %v631_v28  ;;  %v6776_v27 = vor.u32 %v8307_v20, %v6775_v19  ;;  %v6753_v19 = vld [vmem:[%s13666_s2 + $0x1a8] sm:$0xf0] }
  0xc5   :  { %1050 = vmatmul.bf16.vlgmr.msra.gmra.mxu2 %v631_v28  ;;  %1063 = vmatmul.bf16.vlgmr.msra.gmra.mxu3 %v631_v28 }
  0xc6   :  { %6533 = vmatpush.msk.msra.mxu0 %vm86_vm0, %v1253_v29  ;;  %6535 = vmatpush.msk.msra.mxu1 %vm86_vm0, %v1254_v52  ;;  %v6783_v29 = vld [vmem:[%s13666_s2 + $0x1c8] sm:$0xf]  ;;  %v6745_v52 = vld [vmem:[%s13666_s2 + $0x1a0] sm:$0xf0] }
  0xc7   :  { %6537 = vmatpush.msk.msra.mxu2 %vm86_vm0, %v1255_v53  ;;  %v6751_v53 = vld [vmem:[%s13666_s2 + $0x188] sm:$0xf] }
  0xc8   :  { %1300 = vmatpush.msra.mxu0 %v9623_v63  ;;  %1320 = vmatpush.msra.mxu1 %v9705_v41 }
  0xc9   :  { %1340 = vmatpush.msra.mxu2 %v9710_v54 }
  0xca   :  { %v362_v32 = vld [vmem:[#allocation1 + $0x2] ss:$9 sm:$0xff]  ;;  %1301 = vmatpush.msra.mxu0 %v9629_v30  ;;  %1321 = vmatpush.msra.mxu1 %v9721_v56 }
  0xcb   :  { %v364_v33 = vld [vmem:[#allocation1 + $0x3] ss:$9 sm:$0xff]  ;;  %367 = vst [vmem:[#allocation2 + $0xf] sm:$0x1] %v362_v32  ;;  %1341 = vmatpush.msra.mxu2 %v9726_v57  ;;  %v8308_v32 = vld [vmem:[%s13666_s2 + $0x1e4] sm:$0xf0] }
  0xcc   :  { %368 = vst [vmem:[#allocation2 + $0x1f] sm:$0x1] %v364_v33  ;;  %1302 = vmatpush.msra.mxu0 %v9635_v31  ;;  %1322 = vmatpush.msra.mxu1 %v9742_v38 }
  0xcd   :  { %618 = vst [vmem:[#allocation1 + $0x10] ss:$2 sm:$0xff] %v9163_v8  ;;  %1342 = vmatpush.msra.mxu2 %v9747_v59 }
  0xce   :  { %616 = vst [vmem:[#allocation1] ss:$2 sm:$0xff] %v9142_v4  ;;  %1303 = vmatpush.msra.mxu0 %v9641_v34  ;;  %1323 = vmatpush.msra.mxu1 %v9759_v62 }
  0xcf   :  { %1343 = vmatpush.msra.mxu2 %v9764_v60 }
  0xd4   :  { %1076 = vmatmul.bf16.vlgmr.msrb.gmra.mxu0 %v631_v28  ;;  %1089 = vmatmul.bf16.vlgmr.msrb.gmra.mxu1 %v631_v28 }
  0xd5   :  { %1102 = vmatmul.bf16.vlgmr.msrb.gmra.mxu2 %v631_v28  ;;  %1115 = vmatmul.bf16.vlgmr.msrb.gmra.mxu3 %v631_v28  ;;  %v6777_v28 = vld [vmem:[%s13666_s2 + $0x1e0] sm:$0xf0] }
  0xd6   :  { %6541 = vmatpush.msk.msrb.mxu0 %vm86_vm0, %v1257_v35  ;;  %6543 = vmatpush.msk.msrb.mxu1 %vm86_vm0, %v1258_v1  ;;  %v6780_v33 = vor.u32 %v8303_v22, %v6777_v28  ;;  %v6784_v35 = vor.u32 %v8308_v32, %v6783_v29  ;;  %v6748_v1 = vor.u32 %v8295_v49, %v6745_v52  ;;  %v6711_v22 = vld [vmem:[%s13666_s2 + $0x140] sm:$0xf]  ;;  %v8287_v28 = vld [vmem:[%s13666_s2 + $0x144] sm:$0xf]  ;;  %v6719_v32 = vld [vmem:[%s13666_s2 + $0x148] sm:$0xf] }
  0xd7   :  { %6545 = vmatpush.msk.msrb.mxu2 %vm86_vm0, %v1259_v2 }
  0xd8   :  { %1380 = vmatpush.msrb.mxu0 %v9653_v36  ;;  %1400 = vmatpush.msrb.mxu1 %v9788_v5 }
  0xd9   :  { %1420 = vmatpush.msrb.mxu2 %v9793_v7 }
  0xda   :  { %1381 = vmatpush.msrb.mxu0 %v9668_v42  ;;  %1401 = vmatpush.msrb.mxu1 %v9816_v12 }
  0xdb   :  { %1421 = vmatpush.msrb.mxu2 %v9821_v13 }
  0xdc   :  { %1382 = vmatpush.msrb.mxu0 %v9674_v44  ;;  %1402 = vmatpush.msrb.mxu1 %v9836_v15 }
  0xdd   :  { %1422 = vmatpush.msrb.mxu2 %v9841_v16 }
  0xde   :  { %1383 = vmatpush.msrb.mxu0 %v9020_v43  ;;  %v1256_v43 = vld [vmem:[%s13665_s1 + $0x118] sm:$0x7f]  ;;  %1403 = vmatpush.msrb.mxu1 %v9867_v24 }
  0xdf   :  { %6539 = vmatpush.msk.msra.mxu3 %vm86_vm0, %v1256_v43  ;;  %1423 = vmatpush.msrb.mxu2 %v9872_v25  ;;  %v8300_v43 = vld [vmem:[%s13666_s2 + $0x1a4] sm:$0xf0] }
  0xe0   :  { %v6752_v2 = vor.u32 %v8300_v43, %v6751_v53  ;;  %v6679_v53 = vld [vmem:[%s13666_s2 + $0x100] sm:$0xf] }
  0xe1   :  { %1360 = vmatpush.msra.mxu3 %v9715_v55  ;;  %v8283_v43 = vld [vmem:[%s13666_s2 + $0x11c] sm:$0xf0] }
  0xe3   :  { %1361 = vmatpush.msra.mxu3 %v9733_v58 }
  0xe4   :  { %6534 = vmatmul.msk.f32.vlgmr.msra.gmra.mxu0 %vm82_vm4, %v9685_v51  ;;  %6536 = vmatmul.msk.f32.vlgmr.msra.gmra.mxu1 %vm82_vm4, %v9685_v51 }
  0xe5   :  { %1362 = vmatpush.msra.mxu3 %v9752_v61  ;;  %6538 = vmatmul.msk.f32.vlgmr.msra.gmra.mxu2 %vm82_vm4, %v9685_v51 }
  0xe6   :  { %1852 = vmatpush.bf16.msra.mxu0 %v6776_v27  ;;  %1865 = vmatpush.bf16.msra.mxu1 %v6780_v33  ;;  %v8291_v27 = vld [vmem:[%s13666_s2 + $0x15c] sm:$0xf0]  ;;  %v8292_v33 = vld [vmem:[%s13666_s2 + $0x164] sm:$0xf0] }
  0xe7   :  { %1363 = vmatpush.msra.mxu3 %v9769_v0  ;;  %1878 = vmatpush.bf16.msra.mxu2 %v6784_v35  ;;  %v6712_v29 = vor.u32 %v8291_v27, %v6711_v22  ;;  %v6720_v37 = vor.u32 %v8292_v33, %v6719_v32  ;;  %v6647_v32 = vld [vmem:[%s13666_s2 + $0xc0] sm:$0xf] }
  0xe8   :  { %6540 = vmatmul.msk.f32.vlgmr.msra.gmra.mxu3 %vm82_vm4, %v9685_v51  ;;  %v8275_v33 = vld [vmem:[%s13666_s2 + $0xdc] sm:$0xf0] }
  0xe9   :  { %6547 = vmatpush.msk.msrb.mxu3 %vm86_vm0, %v1260_v3  ;;  %v8296_v3 = vld [vmem:[%s13666_s2 + $0x18c] sm:$0xf] }
  0xea   :  { %v6756_v20 = vor.u32 %v8296_v3, %v6753_v19  ;;  %1853 = vmatpush.bf16.msra.mxu0 %v6744_v50  ;;  %1866 = vmatpush.bf16.msra.mxu1 %v6748_v1  ;;  %v8279_v1 = vld [vmem:[%s13666_s2 + $0x104] sm:$0xf]  ;;  %v6687_v19 = vld [vmem:[%s13666_s2 + $0x108] sm:$0xf] }
  0xeb   :  { %1440 = vmatpush.msrb.mxu3 %v9800_v9  ;;  %1879 = vmatpush.bf16.msra.mxu2 %v6752_v2  ;;  %v6680_v2 = vor.u32 %v8283_v43, %v6679_v53  ;;  %v6681_v3 = vld [vmem:[%s13666_s2 + $0x120] sm:$0xf0] }
  0xec   :  { %6542 = vmatmul.msk.f32.vlgmr.msrb.gmra.mxu0 %vm82_vm4, %v9685_v51  ;;  %6544 = vmatmul.msk.f32.vlgmr.msrb.gmra.mxu1 %vm82_vm4, %v9685_v51  ;;  %v6684_v22 = vor.u32 %v8279_v1, %v6681_v3  ;;  %v8272_v1 = vld [vmem:[%s13666_s2 + $0xcc] sm:$0xf] }
  0xed   :  { %1441 = vmatpush.msrb.mxu3 %v9826_v14  ;;  %6546 = vmatmul.msk.f32.vlgmr.msrb.gmra.mxu2 %vm82_vm4, %v9685_v51 }
  0xee   :  { %1854 = vmatpush.bf16.msra.mxu0 %v6712_v29  ;;  %v6689_v29 = vld [vmem:[%s13666_s2 + $0x128] sm:$0xf0] }
  0xef   :  { %1442 = vmatpush.msrb.mxu3 %v9846_v17  ;;  %1880 = vmatpush.bf16.msra.mxu2 %v6720_v37  ;;  %v6648_v37 = vor.u32 %v8275_v33, %v6647_v32  ;;  %v6617_v33 = vld [vmem:[%s13666_s2 + $0xa0] sm:$0xf0] }
  0xf1   :  { %1443 = vmatpush.msrb.mxu3 %v9877_v26 }
  0xf2   :  { %6548 = vmatmul.msk.f32.vlgmr.msrb.gmra.mxu3 %vm82_vm4, %v9685_v51  ;;  %v6713_v51 = vld [vmem:[%s13666_s2 + $0x160] sm:$0xf0]  ;;  %1855 = vmatpush.bf16.msra.mxu0 %v6680_v2  ;;  %v6657_v2 = vld [vmem:[%s13666_s2 + $0xe8] sm:$0xf0] }
  0xf3   :  { %1891 = vmatpush.bf16.msra.mxu3 %v6788_v46  ;;  %v6716_v35 = vor.u32 %v8287_v28, %v6713_v51  ;;  %v6721_v46 = vld [vmem:[%s13666_s2 + $0x168] sm:$0xf0] }
  0xf4   :  { %v6724_v49 = vor.u32 %v8288_v39, %v6721_v46  ;;  %v8280_v28 = vld [vmem:[%s13666_s2 + $0x10c] sm:$0xf]  ;;  %v6649_v39 = vld [vmem:[%s13666_s2 + $0xe0] sm:$0xf0]  ;;  %v6655_v46 = vld [vmem:[%s13666_s2 + $0xc8] sm:$0xf] }
  0xf5   :  { %1867 = vmatpush.bf16.msra.mxu1 %v6716_v35  ;;  %v6692_v51 = vor.u32 %v8280_v28, %v6689_v29  ;;  %v8271_v35 = vld [vmem:[%s13666_s2 + $0xc4] sm:$0xf]  ;;  %v6615_v28 = vld [vmem:[%s13666_s2 + $0x80] sm:$0xf] }
  0xf6   :  { %v6652_v53 = vor.u32 %v8271_v35, %v6649_v39  ;;  %1856 = vmatpush.bf16.msra.mxu0 %v6648_v37  ;;  %v8267_v29 = vld [vmem:[%s13666_s2 + $0x9c] sm:$0xf0]  ;;  %v6623_v35 = vld [vmem:[%s13666_s2 + $0x88] sm:$0xf] }
  0xf7   :  { %1892 = vmatpush.bf16.msra.mxu3 %v6756_v20  ;;  %v8284_v20 = vld [vmem:[%s13666_s2 + $0x124] sm:$0xf0]  ;;  %v6616_v32 = vor.u32 %v8267_v29, %v6615_v28  ;;  %v612_v28 = vsel %vm20_vm5, %v9806_v10, %v9899_v40  ;;  %v613_v29 = vsel %vm20_vm5, %v9808_v11, %v9901_v45  ;;  %v8256_v11 = vld [vmem:[%s13666_s2 + $0x4c] sm:$0xf] }
  0xf8   :  { %v6688_v27 = vor.u32 %v8284_v20, %v6687_v19  ;;  %v6660_v20 = vor.u32 %v8272_v1, %v6657_v2  ;;  %v8268_v37 = vld [vmem:[%s13666_s2 + $0xa4] sm:$0xf0]  ;;  %v6593_v45 = vld [vmem:[%s13666_s2 + $0x68] sm:$0xf0] }
  0xf9   :  { %1868 = vmatpush.bf16.msra.mxu1 %v6684_v22  ;;  %v620_v1 = vld.sshfl [vmem:[#allocation1 + $0x8] sm:$0xff pattern:$0x75316420] }
  0xfa   :  { %1881 = vmatpush.bf16.msra.mxu2 %v6688_v27  ;;  %1857 = vmatpush.bf16.msra.mxu0 %v6616_v32  ;;  %v6585_v32 = vld [vmem:[%s13666_s2 + $0x60] sm:$0xf0]  ;;  %v8260_v10 = vld [vmem:[%s13666_s2 + $0x64] sm:$0xf0] }
  0xfb   :  { %1893 = vmatpush.bf16.msra.mxu3 %v6724_v49  ;;  %v8276_v49 = vld [vmem:[%s13666_s2 + $0xe4] sm:$0xf0] }
  0xfc   :  { %v6656_v43 = vor.u32 %v8276_v49, %v6655_v46  ;;  %v6624_v46 = vor.u32 %v8268_v37, %v6623_v35  ;;  %v8264_v49 = vld [vmem:[%s13666_s2 + $0x8c] sm:$0xf] }
  0xfd   :  { %1869 = vmatpush.bf16.msra.mxu1 %v6652_v53  ;;  %v6625_v53 = vld [vmem:[%s13666_s2 + $0xa8] sm:$0xf0] }
  0xfe   :  { %1882 = vmatpush.bf16.msra.mxu2 %v6656_v43  ;;  %v619_v43 = vld.sshfl [vmem:[#allocation1] sm:$0xff pattern:$0x75316420]  ;;  %v6628_v2 = vor.u32 %v8264_v49, %v6625_v53  ;;  %v628_v53 = vadd.f32 %v620_v1, %v613_v29 }
  0xff   :  { %1894 = vmatpush.bf16.msra.mxu3 %v6692_v51  ;;  %v8263_v51 = vld [vmem:[%s13666_s2 + $0x84] sm:$0xf]  ;;  %v627_v49 = vadd.f32 %v619_v43, %v612_v28 }
 0x100   :  { %v6620_v39 = vor.u32 %v8263_v51, %v6617_v33  ;;  %v6591_v33 = vld [vmem:[%s13666_s2 + $0x48] sm:$0xf]  ;;  %v6553_v29 = vld [vmem:[%s13666_s2 + $0x20] sm:$0xf0] }
 0x101   :  { %v6592_v35 = vor.u32 %v8260_v10, %v6591_v33  ;;  %v8252_v33 = vld [vmem:[%s13666_s2 + $0x24] sm:$0xf0] }
 0x102   :  { %1870 = vmatpush.bf16.msra.mxu1 %v6620_v39  ;;  %1883 = vmatpush.bf16.msra.mxu2 %v6624_v46  ;;  %v6596_v46 = vor.u32 %v8256_v11, %v6593_v45  ;;  %v6561_v45 = vld [vmem:[%s13666_s2 + $0x28] sm:$0xf0] }
 0x103   :  { %1895 = vmatpush.bf16.msra.mxu3 %v6660_v20  ;;  %v8259_v20 = vld [vmem:[%s13666_s2 + $0x5c] sm:$0xf0] }
 0x106   :  { %1884 = vmatpush.bf16.msra.mxu2 %v6592_v35  ;;  %v8248_v35 = vld [vmem:[%s13666_s2 + $0xc] sm:$0xf] }
 0x107   :  { %1896 = vmatpush.bf16.msra.mxu3 %v6628_v2  ;;  %v6551_v2 = vld [vmem:[%s13666_s2] sm:$0xf] }
 0x10b   :  { %1897 = vmatpush.bf16.msra.mxu3 %v6596_v46  ;;  %v6564_v46 = vor.u32 %v8248_v35, %v6561_v45  ;;  %v6761_v45 = vld [vmem:[%s13666_s2 + $0x1b0] sm:$0xf0] }
 0x10f   :  { %1898 = vmatpush.bf16.msra.mxu3 %v6564_v46  ;;  %v8302_v46 = vld [vmem:[%s13666_s2 + $0x1b4] sm:$0xf0] }
 0x141   :  { %v9959_v50 = vpop.f32.mrf.mxu0  ;;  %v9961_v52 = vpop.f32.mrf.mxu1 }
 0x148   :  { %v10011_v3 = vpop.f32.mrf.mxu2  ;;  %v10013_v19 = vpop.f32.mrf.mxu3 }
 0x149   :  { %v1027_v22 = vpop.f32.mrf.mxu0  ;;  %v1040_v27 = vpop.f32.mrf.mxu1 }
 0x14a   :  { %v6583_v22 = vld [vmem:[%s13666_s2 + $0x40] sm:$0xf]  ;;  %v8255_v27 = vld [vmem:[%s13666_s2 + $0x44] sm:$0xf] }
 0x14b   :  { %v6584_v51 = vor.u32 %v8259_v20, %v6583_v22  ;;  %v6588_v40 = vor.u32 %v8255_v27, %v6585_v32  ;;  %v8251_v27 = vld [vmem:[%s13666_s2 + $0x1c] sm:$0xf0]  ;;  %v8247_v32 = vld [vmem:[%s13666_s2 + $0x4] sm:$0xf] }
 0x14c   :  { %v6552_v28 = vor.u32 %v8251_v27, %v6551_v2 }
 0x14d   :  { %1858 = vmatpush.bf16.msra.mxu0 %v6584_v51  ;;  %1871 = vmatpush.bf16.msra.mxu1 %v6588_v40  ;;  %v6559_v51 = vld [vmem:[%s13666_s2 + $0x8] sm:$0xf] }
 0x14e   :  { %v6560_v40 = vor.u32 %v8252_v33, %v6559_v51  ;;  %v6759_v51 = vld [vmem:[%s13666_s2 + $0x190] sm:$0xf] }
 0x14f   :  { %v8301_v33 = vld [vmem:[%s13666_s2 + $0x1ac] sm:$0xf0] }
 0x150   :  { %v1053_v37 = vpop.f32.mrf.mxu2  ;;  %v1066_v39 = vpop.f32.mrf.mxu3  ;;  %1885 = vmatpush.bf16.msra.mxu2 %v6560_v40  ;;  %v6760_v35 = vor.u32 %v8301_v33, %v6759_v51 }
 0x151   :  { %v1077_v22 = vpop.f32.mrf.mxu0  ;;  %v1090_v20 = vpop.f32.mrf.mxu1  ;;  %v6791_v37 = vld [vmem:[%s13666_s2 + $0x1d0] sm:$0xf]  ;;  %v615_v39 = vsel %vm20_vm5, %v9859_v21, %v9955_v47  ;;  %1859 = vmatpush.bf16.msra.mxu0 %v6552_v28  ;;  %v6799_v21 = vld [vmem:[%s13666_s2 + $0x1d8] sm:$0xf] }
 0x152   :  { %v1120_v43 = vsel %vm20_vm5, %v9959_v50, %v1077_v22  ;;  %v1121_v1 = vsel %vm20_vm5, %v9961_v52, %v1090_v20  ;;  %v622_v50 = vld.sshfl [vmem:[#allocation1 + $0x18] sm:$0xff pattern:$0x75316420]  ;;  %v6556_v52 = vor.u32 %v8247_v32, %v6553_v29  ;;  %v6793_v22 = vld [vmem:[%s13666_s2 + $0x1f0] sm:$0xf0] }
 0x153   :  { %v1124_v10 = vadd.f32 %v1120_v43, %v627_v49  ;;  %v1125_v11 = vadd.f32 %v1121_v1, %v628_v53  ;;  %v8309_v49 = vld [vmem:[%s13666_s2 + $0x1ec] sm:$0xf0]  ;;  %v8305_v53 = vld [vmem:[%s13666_s2 + $0x1d4] sm:$0xf]  ;;  %v8310_v47 = vld [vmem:[%s13666_s2 + $0x1f4] sm:$0xf0] }
 0x154   :  { %v6792_v27 = vor.u32 %v8309_v49, %v6791_v37  ;;  %v6796_v32 = vor.u32 %v8305_v53, %v6793_v22  ;;  %1872 = vmatpush.bf16.msra.mxu1 %v6556_v52  ;;  %v8306_v43 = vld [vmem:[%s13666_s2 + $0x1dc] sm:$0xf]  ;;  %v6800_v28 = vor.u32 %v8310_v47, %v6799_v21  ;;  %v6767_v37 = vld [vmem:[%s13666_s2 + $0x198] sm:$0xf]  ;;  %v8293_v21 = vld [vmem:[%s13666_s2 + $0x16c] sm:$0xf0] }
 0x155   :  { %v6530_v20 = vmul.f32 -1.442695, %v1124_v10  ;;  %v6531_v2 = vmul.f32 -1.442695, %v1125_v11  ;;  %v6801_v1 = vld [vmem:[%s13666_s2 + $0x1f8] sm:$0xf0]  ;;  %v630_v11 = vadd.f32 %v622_v50, %v615_v39 }
 0x156   :  { %1904 = vmatpush.bf16.msrb.mxu0 %v6792_v27  ;;  %v6804_v29 = vor.u32 %v8306_v43, %v6801_v1  ;;  %v8297_v10 = vld [vmem:[%s13666_s2 + $0x194] sm:$0xf]  ;;  %1930 = vmatpush.bf16.msrb.mxu2 %v6800_v28  ;;  %v8298_v22 = vld [vmem:[%s13666_s2 + $0x19c] sm:$0xf]  ;;  %v6768_v27 = vor.u32 %v8302_v46, %v6767_v37  ;;  %v6735_v28 = vld [vmem:[%s13666_s2 + $0x158] sm:$0xf] }
 0x157   :  { %8650 = vpow2.f32 %v6530_v20  ;;  %v6764_v53 = vor.u32 %v8297_v10, %v6761_v45  ;;  %v6769_v20 = vld [vmem:[%s13666_s2 + $0x1b8] sm:$0xf0]  ;;  %v8289_v47 = vld [vmem:[%s13666_s2 + $0x154] sm:$0xf] }
 0x158   :  { %8652 = vpow2.f32 %v6531_v2  ;;  %v1103_v52 = vpop.f32.mrf.mxu2  ;;  %v1116_v40 = vpop.f32.mrf.mxu3  ;;  %1917 = vmatpush.bf16.msrb.mxu1 %v6796_v32  ;;  %1943 = vmatpush.bf16.msrb.mxu3 %v6804_v29  ;;  %v6772_v32 = vor.u32 %v8298_v22, %v6769_v20  ;;  %v6729_v1 = vld [vmem:[%s13666_s2 + $0x170] sm:$0xf0]  ;;  %v8294_v29 = vld [vmem:[%s13666_s2 + $0x174] sm:$0xf0]  ;;  %v8290_v10 = vld [vmem:[%s13666_s2 + $0x15c] sm:$0xf] }
 0x159   :  { %v1123_v50 = vsel %vm20_vm5, %v10013_v19, %v1116_v40  ;;  %v1079_v39 = vpop.f32.mrf.mxu0  ;;  %v1092_v49 = vpop.f32.mrf.mxu1  ;;  %v6727_v19 = vld [vmem:[%s13666_s2 + $0x150] sm:$0xf]  ;;  %v6732_v33 = vor.u32 %v8289_v47, %v6729_v1  ;;  %v6736_v37 = vor.u32 %v8294_v29, %v6735_v28  ;;  %v8281_v20 = vld [vmem:[%s13666_s2 + $0x114] sm:$0xf]  ;;  %v8282_v1 = vld [vmem:[%s13666_s2 + $0x11c] sm:$0xf] }
 0x15a   :  { %v1127_v2 = vadd.f32 %v1123_v50, %v630_v11  ;;  %1905 = vmatpush.bf16.msrb.mxu0 %v6760_v35  ;;  %v6728_v43 = vor.u32 %v8293_v21, %v6727_v19  ;;  %v6737_v11 = vld [vmem:[%s13666_s2 + $0x178] sm:$0xf0]  ;;  %v614_v35 = vsel %vm20_vm5, %v9861_v23, %v9957_v48  ;;  %v621_v45 = vld.sshfl [vmem:[#allocation1 + $0x10] sm:$0xff pattern:$0x75316420]  ;;  %1931 = vmatpush.bf16.msrb.mxu2 %v6768_v27 }
 0x15b   :  { %v6740_v46 = vor.u32 %v8290_v10, %v6737_v11  ;;  %v6695_v49 = vld [vmem:[%s13666_s2 + $0x110] sm:$0xf]  ;;  %v1122_v23 = vsel %vm20_vm5, %v10011_v3, %v1103_v52  ;;  %v629_v27 = vadd.f32 %v621_v45, %v614_v35  ;;  %v6703_v3 = vld [vmem:[%s13666_s2 + $0x118] sm:$0xf]  ;;  %v6705_v28 = vld [vmem:[%s13666_s2 + $0x138] sm:$0xf0] }
 0x15c   :  { %v6532_v51 = vmul.f32 -1.442695, %v1127_v2  ;;  %1918 = vmatpush.bf16.msrb.mxu1 %v6764_v53  ;;  %1944 = vmatpush.bf16.msrb.mxu3 %v6772_v32  ;;  %v8285_v53 = vld [vmem:[%s13666_s2 + $0x12c] sm:$0xf0]  ;;  %v6697_v2 = vld [vmem:[%s13666_s2 + $0x130] sm:$0xf0] }
 0x15d   :  { %v8651_v40 = vpop.eup %8650  ;;  %v6696_v48 = vor.u32 %v8285_v53, %v6695_v49  ;;  %v8286_v52 = vld [vmem:[%s13666_s2 + $0x134] sm:$0xf0]  ;;  %v1126_v21 = vadd.f32 %v1122_v23, %v629_v27  ;;  %v6700_v47 = vor.u32 %v8281_v20, %v6697_v2  ;;  %v8277_v10 = vld [vmem:[%s13666_s2 + $0xec] sm:$0xf0]  ;;  %v8273_v35 = vld [vmem:[%s13666_s2 + $0xd4] sm:$0xf] }
 0x15e   :  { %v8653_v50 = vpop.eup %8652  ;;  %v10184_v39 = vadd.f32 1.0, %v8651_v40  ;;  %8654 = vpow2.f32 %v6532_v51  ;;  %1906 = vmatpush.bf16.msrb.mxu0 %v6728_v43  ;;  %1932 = vmatpush.bf16.msrb.mxu2 %v6736_v37  ;;  %v6704_v43 = vor.u32 %v8286_v52, %v6703_v3  ;;  %v6708_v51 = vor.u32 %v8282_v1, %v6705_v28  ;;  %v6665_v45 = vld [vmem:[%s13666_s2 + $0xf0] sm:$0xf0]  ;;  %v6671_v37 = vld [vmem:[%s13666_s2 + $0xd8] sm:$0xf] }
 0x15f   :  { %v10192_v22 = vadd.f32 1.0, %v8653_v50  ;;  %v6668_v50 = vor.u32 %v8273_v35, %v6665_v45  ;;  %v8278_v49 = vld [vmem:[%s13666_s2 + $0xf4] sm:$0xf0]  ;;  %v8274_v53 = vld [vmem:[%s13666_s2 + $0xdc] sm:$0xf] }
 0x160   :  { %8656 = vrcp.f32 %v10184_v39  ;;  %v1105_v32 = vpop.f32.mrf.mxu2  ;;  %v1118_v19 = vpop.f32.mrf.mxu3  ;;  %1919 = vmatpush.bf16.msrb.mxu1 %v6732_v33  ;;  %1945 = vmatpush.bf16.msrb.mxu3 %v6740_v46  ;;  %v1141_v29 = vand.u32 2147483647, %v10184_v39  ;;  %v6663_v33 = vld [vmem:[%s13666_s2 + $0xd0] sm:$0xf]  ;;  %v6673_v20 = vld [vmem:[%s13666_s2 + $0xf8] sm:$0xf0]  ;;  %vm1137_vm10 = vweird.f32 %v10184_v39 }
 0x161   :  { %8658 = vrcp.f32 %v10192_v22  ;;  %v6664_v40 = vor.u32 %v8277_v10, %v6663_v33  ;;  %v6631_v2 = vld [vmem:[%s13666_s2 + $0x90] sm:$0xf]  ;;  %v8265_v3 = vld [vmem:[%s13666_s2 + $0x94] sm:$0xf]  ;;  %v1143_v1 = vand.u32 2147483648, %v10184_v39  ;;  %v6676_v10 = vor.u32 %v8274_v53, %v6673_v20 }
 0x162   :  { %1907 = vmatpush.bf16.msrb.mxu0 %v6696_v48  ;;  %1933 = vmatpush.bf16.msrb.mxu2 %v6704_v43  ;;  %8660 = vtanh.f32 %v1126_v21  ;;  %v6672_v48 = vor.u32 %v8278_v49, %v6671_v37  ;;  %v8269_v27 = vld [vmem:[%s13666_s2 + $0xac] sm:$0xf0]  ;;  %v6633_v52 = vld [vmem:[%s13666_s2 + $0xb0] sm:$0xf0]  ;;  %v6639_v21 = vld [vmem:[%s13666_s2 + $0x98] sm:$0xf]  ;;  %vm1156_vm13 = vweird.f32 %v10192_v22 }
 0x163   :  { %v1162_v43 = vand.u32 2147483648, %v10192_v22  ;;  %v1160_v28 = vand.u32 2147483647, %v10192_v22  ;;  %v8266_v35 = vld [vmem:[%s13666_s2 + $0x9c] sm:$0xf]  ;;  %vm10281_vm9 = vcmp.eq.f32.partialorder %v1141_v29, 8.507059e+37 }
 0x164   :  { %v8655_v11 = vpop.eup %8654  ;;  %1920 = vmatpush.bf16.msrb.mxu1 %v6700_v47  ;;  %1946 = vmatpush.bf16.msrb.mxu3 %v6708_v51  ;;  %v8270_v51 = vld [vmem:[%s13666_s2 + $0xb4] sm:$0xf0]  ;;  %v6641_v45 = vld [vmem:[%s13666_s2 + $0xb8] sm:$0xf0]  ;;  %v6599_v53 = vld [vmem:[%s13666_s2 + $0x50] sm:$0xf] }
 0x165   :  { %v10233_v46 = vadd.f32 1.0, %v8655_v11  ;;  %v6632_v11 = vor.u32 %v8269_v27, %v6631_v2  ;;  %v6640_v49 = vor.u32 %v8270_v51, %v6639_v21  ;;  %v6644_v20 = vor.u32 %v8266_v35, %v6641_v45  ;;  %v8261_v2 = vld [vmem:[%s13666_s2 + $0x6c] sm:$0xf0]  ;;  %v8257_v29 = vld [vmem:[%s13666_s2 + $0x54] sm:$0xf] }
 0x166   :  { %v10241_v23 = vpop.eup %8656  ;;  %1908 = vmatpush.bf16.msrb.mxu0 %v6664_v40  ;;  %1934 = vmatpush.bf16.msrb.mxu2 %v6672_v48  ;;  %v6636_v40 = vor.u32 %v8265_v3, %v6633_v52  ;;  %v6601_v27 = vld [vmem:[%s13666_s2 + $0x70] sm:$0xf0]  ;;  %v6600_v52 = vor.u32 %v8261_v2, %v6599_v53  ;;  %v8262_v51 = vld [vmem:[%s13666_s2 + $0x74] sm:$0xf0]  ;;  %v1144_v45 = vor.u32 1.1754944e-38, %v1143_v1  ;;  %vm1161_vm15 = vcmp.eq.f32.partialorder %v1160_v28, 8.507059e+37 }
 0x167   :  { %v10252_v32 = vpop.eup %8658  ;;  %v1133_v19 = vmul.f32 %v10241_v23, %v10184_v39  ;;  %8662 = vrcp.f32 %v10233_v46  ;;  %vm1138_vm8 = vweird.f32 %v10241_v23  ;;  %v6604_v21 = vor.u32 %v8257_v29, %v6601_v27  ;;  %v6609_v53 = vld [vmem:[%s13666_s2 + $0x78] sm:$0xf0]  ;;  %v6567_v39 = vld [vmem:[%s13666_s2 + $0x10] sm:$0xf] }
 0x168   :  { %v1152_v47 = vmul.f32 %v10252_v32, %v10192_v22  ;;  %1921 = vmatpush.bf16.msrb.mxu1 %v6668_v50  ;;  %1947 = vmatpush.bf16.msrb.mxu3 %v6676_v10  ;;  %vm1157_vm11 = vweird.f32 %v10252_v32  ;;  %vm10315_vm12 = vmor %vm1137_vm10, %vm1138_vm8  ;;  %v8253_v1 = vld [vmem:[%s13666_s2 + $0x2c] sm:$0xf0]  ;;  %vm1176_vm7 = vweird.f32 %v10233_v46 }
 0x169   :  { %v1134_v33 = vsub.f32 1.0, %v1133_v19  ;;  %v8661_v19 = vpop.eup %8660  ;;  %vm10336_vm14 = vmor %vm1156_vm13, %vm1157_vm11  ;;  %v6568_v27 = vor.u32 %v8253_v1, %v6567_v39 }
 0x16a   :  { %v1153_v37 = vsub.f32 1.0, %v1152_v47  ;;  %1909 = vmatpush.bf16.msrb.mxu0 %v6632_v11  ;;  %v6607_v47 = vld [vmem:[%s13666_s2 + $0x58] sm:$0xf]  ;;  %v1163_v11 = vor.u32 1.1754944e-38, %v1162_v43  ;;  %1935 = vmatpush.bf16.msrb.mxu2 %v6640_v49  ;;  %v8249_v49 = vld [vmem:[%s13666_s2 + $0x14] sm:$0xf] }
 0x16b   :  { %v1135_v48 = vmul.f32 %v10241_v23, %v1134_v33  ;;  %v8258_v33 = vld [vmem:[%s13666_s2 + $0x5c] sm:$0xf] }
 0x16c   :  { %v1154_v3 = vmul.f32 %v10252_v32, %v1153_v37  ;;  %1922 = vmatpush.bf16.msrb.mxu1 %v6636_v40  ;;  %v6608_v37 = vor.u32 %v8262_v51, %v6607_v47  ;;  %1948 = vmatpush.bf16.msrb.mxu3 %v6644_v20  ;;  %v6612_v29 = vor.u32 %v8258_v33, %v6609_v53  ;;  %v6575_v47 = vld [vmem:[%s13666_s2 + $0x18] sm:$0xf]  ;;  %v8250_v33 = vld [vmem:[%s13666_s2 + $0x1c] sm:$0xf] }
 0x16d   :  { %v8663_v10 = vpop.eup %8662  ;;  %v1136_v35 = vadd.f32 %v10241_v23, %v1135_v48 }
 0x16e   :  { %v1155_v43 = vadd.f32 %v10252_v32, %v1154_v3  ;;  %v1172_v48 = vmul.f32 %v8663_v10, %v10233_v46  ;;  %1910 = vmatpush.bf16.msrb.mxu0 %v6600_v52  ;;  %v6569_v3 = vld [vmem:[%s13666_s2 + $0x30] sm:$0xf0]  ;;  %v8254_v52 = vld [vmem:[%s13666_s2 + $0x34] sm:$0xf0]  ;;  %1936 = vmatpush.bf16.msrb.mxu2 %v6608_v37  ;;  %vm1177_vm6 = vweird.f32 %v8663_v10 }
 0x16f   :  { %v1140_v2 = vsel %vm10315_vm12, %v10241_v23, %v1136_v35  ;;  %v6572_v20 = vor.u32 %v8249_v49, %v6569_v3  ;;  %v6576_v50 = vor.u32 %v8254_v52, %v6575_v47  ;;  %vm1178_vm8 = vmor %vm1176_vm7, %vm1177_vm6  ;;  %v2092_v52 = vld [vmem:[%s13665_s1 + $0x118] sm:$0x7f] }
 0x170   :  { %v1145_v51 = vsel %vm10281_vm9, %v1144_v45, %v1140_v2  ;;  %v1159_v23 = vsel %vm10336_vm14, %v10252_v32, %v1155_v43  ;;  %v1173_v28 = vsub.f32 1.0, %v1172_v48  ;;  %1923 = vmatpush.bf16.msrb.mxu1 %v6604_v21  ;;  %v6577_v45 = vld [vmem:[%s13666_s2 + $0x38] sm:$0xf0]  ;;  %1949 = vmatpush.bf16.msrb.mxu3 %v6612_v29  ;;  %v2089_v29 = vld [vmem:[%s13665_s1 + $0x100] sm:$0x7f] }
 0x171   :  { %v1164_v35 = vsel %vm1161_vm15, %v1163_v11, %v1159_v23  ;;  %v1187_v40 = vmul.f32 %v8661_v19, %v1145_v51  ;;  %v6580_v53 = vor.u32 %v8250_v33, %v6577_v45  ;;  %v1182_v19 = vand.u32 2147483648, %v10233_v46  ;;  %v2041_v51 = vld [vmem:[%s13664_s0 + $0x3] sm:$0x1] }
 0x172   :  { %v1186_v32 = vmul.f32 %v1164_v35, %v9611_v18  ;;  %v1174_v21 = vmul.f32 %v8663_v10, %v1173_v28  ;;  %1911 = vmatpush.bf16.msrb.mxu0 %v6568_v27  ;;  %1937 = vmatpush.bf16.msrb.mxu2 %v6576_v50  ;;  %v1180_v11 = vand.u32 2147483647, %v10233_v46  ;;  %v2093_v27 = vld [vmem:[%s13665_s1 + $0x120] sm:$0x7f]  ;;  %v8364_v50 = vld [vmem:[%s13666_s2 + $0x1a4] sm:$0xf0] }
 0x173   :  { %v1183_v37 = vor.u32 1.1754944e-38, %v1182_v19  ;;  %v10401_v23 = vld [vmem:[%s13665_s1 + $0x20] sm:$0xff] }
 0x174   :  { %v10364_v43 = vadd.f32 %v1187_v40, %v1186_v32  ;;  %1924 = vmatpush.bf16.msrb.mxu1 %v6572_v20  ;;  %v1175_v48 = vadd.f32 %v8663_v10, %v1174_v21  ;;  %1950 = vmatpush.bf16.msrb.mxu3 %v6580_v53  ;;  %vm1181_vm9 = vcmp.eq.f32.partialorder %v1180_v11, 8.507059e+37  ;;  %v7020_v35 = vld [vmem:[%s13666_s2 + $0x1a0] sm:$0xf0]  ;;  %v7026_v40 = vld [vmem:[%s13666_s2 + $0x188] sm:$0xf] }
 0x175   :  { %v7027_v32 = vor.u32 %v8364_v50, %v7026_v40  ;;  %v8360_v21 = vld [vmem:[%s13666_s2 + $0x18c] sm:$0xf]  ;;  %v6986_v19 = vld [vmem:[%s13666_s2 + $0x140] sm:$0xf]  ;;  %v8327_v40 = vld [vmem:[%s13666_s2 + $0x84] sm:$0xf] }
 0x176   :  { %8664 = vtanh.f32 %v10364_v43  ;;  %v1179_v18 = vsel %vm1178_vm8, %v8663_v10, %v1175_v48  ;;  %v7028_v53 = vld [vmem:[%s13666_s2 + $0x1a8] sm:$0xf0]  ;;  %v8355_v11 = vld [vmem:[%s13666_s2 + $0x15c] sm:$0xf0] }
 0x177   :  { %v1184_v1 = vsel %vm1181_vm9, %v1183_v37, %v1179_v18  ;;  %v7031_v48 = vor.u32 %v8360_v21, %v7028_v53  ;;  %v8351_v18 = vld [vmem:[%s13666_s2 + $0x144] sm:$0xf]  ;;  %v6987_v37 = vor.u32 %v8355_v11, %v6986_v19  ;;  %v8332_v21 = vld [vmem:[%s13666_s2 + $0xa4] sm:$0xf0]  ;;  %v8328_v19 = vld [vmem:[%s13666_s2 + $0x8c] sm:$0xf] }
 0x178   :  { %v6900_v11 = vld [vmem:[%s13666_s2 + $0xa8] sm:$0xf0] }
 0x17c   :  { %v8665_v39 = vpop.eup %8664 }
 0x17d   :  { %v1190_v49 = vmul.f32 %v8665_v39, %v1184_v1  ;;  %v6988_v39 = vld [vmem:[%s13666_s2 + $0x160] sm:$0xf0]  ;;  %v6994_v1 = vld [vmem:[%s13666_s2 + $0x148] sm:$0xf] }
 0x17f   :  { %v1192_v22 = vrot.slane %v1190_v49, 1  ;;  %1194 = vst [vmem:[#allocation2 + $0x1] sm:$0x1] %v1190_v49  ;;  %v1467_v2 = vpack.c.bf16 %v1190_v49, %v1190_v49 }
 0x180   :  { %1196 = vst [vmem:[#allocation1] sm:$0xff] %v1190_v49  ;;  %v8356_v49 = vld [vmem:[%s13666_s2 + $0x164] sm:$0xf0] }
 0x181   :  { %1195 = vst [vmem:[#allocation2 + $0x11] sm:$0x1] %v1192_v22  ;;  %1860 = vmatmul.bf16.vlgmr.msra.gmra.mxu0 %v1467_v2  ;;  %1873 = vmatmul.bf16.vlgmr.msra.gmra.mxu1 %v1467_v2  ;;  %v6991_v22 = vor.u32 %v8351_v18, %v6988_v39  ;;  %v6903_v39 = vor.u32 %v8328_v19, %v6900_v11 }
 0x182   :  { %1886 = vmatmul.bf16.vlgmr.msra.gmra.mxu2 %v1467_v2  ;;  %1899 = vmatmul.bf16.vlgmr.msra.gmra.mxu3 %v1467_v2 }
 0x183   :  { %6808 = vmatpush.msk.msra.mxu0 %vm86_vm0, %v2089_v29  ;;  %6814 = vmatpush.msk.msra.mxu3 %vm86_vm0, %v2092_v52  ;;  %v8352_v29 = vld [vmem:[%s13666_s2 + $0x14c] sm:$0xf] }
 0x184   :  { %v8344_v52 = vld [vmem:[%s13666_s2 + $0x10c] sm:$0xf] }
 0x185   :  { %2136 = vmatpush.msra.mxu0 %v9623_v63  ;;  %v2042_v63 = vld [vmem:[%s13664_s0 + $0xb] sm:$0x1]  ;;  %2196 = vmatpush.msra.mxu3 %v9715_v55  ;;  %v2096_v55 = vld [vmem:[%s13665_s1 + $0x138] sm:$0x7f] }
 0x187   :  { %v1198_v46 = vld [vmem:[#allocation1 + $0x2] ss:$9 sm:$0xff]  ;;  %2137 = vmatpush.msra.mxu0 %v9629_v30  ;;  %v2043_v30 = vld [vmem:[%s13664_s0 + $0x4] sm:$0x1]  ;;  %2197 = vmatpush.msra.mxu3 %v9733_v58 }
 0x188   :  { %v1200_v10 = vld [vmem:[#allocation1 + $0x3] ss:$9 sm:$0xff]  ;;  %1203 = vst [vmem:[#allocation2 + $0xe] sm:$0x1] %v1198_v46  ;;  %v2052_v3 = vrot.slane %v2043_v30, 6 }
 0x189   :  { %1204 = vst [vmem:[#allocation2 + $0x1e] sm:$0x1] %v1200_v10  ;;  %2138 = vmatpush.msra.mxu0 %v9635_v31  ;;  %v2044_v31 = vld [vmem:[%s13664_s0 + $0xc] sm:$0x1]  ;;  %2198 = vmatpush.msra.mxu3 %v9752_v61  ;;  %v7050_v58 = vld [vmem:[%s13666_s2 + $0x1c0] sm:$0xf] }
 0x18a   :  { %1452 = vst [vmem:[#allocation1] ss:$2 sm:$0xff] %v9142_v4  ;;  %v2053_v47 = vrot.slane %v2044_v31, 5  ;;  %v6996_v46 = vld [vmem:[%s13666_s2 + $0x168] sm:$0xf0] }
 0x18b   :  { %1454 = vst [vmem:[#allocation1 + $0x10] ss:$2 sm:$0xff] %v9163_v8  ;;  %2139 = vmatpush.msra.mxu0 %v9641_v34  ;;  %v2047_v34 = vrot.slane %v2042_v63, 7  ;;  %2199 = vmatpush.msra.mxu3 %v9769_v0  ;;  %v8372_v0 = vld [vmem:[%s13666_s2 + $0x1e4] sm:$0xf0]  ;;  %v6999_v63 = vor.u32 %v8352_v29, %v6996_v46 }
 0x18d   :  { %v2048_v28 = vsel %vm30_vm1, %v2047_v34, %v2041_v51  ;;  %v6954_v34 = vld [vmem:[%s13666_s2 + $0x100] sm:$0xf] }
 0x191   :  { %1912 = vmatmul.bf16.vlgmr.msrb.gmra.mxu0 %v1467_v2  ;;  %1925 = vmatmul.bf16.vlgmr.msrb.gmra.mxu1 %v1467_v2  ;;  %v1455_v18 = vld.sshfl [vmem:[#allocation1] sm:$0xff pattern:$0x75316420] }
 0x192   :  { %1938 = vmatmul.bf16.vlgmr.msrb.gmra.mxu2 %v1467_v2  ;;  %1951 = vmatmul.bf16.vlgmr.msrb.gmra.mxu3 %v1467_v2  ;;  %v6995_v2 = vor.u32 %v8356_v49, %v6994_v1  ;;  %v6858_v1 = vld [vmem:[%s13666_s2 + $0x40] sm:$0xf] }
 0x193   :  { %6816 = vmatpush.msk.msrb.mxu0 %vm86_vm0, %v2093_v27  ;;  %6822 = vmatpush.msk.msrb.mxu3 %vm86_vm0, %v2096_v55  ;;  %v6922_v55 = vld [vmem:[%s13666_s2 + $0xc0] sm:$0xf] }
 0x194   :  { %v8323_v49 = vld [vmem:[%s13666_s2 + $0x5c] sm:$0xf0] }
 0x195   :  { %2216 = vmatpush.msrb.mxu0 %v9653_v36  ;;  %v2054_v36 = vsel %vm37_vm2, %v2053_v47, %v2052_v3  ;;  %2276 = vmatpush.msrb.mxu3 %v9800_v9  ;;  %v8347_v3 = vld [vmem:[%s13666_s2 + $0x11c] sm:$0xf0]  ;;  %v8343_v47 = vld [vmem:[%s13666_s2 + $0x104] sm:$0xf]  ;;  %v6859_v46 = vor.u32 %v8323_v49, %v6858_v1 }
 0x196   :  { %v2056_v20 = vsel %vm40_vm3, %v2048_v28, %v2054_v36  ;;  %v6955_v51 = vor.u32 %v8347_v3, %v6954_v34  ;;  %v6956_v28 = vld [vmem:[%s13666_s2 + $0x120] sm:$0xf0]  ;;  %v6962_v36 = vld [vmem:[%s13666_s2 + $0x108] sm:$0xf] }
 0x197   :  { %2217 = vmatpush.msrb.mxu0 %v9668_v42  ;;  %v2090_v42 = vld [vmem:[%s13665_s1 + $0x108] sm:$0x7f]  ;;  %2277 = vmatpush.msrb.mxu3 %v9826_v14 }
 0x198   :  { %6810 = vmatpush.msk.msra.mxu1 %vm86_vm0, %v2090_v42  ;;  %v7060_v14 = vld [vmem:[%s13666_s2 + $0x1e8] sm:$0xf0]  ;;  %v6959_v42 = vor.u32 %v8343_v47, %v6956_v28  ;;  %v6866_v34 = vld [vmem:[%s13666_s2 + $0x48] sm:$0xf] }
 0x199   :  { %2218 = vmatpush.msrb.mxu0 %v9674_v44  ;;  %v2091_v44 = vld [vmem:[%s13665_s1 + $0x110] sm:$0x7f]  ;;  %2278 = vmatpush.msrb.mxu3 %v9846_v17  ;;  %v8324_v3 = vld [vmem:[%s13666_s2 + $0x64] sm:$0xf0] }
 0x19a   :  { %6812 = vmatpush.msk.msra.mxu2 %vm86_vm0, %v2091_v44  ;;  %2156 = vmatpush.msra.mxu1 %v9705_v41  ;;  %v2094_v41 = vld [vmem:[%s13665_s1 + $0x128] sm:$0x7f] }
 0x19b   :  { %2219 = vmatpush.msrb.mxu0 %v10401_v23  ;;  %2279 = vmatpush.msrb.mxu3 %v9877_v26  ;;  %v8359_v26 = vld [vmem:[%s13666_s2 + $0x184] sm:$0xf] }
 0x19c   :  { %2176 = vmatpush.msra.mxu2 %v9710_v54  ;;  %2157 = vmatpush.msra.mxu1 %v9721_v56  ;;  %v2095_v54 = vld [vmem:[%s13665_s1 + $0x130] sm:$0x7f]  ;;  %v10450_v56 = vpop.f32.mrf.mxu0  ;;  %v7023_v45 = vor.u32 %v8359_v26, %v7020_v35  ;;  %v8331_v35 = vld [vmem:[%s13666_s2 + $0x9c] sm:$0xf0] }
 0x19e   :  { %2177 = vmatpush.msra.mxu2 %v9726_v57  ;;  %2158 = vmatpush.msra.mxu1 %v9742_v38  ;;  %v10452_v57 = vpop.f32.mrf.mxu1  ;;  %v8371_v38 = vld [vmem:[%s13666_s2 + $0x1dc] sm:$0xf0] }
 0x19f   :  { %v7051_v61 = vor.u32 %v8371_v38, %v7050_v58  ;;  %v8339_v58 = vld [vmem:[%s13666_s2 + $0xdc] sm:$0xf0]  ;;  %v8335_v38 = vld [vmem:[%s13666_s2 + $0xc4] sm:$0xf] }
 0x1a0   :  { %2178 = vmatpush.msra.mxu2 %v9747_v59  ;;  %2159 = vmatpush.msra.mxu1 %v9759_v62  ;;  %v8367_v59 = vld [vmem:[%s13666_s2 + $0x1c4] sm:$0xf] }
 0x1a1   :  { %6809 = vmatmul.msk.f32.vlgmr.msra.gmra.mxu0 %vm82_vm4, %v2056_v20  ;;  %6811 = vmatmul.msk.f32.vlgmr.msra.gmra.mxu1 %vm82_vm4, %v2056_v20  ;;  %v7052_v62 = vld [vmem:[%s13666_s2 + $0x1e0] sm:$0xf0] }
 0x1a2   :  { %2179 = vmatpush.msra.mxu2 %v9764_v60  ;;  %6818 = vmatpush.msk.msrb.mxu1 %vm86_vm0, %v2094_v41  ;;  %v7058_v60 = vld [vmem:[%s13666_s2 + $0x1c8] sm:$0xf]  ;;  %v7055_v9 = vor.u32 %v8367_v59, %v7052_v62  ;;  %v6964_v41 = vld [vmem:[%s13666_s2 + $0x128] sm:$0xf0]  ;;  %v6923_v59 = vor.u32 %v8339_v58, %v6922_v55 }
 0x1a3   :  { %6815 = vmatmul.msk.f32.vlgmr.msra.gmra.mxu3 %vm82_vm4, %v2056_v20  ;;  %6813 = vmatmul.msk.f32.vlgmr.msra.gmra.mxu2 %vm82_vm4, %v2056_v20  ;;  %v6930_v62 = vld [vmem:[%s13666_s2 + $0xc8] sm:$0xf] }
 0x1a4   :  { %6820 = vmatpush.msk.msrb.mxu2 %vm86_vm0, %v2095_v54  ;;  %2236 = vmatpush.msrb.mxu1 %v9788_v5  ;;  %v10484_v5 = vpop.f32.mrf.mxu3  ;;  %v6967_v54 = vor.u32 %v8344_v52, %v6964_v41  ;;  %v6826_v52 = vld [vmem:[%s13666_s2] sm:$0xf] }
 0x1a5   :  { %2688 = vmatpush.bf16.msra.mxu0 %v7051_v61  ;;  %v6924_v61 = vld [vmem:[%s13666_s2 + $0xe0] sm:$0xf0]  ;;  %v8315_v41 = vld [vmem:[%s13666_s2 + $0x1c] sm:$0xf0] }
 0x1a6   :  { %2256 = vmatpush.msrb.mxu2 %v9793_v7  ;;  %2237 = vmatpush.msrb.mxu1 %v9816_v12  ;;  %v10486_v7 = vpop.f32.mrf.mxu2  ;;  %v7059_v12 = vor.u32 %v8372_v0, %v7058_v60  ;;  %v10498_v17 = vpop.f32.mrf.mxu1  ;;  %v8340_v60 = vld [vmem:[%s13666_s2 + $0xe4] sm:$0xf0]  ;;  %v6927_v0 = vor.u32 %v8335_v38, %v6924_v61  ;;  %v6827_v38 = vor.u32 %v8315_v41, %v6826_v52  ;;  %v7010_v52 = vld [vmem:[%s13666_s2 + $0x158] sm:$0xf] }
 0x1a7   :  { %v1449_v29 = vsel %vm20_vm5, %v10452_v57, %v10498_v17  ;;  %v8320_v57 = vld [vmem:[%s13666_s2 + $0x4c] sm:$0xf]  ;;  %v6834_v61 = vld [vmem:[%s13666_s2 + $0x8] sm:$0xf]  ;;  %v8358_v41 = vld [vmem:[%s13666_s2 + $0x174] sm:$0xf0] }
 0x1a8   :  { %2257 = vmatpush.msrb.mxu2 %v9821_v13  ;;  %2238 = vmatpush.msrb.mxu1 %v9836_v15  ;;  %v8368_v13 = vld [vmem:[%s13666_s2 + $0x1cc] sm:$0xf] }
 0x1a9   :  { %6817 = vmatmul.msk.f32.vlgmr.msrb.gmra.mxu0 %vm82_vm4, %v2056_v20  ;;  %v7063_v15 = vor.u32 %v8368_v13, %v7060_v14  ;;  %v6932_v13 = vld [vmem:[%s13666_s2 + $0xe8] sm:$0xf0] }
 0x1aa   :  { %2258 = vmatpush.msrb.mxu2 %v9841_v16  ;;  %2239 = vmatpush.msrb.mxu1 %v9867_v24  ;;  %v10496_v16 = vpop.f32.mrf.mxu0  ;;  %v7018_v24 = vld [vmem:[%s13666_s2 + $0x180] sm:$0xf]  ;;  %v6868_v17 = vld [vmem:[%s13666_s2 + $0x68] sm:$0xf0] }
 0x1ab   :  { %6819 = vmatmul.msk.f32.vlgmr.msrb.gmra.mxu1 %vm82_vm4, %v2056_v20  ;;  %6823 = vmatmul.msk.f32.vlgmr.msrb.gmra.mxu3 %vm82_vm4, %v2056_v20  ;;  %v6871_v28 = vor.u32 %v8320_v57, %v6868_v17  ;;  %v8362_v57 = vld [vmem:[%s13666_s2 + $0x19c] sm:$0xf] }
 0x1ac   :  { %2259 = vmatpush.msrb.mxu2 %v9872_v25  ;;  %2701 = vmatpush.bf16.msra.mxu1 %v7055_v9  ;;  %v8363_v25 = vld [vmem:[%s13666_s2 + $0x19c] sm:$0xf0]  ;;  %v10548_v10 = vpop.f32.mrf.mxu3  ;;  %v6931_v9 = vor.u32 %v8340_v60, %v6930_v62  ;;  %v8316_v62 = vld [vmem:[%s13666_s2 + $0x24] sm:$0xf0]  ;;  %v7044_v17 = vld [vmem:[%s13666_s2 + $0x1b8] sm:$0xf0] }
 0x1ad   :  { %6821 = vmatmul.msk.f32.vlgmr.msrb.gmra.mxu2 %vm82_vm4, %v2056_v20  ;;  %2727 = vmatpush.bf16.msra.mxu3 %v7063_v15  ;;  %v7019_v33 = vor.u32 %v8363_v25, %v7018_v24  ;;  %v8348_v20 = vld [vmem:[%s13666_s2 + $0x124] sm:$0xf0]  ;;  %v1458_v60 = vld.sshfl [vmem:[#allocation1 + $0x18] sm:$0xff pattern:$0x75316420] }
 0x1ae   :  { %2714 = vmatpush.bf16.msra.mxu2 %v7059_v12  ;;  %v10550_v27 = vpop.f32.mrf.mxu2  ;;  %v6963_v44 = vor.u32 %v8348_v20, %v6962_v36  ;;  %v8336_v12 = vld [vmem:[%s13666_s2 + $0xcc] sm:$0xf] }
 0x1af   :  { %2689 = vmatpush.bf16.msra.mxu0 %v7019_v33  ;;  %v6935_v24 = vor.u32 %v8336_v12, %v6932_v13  ;;  %v6890_v33 = vld [vmem:[%s13666_s2 + $0x80] sm:$0xf]  ;;  %v6835_v12 = vor.u32 %v8316_v62, %v6834_v61  ;;  %v6836_v13 = vld [vmem:[%s13666_s2 + $0x28] sm:$0xf0]  ;;  %v1450_v61 = vsel %vm20_vm5, %v10486_v7, %v10550_v27 }
 0x1b0   :  { %2702 = vmatpush.bf16.msra.mxu1 %v7023_v45  ;;  %v6891_v50 = vor.u32 %v8331_v35, %v6890_v33  ;;  %v6892_v45 = vld [vmem:[%s13666_s2 + $0xa0] sm:$0xf0]  ;;  %v8373_v33 = vld [vmem:[%s13666_s2 + $0x1ec] sm:$0xf0]  ;;  %v8369_v35 = vld [vmem:[%s13666_s2 + $0x1d4] sm:$0xf] }
 0x1b1   :  { %2728 = vmatpush.bf16.msra.mxu3 %v7031_v48  ;;  %v6895_v53 = vor.u32 %v8327_v40, %v6892_v45  ;;  %v7068_v40 = vld [vmem:[%s13666_s2 + $0x1f0] sm:$0xf0] }
 0x1b2   :  { %2715 = vmatpush.bf16.msra.mxu2 %v7027_v32  ;;  %v6898_v32 = vld [vmem:[%s13666_s2 + $0x88] sm:$0xf]  ;;  %v1457_v62 = vld.sshfl [vmem:[#allocation1 + $0x10] sm:$0xff pattern:$0x75316420] }
 0x1b3   :  { %2690 = vmatpush.bf16.msra.mxu0 %v6987_v37  ;;  %v6899_v48 = vor.u32 %v8332_v21, %v6898_v32  ;;  %v1456_v37 = vld.sshfl [vmem:[#allocation1 + $0x8] sm:$0xff pattern:$0x75316420]  ;;  %v8374_v21 = vld [vmem:[%s13666_s2 + $0x1f4] sm:$0xf0] }
 0x1b4   :  { %2703 = vmatpush.bf16.msra.mxu1 %v6991_v22  ;;  %v8319_v22 = vld [vmem:[%s13666_s2 + $0x44] sm:$0xf]  ;;  %v1464_v20 = vadd.f32 %v1456_v37, %v1449_v29  ;;  %v8365_v37 = vld [vmem:[%s13666_s2 + $0x1ac] sm:$0xf0]  ;;  %v7036_v29 = vld [vmem:[%s13666_s2 + $0x1b0] sm:$0xf0] }
 0x1b5   :  { %2729 = vmatpush.bf16.msra.mxu3 %v6999_v63  ;;  %v6860_v63 = vld [vmem:[%s13666_s2 + $0x60] sm:$0xf0] }
 0x1b6   :  { %2716 = vmatpush.bf16.msra.mxu2 %v6995_v2  ;;  %v1448_v2 = vsel %vm20_vm5, %v10450_v56, %v10496_v16  ;;  %v6863_v56 = vor.u32 %v8319_v22, %v6860_v63  ;;  %v6867_v16 = vor.u32 %v8324_v3, %v6866_v34  ;;  %v8366_v63 = vld [vmem:[%s13666_s2 + $0x1b4] sm:$0xf0] }
 0x1b7   :  { %2691 = vmatpush.bf16.msra.mxu0 %v6955_v51  ;;  %v1463_v36 = vadd.f32 %v1455_v18, %v1448_v2  ;;  %v7034_v18 = vld [vmem:[%s13666_s2 + $0x190] sm:$0xf] }
 0x1b8   :  { %2704 = vmatpush.bf16.msra.mxu1 %v6959_v42  ;;  %v7035_v2 = vor.u32 %v8365_v37, %v7034_v18  ;;  %v8337_v37 = vld [vmem:[%s13666_s2 + $0xd4] sm:$0xf] }
 0x1b9   :  { %2730 = vmatpush.bf16.msra.mxu3 %v6967_v54  ;;  %v8311_v54 = vld [vmem:[%s13666_s2 + $0x4] sm:$0xf] }
 0x1ba   :  { %2717 = vmatpush.bf16.msra.mxu2 %v6963_v44 }
 0x1bb   :  { %2692 = vmatpush.bf16.msra.mxu0 %v6923_v59  ;;  %v6828_v59 = vld [vmem:[%s13666_s2 + $0x20] sm:$0xf0] }
 0x1bc   :  { %2705 = vmatpush.bf16.msra.mxu1 %v6927_v0 }
 0x1bd   :  { %2731 = vmatpush.bf16.msra.mxu3 %v6935_v24  ;;  %v7066_v24 = vld [vmem:[%s13666_s2 + $0x1d0] sm:$0xf] }
 0x1be   :  { %2718 = vmatpush.bf16.msra.mxu2 %v6931_v9  ;;  %v6831_v9 = vor.u32 %v8311_v54, %v6828_v59  ;;  %v7067_v32 = vor.u32 %v8373_v33, %v7066_v24  ;;  %v8345_v24 = vld [vmem:[%s13666_s2 + $0x114] sm:$0xf] }
 0x1bf   :  { %2693 = vmatpush.bf16.msra.mxu0 %v6891_v50 }
 0x1c0   :  { %2706 = vmatpush.bf16.msra.mxu1 %v6895_v53  ;;  %v8370_v53 = vld [vmem:[%s13666_s2 + $0x1dc] sm:$0xf] }
 0x1c1   :  { %2732 = vmatpush.bf16.msra.mxu3 %v6903_v39  ;;  %v8361_v39 = vld [vmem:[%s13666_s2 + $0x194] sm:$0xf] }
 0x1c2   :  { %2719 = vmatpush.bf16.msra.mxu2 %v6899_v48  ;;  %v7076_v48 = vld [vmem:[%s13666_s2 + $0x1f8] sm:$0xf0] }
 0x1c3   :  { %2694 = vmatpush.bf16.msra.mxu0 %v6859_v46  ;;  %v7079_v11 = vor.u32 %v8370_v53, %v7076_v48  ;;  %v7042_v46 = vld [vmem:[%s13666_s2 + $0x198] sm:$0xf]  ;;  %v6938_v48 = vld [vmem:[%s13666_s2 + $0xd0] sm:$0xf] }
 0x1c4   :  { %2707 = vmatpush.bf16.msra.mxu1 %v6863_v56 }
 0x1c5   :  { %2733 = vmatpush.bf16.msra.mxu3 %v6871_v28  ;;  %v7047_v28 = vor.u32 %v8362_v57, %v7044_v17  ;;  %v8329_v17 = vld [vmem:[%s13666_s2 + $0x94] sm:$0xf] }
 0x1c6   :  { %2720 = vmatpush.bf16.msra.mxu2 %v6867_v16  ;;  %v7039_v16 = vor.u32 %v8361_v39, %v7036_v29  ;;  %v6940_v39 = vld [vmem:[%s13666_s2 + $0xf0] sm:$0xf0]  ;;  %v8338_v29 = vld [vmem:[%s13666_s2 + $0xdc] sm:$0xf] }
 0x1c7   :  { %2695 = vmatpush.bf16.msra.mxu0 %v6827_v38  ;;  %v7012_v38 = vld [vmem:[%s13666_s2 + $0x178] sm:$0xf0] }
 0x1c8   :  { %2708 = vmatpush.bf16.msra.mxu1 %v6831_v9 }
 0x1ca   :  { %2721 = vmatpush.bf16.msra.mxu2 %v6835_v12  ;;  %v6970_v12 = vld [vmem:[%s13666_s2 + $0x110] sm:$0xf] }
 0x1cb   :  { %2740 = vmatpush.bf16.msrb.mxu0 %v7067_v32 }
 0x1cf   :  { %2741 = vmatpush.bf16.msrb.mxu0 %v7035_v2  ;;  %v8342_v2 = vld [vmem:[%s13666_s2 + $0xf4] sm:$0xf0] }
 0x1fe   :  { %v10552_v30 = vpop.f32.mrf.mxu0  ;;  %v10554_v31 = vpop.f32.mrf.mxu1 }
 0x205   :  { %v10604_v14 = vpop.f32.mrf.mxu2  ;;  %v10606_v15 = vpop.f32.mrf.mxu3 }
 0x206   :  { %v1863_v25 = vpop.f32.mrf.mxu0  ;;  %v1876_v26 = vpop.f32.mrf.mxu1 }
 0x207   :  { %v1451_v25 = vsel %vm20_vm5, %v10484_v5, %v10548_v10  ;;  %v7071_v5 = vor.u32 %v8369_v35, %v7068_v40  ;;  %v7074_v10 = vld [vmem:[%s13666_s2 + $0x1d8] sm:$0xf] }
 0x208   :  { %v7075_v19 = vor.u32 %v8374_v21, %v7074_v10  ;;  %v1466_v1 = vadd.f32 %v1458_v60, %v1451_v25  ;;  %v7011_v60 = vor.u32 %v8358_v41, %v7010_v52  ;;  %v6972_v25 = vld [vmem:[%s13666_s2 + $0x130] sm:$0xf0]  ;;  %v8350_v40 = vld [vmem:[%s13666_s2 + $0x134] sm:$0xf0]  ;;  %v6980_v10 = vld [vmem:[%s13666_s2 + $0x138] sm:$0xf0] }
 0x209   :  { %2753 = vmatpush.bf16.msrb.mxu1 %v7071_v5  ;;  %v8346_v5 = vld [vmem:[%s13666_s2 + $0x11c] sm:$0xf] }
 0x20a   :  { %2766 = vmatpush.bf16.msrb.mxu2 %v7075_v19  ;;  %v6983_v53 = vor.u32 %v8346_v5, %v6980_v10  ;;  %v8341_v19 = vld [vmem:[%s13666_s2 + $0xec] sm:$0xf0]  ;;  %v6884_v10 = vld [vmem:[%s13666_s2 + $0x78] sm:$0xf0] }
 0x20b   :  { %v6939_v18 = vor.u32 %v8341_v19, %v6938_v48  ;;  %v8317_v48 = vld [vmem:[%s13666_s2 + $0x2c] sm:$0xf0]  ;;  %v8313_v19 = vld [vmem:[%s13666_s2 + $0x14] sm:$0xf] }
 0x20d   :  { %v1889_v47 = vpop.f32.mrf.mxu2  ;;  %v1902_v51 = vpop.f32.mrf.mxu3  ;;  %2754 = vmatpush.bf16.msrb.mxu1 %v7039_v16 }
 0x20e   :  { %v1913_v42 = vpop.f32.mrf.mxu0  ;;  %v1926_v44 = vpop.f32.mrf.mxu1  ;;  %v7043_v51 = vor.u32 %v8366_v63, %v7042_v46 }
 0x20f   :  { %v1956_v55 = vsel %vm20_vm5, %v10552_v30, %v1913_v42  ;;  %v1957_v58 = vsel %vm20_vm5, %v10554_v31, %v1926_v44  ;;  %v8312_v31 = vld [vmem:[%s13666_s2 + $0xc] sm:$0xf]  ;;  %v7004_v44 = vld [vmem:[%s13666_s2 + $0x170] sm:$0xf0] }
 0x210   :  { %v1960_v30 = vadd.f32 %v1956_v55, %v1463_v36  ;;  %v1961_v0 = vadd.f32 %v1957_v58, %v1464_v20  ;;  %v6839_v26 = vor.u32 %v8312_v31, %v6836_v13  ;;  %v8357_v36 = vld [vmem:[%s13666_s2 + $0x16c] sm:$0xf0]  ;;  %v8353_v20 = vld [vmem:[%s13666_s2 + $0x154] sm:$0xf]  ;;  %v8354_v58 = vld [vmem:[%s13666_s2 + $0x15c] sm:$0xf]  ;;  %2767 = vmatpush.bf16.msrb.mxu2 %v7043_v51 }
 0x211   :  { %v7007_v55 = vor.u32 %v8353_v20, %v7004_v44  ;;  %v8349_v31 = vld [vmem:[%s13666_s2 + $0x12c] sm:$0xf0]  ;;  %v6914_v51 = vld [vmem:[%s13666_s2 + $0x98] sm:$0xf] }
 0x212   :  { %v6805_v50 = vmul.f32 -1.442695, %v1960_v30  ;;  %v6806_v45 = vmul.f32 -1.442695, %v1961_v0  ;;  %2734 = vmatpush.bf16.msra.mxu3 %v6839_v26  ;;  %v7015_v30 = vor.u32 %v8354_v58, %v7012_v38  ;;  %v6971_v27 = vor.u32 %v8349_v31, %v6970_v12  ;;  %v6916_v58 = vld [vmem:[%s13666_s2 + $0xb8] sm:$0xf0] }
 0x213   :  { %2755 = vmatpush.bf16.msrb.mxu1 %v7007_v55  ;;  %v1465_v26 = vadd.f32 %v1457_v62, %v1450_v61  ;;  %v8330_v55 = vld [vmem:[%s13666_s2 + $0x9c] sm:$0xf]  ;;  %v6874_v62 = vld [vmem:[%s13666_s2 + $0x50] sm:$0xf]  ;;  %v8321_v12 = vld [vmem:[%s13666_s2 + $0x54] sm:$0xf] }
 0x214   :  { %8666 = vpow2.f32 %v6805_v50  ;;  %2768 = vmatpush.bf16.msrb.mxu2 %v7011_v60  ;;  %v6876_v31 = vld [vmem:[%s13666_s2 + $0x70] sm:$0xf0] }
 0x215   :  { %8668 = vpow2.f32 %v6806_v45  ;;  %v1939_v49 = vpop.f32.mrf.mxu2  ;;  %v1952_v22 = vpop.f32.mrf.mxu3  ;;  %v6975_v45 = vor.u32 %v8345_v24, %v6972_v25  ;;  %v6879_v25 = vor.u32 %v8321_v12, %v6876_v31  ;;  %v2878_v12 = vld [vmem:[%s13664_s0 + $0xc] sm:$0x1]  ;;  %v2879_v31 = vld [vmem:[%s13664_s0 + $0x3] sm:$0x1] }
 0x216   :  { %v1959_v34 = vsel %vm20_vm5, %v10606_v15, %v1952_v22  ;;  %v1915_v3 = vpop.f32.mrf.mxu0  ;;  %v1928_v56 = vpop.f32.mrf.mxu1  ;;  %2779 = vmatpush.bf16.msrb.mxu3 %v7079_v11  ;;  %v7002_v15 = vld [vmem:[%s13666_s2 + $0x150] sm:$0xf]  ;;  %v1958_v7 = vsel %vm20_vm5, %v10604_v14, %v1939_v49  ;;  %v6978_v14 = vld [vmem:[%s13666_s2 + $0x118] sm:$0xf]  ;;  %v6943_v22 = vor.u32 %v8337_v37, %v6940_v39  ;;  %v6844_v39 = vld [vmem:[%s13666_s2 + $0x30] sm:$0xf0] }
 0x217   :  { %v1963_v47 = vadd.f32 %v1959_v34, %v1466_v1  ;;  %v7003_v42 = vor.u32 %v8357_v36, %v7002_v15  ;;  %v1962_v50 = vadd.f32 %v1958_v7, %v1465_v26  ;;  %v6979_v32 = vor.u32 %v8350_v40, %v6978_v14  ;;  %2756 = vmatpush.bf16.msrb.mxu1 %v6975_v45  ;;  %v6946_v1 = vld [vmem:[%s13666_s2 + $0xd8] sm:$0xf]  ;;  %v6948_v34 = vld [vmem:[%s13666_s2 + $0xf8] sm:$0xf0]  ;;  %v6906_v3 = vld [vmem:[%s13666_s2 + $0x90] sm:$0xf] }
 0x218   :  { %v6947_v63 = vor.u32 %v8342_v2, %v6946_v1  ;;  %v8333_v56 = vld [vmem:[%s13666_s2 + $0xac] sm:$0xf0]  ;;  %v6951_v52 = vor.u32 %v8338_v29, %v6948_v34  ;;  %v6882_v26 = vld [vmem:[%s13666_s2 + $0x58] sm:$0xf]  ;;  %v8314_v34 = vld [vmem:[%s13666_s2 + $0x1c] sm:$0xf] }
 0x219   :  { %v6807_v54 = vmul.f32 -1.442695, %v1963_v47  ;;  %2742 = vmatpush.bf16.msrb.mxu0 %v7003_v42  ;;  %2769 = vmatpush.bf16.msrb.mxu2 %v6979_v32  ;;  %v6908_v47 = vld [vmem:[%s13666_s2 + $0xb0] sm:$0xf0]  ;;  %v8334_v42 = vld [vmem:[%s13666_s2 + $0xb4] sm:$0xf0]  ;;  %v6907_v41 = vor.u32 %v8333_v56, %v6906_v3 }
 0x21a   :  { %v8667_v59 = vpop.eup %8666  ;;  %2780 = vmatpush.bf16.msrb.mxu3 %v7047_v28  ;;  %v6915_v61 = vor.u32 %v8334_v42, %v6914_v51  ;;  %v6850_v1 = vld [vmem:[%s13666_s2 + $0x18] sm:$0xf]  ;;  %v2926_v45 = vld [vmem:[%s13665_s1 + $0x108] sm:$0x7f] }
 0x21b   :  { %v8669_v0 = vpop.eup %8668  ;;  %v10777_v9 = vadd.f32 1.0, %v8667_v59  ;;  %8670 = vpow2.f32 %v6807_v54  ;;  %2757 = vmatpush.bf16.msrb.mxu1 %v6943_v22  ;;  %v6911_v54 = vor.u32 %v8329_v17, %v6908_v47  ;;  %v6852_v17 = vld [vmem:[%s13666_s2 + $0x38] sm:$0xf0]  ;;  %v10981_v59 = vld [vmem:[%s13665_s1 + $0x40] sm:$0xff] }
 0x21c   :  { %v10785_v13 = vadd.f32 1.0, %v8669_v0  ;;  %v8325_v0 = vld [vmem:[%s13666_s2 + $0x6c] sm:$0xf0]  ;;  %v6855_v51 = vor.u32 %v8314_v34, %v6852_v17  ;;  %v11172_v17 = vld [vmem:[%s13665_s1 + $0xb8] sm:$0xff] }
 0x21d   :  { %8672 = vrcp.f32 %v10777_v9  ;;  %v1941_v33 = vpop.f32.mrf.mxu2  ;;  %v1954_v35 = vpop.f32.mrf.mxu3  ;;  %v1977_v21 = vand.u32 2147483647, %v10777_v9  ;;  %2743 = vmatpush.bf16.msrb.mxu0 %v6971_v27  ;;  %v1979_v36 = vand.u32 2147483648, %v10777_v9  ;;  %2770 = vmatpush.bf16.msrb.mxu2 %v6947_v63  ;;  %vm1973_vm12 = vweird.f32 %v10777_v9  ;;  %v8318_v63 = vld [vmem:[%s13666_s2 + $0x34] sm:$0xf0] }
 0x21e   :  { %8674 = vrcp.f32 %v10785_v13  ;;  %2781 = vmatpush.bf16.msrb.mxu3 %v7015_v30  ;;  %v1998_v15 = vand.u32 2147483648, %v10785_v13  ;;  %v1996_v20 = vand.u32 2147483647, %v10785_v13  ;;  %v6919_v30 = vor.u32 %v8330_v55, %v6916_v58  ;;  %v8326_v33 = vld [vmem:[%s13666_s2 + $0x74] sm:$0xf0]  ;;  %v11152_v34 = vpop.f32.mrf.mxu0 }
 0x21f   :  { %8676 = vtanh.f32 %v1962_v50  ;;  %vm10874_vm11 = vcmp.eq.f32.partialorder %v1977_v21, 8.507059e+37  ;;  %2758 = vmatpush.bf16.msrb.mxu1 %v6911_v54  ;;  %v6875_v24 = vor.u32 %v8325_v0, %v6874_v62  ;;  %v8322_v35 = vld [vmem:[%s13666_s2 + $0x5c] sm:$0xf]  ;;  %v1980_v32 = vor.u32 1.1754944e-38, %v1979_v36  ;;  %v2925_v58 = vld [vmem:[%s13665_s1 + $0x100] sm:$0x7f] }
 0x220   :  { %v1999_v40 = vor.u32 1.1754944e-38, %v1998_v15  ;;  %v6883_v5 = vor.u32 %v8326_v33, %v6882_v26  ;;  %vm1992_vm15 = vweird.f32 %v10785_v13  ;;  %vm1997_vm7 = vcmp.eq.f32.partialorder %v1996_v20, 8.507059e+37  ;;  %v10999_v0 = vld [vmem:[%s13665_s1 + $0xe0] sm:$0xff] }
 0x221   :  { %v8671_v11 = vpop.eup %8670  ;;  %2744 = vmatpush.bf16.msrb.mxu0 %v6939_v18  ;;  %2771 = vmatpush.bf16.msrb.mxu2 %v6915_v61  ;;  %v6887_v18 = vor.u32 %v8322_v35, %v6884_v10  ;;  %v2888_v26 = vrot.slane %v2879_v31, 6  ;;  %v2877_v35 = vld [vmem:[%s13664_s0 + $0x4] sm:$0x1]  ;;  %v11056_v10 = vld [vmem:[%s13665_s1 + $0xd0] sm:$0xff]  ;;  %v7335_v31 = vld [vmem:[%s13666_s2 + $0x1e8] sm:$0xf0] }
 0x222   :  { %v10826_v49 = vadd.f32 1.0, %v8671_v11  ;;  %2782 = vmatpush.bf16.msrb.mxu3 %v6983_v53 }
 0x223   :  { %v10834_v46 = vpop.eup %8672  ;;  %2759 = vmatpush.bf16.msrb.mxu1 %v6879_v25  ;;  %v2883_v25 = vrot.slane %v2878_v12, 7  ;;  %v8432_v12 = vld [vmem:[%s13666_s2 + $0x1cc] sm:$0xf] }
 0x224   :  { %v10845_v16 = vpop.eup %8674  ;;  %v1969_v57 = vmul.f32 %v10834_v46, %v10777_v9  ;;  %8678 = vrcp.f32 %v10826_v49  ;;  %vm1974_vm10 = vweird.f32 %v10834_v46  ;;  %v6842_v9 = vld [vmem:[%s13666_s2 + $0x10] sm:$0xf]  ;;  %v2018_v36 = vand.u32 2147483648, %v10826_v49 }
 0x225   :  { %v1988_v28 = vmul.f32 %v10845_v16, %v10785_v13  ;;  %2745 = vmatpush.bf16.msrb.mxu0 %v6907_v41  ;;  %v8677_v7 = vpop.eup %8676  ;;  %vm1993_vm13 = vweird.f32 %v10845_v16  ;;  %vm10908_vm14 = vmor %vm1973_vm12, %vm1974_vm10  ;;  %v6843_v37 = vor.u32 %v8317_v48, %v6842_v9  ;;  %2772 = vmatpush.bf16.msrb.mxu2 %v6883_v5  ;;  %vm2012_vm9 = vweird.f32 %v10826_v49  ;;  %v11051_v5 = vld [vmem:[%s13665_s1 + $0xc8] sm:$0xff]  ;;  %v11072_v9 = vld [vmem:[%s13665_s1 + $0x90] sm:$0xff] }
 0x226   :  { %v1970_v44 = vsub.f32 1.0, %v1969_v57  ;;  %2783 = vmatpush.bf16.msrb.mxu3 %v6951_v52  ;;  %vm10929_vm6 = vmor %vm1992_vm15, %vm1993_vm13  ;;  %v6851_v57 = vor.u32 %v8318_v63, %v6850_v1  ;;  %v2016_v20 = vand.u32 2147483647, %v10826_v49  ;;  %v2019_v42 = vor.u32 1.1754944e-38, %v2018_v36  ;;  %v11079_v48 = vld [vmem:[%s13665_s1 + $0x98] sm:$0xff]  ;;  %v11093_v13 = vld [vmem:[%s13665_s1 + $0x50] sm:$0xff] }
 0x227   :  { %v1989_v38 = vsub.f32 1.0, %v1988_v28  ;;  %v2930_v1 = vld [vmem:[%s13665_s1 + $0x128] sm:$0x7f]  ;;  %v11146_v63 = vld [vmem:[%s13665_s1 + $0xf8] sm:$0xff]  ;;  %v8435_v36 = vld [vmem:[%s13666_s2 + $0x1dc] sm:$0xf0] }
 0x228   :  { %v1971_v60 = vmul.f32 %v10834_v46, %v1970_v44 }
 0x229   :  { %v1990_v27 = vmul.f32 %v10845_v16, %v1989_v38  ;;  %2746 = vmatpush.bf16.msrb.mxu0 %v6875_v24  ;;  %2773 = vmatpush.bf16.msrb.mxu2 %v6851_v57  ;;  %v10975_v38 = vld [vmem:[%s13665_s1 + $0x80] sm:$0xff]  ;;  %v11167_v57 = vld [vmem:[%s13665_s1 + $0xb0] sm:$0xff] }
 0x22a   :  { %v8679_v14 = vpop.eup %8678  ;;  %v1972_v50 = vadd.f32 %v10834_v46, %v1971_v60  ;;  %2784 = vmatpush.bf16.msrb.mxu3 %v6919_v30  ;;  %v10987_v60 = vld [vmem:[%s13665_s1] sm:$0xff] }
 0x22b   :  { %v1991_v21 = vadd.f32 %v10845_v16, %v1990_v27  ;;  %v2008_v53 = vmul.f32 %v8679_v14, %v10826_v49  ;;  %vm2013_vm8 = vweird.f32 %v8679_v14  ;;  %v10969_v49 = vld [vmem:[%s13665_s1 + $0xc0] sm:$0xff] }
 0x22c   :  { %v1976_v11 = vsel %vm10908_vm14, %v10834_v46, %v1972_v50  ;;  %v6847_v46 = vor.u32 %v8313_v19, %v6844_v39  ;;  %vm2014_vm10 = vmor %vm2012_vm9, %vm2013_vm8  ;;  %v2929_v30 = vld [vmem:[%s13665_s1 + $0x120] sm:$0x7f]  ;;  %v11088_v19 = vld [vmem:[%s13665_s1 + $0x48] sm:$0xff] }
 0x22d   :  { %v1981_v22 = vsel %vm10874_vm11, %v1980_v32, %v1976_v11  ;;  %v1995_v2 = vsel %vm10929_vm6, %v10845_v16, %v1991_v21  ;;  %v2009_v29 = vsub.f32 1.0, %v2008_v53  ;;  %2747 = vmatpush.bf16.msrb.mxu0 %v6843_v37  ;;  %vm2017_vm11 = vcmp.eq.f32.partialorder %v2016_v20, 8.507059e+37  ;;  %v11014_v27 = vld [vmem:[%s13665_s1 + $0xa0] sm:$0xff]  ;;  %v2927_v32 = vld [vmem:[%s13665_s1 + $0x110] sm:$0x7f]  ;;  %v11061_v21 = vld [vmem:[%s13665_s1 + $0xd8] sm:$0xff] }
 0x22e   :  { %v2000_v3 = vsel %vm1997_vm7, %v1999_v40, %v1995_v2  ;;  %v2023_v56 = vmul.f32 %v8677_v7, %v1981_v22  ;;  %2785 = vmatpush.bf16.msrb.mxu3 %v6887_v18  ;;  %2760 = vmatpush.bf16.msrb.mxu1 %v6847_v46  ;;  %v2880_v7 = vld [vmem:[%s13664_s0 + $0xb] sm:$0x1]  ;;  %v11020_v24 = vld [vmem:[%s13665_s1 + $0x60] sm:$0xff]  ;;  %v11098_v11 = vld [vmem:[%s13665_s1 + $0x58] sm:$0xff] }
 0x22f   :  { %v2022_v16 = vmul.f32 %v2000_v3, %v10364_v43  ;;  %v2010_v47 = vmul.f32 %v8679_v14, %v2009_v29  ;;  %v2889_v33 = vrot.slane %v2880_v7, 5  ;;  %v11067_v53 = vld [vmem:[%s13665_s1 + $0x88] sm:$0xff]  ;;  %v11110_v37 = vld [vmem:[%s13665_s1 + $0x10] sm:$0xff]  ;;  %v11115_v39 = vld [vmem:[%s13665_s1 + $0x18] sm:$0xff]  ;;  %v11154_v3 = vpop.f32.mrf.mxu1  ;;  %v7338_v7 = vor.u32 %v8432_v12, %v7335_v31 }
 0x230   :  { %v11105_v18 = vld [vmem:[%s13665_s1 + $0x8] sm:$0xff]  ;;  %v2931_v22 = vld [vmem:[%s13665_s1 + $0x130] sm:$0x7f]  ;;  %v2932_v2 = vld [vmem:[%s13665_s1 + $0x138] sm:$0x7f] }
 0x231   :  { %v10957_v28 = vadd.f32 %v2023_v56, %v2022_v16  ;;  %v2011_v15 = vadd.f32 %v8679_v14, %v2010_v47  ;;  %v2890_v40 = vsel %vm37_vm2, %v2889_v33, %v2888_v26  ;;  %v11134_v29 = vld [vmem:[%s13665_s1 + $0xe8] sm:$0xff]  ;;  %v11139_v46 = vld [vmem:[%s13665_s1 + $0xf0] sm:$0xff]  ;;  %v8431_v20 = vld [vmem:[%s13666_s2 + $0x1c4] sm:$0xf] }
 0x232   :  { %2786 = vmatpush.bf16.msrb.mxu3 %v6855_v51  ;;  %v11162_v56 = vld [vmem:[%s13665_s1 + $0xa8] sm:$0xff]  ;;  %v11187_v47 = vld [vmem:[%s13665_s1 + $0x70] sm:$0xff]  ;;  %v11192_v51 = vld [vmem:[%s13665_s1 + $0x78] sm:$0xff] }
 0x233   :  { %8680 = vtanh.f32 %v10957_v28  ;;  %v2015_v43 = vsel %vm2014_vm10, %v8679_v14, %v2011_v15  ;;  %v2884_v14 = vsel %vm30_vm1, %v2883_v25, %v2877_v35  ;;  %v11182_v16 = vld [vmem:[%s13665_s1 + $0x68] sm:$0xff]  ;;  %v7325_v15 = vld [vmem:[%s13666_s2 + $0x1c0] sm:$0xf]  ;;  %v11247_v25 = vpop.f32.mrf.mxu0 }
 0x234   :  { %v2020_v52 = vsel %vm2017_vm11, %v2019_v42, %v2015_v43  ;;  %v11031_v50 = vsel %vm40_vm3, %v2884_v14, %v2890_v40  ;;  %v11209_v43 = vld [vmem:[%s13665_s1 + $0x28] sm:$0xff]  ;;  %v11214_v42 = vld [vmem:[%s13665_s1 + $0x30] sm:$0xff]  ;;  %v7293_v33 = vld [vmem:[%s13666_s2 + $0x180] sm:$0xf] }
 0x235   :  { %v8427_v35 = vld [vmem:[%s13666_s2 + $0x19c] sm:$0xf0]  ;;  %v8423_v14 = vld [vmem:[%s13666_s2 + $0x184] sm:$0xf]  ;;  %v8416_v31 = vld [vmem:[%s13666_s2 + $0x14c] sm:$0xf] }
 0x236   :  { %v7294_v40 = vor.u32 %v8427_v35, %v7293_v33 }
 0x237   :  { %v11249_v26 = vpop.f32.mrf.mxu1 }
 0x239   :  { %v8681_v44 = vpop.eup %8680 }
 0x23a   :  { %v2026_v41 = vmul.f32 %v8681_v44, %v2020_v52  ;;  %v11219_v44 = vld [vmem:[%s13665_s1 + $0x38] sm:$0xff]  ;;  %v7326_v52 = vor.u32 %v8435_v36, %v7325_v15  ;;  %v7303_v15 = vld [vmem:[%s13666_s2 + $0x1a8] sm:$0xf0] }
 0x23c   :  { %v2028_v54 = vrot.slane %v2026_v41, 1  ;;  %2030 = vst [vmem:[#allocation2 + $0x2] sm:$0x1] %v2026_v41  ;;  %v2303_v55 = vpack.c.bf16 %v2026_v41, %v2026_v41 }
 0x23d   :  { %2032 = vst [vmem:[#allocation1] sm:$0xff] %v2026_v41  ;;  %v11221_v41 = vpop.f32.mrf.mxu3 }
 0x23e   :  { %2031 = vst [vmem:[#allocation2 + $0x12] sm:$0x1] %v2028_v54  ;;  %2696 = vmatmul.bf16.vlgmr.msra.gmra.mxu0 %v2303_v55  ;;  %2709 = vmatmul.bf16.vlgmr.msra.gmra.mxu1 %v2303_v55  ;;  %v11223_v54 = vpop.f32.mrf.mxu2 }
 0x23f   :  { %2722 = vmatmul.bf16.vlgmr.msra.gmra.mxu2 %v2303_v55  ;;  %2735 = vmatmul.bf16.vlgmr.msra.gmra.mxu3 %v2303_v55 }
 0x240   :  { %7083 = vmatpush.msk.msra.mxu0 %vm86_vm0, %v2925_v58  ;;  %7085 = vmatpush.msk.msra.mxu1 %vm86_vm0, %v2926_v45  ;;  %v7333_v58 = vld [vmem:[%s13666_s2 + $0x1c8] sm:$0xf]  ;;  %v7295_v45 = vld [vmem:[%s13666_s2 + $0x1a0] sm:$0xf0] }
 0x241   :  { %7087 = vmatpush.msk.msra.mxu2 %vm86_vm0, %v2927_v32  ;;  %v7301_v32 = vld [vmem:[%s13666_s2 + $0x188] sm:$0xf] }
 0x242   :  { %2972 = vmatpush.msra.mxu0 %v10969_v49  ;;  %2992 = vmatpush.msra.mxu1 %v11051_v5 }
 0x243   :  { %3012 = vmatpush.msra.mxu2 %v11056_v10 }
 0x244   :  { %v2034_v61 = vld [vmem:[#allocation1 + $0x2] ss:$9 sm:$0xff]  ;;  %2973 = vmatpush.msra.mxu0 %v10975_v38  ;;  %2993 = vmatpush.msra.mxu1 %v11067_v53 }
 0x245   :  { %v2036_v62 = vld [vmem:[#allocation1 + $0x3] ss:$9 sm:$0xff]  ;;  %2039 = vst [vmem:[#allocation2 + $0xd] sm:$0x1] %v2034_v61  ;;  %3013 = vmatpush.msra.mxu2 %v11072_v9  ;;  %v8436_v61 = vld [vmem:[%s13666_s2 + $0x1e4] sm:$0xf0]  ;;  %v11301_v33 = vpop.f32.mrf.mxu3 }
 0x246   :  { %2040 = vst [vmem:[#allocation2 + $0x1d] sm:$0x1] %v2036_v62  ;;  %2974 = vmatpush.msra.mxu0 %v10981_v59  ;;  %2994 = vmatpush.msra.mxu1 %v11088_v19  ;;  %v11303_v35 = vpop.f32.mrf.mxu2 }
 0x247   :  { %2288 = vst [vmem:[#allocation1] ss:$2 sm:$0xff] %v9142_v4  ;;  %3014 = vmatpush.msra.mxu2 %v11093_v13 }
 0x248   :  { %2290 = vst [vmem:[#allocation1 + $0x10] ss:$2 sm:$0xff] %v9163_v8  ;;  %2975 = vmatpush.msra.mxu0 %v10987_v60  ;;  %2995 = vmatpush.msra.mxu1 %v11105_v18 }
 0x249   :  { %3015 = vmatpush.msra.mxu2 %v11110_v37 }
 0x24e   :  { %2748 = vmatmul.bf16.vlgmr.msrb.gmra.mxu0 %v2303_v55  ;;  %2761 = vmatmul.bf16.vlgmr.msrb.gmra.mxu1 %v2303_v55 }
 0x24f   :  { %2774 = vmatmul.bf16.vlgmr.msrb.gmra.mxu2 %v2303_v55  ;;  %2787 = vmatmul.bf16.vlgmr.msrb.gmra.mxu3 %v2303_v55  ;;  %v7327_v55 = vld [vmem:[%s13666_s2 + $0x1e0] sm:$0xf0] }
 0x250   :  { %7091 = vmatpush.msk.msrb.mxu0 %vm86_vm0, %v2929_v30  ;;  %7093 = vmatpush.msk.msrb.mxu1 %vm86_vm0, %v2930_v1  ;;  %v7330_v62 = vor.u32 %v8431_v20, %v7327_v55  ;;  %v7334_v30 = vor.u32 %v8436_v61, %v7333_v58  ;;  %v7298_v1 = vor.u32 %v8423_v14, %v7295_v45  ;;  %v7261_v20 = vld [vmem:[%s13666_s2 + $0x140] sm:$0xf]  ;;  %v7263_v58 = vld [vmem:[%s13666_s2 + $0x160] sm:$0xf0]  ;;  %v7269_v61 = vld [vmem:[%s13666_s2 + $0x148] sm:$0xf] }
 0x251   :  { %7095 = vmatpush.msk.msrb.mxu2 %vm86_vm0, %v2931_v22 }
 0x252   :  { %3052 = vmatpush.msrb.mxu0 %v10999_v0  ;;  %3072 = vmatpush.msrb.mxu1 %v11134_v29 }
 0x253   :  { %3092 = vmatpush.msrb.mxu2 %v11139_v46 }
 0x254   :  { %3053 = vmatpush.msrb.mxu0 %v11014_v27  ;;  %3073 = vmatpush.msrb.mxu1 %v11162_v56 }
 0x255   :  { %3093 = vmatpush.msrb.mxu2 %v11167_v57 }
 0x256   :  { %3054 = vmatpush.msrb.mxu0 %v11020_v24  ;;  %3074 = vmatpush.msrb.mxu1 %v11182_v16 }
 0x257   :  { %3094 = vmatpush.msrb.mxu2 %v11187_v47 }
 0x258   :  { %3055 = vmatpush.msrb.mxu0 %v10401_v23  ;;  %v2928_v23 = vld [vmem:[%s13665_s1 + $0x118] sm:$0x7f]  ;;  %3075 = vmatpush.msrb.mxu1 %v11209_v43 }
 0x259   :  { %7089 = vmatpush.msk.msra.mxu3 %vm86_vm0, %v2928_v23  ;;  %3095 = vmatpush.msrb.mxu2 %v11214_v42  ;;  %v8428_v23 = vld [vmem:[%s13666_s2 + $0x1a4] sm:$0xf0] }
 0x25a   :  { %v7302_v22 = vor.u32 %v8428_v23, %v7301_v32  ;;  %v7229_v32 = vld [vmem:[%s13666_s2 + $0x100] sm:$0xf] }
 0x25b   :  { %3032 = vmatpush.msra.mxu3 %v11061_v21  ;;  %v8411_v23 = vld [vmem:[%s13666_s2 + $0x11c] sm:$0xf0] }
 0x25d   :  { %3033 = vmatpush.msra.mxu3 %v11079_v48 }
 0x25e   :  { %7084 = vmatmul.msk.f32.vlgmr.msra.gmra.mxu0 %vm82_vm4, %v11031_v50  ;;  %7086 = vmatmul.msk.f32.vlgmr.msra.gmra.mxu1 %vm82_vm4, %v11031_v50 }
 0x25f   :  { %3034 = vmatpush.msra.mxu3 %v11098_v11  ;;  %7088 = vmatmul.msk.f32.vlgmr.msra.gmra.mxu2 %vm82_vm4, %v11031_v50 }
 0x260   :  { %3524 = vmatpush.bf16.msra.mxu0 %v7326_v52  ;;  %3537 = vmatpush.bf16.msra.mxu1 %v7330_v62  ;;  %v8415_v52 = vld [vmem:[%s13666_s2 + $0x144] sm:$0xf]  ;;  %v8420_v62 = vld [vmem:[%s13666_s2 + $0x164] sm:$0xf0] }
 0x261   :  { %3035 = vmatpush.msra.mxu3 %v11115_v39  ;;  %3550 = vmatpush.bf16.msra.mxu2 %v7334_v30  ;;  %v7266_v30 = vor.u32 %v8415_v52, %v7263_v58  ;;  %v7270_v12 = vor.u32 %v8420_v62, %v7269_v61  ;;  %v8408_v52 = vld [vmem:[%s13666_s2 + $0x10c] sm:$0xf]  ;;  %v7197_v61 = vld [vmem:[%s13666_s2 + $0xc0] sm:$0xf] }
 0x262   :  { %7090 = vmatmul.msk.f32.vlgmr.msra.gmra.mxu3 %vm82_vm4, %v11031_v50  ;;  %v8403_v62 = vld [vmem:[%s13666_s2 + $0xdc] sm:$0xf0] }
 0x263   :  { %7097 = vmatpush.msk.msrb.mxu3 %vm86_vm0, %v2932_v2  ;;  %v8424_v2 = vld [vmem:[%s13666_s2 + $0x18c] sm:$0xf] }
 0x264   :  { %3525 = vmatpush.bf16.msra.mxu0 %v7294_v40  ;;  %v7306_v36 = vor.u32 %v8424_v2, %v7303_v15  ;;  %3538 = vmatpush.bf16.msra.mxu1 %v7298_v1  ;;  %v8407_v1 = vld [vmem:[%s13666_s2 + $0x104] sm:$0xf]  ;;  %v7237_v15 = vld [vmem:[%s13666_s2 + $0x108] sm:$0xf] }
 0x265   :  { %3112 = vmatpush.msrb.mxu3 %v11146_v63  ;;  %3551 = vmatpush.bf16.msra.mxu2 %v7302_v22  ;;  %v7230_v22 = vor.u32 %v8411_v23, %v7229_v32  ;;  %v7231_v2 = vld [vmem:[%s13666_s2 + $0x120] sm:$0xf0] }
 0x266   :  { %7092 = vmatmul.msk.f32.vlgmr.msrb.gmra.mxu0 %vm82_vm4, %v11031_v50  ;;  %7094 = vmatmul.msk.f32.vlgmr.msrb.gmra.mxu1 %vm82_vm4, %v11031_v50 }
 0x267   :  { %3113 = vmatpush.msrb.mxu3 %v11172_v17  ;;  %7096 = vmatmul.msk.f32.vlgmr.msrb.gmra.mxu2 %vm82_vm4, %v11031_v50 }
 0x268   :  { %3539 = vmatpush.bf16.msra.mxu1 %v7266_v30  ;;  %v8399_v30 = vld [vmem:[%s13666_s2 + $0xc4] sm:$0xf] }
 0x269   :  { %3114 = vmatpush.msrb.mxu3 %v11192_v51  ;;  %3552 = vmatpush.bf16.msra.mxu2 %v7270_v12  ;;  %v7198_v12 = vor.u32 %v8403_v62, %v7197_v61  ;;  %v7167_v62 = vld [vmem:[%s13666_s2 + $0xa0] sm:$0xf0] }
 0x26b   :  { %3115 = vmatpush.msrb.mxu3 %v11219_v44 }
 0x26c   :  { %7098 = vmatmul.msk.f32.vlgmr.msrb.gmra.mxu3 %vm82_vm4, %v11031_v50  ;;  %v8419_v50 = vld [vmem:[%s13666_s2 + $0x15c] sm:$0xf0] }
 0x26d   :  { %3563 = vmatpush.bf16.msra.mxu3 %v7338_v7  ;;  %v7262_v55 = vor.u32 %v8419_v50, %v7261_v20  ;;  %v7271_v7 = vld [vmem:[%s13666_s2 + $0x168] sm:$0xf0]  ;;  %v7234_v20 = vor.u32 %v8407_v1, %v7231_v2 }
 0x26e   :  { %v7274_v14 = vor.u32 %v8416_v31, %v7271_v7  ;;  %v7199_v31 = vld [vmem:[%s13666_s2 + $0xe0] sm:$0xf0]  ;;  %v7205_v7 = vld [vmem:[%s13666_s2 + $0xc8] sm:$0xf]  ;;  %v8400_v1 = vld [vmem:[%s13666_s2 + $0xcc] sm:$0xf] }
 0x26f   :  { %3526 = vmatpush.bf16.msra.mxu0 %v7262_v55  ;;  %v7239_v55 = vld [vmem:[%s13666_s2 + $0x128] sm:$0xf0]  ;;  %3540 = vmatpush.bf16.msra.mxu1 %v7234_v20  ;;  %v7202_v32 = vor.u32 %v8399_v30, %v7199_v31  ;;  %v7173_v30 = vld [vmem:[%s13666_s2 + $0x88] sm:$0xf] }
 0x270   :  { %v7242_v58 = vor.u32 %v8408_v52, %v7239_v55  ;;  %v7165_v52 = vld [vmem:[%s13666_s2 + $0x80] sm:$0xf] }
 0x271   :  { %3564 = vmatpush.bf16.msra.mxu3 %v7306_v36  ;;  %v8412_v36 = vld [vmem:[%s13666_s2 + $0x124] sm:$0xf0]  ;;  %v8395_v55 = vld [vmem:[%s13666_s2 + $0x9c] sm:$0xf0] }
 0x272   :  { %v7238_v50 = vor.u32 %v8412_v36, %v7237_v15  ;;  %v7166_v61 = vor.u32 %v8395_v55, %v7165_v52  ;;  %v2284_v52 = vsel %vm20_vm5, %v11152_v34, %v11247_v25  ;;  %v2285_v55 = vsel %vm20_vm5, %v11154_v3, %v11249_v26  ;;  %v8384_v3 = vld [vmem:[%s13666_s2 + $0x4c] sm:$0xf] }
 0x273   :  { %3527 = vmatpush.bf16.msra.mxu0 %v7230_v22  ;;  %v7207_v22 = vld [vmem:[%s13666_s2 + $0xe8] sm:$0xf0]  ;;  %3541 = vmatpush.bf16.msra.mxu1 %v7202_v32 }
 0x274   :  { %3553 = vmatpush.bf16.msra.mxu2 %v7238_v50  ;;  %v7210_v36 = vor.u32 %v8400_v1, %v7207_v22  ;;  %v7175_v32 = vld [vmem:[%s13666_s2 + $0xa8] sm:$0xf0] }
 0x275   :  { %3565 = vmatpush.bf16.msra.mxu3 %v7274_v14  ;;  %v8404_v14 = vld [vmem:[%s13666_s2 + $0xe4] sm:$0xf0]  ;;  %v7143_v26 = vld [vmem:[%s13666_s2 + $0x68] sm:$0xf0] }
 0x276   :  { %v7206_v23 = vor.u32 %v8404_v14, %v7205_v7  ;;  %v8392_v14 = vld [vmem:[%s13666_s2 + $0x8c] sm:$0xf] }
 0x277   :  { %3528 = vmatpush.bf16.msra.mxu0 %v7198_v12  ;;  %v8396_v12 = vld [vmem:[%s13666_s2 + $0xa4] sm:$0xf0]  ;;  %v7178_v22 = vor.u32 %v8392_v14, %v7175_v32 }
 0x278   :  { %3554 = vmatpush.bf16.msra.mxu2 %v7206_v23  ;;  %v7174_v7 = vor.u32 %v8396_v12, %v7173_v30  ;;  %v2291_v23 = vld.sshfl [vmem:[#allocation1] sm:$0xff pattern:$0x75316420]  ;;  %v2292_v1 = vld.sshfl [vmem:[#allocation1 + $0x8] sm:$0xff pattern:$0x75316420] }
 0x279   :  { %3566 = vmatpush.bf16.msra.mxu3 %v7242_v58  ;;  %v8391_v58 = vld [vmem:[%s13666_s2 + $0x84] sm:$0xf]  ;;  %v8388_v30 = vld [vmem:[%s13666_s2 + $0x64] sm:$0xf0]  ;;  %v2299_v14 = vadd.f32 %v2291_v23, %v2284_v52  ;;  %v2300_v32 = vadd.f32 %v2292_v1, %v2285_v55 }
 0x27a   :  { %v7170_v31 = vor.u32 %v8391_v58, %v7167_v62  ;;  %v7141_v62 = vld [vmem:[%s13666_s2 + $0x48] sm:$0xf]  ;;  %v7103_v55 = vld [vmem:[%s13666_s2 + $0x20] sm:$0xf0] }
 0x27b   :  { %3529 = vmatpush.bf16.msra.mxu0 %v7166_v61  ;;  %v7135_v61 = vld [vmem:[%s13666_s2 + $0x60] sm:$0xf0]  ;;  %v7142_v25 = vor.u32 %v8388_v30, %v7141_v62  ;;  %v8380_v62 = vld [vmem:[%s13666_s2 + $0x24] sm:$0xf0] }
 0x27c   :  { %3542 = vmatpush.bf16.msra.mxu1 %v7170_v31  ;;  %3555 = vmatpush.bf16.msra.mxu2 %v7174_v7  ;;  %v7146_v7 = vor.u32 %v8384_v3, %v7143_v26  ;;  %v2294_v30 = vld.sshfl [vmem:[#allocation1 + $0x18] sm:$0xff pattern:$0x75316420]  ;;  %v7111_v26 = vld [vmem:[%s13666_s2 + $0x28] sm:$0xf0] }
 0x27d   :  { %3567 = vmatpush.bf16.msra.mxu3 %v7210_v36  ;;  %v7133_v36 = vld [vmem:[%s13666_s2 + $0x40] sm:$0xf] }
 0x280   :  { %3556 = vmatpush.bf16.msra.mxu2 %v7142_v25 }
 0x281   :  { %3568 = vmatpush.bf16.msra.mxu3 %v7178_v22 }
 0x285   :  { %3569 = vmatpush.bf16.msra.mxu3 %v7146_v7 }
 0x2bb   :  { %v11305_v40 = vpop.f32.mrf.mxu0  ;;  %v11307_v45 = vpop.f32.mrf.mxu1 }
 0x2c2   :  { %v11357_v2 = vpop.f32.mrf.mxu2  ;;  %v11359_v15 = vpop.f32.mrf.mxu3 }
 0x2c3   :  { %v2699_v20 = vpop.f32.mrf.mxu0  ;;  %v2712_v50 = vpop.f32.mrf.mxu1 }
 0x2c4   :  { %v8387_v20 = vld [vmem:[%s13666_s2 + $0x5c] sm:$0xf0]  ;;  %v8383_v50 = vld [vmem:[%s13666_s2 + $0x44] sm:$0xf] }
 0x2c5   :  { %v7134_v58 = vor.u32 %v8387_v20, %v7133_v36  ;;  %v7138_v34 = vor.u32 %v8383_v50, %v7135_v61  ;;  %v7101_v20 = vld [vmem:[%s13666_s2] sm:$0xf]  ;;  %v8375_v61 = vld [vmem:[%s13666_s2 + $0x4] sm:$0xf] }
 0x2c6   :  { %v8379_v50 = vld [vmem:[%s13666_s2 + $0x1c] sm:$0xf0]  ;;  %v7106_v25 = vor.u32 %v8375_v61, %v7103_v55  ;;  %v8438_v61 = vld [vmem:[%s13666_s2 + $0x1f4] sm:$0xf0] }
 0x2c7   :  { %3530 = vmatpush.bf16.msra.mxu0 %v7134_v58  ;;  %3543 = vmatpush.bf16.msra.mxu1 %v7138_v34  ;;  %v7102_v52 = vor.u32 %v8379_v50, %v7101_v20  ;;  %v7109_v58 = vld [vmem:[%s13666_s2 + $0x8] sm:$0xf] }
 0x2c8   :  { %v7110_v3 = vor.u32 %v8380_v62, %v7109_v58  ;;  %v7309_v58 = vld [vmem:[%s13666_s2 + $0x190] sm:$0xf] }
 0x2c9   :  { %v8429_v62 = vld [vmem:[%s13666_s2 + $0x1ac] sm:$0xf0] }
 0x2ca   :  { %v2725_v12 = vpop.f32.mrf.mxu2  ;;  %v2738_v31 = vpop.f32.mrf.mxu3  ;;  %3557 = vmatpush.bf16.msra.mxu2 %v7110_v3 }
 0x2cb   :  { %v2749_v22 = vpop.f32.mrf.mxu0  ;;  %v2762_v36 = vpop.f32.mrf.mxu1  ;;  %v7341_v12 = vld [vmem:[%s13666_s2 + $0x1d0] sm:$0xf]  ;;  %v2287_v31 = vsel %vm20_vm5, %v11221_v41, %v11301_v33  ;;  %3531 = vmatpush.bf16.msra.mxu0 %v7102_v52  ;;  %3544 = vmatpush.bf16.msra.mxu1 %v7106_v25  ;;  %v7349_v33 = vld [vmem:[%s13666_s2 + $0x1d8] sm:$0xf] }
 0x2cc   :  { %v2792_v23 = vsel %vm20_vm5, %v11305_v40, %v2749_v22  ;;  %v2793_v1 = vsel %vm20_vm5, %v11307_v45, %v2762_v36  ;;  %v8376_v45 = vld [vmem:[%s13666_s2 + $0xc] sm:$0xf]  ;;  %v7343_v22 = vld [vmem:[%s13666_s2 + $0x1f0] sm:$0xf0]  ;;  %v7350_v52 = vor.u32 %v8438_v61, %v7349_v33  ;;  %v8421_v33 = vld [vmem:[%s13666_s2 + $0x16c] sm:$0xf0] }
 0x2cd   :  { %v2796_v40 = vadd.f32 %v2792_v23, %v2299_v14  ;;  %v2797_v34 = vadd.f32 %v2793_v1, %v2300_v32  ;;  %v7114_v7 = vor.u32 %v8376_v45, %v7111_v26  ;;  %v8437_v14 = vld [vmem:[%s13666_s2 + $0x1ec] sm:$0xf0]  ;;  %v8433_v32 = vld [vmem:[%s13666_s2 + $0x1d4] sm:$0xf]  ;;  %v8434_v23 = vld [vmem:[%s13666_s2 + $0x1dc] sm:$0xf]  ;;  %v7310_v45 = vor.u32 %v8429_v62, %v7309_v58 }
 0x2ce   :  { %v7342_v50 = vor.u32 %v8437_v14, %v7341_v12  ;;  %v7346_v41 = vor.u32 %v8433_v32, %v7343_v22  ;;  %v7351_v1 = vld [vmem:[%s13666_s2 + $0x1f8] sm:$0xf0]  ;;  %v7311_v26 = vld [vmem:[%s13666_s2 + $0x1b0] sm:$0xf0]  ;;  %v7317_v12 = vld [vmem:[%s13666_s2 + $0x198] sm:$0xf]  ;;  %3602 = vmatpush.bf16.msrb.mxu2 %v7350_v52 }
 0x2cf   :  { %v7080_v36 = vmul.f32 -1.442695, %v2796_v40  ;;  %v7081_v20 = vmul.f32 -1.442695, %v2797_v34  ;;  %3570 = vmatpush.bf16.msra.mxu3 %v7114_v7  ;;  %v7354_v55 = vor.u32 %v8434_v23, %v7351_v1  ;;  %v8425_v40 = vld [vmem:[%s13666_s2 + $0x194] sm:$0xf]  ;;  %v2302_v34 = vadd.f32 %v2294_v30, %v2287_v31 }
 0x2d0   :  { %3576 = vmatpush.bf16.msrb.mxu0 %v7342_v50  ;;  %3589 = vmatpush.bf16.msrb.mxu1 %v7346_v41  ;;  %v8430_v7 = vld [vmem:[%s13666_s2 + $0x1b4] sm:$0xf0]  ;;  %v7314_v32 = vor.u32 %v8425_v40, %v7311_v26  ;;  %v8426_v22 = vld [vmem:[%s13666_s2 + $0x19c] sm:$0xf]  ;;  %v8417_v61 = vld [vmem:[%s13666_s2 + $0x154] sm:$0xf] }
 0x2d1   :  { %8682 = vpow2.f32 %v7080_v36  ;;  %v7319_v36 = vld [vmem:[%s13666_s2 + $0x1b8] sm:$0xf0]  ;;  %v7318_v50 = vor.u32 %v8430_v7, %v7317_v12  ;;  %v7279_v1 = vld [vmem:[%s13666_s2 + $0x170] sm:$0xf0]  ;;  %v7285_v52 = vld [vmem:[%s13666_s2 + $0x158] sm:$0xf] }
 0x2d2   :  { %8684 = vpow2.f32 %v7081_v20  ;;  %v2775_v25 = vpop.f32.mrf.mxu2  ;;  %v2788_v3 = vpop.f32.mrf.mxu3  ;;  %v7322_v41 = vor.u32 %v8426_v22, %v7319_v36  ;;  %v7282_v62 = vor.u32 %v8417_v61, %v7279_v1  ;;  %v8418_v40 = vld [vmem:[%s13666_s2 + $0x15c] sm:$0xf]  ;;  %v2293_v26 = vld.sshfl [vmem:[#allocation1 + $0x10] sm:$0xff pattern:$0x75316420] }
 0x2d3   :  { %v2795_v30 = vsel %vm20_vm5, %v11359_v15, %v2788_v3  ;;  %v2751_v31 = vpop.f32.mrf.mxu0  ;;  %v2764_v14 = vpop.f32.mrf.mxu1  ;;  %3615 = vmatpush.bf16.msrb.mxu3 %v7354_v55  ;;  %v7277_v15 = vld [vmem:[%s13666_s2 + $0x150] sm:$0xf]  ;;  %v8422_v55 = vld [vmem:[%s13666_s2 + $0x174] sm:$0xf0]  ;;  %3603 = vmatpush.bf16.msrb.mxu2 %v7318_v50  ;;  %v8409_v36 = vld [vmem:[%s13666_s2 + $0x114] sm:$0xf] }
 0x2d4   :  { %v2799_v20 = vadd.f32 %v2795_v30, %v2302_v34  ;;  %3577 = vmatpush.bf16.msrb.mxu0 %v7310_v45  ;;  %3590 = vmatpush.bf16.msrb.mxu1 %v7314_v32  ;;  %v7278_v23 = vor.u32 %v8421_v33, %v7277_v15  ;;  %v7287_v34 = vld [vmem:[%s13666_s2 + $0x178] sm:$0xf0]  ;;  %v2286_v45 = vsel %vm20_vm5, %v11223_v54, %v11303_v35  ;;  %v7245_v14 = vld [vmem:[%s13666_s2 + $0x110] sm:$0xf] }
 0x2d5   :  { %v7286_v12 = vor.u32 %v8422_v55, %v7285_v52  ;;  %v7290_v7 = vor.u32 %v8418_v40, %v7287_v34  ;;  %v8413_v32 = vld [vmem:[%s13666_s2 + $0x12c] sm:$0xf0]  ;;  %v2794_v54 = vsel %vm20_vm5, %v11357_v2, %v2775_v25  ;;  %v2301_v50 = vadd.f32 %v2293_v26, %v2286_v45  ;;  %v7253_v2 = vld [vmem:[%s13666_s2 + $0x118] sm:$0xf]  ;;  %v8410_v1 = vld [vmem:[%s13666_s2 + $0x11c] sm:$0xf] }
 0x2d6   :  { %v7082_v58 = vmul.f32 -1.442695, %v2799_v20  ;;  %v7246_v35 = vor.u32 %v8413_v32, %v7245_v14  ;;  %v7247_v20 = vld [vmem:[%s13666_s2 + $0x130] sm:$0xf0]  ;;  %v8414_v25 = vld [vmem:[%s13666_s2 + $0x134] sm:$0xf0] }
 0x2d7   :  { %v8683_v3 = vpop.eup %8682  ;;  %3616 = vmatpush.bf16.msrb.mxu3 %v7322_v41  ;;  %3604 = vmatpush.bf16.msrb.mxu2 %v7286_v12  ;;  %v2798_v33 = vadd.f32 %v2794_v54, %v2301_v50  ;;  %v7250_v61 = vor.u32 %v8409_v36, %v7247_v20  ;;  %v7255_v52 = vld [vmem:[%s13666_s2 + $0x138] sm:$0xf0]  ;;  %v8405_v40 = vld [vmem:[%s13666_s2 + $0xec] sm:$0xf0]  ;;  %v8401_v45 = vld [vmem:[%s13666_s2 + $0xd4] sm:$0xf] }
 0x2d8   :  { %v8685_v30 = vpop.eup %8684  ;;  %v11530_v31 = vadd.f32 1.0, %v8683_v3  ;;  %8686 = vpow2.f32 %v7082_v58  ;;  %3578 = vmatpush.bf16.msrb.mxu0 %v7278_v23  ;;  %3591 = vmatpush.bf16.msrb.mxu1 %v7282_v62  ;;  %v7254_v23 = vor.u32 %v8414_v25, %v7253_v2  ;;  %v7258_v58 = vor.u32 %v8410_v1, %v7255_v52  ;;  %v7213_v62 = vld [vmem:[%s13666_s2 + $0xd0] sm:$0xf]  ;;  %v7215_v26 = vld [vmem:[%s13666_s2 + $0xf0] sm:$0xf0] }
 0x2d9   :  { %v11538_v22 = vadd.f32 1.0, %v8685_v30  ;;  %v7214_v3 = vor.u32 %v8405_v40, %v7213_v62  ;;  %v7221_v12 = vld [vmem:[%s13666_s2 + $0xd8] sm:$0xf]  ;;  %v7218_v30 = vor.u32 %v8401_v45, %v7215_v26  ;;  %v8402_v32 = vld [vmem:[%s13666_s2 + $0xdc] sm:$0xf] }
 0x2da   :  { %8688 = vrcp.f32 %v11530_v31  ;;  %v2777_v41 = vpop.f32.mrf.mxu2  ;;  %v2790_v15 = vpop.f32.mrf.mxu3  ;;  %v2813_v55 = vand.u32 2147483647, %v11530_v31  ;;  %v8406_v14 = vld [vmem:[%s13666_s2 + $0xf4] sm:$0xf0]  ;;  %v7223_v36 = vld [vmem:[%s13666_s2 + $0xf8] sm:$0xf0]  ;;  %vm2809_vm14 = vweird.f32 %v11530_v31 }
 0x2db   :  { %8690 = vrcp.f32 %v11538_v22  ;;  %3617 = vmatpush.bf16.msrb.mxu3 %v7290_v7  ;;  %3605 = vmatpush.bf16.msrb.mxu2 %v7254_v23  ;;  %v7181_v20 = vld [vmem:[%s13666_s2 + $0x90] sm:$0xf]  ;;  %v8393_v2 = vld [vmem:[%s13666_s2 + $0x94] sm:$0xf]  ;;  %v2834_v23 = vand.u32 2147483648, %v11538_v22  ;;  %v2815_v1 = vand.u32 2147483648, %v11530_v31  ;;  %v7226_v40 = vor.u32 %v8402_v32, %v7223_v36 }
 0x2dc   :  { %3579 = vmatpush.bf16.msrb.mxu0 %v7246_v35  ;;  %3592 = vmatpush.bf16.msrb.mxu1 %v7250_v61  ;;  %8692 = vtanh.f32 %v2798_v33  ;;  %v7222_v35 = vor.u32 %v8406_v14, %v7221_v12  ;;  %v8397_v50 = vld [vmem:[%s13666_s2 + $0xac] sm:$0xf0]  ;;  %v7183_v25 = vld [vmem:[%s13666_s2 + $0xb0] sm:$0xf0]  ;;  %v7189_v33 = vld [vmem:[%s13666_s2 + $0x98] sm:$0xf]  ;;  %vm2828_vm7 = vweird.f32 %v11538_v22 }
 0x2dd   :  { %v2832_v52 = vand.u32 2147483647, %v11538_v22  ;;  %v8394_v45 = vld [vmem:[%s13666_s2 + $0x9c] sm:$0xf]  ;;  %vm11627_vm13 = vcmp.eq.f32.partialorder %v2813_v55, 8.507059e+37 }
 0x2de   :  { %v8687_v34 = vpop.eup %8686  ;;  %v7191_v26 = vld [vmem:[%s13666_s2 + $0xb8] sm:$0xf0]  ;;  %v7149_v32 = vld [vmem:[%s13666_s2 + $0x50] sm:$0xf]  ;;  %v8385_v55 = vld [vmem:[%s13666_s2 + $0x54] sm:$0xf] }
 0x2df   :  { %v11579_v7 = vadd.f32 1.0, %v8687_v34  ;;  %3618 = vmatpush.bf16.msrb.mxu3 %v7258_v58  ;;  %v8398_v58 = vld [vmem:[%s13666_s2 + $0xb4] sm:$0xf0]  ;;  %3606 = vmatpush.bf16.msrb.mxu2 %v7222_v35  ;;  %v7182_v34 = vor.u32 %v8397_v50, %v7181_v20  ;;  %v7194_v36 = vor.u32 %v8394_v45, %v7191_v26  ;;  %v8389_v20 = vld [vmem:[%s13666_s2 + $0x6c] sm:$0xf0]  ;;  %v2816_v26 = vor.u32 1.1754944e-38, %v2815_v1 }
 0x2e0   :  { %v11587_v54 = vpop.eup %8688  ;;  %3580 = vmatpush.bf16.msrb.mxu0 %v7214_v3  ;;  %3593 = vmatpush.bf16.msrb.mxu1 %v7218_v30  ;;  %v7186_v3 = vor.u32 %v8393_v2, %v7183_v25  ;;  %v7190_v14 = vor.u32 %v8398_v58, %v7189_v33  ;;  %v7151_v50 = vld [vmem:[%s13666_s2 + $0x70] sm:$0xf0]  ;;  %v7150_v25 = vor.u32 %v8389_v20, %v7149_v32  ;;  %v8390_v58 = vld [vmem:[%s13666_s2 + $0x74] sm:$0xf0]  ;;  %v7159_v32 = vld [vmem:[%s13666_s2 + $0x78] sm:$0xf0] }
 0x2e1   :  { %v11598_v41 = vpop.eup %8690  ;;  %v2805_v15 = vmul.f32 %v11587_v54, %v11530_v31  ;;  %8694 = vrcp.f32 %v11579_v7  ;;  %vm2810_vm12 = vweird.f32 %v11587_v54  ;;  %v7154_v33 = vor.u32 %v8385_v55, %v7151_v50  ;;  %v7117_v31 = vld [vmem:[%s13666_s2 + $0x10] sm:$0xf] }
 0x2e2   :  { %v2824_v61 = vmul.f32 %v11598_v41, %v11538_v22  ;;  %vm2829_vm15 = vweird.f32 %v11598_v41  ;;  %vm11661_vm6 = vmor %vm2809_vm14, %vm2810_vm12  ;;  %v8381_v1 = vld [vmem:[%s13666_s2 + $0x2c] sm:$0xf0]  ;;  %vm2833_vm9 = vcmp.eq.f32.partialorder %v2832_v52, 8.507059e+37  ;;  %vm2848_vm11 = vweird.f32 %v11579_v7 }
 0x2e3   :  { %v2806_v62 = vsub.f32 1.0, %v2805_v15  ;;  %3619 = vmatpush.bf16.msrb.mxu3 %v7226_v40  ;;  %v8693_v15 = vpop.eup %8692  ;;  %3607 = vmatpush.bf16.msrb.mxu2 %v7190_v14  ;;  %v8377_v14 = vld [vmem:[%s13666_s2 + $0x14] sm:$0xf]  ;;  %vm11682_vm8 = vmor %vm2828_vm7, %vm2829_vm15  ;;  %v7118_v50 = vor.u32 %v8381_v1, %v7117_v31 }
 0x2e4   :  { %v2825_v12 = vsub.f32 1.0, %v2824_v61  ;;  %3581 = vmatpush.bf16.msrb.mxu0 %v7182_v34  ;;  %3594 = vmatpush.bf16.msrb.mxu1 %v7186_v3  ;;  %v7157_v61 = vld [vmem:[%s13666_s2 + $0x58] sm:$0xf]  ;;  %v2835_v34 = vor.u32 1.1754944e-38, %v2834_v23 }
 0x2e5   :  { %v2807_v35 = vmul.f32 %v11587_v54, %v2806_v62  ;;  %v8386_v62 = vld [vmem:[%s13666_s2 + $0x5c] sm:$0xf] }
 0x2e6   :  { %v2826_v2 = vmul.f32 %v11598_v41, %v2825_v12  ;;  %v7158_v12 = vor.u32 %v8390_v58, %v7157_v61  ;;  %v7162_v55 = vor.u32 %v8386_v62, %v7159_v32  ;;  %v7125_v61 = vld [vmem:[%s13666_s2 + $0x18] sm:$0xf]  ;;  %v8378_v62 = vld [vmem:[%s13666_s2 + $0x1c] sm:$0xf] }
 0x2e7   :  { %v8695_v40 = vpop.eup %8694  ;;  %v2808_v45 = vadd.f32 %v11587_v54, %v2807_v35  ;;  %3620 = vmatpush.bf16.msrb.mxu3 %v7194_v36 }
 0x2e8   :  { %v2827_v23 = vadd.f32 %v11598_v41, %v2826_v2  ;;  %v2844_v35 = vmul.f32 %v8695_v40, %v11579_v7  ;;  %3582 = vmatpush.bf16.msrb.mxu0 %v7150_v25  ;;  %v7119_v2 = vld [vmem:[%s13666_s2 + $0x30] sm:$0xf0]  ;;  %3595 = vmatpush.bf16.msrb.mxu1 %v7154_v33  ;;  %v8382_v25 = vld [vmem:[%s13666_s2 + $0x34] sm:$0xf0]  ;;  %vm2849_vm10 = vweird.f32 %v8695_v40 }
 0x2e9   :  { %v2812_v20 = vsel %vm11661_vm6, %v11587_v54, %v2808_v45  ;;  %v7122_v36 = vor.u32 %v8377_v14, %v7119_v2  ;;  %3608 = vmatpush.bf16.msrb.mxu2 %v7158_v12  ;;  %v7126_v30 = vor.u32 %v8382_v25, %v7125_v61  ;;  %vm2850_vm12 = vmor %vm2848_vm11, %vm2849_vm10  ;;  %v3764_v25 = vld [vmem:[%s13665_s1 + $0x118] sm:$0x7f] }
 0x2ea   :  { %v2817_v58 = vsel %vm11627_vm13, %v2816_v26, %v2812_v20  ;;  %v2831_v54 = vsel %vm11682_vm8, %v11598_v41, %v2827_v23  ;;  %v2845_v52 = vsub.f32 1.0, %v2844_v35  ;;  %v7127_v26 = vld [vmem:[%s13666_s2 + $0x38] sm:$0xf0] }
 0x2eb   :  { %v2836_v45 = vsel %vm2833_vm9, %v2835_v34, %v2831_v54  ;;  %v2859_v3 = vmul.f32 %v8693_v15, %v2817_v58  ;;  %3621 = vmatpush.bf16.msrb.mxu3 %v7162_v55  ;;  %v7130_v32 = vor.u32 %v8378_v62, %v7127_v26  ;;  %v2854_v15 = vand.u32 2147483648, %v11579_v7  ;;  %v3761_v55 = vld [vmem:[%s13665_s1 + $0x100] sm:$0x7f] }
 0x2ec   :  { %v2858_v41 = vmul.f32 %v2836_v45, %v10957_v28  ;;  %v2846_v33 = vmul.f32 %v8695_v40, %v2845_v52  ;;  %3583 = vmatpush.bf16.msrb.mxu0 %v7118_v50  ;;  %3596 = vmatpush.bf16.msrb.mxu1 %v7122_v36  ;;  %v2852_v34 = vand.u32 2147483647, %v11579_v7  ;;  %v3765_v50 = vld [vmem:[%s13665_s1 + $0x120] sm:$0x7f] }
 0x2ed   :  { %3609 = vmatpush.bf16.msrb.mxu2 %v7126_v30  ;;  %v2855_v12 = vor.u32 1.1754944e-38, %v2854_v15  ;;  %v3713_v58 = vld [vmem:[%s13664_s0 + $0x5] sm:$0x1]  ;;  %v8492_v30 = vld [vmem:[%s13666_s2 + $0x1a4] sm:$0xf0] }
 0x2ee   :  { %v11710_v23 = vadd.f32 %v2859_v3, %v2858_v41  ;;  %v2847_v35 = vadd.f32 %v8695_v40, %v2846_v33  ;;  %vm2853_vm13 = vcmp.eq.f32.partialorder %v2852_v34, 8.507059e+37  ;;  %v11747_v54 = vld [vmem:[%s13665_s1 + $0x20] sm:$0xff]  ;;  %v7576_v3 = vld [vmem:[%s13666_s2 + $0x188] sm:$0xf]  ;;  %v8488_v33 = vld [vmem:[%s13666_s2 + $0x18c] sm:$0xf] }
 0x2ef   :  { %3622 = vmatpush.bf16.msrb.mxu3 %v7130_v32  ;;  %v7570_v45 = vld [vmem:[%s13666_s2 + $0x1a0] sm:$0xf0]  ;;  %v7577_v41 = vor.u32 %v8492_v30, %v7576_v3  ;;  %v7578_v32 = vld [vmem:[%s13666_s2 + $0x1a8] sm:$0xf0]  ;;  %v7536_v15 = vld [vmem:[%s13666_s2 + $0x140] sm:$0xf] }
 0x2f0   :  { %8696 = vtanh.f32 %v11710_v23  ;;  %v2851_v28 = vsel %vm2850_vm12, %v8695_v40, %v2847_v35  ;;  %v7581_v35 = vor.u32 %v8488_v33, %v7578_v32  ;;  %v8483_v34 = vld [vmem:[%s13666_s2 + $0x15c] sm:$0xf0]  ;;  %v8460_v33 = vld [vmem:[%s13666_s2 + $0xa4] sm:$0xf0] }
 0x2f1   :  { %v2856_v1 = vsel %vm2853_vm13, %v2855_v12, %v2851_v28  ;;  %v8479_v28 = vld [vmem:[%s13666_s2 + $0x144] sm:$0xf]  ;;  %v7537_v12 = vor.u32 %v8483_v34, %v7536_v15  ;;  %v8456_v15 = vld [vmem:[%s13666_s2 + $0x8c] sm:$0xf] }
 0x2f2   :  { %v7450_v34 = vld [vmem:[%s13666_s2 + $0xa8] sm:$0xf0] }
 0x2f6   :  { %v8697_v31 = vpop.eup %8696 }
 0x2f7   :  { %v2862_v14 = vmul.f32 %v8697_v31, %v2856_v1  ;;  %v7538_v31 = vld [vmem:[%s13666_s2 + $0x160] sm:$0xf0]  ;;  %v7544_v1 = vld [vmem:[%s13666_s2 + $0x148] sm:$0xf] }
 0x2f9   :  { %v2864_v22 = vrot.slane %v2862_v14, 1  ;;  %2866 = vst [vmem:[#allocation2 + $0x3] sm:$0x1] %v2862_v14  ;;  %v3139_v20 = vpack.c.bf16 %v2862_v14, %v2862_v14 }
 0x2fa   :  { %2868 = vst [vmem:[#allocation1] sm:$0xff] %v2862_v14  ;;  %v8484_v14 = vld [vmem:[%s13666_s2 + $0x164] sm:$0xf0] }
 0x2fb   :  { %2867 = vst [vmem:[#allocation2 + $0x13] sm:$0x1] %v2864_v22  ;;  %3532 = vmatmul.bf16.vlgmr.msra.gmra.mxu0 %v3139_v20  ;;  %3545 = vmatmul.bf16.vlgmr.msra.gmra.mxu1 %v3139_v20  ;;  %v7541_v22 = vor.u32 %v8479_v28, %v7538_v31  ;;  %v7453_v28 = vor.u32 %v8456_v15, %v7450_v34 }
 0x2fc   :  { %3558 = vmatmul.bf16.vlgmr.msra.gmra.mxu2 %v3139_v20  ;;  %3571 = vmatmul.bf16.vlgmr.msra.gmra.mxu3 %v3139_v20 }
 0x2fd   :  { %7358 = vmatpush.msk.msra.mxu0 %vm86_vm0, %v3761_v55  ;;  %7364 = vmatpush.msk.msra.mxu3 %vm86_vm0, %v3764_v25  ;;  %v8480_v55 = vld [vmem:[%s13666_s2 + $0x14c] sm:$0xf] }
 0x2fe   :  { %v8472_v25 = vld [vmem:[%s13666_s2 + $0x10c] sm:$0xf] }
 0x2ff   :  { %3808 = vmatpush.msra.mxu0 %v10969_v49  ;;  %v3714_v49 = vld [vmem:[%s13664_s0 + $0xd] sm:$0x1]  ;;  %3868 = vmatpush.msra.mxu3 %v11061_v21  ;;  %v3768_v21 = vld [vmem:[%s13665_s1 + $0x138] sm:$0x7f] }
 0x301   :  { %v2870_v7 = vld [vmem:[#allocation1 + $0x2] ss:$9 sm:$0xff]  ;;  %3809 = vmatpush.msra.mxu0 %v10975_v38  ;;  %3869 = vmatpush.msra.mxu3 %v11079_v48 }
 0x302   :  { %v2872_v40 = vld [vmem:[#allocation1 + $0x3] ss:$9 sm:$0xff]  ;;  %2875 = vst [vmem:[#allocation2 + $0xc] sm:$0x1] %v2870_v7 }
 0x303   :  { %2876 = vst [vmem:[#allocation2 + $0x1c] sm:$0x1] %v2872_v40  ;;  %3810 = vmatpush.msra.mxu0 %v10981_v59  ;;  %v3715_v38 = vld [vmem:[%s13664_s0 + $0x2] sm:$0x1]  ;;  %v3716_v59 = vld [vmem:[%s13664_s0 + $0xa] sm:$0x1]  ;;  %3870 = vmatpush.msra.mxu3 %v11098_v11 }
 0x304   :  { %3124 = vst [vmem:[#allocation1] ss:$2 sm:$0xff] %v9142_v4  ;;  %v3724_v2 = vrot.slane %v3715_v38, 6  ;;  %v3725_v61 = vrot.slane %v3716_v59, 5  ;;  %v7600_v48 = vld [vmem:[%s13666_s2 + $0x1c0] sm:$0xf] }
 0x305   :  { %3126 = vst [vmem:[#allocation1 + $0x10] ss:$2 sm:$0xff] %v9163_v8  ;;  %3811 = vmatpush.msra.mxu0 %v10987_v60  ;;  %v3719_v60 = vrot.slane %v3714_v49, 7  ;;  %3871 = vmatpush.msra.mxu3 %v11115_v39  ;;  %v8500_v39 = vld [vmem:[%s13666_s2 + $0x1e4] sm:$0xf0] }
 0x306   :  { %v7546_v7 = vld [vmem:[%s13666_s2 + $0x168] sm:$0xf0]  ;;  %v7504_v38 = vld [vmem:[%s13666_s2 + $0x100] sm:$0xf] }
 0x307   :  { %v3720_v52 = vsel %vm30_vm1, %v3719_v60, %v3713_v58  ;;  %v7549_v40 = vor.u32 %v8480_v55, %v7546_v7  ;;  %v8475_v59 = vld [vmem:[%s13666_s2 + $0x11c] sm:$0xf0]  ;;  %v8471_v60 = vld [vmem:[%s13666_s2 + $0x104] sm:$0xf]  ;;  %v7416_v7 = vld [vmem:[%s13666_s2 + $0x48] sm:$0xf] }
 0x308   :  { %v7505_v58 = vor.u32 %v8475_v59, %v7504_v38  ;;  %v7410_v55 = vld [vmem:[%s13666_s2 + $0x60] sm:$0xf0] }
 0x30b   :  { %3584 = vmatmul.bf16.vlgmr.msrb.gmra.mxu0 %v3139_v20  ;;  %3597 = vmatmul.bf16.vlgmr.msrb.gmra.mxu1 %v3139_v20  ;;  %v3128_v31 = vld.sshfl [vmem:[#allocation1 + $0x8] sm:$0xff pattern:$0x75316420] }
 0x30c   :  { %3610 = vmatmul.bf16.vlgmr.msrb.gmra.mxu2 %v3139_v20  ;;  %3623 = vmatmul.bf16.vlgmr.msrb.gmra.mxu3 %v3139_v20  ;;  %v7545_v20 = vor.u32 %v8484_v14, %v7544_v1  ;;  %v7408_v1 = vld [vmem:[%s13666_s2 + $0x40] sm:$0xf] }
 0x30d   :  { %7366 = vmatpush.msk.msrb.mxu0 %vm86_vm0, %v3765_v50  ;;  %7372 = vmatpush.msk.msrb.mxu3 %vm86_vm0, %v3768_v21  ;;  %v7472_v21 = vld [vmem:[%s13666_s2 + $0xc0] sm:$0xf] }
 0x30e   :  { %v8451_v14 = vld [vmem:[%s13666_s2 + $0x5c] sm:$0xf0] }
 0x30f   :  { %3888 = vmatpush.msrb.mxu0 %v10999_v0  ;;  %v3726_v0 = vsel %vm37_vm2, %v3725_v61, %v3724_v2  ;;  %3948 = vmatpush.msrb.mxu3 %v11146_v63 }
 0x310   :  { %v3728_v36 = vsel %vm40_vm3, %v3720_v52, %v3726_v0  ;;  %v7506_v52 = vld [vmem:[%s13666_s2 + $0x120] sm:$0xf0]  ;;  %v7512_v0 = vld [vmem:[%s13666_s2 + $0x108] sm:$0xf] }
 0x311   :  { %3889 = vmatpush.msrb.mxu0 %v11014_v27  ;;  %v3762_v27 = vld [vmem:[%s13665_s1 + $0x108] sm:$0x7f]  ;;  %3949 = vmatpush.msrb.mxu3 %v11172_v17 }
 0x312   :  { %7360 = vmatpush.msk.msra.mxu1 %vm86_vm0, %v3762_v27  ;;  %v7610_v17 = vld [vmem:[%s13666_s2 + $0x1e8] sm:$0xf0]  ;;  %v7509_v27 = vor.u32 %v8471_v60, %v7506_v52 }
 0x313   :  { %3890 = vmatpush.msrb.mxu0 %v11020_v24  ;;  %v3763_v24 = vld [vmem:[%s13665_s1 + $0x110] sm:$0x7f]  ;;  %3950 = vmatpush.msrb.mxu3 %v11192_v51  ;;  %v8491_v51 = vld [vmem:[%s13666_s2 + $0x19c] sm:$0xf0]  ;;  %v8448_v52 = vld [vmem:[%s13666_s2 + $0x4c] sm:$0xf] }
 0x314   :  { %7362 = vmatpush.msk.msra.mxu2 %vm86_vm0, %v3763_v24  ;;  %3828 = vmatpush.msra.mxu1 %v11051_v5  ;;  %v3766_v5 = vld [vmem:[%s13665_s1 + $0x128] sm:$0x7f] }
 0x315   :  { %3891 = vmatpush.msrb.mxu0 %v11747_v54  ;;  %3951 = vmatpush.msrb.mxu3 %v11219_v44 }
 0x316   :  { %3848 = vmatpush.msra.mxu2 %v11056_v10  ;;  %3829 = vmatpush.msra.mxu1 %v11067_v53  ;;  %v3767_v10 = vld [vmem:[%s13665_s1 + $0x130] sm:$0x7f]  ;;  %v11796_v53 = vpop.f32.mrf.mxu0 }
 0x318   :  { %3849 = vmatpush.msra.mxu2 %v11072_v9  ;;  %3830 = vmatpush.msra.mxu1 %v11088_v19  ;;  %v11798_v9 = vpop.f32.mrf.mxu1  ;;  %v8499_v19 = vld [vmem:[%s13666_s2 + $0x1dc] sm:$0xf0] }
 0x319   :  { %v7601_v11 = vor.u32 %v8499_v19, %v7600_v48  ;;  %v8467_v48 = vld [vmem:[%s13666_s2 + $0xdc] sm:$0xf0]  ;;  %v8463_v19 = vld [vmem:[%s13666_s2 + $0xc4] sm:$0xf] }
 0x31a   :  { %3850 = vmatpush.msra.mxu2 %v11093_v13  ;;  %3831 = vmatpush.msra.mxu1 %v11105_v18  ;;  %v8495_v13 = vld [vmem:[%s13666_s2 + $0x1c4] sm:$0xf] }
 0x31b   :  { %7359 = vmatmul.msk.f32.vlgmr.msra.gmra.mxu0 %vm82_vm4, %v3728_v36  ;;  %7361 = vmatmul.msk.f32.vlgmr.msra.gmra.mxu1 %vm82_vm4, %v3728_v36  ;;  %v7602_v18 = vld [vmem:[%s13666_s2 + $0x1e0] sm:$0xf0] }
 0x31c   :  { %3851 = vmatpush.msra.mxu2 %v11110_v37  ;;  %7368 = vmatpush.msk.msrb.mxu1 %vm86_vm0, %v3766_v5  ;;  %v7608_v37 = vld [vmem:[%s13666_s2 + $0x1c8] sm:$0xf]  ;;  %v7605_v63 = vor.u32 %v8495_v13, %v7602_v18  ;;  %v7514_v5 = vld [vmem:[%s13666_s2 + $0x128] sm:$0xf0]  ;;  %v7473_v13 = vor.u32 %v8467_v48, %v7472_v21  ;;  %v7378_v48 = vld [vmem:[%s13666_s2 + $0x20] sm:$0xf0] }
 0x31d   :  { %7365 = vmatmul.msk.f32.vlgmr.msra.gmra.mxu3 %vm82_vm4, %v3728_v36  ;;  %7363 = vmatmul.msk.f32.vlgmr.msra.gmra.mxu2 %vm82_vm4, %v3728_v36  ;;  %v7480_v18 = vld [vmem:[%s13666_s2 + $0xc8] sm:$0xf] }
 0x31e   :  { %7370 = vmatpush.msk.msrb.mxu2 %vm86_vm0, %v3767_v10  ;;  %3908 = vmatpush.msrb.mxu1 %v11134_v29  ;;  %v11830_v29 = vpop.f32.mrf.mxu3  ;;  %v7517_v10 = vor.u32 %v8472_v25, %v7514_v5 }
 0x31f   :  { %4360 = vmatpush.bf16.msra.mxu0 %v7601_v11  ;;  %v7474_v11 = vld [vmem:[%s13666_s2 + $0xe0] sm:$0xf0] }
 0x320   :  { %3928 = vmatpush.msrb.mxu2 %v11139_v46  ;;  %3909 = vmatpush.msrb.mxu1 %v11162_v56  ;;  %v11832_v46 = vpop.f32.mrf.mxu2  ;;  %v7609_v56 = vor.u32 %v8500_v39, %v7608_v37  ;;  %v11853_v44 = vpop.f32.mrf.mxu1  ;;  %v8468_v37 = vld [vmem:[%s13666_s2 + $0xe4] sm:$0xf0]  ;;  %v7477_v39 = vor.u32 %v8463_v19, %v7474_v11 }
 0x321   :  { %v3121_v59 = vsel %vm20_vm5, %v11798_v9, %v11853_v44  ;;  %v8443_v9 = vld [vmem:[%s13666_s2 + $0x1c] sm:$0xf0]  ;;  %v7384_v19 = vld [vmem:[%s13666_s2 + $0x8] sm:$0xf] }
 0x322   :  { %3929 = vmatpush.msrb.mxu2 %v11167_v57  ;;  %3910 = vmatpush.msrb.mxu1 %v11182_v16  ;;  %v8496_v57 = vld [vmem:[%s13666_s2 + $0x1cc] sm:$0xf]  ;;  %v3136_v25 = vadd.f32 %v3128_v31, %v3121_v59  ;;  %v7584_v31 = vld [vmem:[%s13666_s2 + $0x190] sm:$0xf] }
 0x323   :  { %7367 = vmatmul.msk.f32.vlgmr.msrb.gmra.mxu0 %vm82_vm4, %v3728_v36  ;;  %v7613_v16 = vor.u32 %v8496_v57, %v7610_v17  ;;  %v7482_v57 = vld [vmem:[%s13666_s2 + $0xe8] sm:$0xf0] }
 0x324   :  { %3930 = vmatpush.msrb.mxu2 %v11187_v47  ;;  %3911 = vmatpush.msrb.mxu1 %v11209_v43  ;;  %v7568_v47 = vld [vmem:[%s13666_s2 + $0x180] sm:$0xf]  ;;  %v8487_v43 = vld [vmem:[%s13666_s2 + $0x184] sm:$0xf] }
 0x325   :  { %7369 = vmatmul.msk.f32.vlgmr.msrb.gmra.mxu1 %vm82_vm4, %v3728_v36  ;;  %7373 = vmatmul.msk.f32.vlgmr.msrb.gmra.mxu3 %vm82_vm4, %v3728_v36  ;;  %v7569_v62 = vor.u32 %v8491_v51, %v7568_v47  ;;  %v7573_v26 = vor.u32 %v8487_v43, %v7570_v45  ;;  %v7440_v51 = vld [vmem:[%s13666_s2 + $0x80] sm:$0xf] }
 0x326   :  { %3931 = vmatpush.msrb.mxu2 %v11214_v42  ;;  %4373 = vmatpush.bf16.msra.mxu1 %v7605_v63  ;;  %v11851_v42 = vpop.f32.mrf.mxu0  ;;  %v11894_v50 = vpop.f32.mrf.mxu3  ;;  %v7481_v63 = vor.u32 %v8468_v37, %v7480_v18  ;;  %v8459_v43 = vld [vmem:[%s13666_s2 + $0x9c] sm:$0xf0] }
 0x327   :  { %7371 = vmatmul.msk.f32.vlgmr.msrb.gmra.mxu2 %vm82_vm4, %v3728_v36  ;;  %4399 = vmatpush.bf16.msra.mxu3 %v7613_v16  ;;  %v8476_v36 = vld [vmem:[%s13666_s2 + $0x124] sm:$0xf0]  ;;  %v7441_v30 = vor.u32 %v8459_v43, %v7440_v51  ;;  %v3120_v38 = vsel %vm20_vm5, %v11796_v53, %v11851_v42  ;;  %v7376_v53 = vld [vmem:[%s13666_s2] sm:$0xf]  ;;  %v8439_v42 = vld [vmem:[%s13666_s2 + $0x4] sm:$0xf] }
 0x328   :  { %4386 = vmatpush.bf16.msra.mxu2 %v7609_v56  ;;  %4361 = vmatpush.bf16.msra.mxu0 %v7569_v62  ;;  %v11896_v49 = vpop.f32.mrf.mxu2  ;;  %v7513_v24 = vor.u32 %v8476_v36, %v7512_v0  ;;  %v8464_v56 = vld [vmem:[%s13666_s2 + $0xcc] sm:$0xf]  ;;  %v8455_v62 = vld [vmem:[%s13666_s2 + $0x84] sm:$0xf]  ;;  %v7377_v21 = vor.u32 %v8443_v9, %v7376_v53  ;;  %v7381_v37 = vor.u32 %v8439_v42, %v7378_v48  ;;  %v8485_v53 = vld [vmem:[%s13666_s2 + $0x16c] sm:$0xf0] }
 0x329   :  { %v7485_v17 = vor.u32 %v8464_v56, %v7482_v57  ;;  %v7418_v0 = vld [vmem:[%s13666_s2 + $0x68] sm:$0xf0]  ;;  %v7616_v57 = vld [vmem:[%s13666_s2 + $0x1d0] sm:$0xf]  ;;  %v8481_v9 = vld [vmem:[%s13666_s2 + $0x154] sm:$0xf] }
 0x32a   :  { %4374 = vmatpush.bf16.msra.mxu1 %v7573_v26  ;;  %v7442_v26 = vld [vmem:[%s13666_s2 + $0xa0] sm:$0xf0]  ;;  %v7421_v36 = vor.u32 %v8448_v52, %v7418_v0  ;;  %v7386_v56 = vld [vmem:[%s13666_s2 + $0x28] sm:$0xf0]  ;;  %v8482_v48 = vld [vmem:[%s13666_s2 + $0x15c] sm:$0xf] }
 0x32b   :  { %4400 = vmatpush.bf16.msra.mxu3 %v7581_v35  ;;  %v7445_v32 = vor.u32 %v8455_v62, %v7442_v26  ;;  %v8497_v62 = vld [vmem:[%s13666_s2 + $0x1d4] sm:$0xf]  ;;  %v7624_v26 = vld [vmem:[%s13666_s2 + $0x1d8] sm:$0xf] }
 0x32c   :  { %4387 = vmatpush.bf16.msra.mxu2 %v7577_v41  ;;  %4362 = vmatpush.bf16.msra.mxu0 %v7537_v12  ;;  %v7448_v41 = vld [vmem:[%s13666_s2 + $0x88] sm:$0xf]  ;;  %v3127_v12 = vld.sshfl [vmem:[#allocation1] sm:$0xff pattern:$0x75316420] }
 0x32d   :  { %v7449_v35 = vor.u32 %v8460_v33, %v7448_v41  ;;  %v3135_v44 = vadd.f32 %v3127_v12, %v3120_v38  ;;  %v8502_v41 = vld [vmem:[%s13666_s2 + $0x1f4] sm:$0xf0]  ;;  %v8498_v33 = vld [vmem:[%s13666_s2 + $0x1dc] sm:$0xf] }
 0x32e   :  { %4375 = vmatpush.bf16.msra.mxu1 %v7541_v22  ;;  %v8447_v22 = vld [vmem:[%s13666_s2 + $0x44] sm:$0xf]  ;;  %v7625_v34 = vor.u32 %v8502_v41, %v7624_v26 }
 0x32f   :  { %4401 = vmatpush.bf16.msra.mxu3 %v7549_v40  ;;  %v8452_v40 = vld [vmem:[%s13666_s2 + $0x64] sm:$0xf0]  ;;  %v7413_v60 = vor.u32 %v8447_v22, %v7410_v55  ;;  %v7592_v22 = vld [vmem:[%s13666_s2 + $0x198] sm:$0xf] }
 0x330   :  { %4388 = vmatpush.bf16.msra.mxu2 %v7545_v20  ;;  %4363 = vmatpush.bf16.msra.mxu0 %v7505_v58  ;;  %v7409_v20 = vor.u32 %v8451_v14, %v7408_v1  ;;  %v7417_v58 = vor.u32 %v8452_v40, %v7416_v7  ;;  %v8493_v1 = vld [vmem:[%s13666_s2 + $0x1ac] sm:$0xf0]  ;;  %v7586_v14 = vld [vmem:[%s13666_s2 + $0x1b0] sm:$0xf0] }
 0x332   :  { %4376 = vmatpush.bf16.msra.mxu1 %v7509_v27 }
 0x333   :  { %4402 = vmatpush.bf16.msra.mxu3 %v7517_v10 }
 0x334   :  { %4389 = vmatpush.bf16.msra.mxu2 %v7513_v24  ;;  %4364 = vmatpush.bf16.msra.mxu0 %v7473_v13  ;;  %v8444_v13 = vld [vmem:[%s13666_s2 + $0x24] sm:$0xf0] }
 0x336   :  { %4377 = vmatpush.bf16.msra.mxu1 %v7477_v39  ;;  %v7385_v39 = vor.u32 %v8444_v13, %v7384_v19  ;;  %v7562_v19 = vld [vmem:[%s13666_s2 + $0x178] sm:$0xf0] }
 0x337   :  { %4403 = vmatpush.bf16.msra.mxu3 %v7485_v17  ;;  %v3130_v17 = vld.sshfl [vmem:[#allocation1 + $0x18] sm:$0xff pattern:$0x75316420] }
 0x338   :  { %4390 = vmatpush.bf16.msra.mxu2 %v7481_v63  ;;  %4365 = vmatpush.bf16.msra.mxu0 %v7441_v30  ;;  %v8440_v63 = vld [vmem:[%s13666_s2 + $0xc] sm:$0xf] }
 0x339   :  { %v7389_v43 = vor.u32 %v8440_v63, %v7386_v56  ;;  %v8477_v63 = vld [vmem:[%s13666_s2 + $0x12c] sm:$0xf0]  ;;  %v8473_v56 = vld [vmem:[%s13666_s2 + $0x114] sm:$0xf] }
 0x33a   :  { %4378 = vmatpush.bf16.msra.mxu1 %v7445_v32  ;;  %v3123_v32 = vsel %vm20_vm5, %v11830_v29, %v11894_v50  ;;  %v8489_v29 = vld [vmem:[%s13666_s2 + $0x194] sm:$0xf]  ;;  %v7585_v50 = vor.u32 %v8493_v1, %v7584_v31  ;;  %v7496_v31 = vld [vmem:[%s13666_s2 + $0xd8] sm:$0xf] }
 0x33b   :  { %4404 = vmatpush.bf16.msra.mxu3 %v7453_v28  ;;  %v7626_v28 = vld [vmem:[%s13666_s2 + $0x1f8] sm:$0xf0]  ;;  %v3138_v55 = vadd.f32 %v3130_v17, %v3123_v32  ;;  %v7589_v38 = vor.u32 %v8489_v29, %v7586_v14  ;;  %v8470_v14 = vld [vmem:[%s13666_s2 + $0xf4] sm:$0xf0] }
 0x33c   :  { %4391 = vmatpush.bf16.msra.mxu2 %v7449_v35  ;;  %4366 = vmatpush.bf16.msra.mxu0 %v7409_v20  ;;  %v7629_v12 = vor.u32 %v8498_v33, %v7626_v28  ;;  %v8494_v20 = vld [vmem:[%s13666_s2 + $0x1b4] sm:$0xf0]  ;;  %v7488_v33 = vld [vmem:[%s13666_s2 + $0xd0] sm:$0xf]  ;;  %v8465_v28 = vld [vmem:[%s13666_s2 + $0xd4] sm:$0xf] }
 0x33d   :  { %v7593_v59 = vor.u32 %v8494_v20, %v7592_v22  ;;  %v8466_v22 = vld [vmem:[%s13666_s2 + $0xdc] sm:$0xf] }
 0x33e   :  { %4379 = vmatpush.bf16.msra.mxu1 %v7413_v60  ;;  %v8490_v60 = vld [vmem:[%s13666_s2 + $0x19c] sm:$0xf] }
 0x33f   :  { %4405 = vmatpush.bf16.msra.mxu3 %v7421_v36  ;;  %v7498_v20 = vld [vmem:[%s13666_s2 + $0xf8] sm:$0xf0] }
 0x340   :  { %4392 = vmatpush.bf16.msra.mxu2 %v7417_v58  ;;  %4367 = vmatpush.bf16.msra.mxu0 %v7377_v21  ;;  %v7594_v58 = vld [vmem:[%s13666_s2 + $0x1b8] sm:$0xf0] }
 0x342   :  { %4380 = vmatpush.bf16.msra.mxu1 %v7381_v37  ;;  %v3129_v37 = vld.sshfl [vmem:[#allocation1 + $0x10] sm:$0xff pattern:$0x75316420] }
 0x343   :  { %4406 = vmatpush.bf16.msra.mxu3 %v7389_v43  ;;  %v7528_v43 = vld [vmem:[%s13666_s2 + $0x118] sm:$0xf] }
 0x344   :  { %4393 = vmatpush.bf16.msra.mxu2 %v7385_v39  ;;  %v7520_v39 = vld [vmem:[%s13666_s2 + $0x110] sm:$0xf] }
 0x347   :  { %4451 = vmatpush.bf16.msrb.mxu3 %v7629_v12 }
 0x348   :  { %4438 = vmatpush.bf16.msrb.mxu2 %v7625_v34  ;;  %v8469_v34 = vld [vmem:[%s13666_s2 + $0xec] sm:$0xf0] }
 0x349   :  { %v7489_v12 = vor.u32 %v8469_v34, %v7488_v33  ;;  %v7392_v34 = vld [vmem:[%s13666_s2 + $0x10] sm:$0xf] }
 0x34c   :  { %4439 = vmatpush.bf16.msrb.mxu2 %v7593_v59  ;;  %v8461_v59 = vld [vmem:[%s13666_s2 + $0xac] sm:$0xf0] }
 0x378   :  { %v11907_v2 = vpop.f32.mrf.mxu0  ;;  %v11909_v61 = vpop.f32.mrf.mxu1 }
 0x37f   :  { %v11950_v16 = vpop.f32.mrf.mxu2  ;;  %v11952_v47 = vpop.f32.mrf.mxu3 }
 0x380   :  { %v3535_v45 = vpop.f32.mrf.mxu0  ;;  %v3548_v3 = vpop.f32.mrf.mxu1 }
 0x381   :  { %v7618_v45 = vld [vmem:[%s13666_s2 + $0x1f0] sm:$0xf0] }
 0x382   :  { %v7621_v30 = vor.u32 %v8497_v62, %v7618_v45 }
 0x384   :  { %4425 = vmatpush.bf16.msrb.mxu1 %v7621_v30  ;;  %v8474_v30 = vld [vmem:[%s13666_s2 + $0x11c] sm:$0xf] }
 0x387   :  { %v3561_v27 = vpop.f32.mrf.mxu2  ;;  %v3574_v24 = vpop.f32.mrf.mxu3 }
 0x388   :  { %v3585_v5 = vpop.f32.mrf.mxu0  ;;  %v3598_v10 = vpop.f32.mrf.mxu1  ;;  %v7597_v27 = vor.u32 %v8490_v60, %v7594_v58  ;;  %v7552_v24 = vld [vmem:[%s13666_s2 + $0x150] sm:$0xf]  ;;  %4426 = vmatpush.bf16.msrb.mxu1 %v7589_v38 }
 0x389   :  { %v3628_v11 = vsel %vm20_vm5, %v11907_v2, %v3585_v5  ;;  %v3629_v18 = vsel %vm20_vm5, %v11909_v61, %v3598_v10  ;;  %v8501_v61 = vld [vmem:[%s13666_s2 + $0x1ec] sm:$0xf0]  ;;  %v8486_v5 = vld [vmem:[%s13666_s2 + $0x174] sm:$0xf0] }
 0x38a   :  { %v3632_v2 = vadd.f32 %v3628_v11, %v3135_v44  ;;  %v3633_v51 = vadd.f32 %v3629_v18, %v3136_v25  ;;  %v7617_v3 = vor.u32 %v8501_v61, %v7616_v57  ;;  %v7553_v44 = vor.u32 %v8485_v53, %v7552_v24  ;;  %v7560_v25 = vld [vmem:[%s13666_s2 + $0x158] sm:$0xf]  ;;  %4452 = vmatpush.bf16.msrb.mxu3 %v7597_v27  ;;  %v7456_v38 = vld [vmem:[%s13666_s2 + $0x90] sm:$0xf] }
 0x38b   :  { %v7561_v21 = vor.u32 %v8486_v5, %v7560_v25  ;;  %v7565_v11 = vor.u32 %v8482_v48, %v7562_v19  ;;  %v3122_v61 = vsel %vm20_vm5, %v11832_v46, %v11896_v49  ;;  %v7530_v46 = vld [vmem:[%s13666_s2 + $0x138] sm:$0xf0]  ;;  %v7457_v58 = vor.u32 %v8461_v59, %v7456_v38  ;;  %v8462_v53 = vld [vmem:[%s13666_s2 + $0xb4] sm:$0xf0]  ;;  %v7424_v5 = vld [vmem:[%s13666_s2 + $0x50] sm:$0xf] }
 0x38c   :  { %v7355_v35 = vmul.f32 -1.442695, %v3632_v2  ;;  %v7356_v15 = vmul.f32 -1.442695, %v3633_v51  ;;  %4412 = vmatpush.bf16.msrb.mxu0 %v7617_v3  ;;  %v7521_v2 = vor.u32 %v8477_v63, %v7520_v39  ;;  %v7522_v51 = vld [vmem:[%s13666_s2 + $0x130] sm:$0xf0]  ;;  %v3137_v32 = vadd.f32 %v3129_v37, %v3122_v61 }
 0x38d   :  { %4440 = vmatpush.bf16.msrb.mxu2 %v7561_v21  ;;  %v7525_v45 = vor.u32 %v8473_v56, %v7522_v51  ;;  %v8478_v3 = vld [vmem:[%s13666_s2 + $0x134] sm:$0xf0]  ;;  %v7426_v63 = vld [vmem:[%s13666_s2 + $0x70] sm:$0xf0] }
 0x38e   :  { %8698 = vpow2.f32 %v7355_v35  ;;  %4453 = vmatpush.bf16.msrb.mxu3 %v7565_v11  ;;  %v7529_v35 = vor.u32 %v8478_v3, %v7528_v43  ;;  %v8449_v11 = vld [vmem:[%s13666_s2 + $0x54] sm:$0xf]  ;;  %v8454_v51 = vld [vmem:[%s13666_s2 + $0x74] sm:$0xf0]  ;;  %v8450_v43 = vld [vmem:[%s13666_s2 + $0x5c] sm:$0xf] }
 0x38f   :  { %8700 = vpow2.f32 %v7356_v15  ;;  %v3611_v7 = vpop.f32.mrf.mxu2  ;;  %v3624_v40 = vpop.f32.mrf.mxu3  ;;  %v7533_v15 = vor.u32 %v8474_v30, %v7530_v46  ;;  %v7434_v30 = vld [vmem:[%s13666_s2 + $0x78] sm:$0xf0]  ;;  %v4598_v46 = vld [vmem:[%s13665_s1 + $0x108] sm:$0x7f] }
 0x390   :  { %v3631_v52 = vsel %vm20_vm5, %v11952_v47, %v3624_v40  ;;  %v3587_v0 = vpop.f32.mrf.mxu0  ;;  %v3600_v36 = vpop.f32.mrf.mxu1  ;;  %4413 = vmatpush.bf16.msrb.mxu0 %v7585_v50  ;;  %v7554_v47 = vld [vmem:[%s13666_s2 + $0x170] sm:$0xf0]  ;;  %v3630_v49 = vsel %vm20_vm5, %v11950_v16, %v3611_v7  ;;  %v7497_v7 = vor.u32 %v8470_v14, %v7496_v31  ;;  %v7501_v40 = vor.u32 %v8466_v22, %v7498_v20  ;;  %v8446_v20 = vld [vmem:[%s13666_s2 + $0x34] sm:$0xf0] }
 0x391   :  { %v3635_v42 = vadd.f32 %v3631_v52, %v3138_v55  ;;  %v7557_v10 = vor.u32 %v8481_v9, %v7554_v47  ;;  %v7490_v16 = vld [vmem:[%s13666_s2 + $0xf0] sm:$0xf0]  ;;  %v3634_v29 = vadd.f32 %v3630_v49, %v3137_v32  ;;  %4441 = vmatpush.bf16.msrb.mxu2 %v7529_v35  ;;  %v7464_v36 = vld [vmem:[%s13666_s2 + $0x98] sm:$0xf]  ;;  %v8458_v9 = vld [vmem:[%s13666_s2 + $0x9c] sm:$0xf]  ;;  %v7437_v33 = vor.u32 %v8450_v43, %v7434_v30 }
 0x392   :  { %4454 = vmatpush.bf16.msrb.mxu3 %v7533_v15  ;;  %v7493_v50 = vor.u32 %v8465_v28, %v7490_v16  ;;  %v8457_v52 = vld [vmem:[%s13666_s2 + $0x94] sm:$0xf]  ;;  %v7465_v48 = vor.u32 %v8462_v53, %v7464_v36 }
 0x393   :  { %v7357_v13 = vmul.f32 -1.442695, %v3635_v42  ;;  %4427 = vmatpush.bf16.msrb.mxu1 %v7557_v10  ;;  %v7458_v0 = vld [vmem:[%s13666_s2 + $0xb0] sm:$0xf0]  ;;  %v7466_v42 = vld [vmem:[%s13666_s2 + $0xb8] sm:$0xf0] }
 0x394   :  { %v8699_v18 = vpop.eup %8698  ;;  %4414 = vmatpush.bf16.msrb.mxu0 %v7553_v44  ;;  %v7461_v21 = vor.u32 %v8457_v52, %v7458_v0  ;;  %v7469_v19 = vor.u32 %v8458_v9, %v7466_v42  ;;  %v8441_v28 = vld [vmem:[%s13666_s2 + $0x14] sm:$0xf] }
 0x395   :  { %v8701_v57 = vpop.eup %8700  ;;  %v12128_v17 = vadd.f32 1.0, %v8699_v18  ;;  %8702 = vpow2.f32 %v7357_v13  ;;  %4442 = vmatpush.bf16.msrb.mxu2 %v7497_v7  ;;  %v8453_v13 = vld [vmem:[%s13666_s2 + $0x6c] sm:$0xf0]  ;;  %v8442_v7 = vld [vmem:[%s13666_s2 + $0x1c] sm:$0xf] }
 0x396   :  { %v12140_v62 = vadd.f32 1.0, %v8701_v57  ;;  %4455 = vmatpush.bf16.msrb.mxu3 %v7501_v40  ;;  %v7425_v39 = vor.u32 %v8453_v13, %v7424_v5  ;;  %v7429_v57 = vor.u32 %v8449_v11, %v7426_v63  ;;  %v4550_v63 = vld [vmem:[%s13664_s0 + $0xe] sm:$0x1] }
 0x397   :  { %8704 = vrcp.f32 %v12128_v17  ;;  %v3613_v26 = vpop.f32.mrf.mxu2  ;;  %v3626_v41 = vpop.f32.mrf.mxu3  ;;  %4428 = vmatpush.bf16.msrb.mxu1 %v7525_v45  ;;  %v3649_v47 = vand.u32 2147483647, %v12128_v17  ;;  %v3651_v25 = vand.u32 2147483648, %v12128_v17  ;;  %vm3645_vm15 = vweird.f32 %v12128_v17 }
 0x398   :  { %8706 = vrcp.f32 %v12140_v62  ;;  %4415 = vmatpush.bf16.msrb.mxu0 %v7521_v2  ;;  %v3670_v37 = vand.u32 2147483648, %v12140_v62  ;;  %v7432_v2 = vld [vmem:[%s13666_s2 + $0x58] sm:$0xf]  ;;  %v3668_v45 = vand.u32 2147483647, %v12140_v62  ;;  %vm3664_vm8 = vweird.f32 %v12140_v62 }
 0x399   :  { %4443 = vmatpush.bf16.msrb.mxu2 %v7465_v48  ;;  %v7433_v3 = vor.u32 %v8454_v51, %v7432_v2  ;;  %v3652_v49 = vor.u32 1.1754944e-38, %v3651_v25  ;;  %vm3650_vm10 = vcmp.eq.f32.partialorder %v3649_v47, 8.507059e+37  ;;  %v12315_v48 = vld [vmem:[%s13665_s1 + $0x80] sm:$0xff]  ;;  %v4555_v43 = vrot.slane %v4550_v63, 7  ;;  %v8560_v63 = vld [vmem:[%s13666_s2 + $0x1cc] sm:$0xf] }
 0x39a   :  { %4456 = vmatpush.bf16.msrb.mxu3 %v7469_v19  ;;  %vm3669_vm11 = vcmp.eq.f32.partialorder %v3668_v45, 8.507059e+37  ;;  %v12321_v19 = vld [vmem:[%s13665_s1 + $0x40] sm:$0xff] }
 0x39b   :  { %v8703_v1 = vpop.eup %8702  ;;  %4429 = vmatpush.bf16.msrb.mxu1 %v7493_v50  ;;  %v12354_v2 = vld [vmem:[%s13665_s1 + $0xa0] sm:$0xff] }
 0x39c   :  { %v12180_v55 = vadd.f32 1.0, %v8703_v1  ;;  %4416 = vmatpush.bf16.msrb.mxu0 %v7489_v12  ;;  %v3671_v12 = vor.u32 1.1754944e-38, %v3670_v37  ;;  %v7394_v1 = vld [vmem:[%s13666_s2 + $0x30] sm:$0xf0]  ;;  %v4601_v37 = vld [vmem:[%s13665_s1 + $0x120] sm:$0x7f] }
 0x39d   :  { %v12188_v60 = vpop.eup %8704  ;;  %4444 = vmatpush.bf16.msrb.mxu2 %v7433_v3  ;;  %v7397_v59 = vor.u32 %v8441_v28, %v7394_v1  ;;  %v12360_v51 = vld [vmem:[%s13665_s1 + $0x60] sm:$0xff]  ;;  %v12428_v28 = vld [vmem:[%s13665_s1 + $0x48] sm:$0xff]  ;;  %v12455_v1 = vld [vmem:[%s13665_s1 + $0x18] sm:$0xff] }
 0x39e   :  { %v12199_v27 = vpop.eup %8706  ;;  %v3641_v24 = vmul.f32 %v12188_v60, %v12128_v17  ;;  %8708 = vrcp.f32 %v12180_v55  ;;  %vm3646_vm14 = vweird.f32 %v12188_v60  ;;  %v8445_v17 = vld [vmem:[%s13666_s2 + $0x2c] sm:$0xf0]  ;;  %4457 = vmatpush.bf16.msrb.mxu3 %v7437_v33  ;;  %v3690_v53 = vand.u32 2147483648, %v12180_v55  ;;  %v4549_v3 = vld [vmem:[%s13664_s0 + $0x6] sm:$0x1]  ;;  %v12391_v33 = vld [vmem:[%s13665_s1 + $0xc8] sm:$0xff] }
 0x39f   :  { %v3660_v44 = vmul.f32 %v12199_v27, %v12140_v62  ;;  %8710 = vtanh.f32 %v3634_v29  ;;  %4430 = vmatpush.bf16.msrb.mxu1 %v7461_v21  ;;  %vm3665_vm6 = vweird.f32 %v12199_v27  ;;  %vm12253_vm7 = vmor %vm3645_vm15, %vm3646_vm14  ;;  %v7393_v31 = vor.u32 %v8445_v17, %v7392_v34  ;;  %v7400_v29 = vld [vmem:[%s13666_s2 + $0x18] sm:$0xf]  ;;  %v4597_v21 = vld [vmem:[%s13665_s1 + $0x100] sm:$0x7f] }
 0x3a0   :  { %v3642_v10 = vsub.f32 1.0, %v3641_v24  ;;  %4417 = vmatpush.bf16.msrb.mxu0 %v7457_v58  ;;  %vm12271_vm9 = vmor %vm3664_vm8, %vm3665_vm6  ;;  %v7402_v58 = vld [vmem:[%s13666_s2 + $0x38] sm:$0xf0]  ;;  %vm3684_vm13 = vweird.f32 %v12180_v55  ;;  %v3688_v9 = vand.u32 2147483647, %v12180_v55  ;;  %v3691_v42 = vor.u32 1.1754944e-38, %v3690_v53 }
 0x3a1   :  { %v3661_v18 = vsub.f32 1.0, %v3660_v44  ;;  %v7405_v36 = vor.u32 %v8442_v7, %v7402_v58  ;;  %v4556_v30 = vsel %vm30_vm1, %v4555_v43, %v4549_v3  ;;  %v12412_v34 = vld [vmem:[%s13665_s1 + $0x90] sm:$0xff]  ;;  %v12419_v17 = vld [vmem:[%s13665_s1 + $0x98] sm:$0xff]  ;;  %v8563_v53 = vld [vmem:[%s13666_s2 + $0x1dc] sm:$0xf0] }
 0x3a2   :  { %v3643_v56 = vmul.f32 %v12188_v60, %v3642_v10  ;;  %vm3689_vm15 = vcmp.eq.f32.partialorder %v3688_v9, 8.507059e+37  ;;  %v12433_v62 = vld [vmem:[%s13665_s1 + $0x50] sm:$0xff]  ;;  %v12486_v7 = vld [vmem:[%s13665_s1 + $0xf8] sm:$0xff]  ;;  %v8559_v9 = vld [vmem:[%s13666_s2 + $0x1c4] sm:$0xf] }
 0x3a3   :  { %v3662_v61 = vmul.f32 %v12199_v27, %v3661_v18  ;;  %4431 = vmatpush.bf16.msrb.mxu1 %v7429_v57  ;;  %4458 = vmatpush.bf16.msrb.mxu3 %v7405_v36  ;;  %v12327_v18 = vld [vmem:[%s13665_s1] sm:$0xff]  ;;  %v4552_v57 = vld [vmem:[%s13664_s0 + $0x9] sm:$0x1]  ;;  %v12512_v58 = vld [vmem:[%s13665_s1 + $0xb8] sm:$0xff] }
 0x3a4   :  { %v8709_v26 = vpop.eup %8708  ;;  %v3644_v41 = vadd.f32 %v12188_v60, %v3643_v56  ;;  %4418 = vmatpush.bf16.msrb.mxu0 %v7425_v39  ;;  %v12339_v39 = vld [vmem:[%s13665_s1 + $0xe0] sm:$0xff]  ;;  %v4561_v45 = vrot.slane %v4552_v57, 5  ;;  %v12532_v36 = vld [vmem:[%s13665_s1 + $0x78] sm:$0xff] }
 0x3a5   :  { %v8711_v32 = vpop.eup %8710  ;;  %v3663_v35 = vadd.f32 %v12199_v27, %v3662_v61  ;;  %v3680_v15 = vmul.f32 %v8709_v26, %v12180_v55  ;;  %vm3685_vm12 = vweird.f32 %v8709_v26  ;;  %v12309_v55 = vld [vmem:[%s13665_s1 + $0xc0] sm:$0xff] }
 0x3a6   :  { %v3648_v16 = vsel %vm12253_vm7, %v12188_v60, %v3644_v41  ;;  %v7401_v60 = vor.u32 %v8446_v20, %v7400_v29  ;;  %vm3686_vm14 = vmor %vm3684_vm13, %vm3685_vm12  ;;  %v4551_v56 = vld [vmem:[%s13664_s0 + $0x1] sm:$0x1]  ;;  %v4602_v29 = vld [vmem:[%s13665_s1 + $0x128] sm:$0x7f] }
 0x3a7   :  { %v3653_v50 = vsel %vm3650_vm10, %v3652_v49, %v3648_v16  ;;  %v3667_v14 = vsel %vm12271_vm9, %v12199_v27, %v3663_v35  ;;  %v3681_v22 = vsub.f32 1.0, %v3680_v15  ;;  %4432 = vmatpush.bf16.msrb.mxu1 %v7397_v59  ;;  %v4560_v61 = vrot.slane %v4551_v56, 6  ;;  %v4599_v49 = vld [vmem:[%s13665_s1 + $0x110] sm:$0x7f]  ;;  %v12401_v35 = vld [vmem:[%s13665_s1 + $0xd8] sm:$0xff]  ;;  %v12407_v15 = vld [vmem:[%s13665_s1 + $0x88] sm:$0xff] }
 0x3a8   :  { %v3672_v40 = vsel %vm3669_vm11, %v3671_v12, %v3667_v14  ;;  %v3695_v38 = vmul.f32 %v8711_v32, %v3653_v50  ;;  %4419 = vmatpush.bf16.msrb.mxu0 %v7393_v31  ;;  %4445 = vmatpush.bf16.msrb.mxu2 %v7401_v60  ;;  %v12396_v32 = vld [vmem:[%s13665_s1 + $0xd0] sm:$0xff]  ;;  %v12438_v12 = vld [vmem:[%s13665_s1 + $0x58] sm:$0xff]  ;;  %v12445_v16 = vld [vmem:[%s13665_s1 + $0x8] sm:$0xff] }
 0x3a9   :  { %v3694_v52 = vmul.f32 %v3672_v40, %v11710_v23  ;;  %v3682_v0 = vmul.f32 %v8709_v26, %v3681_v22  ;;  %v12450_v31 = vld [vmem:[%s13665_s1 + $0x10] sm:$0xff]  ;;  %v4604_v14 = vld [vmem:[%s13665_s1 + $0x138] sm:$0x7f]  ;;  %v12474_v22 = vld [vmem:[%s13665_s1 + $0xe8] sm:$0xff]  ;;  %v12492_v40 = vpop.f32.mrf.mxu0 }
 0x3aa   :  { %v4603_v50 = vld [vmem:[%s13665_s1 + $0x130] sm:$0x7f]  ;;  %v12502_v59 = vld [vmem:[%s13665_s1 + $0xa8] sm:$0xff]  ;;  %v7843_v43 = vld [vmem:[%s13666_s2 + $0x180] sm:$0xf] }
 0x3ab   :  { %v12297_v27 = vadd.f32 %v3695_v38, %v3694_v52  ;;  %v3683_v24 = vadd.f32 %v8709_v26, %v3682_v0  ;;  %v12479_v20 = vld [vmem:[%s13665_s1 + $0xf0] sm:$0xff]  ;;  %v12494_v38 = vpop.f32.mrf.mxu1  ;;  %v12522_v52 = vld [vmem:[%s13665_s1 + $0x68] sm:$0xff] }
 0x3ac   :  { %v12507_v60 = vld [vmem:[%s13665_s1 + $0xb0] sm:$0xff]  ;;  %v7885_v56 = vld [vmem:[%s13666_s2 + $0x1e8] sm:$0xf0] }
 0x3ad   :  { %8712 = vtanh.f32 %v12297_v27  ;;  %v3687_v23 = vsel %vm3686_vm14, %v8709_v26, %v3683_v24  ;;  %v4562_v26 = vsel %vm37_vm2, %v4561_v45, %v4560_v61  ;;  %v12527_v0 = vld [vmem:[%s13665_s1 + $0x70] sm:$0xff]  ;;  %v7875_v24 = vld [vmem:[%s13666_s2 + $0x1c0] sm:$0xf]  ;;  %v7888_v57 = vor.u32 %v8560_v63, %v7885_v56  ;;  %v8551_v45 = vld [vmem:[%s13666_s2 + $0x184] sm:$0xf] }
 0x3ae   :  { %v3692_v47 = vsel %vm3689_vm15, %v3691_v42, %v3687_v23  ;;  %v12371_v41 = vsel %vm40_vm3, %v4556_v30, %v4562_v26  ;;  %v12549_v23 = vld [vmem:[%s13665_s1 + $0x28] sm:$0xff]  ;;  %v12554_v42 = vld [vmem:[%s13665_s1 + $0x30] sm:$0xff]  ;;  %v8555_v61 = vld [vmem:[%s13666_s2 + $0x19c] sm:$0xf0] }
 0x3af   :  { %v7844_v26 = vor.u32 %v8555_v61, %v7843_v43  ;;  %v8544_v56 = vld [vmem:[%s13666_s2 + $0x14c] sm:$0xf] }
 0x3b1   :  { %v12596_v3 = vpop.f32.mrf.mxu0 }
 0x3b3   :  { %v8713_v44 = vpop.eup %8712  ;;  %v12598_v30 = vpop.f32.mrf.mxu1 }
 0x3b4   :  { %v3698_v25 = vmul.f32 %v8713_v44, %v3692_v47  ;;  %v12559_v44 = vld [vmem:[%s13665_s1 + $0x38] sm:$0xff]  ;;  %v7876_v47 = vor.u32 %v8563_v53, %v7875_v24  ;;  %v7853_v24 = vld [vmem:[%s13666_s2 + $0x1a8] sm:$0xf0] }
 0x3b6   :  { %v3700_v5 = vrot.slane %v3698_v25, 1  ;;  %3702 = vst [vmem:[#allocation2 + $0x4] sm:$0x1] %v3698_v25  ;;  %v3975_v10 = vpack.c.bf16 %v3698_v25, %v3698_v25 }
 0x3b7   :  { %3704 = vst [vmem:[#allocation1] sm:$0xff] %v3698_v25  ;;  %v12561_v25 = vpop.f32.mrf.mxu3 }
 0x3b8   :  { %3703 = vst [vmem:[#allocation2 + $0x14] sm:$0x1] %v3700_v5  ;;  %4368 = vmatmul.bf16.vlgmr.msra.gmra.mxu0 %v3975_v10  ;;  %4381 = vmatmul.bf16.vlgmr.msra.gmra.mxu1 %v3975_v10  ;;  %v12563_v5 = vpop.f32.mrf.mxu2 }
 0x3b9   :  { %4394 = vmatmul.bf16.vlgmr.msra.gmra.mxu2 %v3975_v10  ;;  %4407 = vmatmul.bf16.vlgmr.msra.gmra.mxu3 %v3975_v10 }
 0x3ba   :  { %7633 = vmatpush.msk.msra.mxu0 %vm86_vm0, %v4597_v21  ;;  %7635 = vmatpush.msk.msra.mxu1 %vm86_vm0, %v4598_v46  ;;  %v7883_v21 = vld [vmem:[%s13666_s2 + $0x1c8] sm:$0xf]  ;;  %v7845_v46 = vld [vmem:[%s13666_s2 + $0x1a0] sm:$0xf0] }
 0x3bb   :  { %7637 = vmatpush.msk.msra.mxu2 %vm86_vm0, %v4599_v49  ;;  %v7851_v49 = vld [vmem:[%s13666_s2 + $0x188] sm:$0xf] }
 0x3bc   :  { %4644 = vmatpush.msra.mxu0 %v12309_v55  ;;  %4664 = vmatpush.msra.mxu1 %v12391_v33 }
 0x3bd   :  { %4684 = vmatpush.msra.mxu2 %v12396_v32 }
 0x3be   :  { %v3708_v13 = vld [vmem:[#allocation1 + $0x3] ss:$9 sm:$0xff]  ;;  %4645 = vmatpush.msra.mxu0 %v12315_v48  ;;  %4665 = vmatpush.msra.mxu1 %v12407_v15 }
 0x3bf   :  { %v3706_v11 = vld [vmem:[#allocation1 + $0x2] ss:$9 sm:$0xff]  ;;  %3712 = vst [vmem:[#allocation2 + $0x1b] sm:$0x1] %v3708_v13  ;;  %4685 = vmatpush.msra.mxu2 %v12412_v34  ;;  %v12641_v61 = vpop.f32.mrf.mxu3 }
 0x3c0   :  { %3711 = vst [vmem:[#allocation2 + $0xb] sm:$0x1] %v3706_v11  ;;  %4646 = vmatpush.msra.mxu0 %v12321_v19  ;;  %4666 = vmatpush.msra.mxu1 %v12428_v28  ;;  %v8564_v13 = vld [vmem:[%s13666_s2 + $0x1e4] sm:$0xf0] }
 0x3c1   :  { %3960 = vst [vmem:[#allocation1] ss:$2 sm:$0xff] %v9142_v4  ;;  %4686 = vmatpush.msra.mxu2 %v12433_v62 }
 0x3c2   :  { %3962 = vst [vmem:[#allocation1 + $0x10] ss:$2 sm:$0xff] %v9163_v8  ;;  %4647 = vmatpush.msra.mxu0 %v12327_v18  ;;  %4667 = vmatpush.msra.mxu1 %v12445_v16 }
 0x3c3   :  { %4687 = vmatpush.msra.mxu2 %v12450_v31 }
 0x3c8   :  { %4420 = vmatmul.bf16.vlgmr.msrb.gmra.mxu0 %v3975_v10  ;;  %4433 = vmatmul.bf16.vlgmr.msrb.gmra.mxu1 %v3975_v10 }
 0x3c9   :  { %4446 = vmatmul.bf16.vlgmr.msrb.gmra.mxu2 %v3975_v10  ;;  %4459 = vmatmul.bf16.vlgmr.msrb.gmra.mxu3 %v3975_v10  ;;  %v7877_v10 = vld [vmem:[%s13666_s2 + $0x1e0] sm:$0xf0] }
 0x3ca   :  { %7641 = vmatpush.msk.msrb.mxu0 %vm86_vm0, %v4601_v37  ;;  %7643 = vmatpush.msk.msrb.mxu1 %vm86_vm0, %v4602_v29  ;;  %v7880_v11 = vor.u32 %v8559_v9, %v7877_v10  ;;  %v7884_v37 = vor.u32 %v8564_v13, %v7883_v21  ;;  %v7848_v29 = vor.u32 %v8551_v45, %v7845_v46  ;;  %v7811_v9 = vld [vmem:[%s13666_s2 + $0x140] sm:$0xf]  ;;  %v8543_v10 = vld [vmem:[%s13666_s2 + $0x144] sm:$0xf]  ;;  %v7819_v13 = vld [vmem:[%s13666_s2 + $0x148] sm:$0xf]  ;;  %v12643_v45 = vpop.f32.mrf.mxu2 }
 0x3cb   :  { %7645 = vmatpush.msk.msrb.mxu2 %vm86_vm0, %v4603_v50  ;;  %v8539_v46 = vld [vmem:[%s13666_s2 + $0x11c] sm:$0xf0] }
 0x3cc   :  { %4724 = vmatpush.msrb.mxu0 %v12339_v39  ;;  %4744 = vmatpush.msrb.mxu1 %v12474_v22 }
 0x3cd   :  { %4764 = vmatpush.msrb.mxu2 %v12479_v20 }
 0x3ce   :  { %4725 = vmatpush.msrb.mxu0 %v12354_v2  ;;  %4745 = vmatpush.msrb.mxu1 %v12502_v59 }
 0x3cf   :  { %4765 = vmatpush.msrb.mxu2 %v12507_v60 }
 0x3d0   :  { %4726 = vmatpush.msrb.mxu0 %v12360_v51  ;;  %4746 = vmatpush.msrb.mxu1 %v12522_v52 }
 0x3d1   :  { %4766 = vmatpush.msrb.mxu2 %v12527_v0 }
 0x3d2   :  { %4727 = vmatpush.msrb.mxu0 %v11747_v54  ;;  %v4600_v54 = vld [vmem:[%s13665_s1 + $0x118] sm:$0x7f]  ;;  %4747 = vmatpush.msrb.mxu1 %v12549_v23 }
 0x3d3   :  { %7639 = vmatpush.msk.msra.mxu3 %vm86_vm0, %v4600_v54  ;;  %4767 = vmatpush.msrb.mxu2 %v12554_v42  ;;  %v8556_v54 = vld [vmem:[%s13666_s2 + $0x1a4] sm:$0xf0] }
 0x3d4   :  { %v7852_v50 = vor.u32 %v8556_v54, %v7851_v49  ;;  %v8535_v49 = vld [vmem:[%s13666_s2 + $0x104] sm:$0xf] }
 0x3d5   :  { %4704 = vmatpush.msra.mxu3 %v12401_v35 }
 0x3d7   :  { %4705 = vmatpush.msra.mxu3 %v12419_v17 }
 0x3d8   :  { %7634 = vmatmul.msk.f32.vlgmr.msra.gmra.mxu0 %vm82_vm4, %v12371_v41  ;;  %7636 = vmatmul.msk.f32.vlgmr.msra.gmra.mxu1 %vm82_vm4, %v12371_v41 }
 0x3d9   :  { %4706 = vmatpush.msra.mxu3 %v12438_v12  ;;  %7638 = vmatmul.msk.f32.vlgmr.msra.gmra.mxu2 %vm82_vm4, %v12371_v41 }
 0x3da   :  { %5196 = vmatpush.bf16.msra.mxu0 %v7876_v47  ;;  %5209 = vmatpush.bf16.msra.mxu1 %v7880_v11  ;;  %v8547_v47 = vld [vmem:[%s13666_s2 + $0x15c] sm:$0xf0]  ;;  %v8548_v11 = vld [vmem:[%s13666_s2 + $0x164] sm:$0xf0] }
 0x3db   :  { %4707 = vmatpush.msra.mxu3 %v12455_v1  ;;  %5222 = vmatpush.bf16.msra.mxu2 %v7884_v37  ;;  %v7812_v21 = vor.u32 %v8547_v47, %v7811_v9  ;;  %v7820_v63 = vor.u32 %v8548_v11, %v7819_v13  ;;  %v7747_v13 = vld [vmem:[%s13666_s2 + $0xc0] sm:$0xf] }
 0x3dc   :  { %7640 = vmatmul.msk.f32.vlgmr.msra.gmra.mxu3 %vm82_vm4, %v12371_v41  ;;  %v8531_v11 = vld [vmem:[%s13666_s2 + $0xdc] sm:$0xf0] }
 0x3dd   :  { %7647 = vmatpush.msk.msrb.mxu3 %vm86_vm0, %v4604_v14  ;;  %v8552_v14 = vld [vmem:[%s13666_s2 + $0x18c] sm:$0xf] }
 0x3de   :  { %v7856_v53 = vor.u32 %v8552_v14, %v7853_v24  ;;  %5197 = vmatpush.bf16.msra.mxu0 %v7844_v26  ;;  %5210 = vmatpush.bf16.msra.mxu1 %v7848_v29  ;;  %v7779_v26 = vld [vmem:[%s13666_s2 + $0x100] sm:$0xf]  ;;  %v7781_v14 = vld [vmem:[%s13666_s2 + $0x120] sm:$0xf0]  ;;  %v7787_v24 = vld [vmem:[%s13666_s2 + $0x108] sm:$0xf] }
 0x3df   :  { %4784 = vmatpush.msrb.mxu3 %v12486_v7  ;;  %5223 = vmatpush.bf16.msra.mxu2 %v7852_v50  ;;  %v7780_v50 = vor.u32 %v8539_v46, %v7779_v26  ;;  %v7784_v9 = vor.u32 %v8535_v49, %v7781_v14  ;;  %v8528_v49 = vld [vmem:[%s13666_s2 + $0xcc] sm:$0xf] }
 0x3e0   :  { %7642 = vmatmul.msk.f32.vlgmr.msrb.gmra.mxu0 %vm82_vm4, %v12371_v41  ;;  %7644 = vmatmul.msk.f32.vlgmr.msrb.gmra.mxu1 %vm82_vm4, %v12371_v41 }
 0x3e1   :  { %4785 = vmatpush.msrb.mxu3 %v12512_v58  ;;  %7646 = vmatmul.msk.f32.vlgmr.msrb.gmra.mxu2 %vm82_vm4, %v12371_v41 }
 0x3e2   :  { %5198 = vmatpush.bf16.msra.mxu0 %v7812_v21  ;;  %v7789_v21 = vld [vmem:[%s13666_s2 + $0x128] sm:$0xf0] }
 0x3e3   :  { %4786 = vmatpush.msrb.mxu3 %v12532_v36  ;;  %5224 = vmatpush.bf16.msra.mxu2 %v7820_v63  ;;  %v7748_v63 = vor.u32 %v8531_v11, %v7747_v13  ;;  %v7717_v11 = vld [vmem:[%s13666_s2 + $0xa0] sm:$0xf0] }
 0x3e5   :  { %4787 = vmatpush.msrb.mxu3 %v12559_v44 }
 0x3e6   :  { %7648 = vmatmul.msk.f32.vlgmr.msrb.gmra.mxu3 %vm82_vm4, %v12371_v41  ;;  %v7813_v41 = vld [vmem:[%s13666_s2 + $0x160] sm:$0xf0]  ;;  %5199 = vmatpush.bf16.msra.mxu0 %v7780_v50  ;;  %v7757_v50 = vld [vmem:[%s13666_s2 + $0xe8] sm:$0xf0] }
 0x3e7   :  { %5235 = vmatpush.bf16.msra.mxu3 %v7888_v57  ;;  %v7816_v37 = vor.u32 %v8543_v10, %v7813_v41  ;;  %v7821_v57 = vld [vmem:[%s13666_s2 + $0x168] sm:$0xf0]  ;;  %v7760_v14 = vor.u32 %v8528_v49, %v7757_v50  ;;  %v3963_v49 = vld.sshfl [vmem:[#allocation1] sm:$0xff pattern:$0x75316420] }
 0x3e8   :  { %v7824_v43 = vor.u32 %v8544_v56, %v7821_v57  ;;  %v8536_v10 = vld [vmem:[%s13666_s2 + $0x10c] sm:$0xf]  ;;  %v7749_v56 = vld [vmem:[%s13666_s2 + $0xe0] sm:$0xf0]  ;;  %v7755_v57 = vld [vmem:[%s13666_s2 + $0xc8] sm:$0xf] }
 0x3e9   :  { %5211 = vmatpush.bf16.msra.mxu1 %v7816_v37  ;;  %v7792_v41 = vor.u32 %v8536_v10, %v7789_v21  ;;  %v8527_v37 = vld [vmem:[%s13666_s2 + $0xc4] sm:$0xf]  ;;  %v3964_v50 = vld.sshfl [vmem:[#allocation1 + $0x8] sm:$0xff pattern:$0x75316420] }
 0x3ea   :  { %v7752_v26 = vor.u32 %v8527_v37, %v7749_v56  ;;  %5200 = vmatpush.bf16.msra.mxu0 %v7748_v63  ;;  %v8519_v10 = vld [vmem:[%s13666_s2 + $0x84] sm:$0xf]  ;;  %v7723_v37 = vld [vmem:[%s13666_s2 + $0x88] sm:$0xf] }
 0x3eb   :  { %5236 = vmatpush.bf16.msra.mxu3 %v7856_v53  ;;  %v8540_v53 = vld [vmem:[%s13666_s2 + $0x124] sm:$0xf0]  ;;  %v7720_v56 = vor.u32 %v8519_v10, %v7717_v11  ;;  %v3956_v11 = vsel %vm20_vm5, %v12492_v40, %v12596_v3  ;;  %v7651_v40 = vld [vmem:[%s13666_s2] sm:$0xf]  ;;  %v8503_v3 = vld [vmem:[%s13666_s2 + $0x4] sm:$0xf] }
 0x3ec   :  { %v7788_v47 = vor.u32 %v8540_v53, %v7787_v24  ;;  %v8524_v63 = vld [vmem:[%s13666_s2 + $0xa4] sm:$0xf0] }
 0x3ed   :  { %5212 = vmatpush.bf16.msra.mxu1 %v7784_v9  ;;  %v7715_v9 = vld [vmem:[%s13666_s2 + $0x80] sm:$0xf] }
 0x3ee   :  { %5225 = vmatpush.bf16.msra.mxu2 %v7788_v47  ;;  %v8523_v47 = vld [vmem:[%s13666_s2 + $0x9c] sm:$0xf0] }
 0x3ef   :  { %5237 = vmatpush.bf16.msra.mxu3 %v7824_v43  ;;  %v8532_v43 = vld [vmem:[%s13666_s2 + $0xe4] sm:$0xf0]  ;;  %v7716_v13 = vor.u32 %v8523_v47, %v7715_v9  ;;  %v7683_v9 = vld [vmem:[%s13666_s2 + $0x40] sm:$0xf]  ;;  %v8511_v47 = vld [vmem:[%s13666_s2 + $0x44] sm:$0xf] }
 0x3f0   :  { %v7756_v46 = vor.u32 %v8532_v43, %v7755_v57  ;;  %v7724_v57 = vor.u32 %v8524_v63, %v7723_v37  ;;  %v8520_v43 = vld [vmem:[%s13666_s2 + $0x8c] sm:$0xf]  ;;  %v3957_v37 = vsel %vm20_vm5, %v12494_v38, %v12598_v30  ;;  %v8507_v38 = vld [vmem:[%s13666_s2 + $0x1c] sm:$0xf0]  ;;  %v3971_v30 = vadd.f32 %v3963_v49, %v3956_v11 }
 0x3f1   :  { %5213 = vmatpush.bf16.msra.mxu1 %v7752_v26  ;;  %v7725_v26 = vld [vmem:[%s13666_s2 + $0xa8] sm:$0xf0]  ;;  %5201 = vmatpush.bf16.msra.mxu0 %v7716_v13  ;;  %v8516_v13 = vld [vmem:[%s13666_s2 + $0x64] sm:$0xf0] }
 0x3f2   :  { %5226 = vmatpush.bf16.msra.mxu2 %v7756_v46  ;;  %v7728_v46 = vor.u32 %v8520_v43, %v7725_v26  ;;  %v7693_v43 = vld [vmem:[%s13666_s2 + $0x68] sm:$0xf0] }
 0x3f3   :  { %5238 = vmatpush.bf16.msra.mxu3 %v7792_v41 }
 0x3f5   :  { %5214 = vmatpush.bf16.msra.mxu1 %v7720_v56 }
 0x3f6   :  { %5227 = vmatpush.bf16.msra.mxu2 %v7724_v57  ;;  %v8512_v57 = vld [vmem:[%s13666_s2 + $0x4c] sm:$0xf] }
 0x3f7   :  { %5239 = vmatpush.bf16.msra.mxu3 %v7760_v14  ;;  %v8515_v14 = vld [vmem:[%s13666_s2 + $0x5c] sm:$0xf0]  ;;  %v7696_v26 = vor.u32 %v8512_v57, %v7693_v43  ;;  %v8508_v57 = vld [vmem:[%s13666_s2 + $0x24] sm:$0xf0]  ;;  %v7891_v43 = vld [vmem:[%s13666_s2 + $0x1d0] sm:$0xf] }
 0x3f8   :  { %v7684_v10 = vor.u32 %v8515_v14, %v7683_v9 }
 0x3fa   :  { %5202 = vmatpush.bf16.msra.mxu0 %v7684_v10  ;;  %v7653_v10 = vld [vmem:[%s13666_s2 + $0x20] sm:$0xf0] }
 0x3fb   :  { %5240 = vmatpush.bf16.msra.mxu3 %v7728_v46  ;;  %v3972_v46 = vadd.f32 %v3964_v50, %v3957_v37  ;;  %v7656_v11 = vor.u32 %v8503_v3, %v7653_v10  ;;  %v3959_v10 = vsel %vm20_vm5, %v12561_v25, %v12641_v61  ;;  %v8557_v25 = vld [vmem:[%s13666_s2 + $0x1ac] sm:$0xf0]  ;;  %v8553_v61 = vld [vmem:[%s13666_s2 + $0x194] sm:$0xf] }
 0x3ff   :  { %5241 = vmatpush.bf16.msra.mxu3 %v7696_v26  ;;  %v8561_v26 = vld [vmem:[%s13666_s2 + $0x1d4] sm:$0xf] }
 0x435   :  { %v12654_v54 = vpop.f32.mrf.mxu0  ;;  %v12656_v29 = vpop.f32.mrf.mxu1 }
 0x43c   :  { %v12697_v24 = vpop.f32.mrf.mxu2  ;;  %v12699_v53 = vpop.f32.mrf.mxu3 }
 0x43d   :  { %v4371_v21 = vpop.f32.mrf.mxu0  ;;  %v4384_v41 = vpop.f32.mrf.mxu1 }
 0x43e   :  { %v7685_v21 = vld [vmem:[%s13666_s2 + $0x60] sm:$0xf0]  ;;  %v7691_v41 = vld [vmem:[%s13666_s2 + $0x48] sm:$0xf] }
 0x43f   :  { %v7688_v63 = vor.u32 %v8511_v47, %v7685_v21  ;;  %v7692_v56 = vor.u32 %v8516_v13, %v7691_v41  ;;  %v7652_v41 = vor.u32 %v8507_v38, %v7651_v40  ;;  %v7659_v13 = vld [vmem:[%s13666_s2 + $0x8] sm:$0xf]  ;;  %v7893_v38 = vld [vmem:[%s13666_s2 + $0x1f0] sm:$0xf0] }
 0x440   :  { %v7660_v37 = vor.u32 %v8508_v57, %v7659_v13 }
 0x441   :  { %5215 = vmatpush.bf16.msra.mxu1 %v7688_v63  ;;  %5228 = vmatpush.bf16.msra.mxu2 %v7692_v56  ;;  %v8504_v63 = vld [vmem:[%s13666_s2 + $0xc] sm:$0xf] }
 0x442   :  { %v7661_v56 = vld [vmem:[%s13666_s2 + $0x28] sm:$0xf0]  ;;  %5203 = vmatpush.bf16.msra.mxu0 %v7652_v41 }
 0x443   :  { %v7664_v40 = vor.u32 %v8504_v63, %v7661_v56  ;;  %v7859_v63 = vld [vmem:[%s13666_s2 + $0x190] sm:$0xf]  ;;  %v7867_v56 = vld [vmem:[%s13666_s2 + $0x198] sm:$0xf] }
 0x444   :  { %v4397_v9 = vpop.f32.mrf.mxu2  ;;  %v4410_v14 = vpop.f32.mrf.mxu3 }
 0x445   :  { %v4421_v47 = vpop.f32.mrf.mxu0  ;;  %v4434_v21 = vpop.f32.mrf.mxu1  ;;  %5216 = vmatpush.bf16.msra.mxu1 %v7656_v11  ;;  %5229 = vmatpush.bf16.msra.mxu2 %v7660_v37  ;;  %v7860_v11 = vor.u32 %v8557_v25, %v7859_v63  ;;  %v7861_v37 = vld [vmem:[%s13666_s2 + $0x1b0] sm:$0xf0] }
 0x446   :  { %v4464_v49 = vsel %vm20_vm5, %v12654_v54, %v4421_v47  ;;  %v4465_v50 = vsel %vm20_vm5, %v12656_v29, %v4434_v21  ;;  %v3966_v54 = vld.sshfl [vmem:[#allocation1 + $0x18] sm:$0xff pattern:$0x75316420]  ;;  %v8565_v29 = vld [vmem:[%s13666_s2 + $0x1ec] sm:$0xf0]  ;;  %v7896_v47 = vor.u32 %v8561_v26, %v7893_v38  ;;  %5242 = vmatpush.bf16.msra.mxu3 %v7664_v40 }
 0x447   :  { %v4468_v9 = vadd.f32 %v4464_v49, %v3971_v30  ;;  %v4469_v14 = vadd.f32 %v4465_v50, %v3972_v46  ;;  %v7892_v3 = vor.u32 %v8565_v29, %v7891_v43  ;;  %v7899_v30 = vld [vmem:[%s13666_s2 + $0x1d8] sm:$0xf]  ;;  %v8562_v21 = vld [vmem:[%s13666_s2 + $0x1dc] sm:$0xf]  ;;  %v7864_v29 = vor.u32 %v8553_v61, %v7861_v37 }
 0x448   :  { %v8566_v46 = vld [vmem:[%s13666_s2 + $0x1f4] sm:$0xf0]  ;;  %v7901_v49 = vld [vmem:[%s13666_s2 + $0x1f8] sm:$0xf0] }
 0x449   :  { %v7630_v41 = vmul.f32 -1.442695, %v4468_v9  ;;  %v7631_v13 = vmul.f32 -1.442695, %v4469_v14  ;;  %v7900_v57 = vor.u32 %v8566_v46, %v7899_v30  ;;  %5248 = vmatpush.bf16.msrb.mxu0 %v7892_v3  ;;  %v7904_v50 = vor.u32 %v8562_v21, %v7901_v49  ;;  %5261 = vmatpush.bf16.msrb.mxu1 %v7896_v47  ;;  %v8558_v43 = vld [vmem:[%s13666_s2 + $0x1b4] sm:$0xf0] }
 0x44a   :  { %v3974_v9 = vadd.f32 %v3966_v54, %v3959_v10  ;;  %v7868_v26 = vor.u32 %v8558_v43, %v7867_v56  ;;  %v8554_v38 = vld [vmem:[%s13666_s2 + $0x19c] sm:$0xf]  ;;  %v7827_v21 = vld [vmem:[%s13666_s2 + $0x150] sm:$0xf]  ;;  %v7835_v49 = vld [vmem:[%s13666_s2 + $0x158] sm:$0xf] }
 0x44b   :  { %8714 = vpow2.f32 %v7630_v41  ;;  %5274 = vmatpush.bf16.msrb.mxu2 %v7900_v57  ;;  %5287 = vmatpush.bf16.msrb.mxu3 %v7904_v50  ;;  %v7869_v3 = vld [vmem:[%s13666_s2 + $0x1b8] sm:$0xf0]  ;;  %v8549_v10 = vld [vmem:[%s13666_s2 + $0x16c] sm:$0xf0]  ;;  %v8545_v41 = vld [vmem:[%s13666_s2 + $0x154] sm:$0xf] }
 0x44c   :  { %8716 = vpow2.f32 %v7631_v13  ;;  %v4447_v14 = vpop.f32.mrf.mxu2  ;;  %v4460_v40 = vpop.f32.mrf.mxu3  ;;  %v7872_v46 = vor.u32 %v8554_v38, %v7869_v3  ;;  %v7828_v57 = vor.u32 %v8549_v10, %v7827_v21  ;;  %v8550_v50 = vld [vmem:[%s13666_s2 + $0x174] sm:$0xf0]  ;;  %v8546_v61 = vld [vmem:[%s13666_s2 + $0x15c] sm:$0xf]  ;;  %v8537_v38 = vld [vmem:[%s13666_s2 + $0x114] sm:$0xf] }
 0x44d   :  { %v4467_v47 = vsel %vm20_vm5, %v12699_v53, %v4460_v40  ;;  %v4423_v30 = vpop.f32.mrf.mxu0  ;;  %v4436_v54 = vpop.f32.mrf.mxu1  ;;  %5249 = vmatpush.bf16.msrb.mxu0 %v7860_v11  ;;  %v7829_v53 = vld [vmem:[%s13666_s2 + $0x170] sm:$0xf0]  ;;  %5262 = vmatpush.bf16.msrb.mxu1 %v7864_v29  ;;  %v7836_v25 = vor.u32 %v8550_v50, %v7835_v49  ;;  %v7837_v11 = vld [vmem:[%s13666_s2 + $0x178] sm:$0xf0]  ;;  %v3958_v40 = vsel %vm20_vm5, %v12563_v5, %v12643_v45  ;;  %v7795_v29 = vld [vmem:[%s13666_s2 + $0x110] sm:$0xf] }
 0x44e   :  { %v4471_v13 = vadd.f32 %v4467_v47, %v3974_v9  ;;  %v7832_v63 = vor.u32 %v8545_v41, %v7829_v53  ;;  %v3965_v37 = vld.sshfl [vmem:[#allocation1 + $0x10] sm:$0xff pattern:$0x75316420]  ;;  %v7840_v43 = vor.u32 %v8546_v61, %v7837_v11  ;;  %v7803_v45 = vld [vmem:[%s13666_s2 + $0x118] sm:$0xf] }
 0x44f   :  { %5275 = vmatpush.bf16.msrb.mxu2 %v7868_v26  ;;  %5288 = vmatpush.bf16.msrb.mxu3 %v7872_v46  ;;  %v8541_v26 = vld [vmem:[%s13666_s2 + $0x12c] sm:$0xf0]  ;;  %v7797_v5 = vld [vmem:[%s13666_s2 + $0x130] sm:$0xf0]  ;;  %v4466_v46 = vsel %vm20_vm5, %v12697_v24, %v4447_v14  ;;  %v8542_v10 = vld [vmem:[%s13666_s2 + $0x134] sm:$0xf0] }
 0x450   :  { %v7632_v56 = vmul.f32 -1.442695, %v4471_v13  ;;  %v7796_v30 = vor.u32 %v8541_v26, %v7795_v29  ;;  %v7800_v21 = vor.u32 %v8537_v38, %v7797_v5  ;;  %v8538_v41 = vld [vmem:[%s13666_s2 + $0x11c] sm:$0xf]  ;;  %v3973_v13 = vadd.f32 %v3965_v37, %v3958_v40  ;;  %v7763_v14 = vld [vmem:[%s13666_s2 + $0xd0] sm:$0xf] }
 0x451   :  { %v8715_v9 = vpop.eup %8714  ;;  %5250 = vmatpush.bf16.msrb.mxu0 %v7828_v57  ;;  %5263 = vmatpush.bf16.msrb.mxu1 %v7832_v63  ;;  %v7805_v24 = vld [vmem:[%s13666_s2 + $0x138] sm:$0xf0]  ;;  %v7804_v50 = vor.u32 %v8542_v10, %v7803_v45  ;;  %v8529_v61 = vld [vmem:[%s13666_s2 + $0xd4] sm:$0xf]  ;;  %v8534_v40 = vld [vmem:[%s13666_s2 + $0xf4] sm:$0xf0] }
 0x452   :  { %v8717_v3 = vpop.eup %8716  ;;  %v12879_v47 = vadd.f32 1.0, %v8715_v9  ;;  %8718 = vpow2.f32 %v7632_v56  ;;  %v4470_v49 = vadd.f32 %v4466_v46, %v3973_v13  ;;  %v7808_v63 = vor.u32 %v8538_v41, %v7805_v24  ;;  %v7765_v37 = vld [vmem:[%s13666_s2 + $0xf0] sm:$0xf0]  ;;  %v7771_v56 = vld [vmem:[%s13666_s2 + $0xd8] sm:$0xf] }
 0x453   :  { %v12887_v54 = vadd.f32 1.0, %v8717_v3  ;;  %5276 = vmatpush.bf16.msrb.mxu2 %v7836_v25  ;;  %5289 = vmatpush.bf16.msrb.mxu3 %v7840_v43  ;;  %v8533_v25 = vld [vmem:[%s13666_s2 + $0xec] sm:$0xf0]  ;;  %v7768_v9 = vor.u32 %v8529_v61, %v7765_v37  ;;  %v8530_v29 = vld [vmem:[%s13666_s2 + $0xdc] sm:$0xf]  ;;  %v7772_v3 = vor.u32 %v8534_v40, %v7771_v56 }
 0x454   :  { %8720 = vrcp.f32 %v12879_v47  ;;  %v4449_v57 = vpop.f32.mrf.mxu2  ;;  %v4462_v53 = vpop.f32.mrf.mxu3  ;;  %v7764_v11 = vor.u32 %v8533_v25, %v7763_v14  ;;  %v7773_v26 = vld [vmem:[%s13666_s2 + $0xf8] sm:$0xf0]  ;;  %v7731_v5 = vld [vmem:[%s13666_s2 + $0x90] sm:$0xf]  ;;  %v8521_v10 = vld [vmem:[%s13666_s2 + $0x94] sm:$0xf]  ;;  %vm4481_vm8 = vweird.f32 %v12879_v47 }
 0x455   :  { %8722 = vrcp.f32 %v12887_v54  ;;  %5251 = vmatpush.bf16.msrb.mxu0 %v7796_v30  ;;  %5264 = vmatpush.bf16.msrb.mxu1 %v7800_v21  ;;  %v7776_v30 = vor.u32 %v8530_v29, %v7773_v26  ;;  %v8525_v45 = vld [vmem:[%s13666_s2 + $0xac] sm:$0xf0]  ;;  %v7733_v41 = vld [vmem:[%s13666_s2 + $0xb0] sm:$0xf0]  ;;  %v7739_v13 = vld [vmem:[%s13666_s2 + $0x98] sm:$0xf]  ;;  %vm4500_vm11 = vweird.f32 %v12887_v54 }
 0x456   :  { %8724 = vtanh.f32 %v4470_v49  ;;  %v7732_v21 = vor.u32 %v8525_v45, %v7731_v5  ;;  %v8526_v24 = vld [vmem:[%s13666_s2 + $0xb4] sm:$0xf0]  ;;  %v8522_v14 = vld [vmem:[%s13666_s2 + $0x9c] sm:$0xf]  ;;  %v4485_v25 = vand.u32 2147483647, %v12879_v47  ;;  %v7736_v56 = vor.u32 %v8521_v10, %v7733_v41 }
 0x457   :  { %5277 = vmatpush.bf16.msrb.mxu2 %v7804_v50  ;;  %5290 = vmatpush.bf16.msrb.mxu3 %v7808_v63  ;;  %v7741_v49 = vld [vmem:[%s13666_s2 + $0xb8] sm:$0xf0]  ;;  %v4506_v63 = vand.u32 2147483648, %v12887_v54  ;;  %v4487_v61 = vand.u32 2147483648, %v12879_v47  ;;  %v8517_v40 = vld [vmem:[%s13666_s2 + $0x6c] sm:$0xf0] }
 0x458   :  { %v8719_v43 = vpop.eup %8718  ;;  %v8513_v29 = vld [vmem:[%s13666_s2 + $0x54] sm:$0xf]  ;;  %v7707_v41 = vld [vmem:[%s13666_s2 + $0x58] sm:$0xf]  ;;  %vm13002_vm10 = vcmp.eq.f32.partialorder %v4485_v25, 8.507059e+37 }
 0x459   :  { %v12927_v38 = vadd.f32 1.0, %v8719_v43  ;;  %5252 = vmatpush.bf16.msrb.mxu0 %v7764_v11  ;;  %5265 = vmatpush.bf16.msrb.mxu1 %v7768_v9  ;;  %v7699_v11 = vld [vmem:[%s13666_s2 + $0x50] sm:$0xf]  ;;  %v7740_v43 = vor.u32 %v8526_v24, %v7739_v13  ;;  %v7744_v9 = vor.u32 %v8522_v14, %v7741_v49  ;;  %v7701_v5 = vld [vmem:[%s13666_s2 + $0x70] sm:$0xf0] }
 0x45a   :  { %v12935_v46 = vpop.eup %8720  ;;  %v7704_v10 = vor.u32 %v8513_v29, %v7701_v5  ;;  %v8518_v13 = vld [vmem:[%s13666_s2 + $0x74] sm:$0xf0]  ;;  %v7709_v49 = vld [vmem:[%s13666_s2 + $0x78] sm:$0xf0]  ;;  %v7667_v29 = vld [vmem:[%s13666_s2 + $0x10] sm:$0xf] }
 0x45b   :  { %v12946_v57 = vpop.eup %8722  ;;  %v4477_v53 = vmul.f32 %v12935_v46, %v12879_v47  ;;  %8726 = vrcp.f32 %v12927_v38  ;;  %5278 = vmatpush.bf16.msrb.mxu2 %v7772_v3  ;;  %5291 = vmatpush.bf16.msrb.mxu3 %v7776_v30  ;;  %vm4482_vm6 = vweird.f32 %v12935_v46  ;;  %v4504_v3 = vand.u32 2147483647, %v12887_v54  ;;  %v8509_v25 = vld [vmem:[%s13666_s2 + $0x2c] sm:$0xf0] }
 0x45c   :  { %v4496_v50 = vmul.f32 %v12946_v57, %v12887_v54  ;;  %v7700_v30 = vor.u32 %v8517_v40, %v7699_v11  ;;  %vm4501_vm7 = vweird.f32 %v12946_v57  ;;  %v7708_v14 = vor.u32 %v8518_v13, %v7707_v41  ;;  %vm12998_vm9 = vmor %vm4481_vm8, %vm4482_vm6  ;;  %v7675_v41 = vld [vmem:[%s13666_s2 + $0x18] sm:$0xf] }
 0x45d   :  { %v4478_v37 = vsub.f32 1.0, %v4477_v53  ;;  %5253 = vmatpush.bf16.msrb.mxu0 %v7732_v21  ;;  %5266 = vmatpush.bf16.msrb.mxu1 %v7736_v56  ;;  %v8514_v21 = vld [vmem:[%s13666_s2 + $0x5c] sm:$0xf]  ;;  %v8725_v53 = vpop.eup %8724  ;;  %v4488_v47 = vor.u32 1.1754944e-38, %v4487_v61  ;;  %v8505_v61 = vld [vmem:[%s13666_s2 + $0x14] sm:$0xf]  ;;  %vm13020_vm12 = vmor %vm4500_vm11, %vm4501_vm7  ;;  %v7668_v5 = vor.u32 %v8509_v25, %v7667_v29  ;;  %vm4520_vm15 = vweird.f32 %v12927_v38 }
 0x45e   :  { %v4497_v26 = vsub.f32 1.0, %v4496_v50  ;;  %vm4505_vm13 = vcmp.eq.f32.partialorder %v4504_v3, 8.507059e+37  ;;  %v8510_v3 = vld [vmem:[%s13666_s2 + $0x34] sm:$0xf0] }
 0x45f   :  { %v4479_v45 = vmul.f32 %v12935_v46, %v4478_v37  ;;  %5279 = vmatpush.bf16.msrb.mxu2 %v7740_v43  ;;  %5292 = vmatpush.bf16.msrb.mxu3 %v7744_v9  ;;  %v7712_v43 = vor.u32 %v8514_v21, %v7709_v49  ;;  %v7677_v37 = vld [vmem:[%s13666_s2 + $0x38] sm:$0xf0] }
 0x460   :  { %v4498_v24 = vmul.f32 %v12946_v57, %v4497_v26  ;;  %v4507_v26 = vor.u32 1.1754944e-38, %v4506_v63 }
 0x461   :  { %v8727_v50 = vpop.eup %8726  ;;  %v4480_v11 = vadd.f32 %v12935_v46, %v4479_v45  ;;  %5254 = vmatpush.bf16.msrb.mxu0 %v7700_v30  ;;  %5267 = vmatpush.bf16.msrb.mxu1 %v7704_v10  ;;  %v7669_v45 = vld [vmem:[%s13666_s2 + $0x30] sm:$0xf0]  ;;  %v8506_v10 = vld [vmem:[%s13666_s2 + $0x1c] sm:$0xf] }
 0x462   :  { %v4499_v9 = vadd.f32 %v12946_v57, %v4498_v24  ;;  %v4516_v40 = vmul.f32 %v8727_v50, %v12927_v38  ;;  %v7680_v56 = vor.u32 %v8506_v10, %v7677_v37  ;;  %vm4521_vm14 = vweird.f32 %v8727_v50 }
 0x463   :  { %v4484_v30 = vsel %vm12998_vm9, %v12935_v46, %v4480_v11  ;;  %5280 = vmatpush.bf16.msrb.mxu2 %v7708_v14  ;;  %5293 = vmatpush.bf16.msrb.mxu3 %v7712_v43  ;;  %v7672_v46 = vor.u32 %v8505_v61, %v7669_v45  ;;  %v7676_v11 = vor.u32 %v8510_v3, %v7675_v41  ;;  %vm4522_vm6 = vmor %vm4520_vm15, %vm4521_vm14  ;;  %v5435_v3 = vld [vmem:[%s13665_s1 + $0x110] sm:$0x7f] }
 0x464   :  { %v4489_v13 = vsel %vm13002_vm10, %v4488_v47, %v4484_v30  ;;  %v4503_v63 = vsel %vm13020_vm12, %v12946_v57, %v4499_v9  ;;  %v4517_v21 = vsub.f32 1.0, %v4516_v40  ;;  %v4524_v9 = vand.u32 2147483647, %v12927_v38  ;;  %v5433_v30 = vld [vmem:[%s13665_s1 + $0x100] sm:$0x7f] }
 0x465   :  { %v4508_v24 = vsel %vm4505_vm13, %v4507_v26, %v4503_v63  ;;  %v4531_v49 = vmul.f32 %v8725_v53, %v4489_v13  ;;  %5255 = vmatpush.bf16.msrb.mxu0 %v7668_v5  ;;  %5268 = vmatpush.bf16.msrb.mxu1 %v7672_v46  ;;  %v4526_v53 = vand.u32 2147483648, %v12927_v38  ;;  %v5437_v5 = vld [vmem:[%s13665_s1 + $0x120] sm:$0x7f]  ;;  %v5385_v13 = vld [vmem:[%s13664_s0 + $0x7] sm:$0x1] }
 0x466   :  { %v4530_v57 = vmul.f32 %v4508_v24, %v12297_v27  ;;  %v4518_v14 = vmul.f32 %v8727_v50, %v4517_v21  ;;  %vm4525_vm7 = vcmp.eq.f32.partialorder %v4524_v9, 8.507059e+37  ;;  %v5405_v63 = vld [vmem:[%s13665_s1 + $0x20] sm:$0xff] }
 0x467   :  { %5281 = vmatpush.bf16.msrb.mxu2 %v7676_v11  ;;  %5294 = vmatpush.bf16.msrb.mxu3 %v7680_v56  ;;  %v4527_v40 = vor.u32 1.1754944e-38, %v4526_v53  ;;  %v8120_v24 = vld [vmem:[%s13666_s2 + $0x1a0] sm:$0xf0]  ;;  %v8620_v11 = vld [vmem:[%s13666_s2 + $0x1a4] sm:$0xf0] }
 0x468   :  { %v13048_v47 = vadd.f32 %v4531_v49, %v4530_v57  ;;  %v4519_v43 = vadd.f32 %v8727_v50, %v4518_v14  ;;  %v8126_v49 = vld [vmem:[%s13666_s2 + $0x188] sm:$0xf]  ;;  %v8616_v14 = vld [vmem:[%s13666_s2 + $0x18c] sm:$0xf]  ;;  %v8086_v53 = vld [vmem:[%s13666_s2 + $0x140] sm:$0xf] }
 0x469   :  { %v8127_v57 = vor.u32 %v8620_v11, %v8126_v49  ;;  %v8128_v56 = vld [vmem:[%s13666_s2 + $0x1a8] sm:$0xf0]  ;;  %v8611_v9 = vld [vmem:[%s13666_s2 + $0x15c] sm:$0xf0]  ;;  %v7992_v11 = vld [vmem:[%s13666_s2 + $0xa0] sm:$0xf0] }
 0x46a   :  { %8728 = vtanh.f32 %v13048_v47  ;;  %v4523_v27 = vsel %vm4522_vm6, %v8727_v50, %v4519_v43  ;;  %v8131_v43 = vor.u32 %v8616_v14, %v8128_v56 }
 0x46b   :  { %v4528_v25 = vsel %vm4525_vm7, %v4527_v40, %v4523_v27  ;;  %v8607_v27 = vld [vmem:[%s13666_s2 + $0x144] sm:$0xf]  ;;  %v8087_v40 = vor.u32 %v8611_v9, %v8086_v53  ;;  %v8000_v53 = vld [vmem:[%s13666_s2 + $0xa8] sm:$0xf0] }
 0x470   :  { %v8729_v29 = vpop.eup %8728 }
 0x471   :  { %v4534_v61 = vmul.f32 %v8729_v29, %v4528_v25  ;;  %v8088_v29 = vld [vmem:[%s13666_s2 + $0x160] sm:$0xf0]  ;;  %v8094_v25 = vld [vmem:[%s13666_s2 + $0x148] sm:$0xf] }
 0x473   :  { %v4536_v54 = vrot.slane %v4534_v61, 1  ;;  %4538 = vst [vmem:[#allocation2 + $0x5] sm:$0x1] %v4534_v61  ;;  %v4811_v26 = vpack.c.bf16 %v4534_v61, %v4534_v61 }
 0x474   :  { %4540 = vst [vmem:[#allocation1] sm:$0xff] %v4534_v61  ;;  %v8612_v61 = vld [vmem:[%s13666_s2 + $0x164] sm:$0xf0] }
 0x475   :  { %4539 = vst [vmem:[#allocation2 + $0x15] sm:$0x1] %v4536_v54  ;;  %5204 = vmatmul.bf16.vlgmr.msra.gmra.mxu0 %v4811_v26  ;;  %5217 = vmatmul.bf16.vlgmr.msra.gmra.mxu1 %v4811_v26  ;;  %v8091_v54 = vor.u32 %v8607_v27, %v8088_v29  ;;  %v7958_v29 = vld [vmem:[%s13666_s2 + $0x40] sm:$0xf] }
 0x476   :  { %5230 = vmatmul.bf16.vlgmr.msra.gmra.mxu2 %v4811_v26  ;;  %5243 = vmatmul.bf16.vlgmr.msra.gmra.mxu3 %v4811_v26 }
 0x477   :  { %7908 = vmatpush.msk.msra.mxu0 %vm86_vm0, %v5433_v30  ;;  %7912 = vmatpush.msk.msra.mxu2 %vm86_vm0, %v5435_v3  ;;  %v8608_v30 = vld [vmem:[%s13666_s2 + $0x14c] sm:$0xf] }
 0x478   :  { %v8600_v3 = vld [vmem:[%s13666_s2 + $0x10c] sm:$0xf] }
 0x479   :  { %5480 = vmatpush.msra.mxu0 %v12309_v55  ;;  %v5386_v55 = vld [vmem:[%s13664_s0 + $0xf] sm:$0x1]  ;;  %5520 = vmatpush.msra.mxu2 %v12396_v32  ;;  %v5439_v32 = vld [vmem:[%s13665_s1 + $0x130] sm:$0x7f] }
 0x47b   :  { %v4542_v38 = vld [vmem:[#allocation1 + $0x2] ss:$9 sm:$0xff]  ;;  %5481 = vmatpush.msra.mxu0 %v12315_v48  ;;  %v5387_v48 = vld [vmem:[%s13664_s0] sm:$0x1]  ;;  %5521 = vmatpush.msra.mxu2 %v12412_v34  ;;  %v13133_v34 = vpop.f32.mrf.mxu1 }
 0x47c   :  { %v4544_v50 = vld [vmem:[#allocation1 + $0x3] ss:$9 sm:$0xff]  ;;  %4547 = vst [vmem:[#allocation2 + $0xa] sm:$0x1] %v4542_v38  ;;  %v5396_v45 = vrot.slane %v5387_v48, 6 }
 0x47d   :  { %4548 = vst [vmem:[#allocation2 + $0x1a] sm:$0x1] %v4544_v50  ;;  %5482 = vmatpush.msra.mxu0 %v12321_v19  ;;  %v5388_v19 = vld [vmem:[%s13664_s0 + $0x8] sm:$0x1]  ;;  %5522 = vmatpush.msra.mxu2 %v12433_v62  ;;  %v8623_v62 = vld [vmem:[%s13666_s2 + $0x1c4] sm:$0xf] }
 0x47e   :  { %4796 = vst [vmem:[#allocation1] ss:$2 sm:$0xff] %v9142_v4  ;;  %v5397_v41 = vrot.slane %v5388_v19, 5  ;;  %v8096_v38 = vld [vmem:[%s13666_s2 + $0x168] sm:$0xf0] }
 0x47f   :  { %4798 = vst [vmem:[#allocation1 + $0x10] ss:$2 sm:$0xff] %v9163_v8  ;;  %5483 = vmatpush.msra.mxu0 %v12327_v18  ;;  %v5391_v18 = vrot.slane %v5386_v55, 7  ;;  %5523 = vmatpush.msra.mxu2 %v12450_v31  ;;  %v8158_v31 = vld [vmem:[%s13666_s2 + $0x1c8] sm:$0xf]  ;;  %v8099_v50 = vor.u32 %v8608_v30, %v8096_v38 }
 0x480   :  { %v5398_v46 = vsel %vm37_vm2, %v5397_v41, %v5396_v45  ;;  %v8054_v48 = vld [vmem:[%s13666_s2 + $0x100] sm:$0xf]  ;;  %v7966_v30 = vld [vmem:[%s13666_s2 + $0x48] sm:$0xf] }
 0x481   :  { %v5392_v21 = vsel %vm30_vm1, %v5391_v18, %v5385_v13  ;;  %v8603_v19 = vld [vmem:[%s13666_s2 + $0x11c] sm:$0xf0]  ;;  %v8599_v18 = vld [vmem:[%s13666_s2 + $0x104] sm:$0xf]  ;;  %v8580_v38 = vld [vmem:[%s13666_s2 + $0x64] sm:$0xf0] }
 0x482   :  { %v8055_v13 = vor.u32 %v8603_v19, %v8054_v48 }
 0x485   :  { %5256 = vmatmul.bf16.vlgmr.msrb.gmra.mxu0 %v4811_v26  ;;  %5269 = vmatmul.bf16.vlgmr.msrb.gmra.mxu1 %v4811_v26  ;;  %v4799_v27 = vld.sshfl [vmem:[#allocation1] sm:$0xff pattern:$0x75316420] }
 0x486   :  { %5282 = vmatmul.bf16.vlgmr.msrb.gmra.mxu2 %v4811_v26  ;;  %5295 = vmatmul.bf16.vlgmr.msrb.gmra.mxu3 %v4811_v26  ;;  %v8095_v26 = vor.u32 %v8612_v61, %v8094_v25  ;;  %v8579_v25 = vld [vmem:[%s13666_s2 + $0x5c] sm:$0xf0]  ;;  %v8575_v61 = vld [vmem:[%s13666_s2 + $0x44] sm:$0xf] }
 0x487   :  { %7916 = vmatpush.msk.msrb.mxu0 %vm86_vm0, %v5437_v5  ;;  %7920 = vmatpush.msk.msrb.mxu2 %vm86_vm0, %v5439_v32  ;;  %v8022_v32 = vld [vmem:[%s13666_s2 + $0xc0] sm:$0xf] }
 0x489   :  { %5560 = vmatpush.msrb.mxu0 %v12339_v39  ;;  %v5400_v39 = vsel %vm40_vm3, %v5392_v21, %v5398_v46  ;;  %5600 = vmatpush.msrb.mxu2 %v12479_v20  ;;  %v13167_v20 = vpop.f32.mrf.mxu2  ;;  %v8062_v21 = vld [vmem:[%s13666_s2 + $0x108] sm:$0xf] }
 0x48a   :  { %v8604_v46 = vld [vmem:[%s13666_s2 + $0x124] sm:$0xf0] }
 0x48b   :  { %5561 = vmatpush.msrb.mxu0 %v12354_v2  ;;  %v5434_v2 = vld [vmem:[%s13665_s1 + $0x108] sm:$0x7f]  ;;  %5601 = vmatpush.msrb.mxu2 %v12507_v60 }
 0x48c   :  { %7910 = vmatpush.msk.msra.mxu1 %vm86_vm0, %v5434_v2  ;;  %v8624_v60 = vld [vmem:[%s13666_s2 + $0x1cc] sm:$0xf]  ;;  %v8063_v2 = vor.u32 %v8604_v46, %v8062_v21 }
 0x48d   :  { %5562 = vmatpush.msrb.mxu0 %v12360_v51  ;;  %v5436_v51 = vld [vmem:[%s13665_s1 + $0x118] sm:$0x7f]  ;;  %5602 = vmatpush.msrb.mxu2 %v12527_v0  ;;  %v8118_v0 = vld [vmem:[%s13666_s2 + $0x180] sm:$0xf] }
 0x48e   :  { %7914 = vmatpush.msk.msra.mxu3 %vm86_vm0, %v5436_v51  ;;  %5500 = vmatpush.msra.mxu1 %v12391_v33  ;;  %v5438_v33 = vld [vmem:[%s13665_s1 + $0x128] sm:$0x7f] }
 0x48f   :  { %5563 = vmatpush.msrb.mxu0 %v5405_v63  ;;  %5603 = vmatpush.msrb.mxu2 %v12554_v42  ;;  %v8056_v63 = vld [vmem:[%s13666_s2 + $0x120] sm:$0xf0]  ;;  %v8064_v51 = vld [vmem:[%s13666_s2 + $0x128] sm:$0xf0] }
 0x490   :  { %5540 = vmatpush.msra.mxu3 %v12401_v35  ;;  %5501 = vmatpush.msra.mxu1 %v12407_v15  ;;  %v5440_v35 = vld [vmem:[%s13665_s1 + $0x138] sm:$0x7f]  ;;  %v13131_v15 = vpop.f32.mrf.mxu0  ;;  %s8790_s1 = smov 16  }
 0x491   :  { %v13231_v55 = vpop.f32.mrf.mxu2 }
 0x492   :  { %5541 = vmatpush.msra.mxu3 %v12419_v17  ;;  %5502 = vmatpush.msra.mxu1 %v12428_v28  ;;  %v8150_v17 = vld [vmem:[%s13666_s2 + $0x1c0] sm:$0xf] }
 0x493   :  { %v8627_v28 = vld [vmem:[%s13666_s2 + $0x1dc] sm:$0xf0] }
 0x494   :  { %5542 = vmatpush.msra.mxu3 %v12438_v12  ;;  %5503 = vmatpush.msra.mxu1 %v12445_v16  ;;  %v8151_v12 = vor.u32 %v8627_v28, %v8150_v17  ;;  %v8152_v16 = vld [vmem:[%s13666_s2 + $0x1e0] sm:$0xf0] }
 0x495   :  { %7909 = vmatmul.msk.f32.vlgmr.msra.gmra.mxu0 %vm82_vm4, %v5400_v39  ;;  %7911 = vmatmul.msk.f32.vlgmr.msra.gmra.mxu1 %vm82_vm4, %v5400_v39  ;;  %v8591_v17 = vld [vmem:[%s13666_s2 + $0xc4] sm:$0xf] }
 0x496   :  { %5543 = vmatpush.msra.mxu3 %v12455_v1  ;;  %7918 = vmatpush.msk.msrb.mxu1 %vm86_vm0, %v5438_v33  ;;  %v8628_v1 = vld [vmem:[%s13666_s2 + $0x1e4] sm:$0xf0]  ;;  %v8067_v33 = vor.u32 %v8600_v3, %v8064_v51 }
 0x497   :  { %7915 = vmatmul.msk.f32.vlgmr.msra.gmra.mxu3 %vm82_vm4, %v5400_v39  ;;  %7913 = vmatmul.msk.f32.vlgmr.msra.gmra.mxu2 %vm82_vm4, %v5400_v39 }
 0x498   :  { %7922 = vmatpush.msk.msrb.mxu3 %vm86_vm0, %v5440_v35  ;;  %5580 = vmatpush.msrb.mxu1 %v12474_v22  ;;  %v13165_v22 = vpop.f32.mrf.mxu3  ;;  %v13186_v42 = vpop.f32.mrf.mxu0  ;;  %v8595_v35 = vld [vmem:[%s13666_s2 + $0xdc] sm:$0xf0] }
 0x499   :  { %6032 = vmatpush.bf16.msra.mxu0 %v8151_v12  ;;  %v8023_v28 = vor.u32 %v8595_v35, %v8022_v32  ;;  %v8030_v12 = vld [vmem:[%s13666_s2 + $0xc8] sm:$0xf]  ;;  %v7928_v32 = vld [vmem:[%s13666_s2 + $0x20] sm:$0xf0] }
 0x49a   :  { %5620 = vmatpush.msrb.mxu3 %v12486_v7  ;;  %5581 = vmatpush.msrb.mxu1 %v12502_v59  ;;  %v8155_v7 = vor.u32 %v8623_v62, %v8152_v16  ;;  %v8159_v59 = vor.u32 %v8628_v1, %v8158_v31  ;;  %v8024_v62 = vld [vmem:[%s13666_s2 + $0xe0] sm:$0xf0]  ;;  %v8596_v16 = vld [vmem:[%s13666_s2 + $0xe4] sm:$0xf0] }
 0x49b   :  { %v8027_v31 = vor.u32 %v8591_v17, %v8024_v62  ;;  %v8031_v1 = vor.u32 %v8596_v16, %v8030_v12  ;;  %v7934_v35 = vld [vmem:[%s13666_s2 + $0x8] sm:$0xf] }
 0x49c   :  { %5621 = vmatpush.msrb.mxu3 %v12512_v58  ;;  %5582 = vmatpush.msrb.mxu1 %v12522_v52  ;;  %v8160_v58 = vld [vmem:[%s13666_s2 + $0x1e8] sm:$0xf0]  ;;  %v8572_v17 = vld [vmem:[%s13666_s2 + $0x24] sm:$0xf0] }
 0x49d   :  { %7917 = vmatmul.msk.f32.vlgmr.msrb.gmra.mxu0 %vm82_vm4, %v5400_v39  ;;  %v8163_v52 = vor.u32 %v8624_v60, %v8160_v58  ;;  %6058 = vmatpush.bf16.msra.mxu2 %v8159_v59  ;;  %v8032_v59 = vld [vmem:[%s13666_s2 + $0xe8] sm:$0xf0]  ;;  %v7935_v16 = vor.u32 %v8572_v17, %v7934_v35  ;;  %v4801_v35 = vld.sshfl [vmem:[#allocation1 + $0x10] sm:$0xff pattern:$0x75316420] }
 0x49e   :  { %5622 = vmatpush.msrb.mxu3 %v12532_v36  ;;  %5583 = vmatpush.msrb.mxu1 %v12549_v23  ;;  %v8619_v36 = vld [vmem:[%s13666_s2 + $0x19c] sm:$0xf0]  ;;  %v8615_v23 = vld [vmem:[%s13666_s2 + $0x184] sm:$0xf] }
 0x49f   :  { %7919 = vmatmul.msk.f32.vlgmr.msrb.gmra.mxu1 %vm82_vm4, %v5400_v39  ;;  %7921 = vmatmul.msk.f32.vlgmr.msrb.gmra.mxu2 %vm82_vm4, %v5400_v39  ;;  %v8119_v10 = vor.u32 %v8619_v36, %v8118_v0  ;;  %v8123_v37 = vor.u32 %v8615_v23, %v8120_v24  ;;  %v7990_v0 = vld [vmem:[%s13666_s2 + $0x80] sm:$0xf]  ;;  %v8583_v23 = vld [vmem:[%s13666_s2 + $0x84] sm:$0xf] }
 0x4a0   :  { %5623 = vmatpush.msrb.mxu3 %v12559_v44  ;;  %6045 = vmatpush.bf16.msra.mxu1 %v8155_v7  ;;  %v13188_v44 = vpop.f32.mrf.mxu1  ;;  %v13229_v5 = vpop.f32.mrf.mxu3  ;;  %v8592_v7 = vld [vmem:[%s13666_s2 + $0xcc] sm:$0xf]  ;;  %v8587_v36 = vld [vmem:[%s13666_s2 + $0x9c] sm:$0xf0]  ;;  %v7995_v14 = vor.u32 %v8583_v23, %v7992_v11  ;;  %v8168_v23 = vld [vmem:[%s13666_s2 + $0x1f0] sm:$0xf0] }
 0x4a1   :  { %7923 = vmatmul.msk.f32.vlgmr.msrb.gmra.mxu3 %vm82_vm4, %v5400_v39  ;;  %6033 = vmatpush.bf16.msra.mxu0 %v8119_v10  ;;  %v8059_v39 = vor.u32 %v8599_v18, %v8056_v63  ;;  %v8035_v60 = vor.u32 %v8592_v7, %v8032_v59  ;;  %v7991_v49 = vor.u32 %v8587_v36, %v7990_v0  ;;  %v7968_v63 = vld [vmem:[%s13666_s2 + $0x68] sm:$0xf0]  ;;  %v8166_v7 = vld [vmem:[%s13666_s2 + $0x1d0] sm:$0xf]  ;;  %v8625_v36 = vld [vmem:[%s13666_s2 + $0x1d4] sm:$0xf] }
 0x4a2   :  { %6071 = vmatpush.bf16.msra.mxu3 %v8163_v52  ;;  %6059 = vmatpush.bf16.msra.mxu2 %v8127_v57  ;;  %v8588_v57 = vld [vmem:[%s13666_s2 + $0xa4] sm:$0xf0]  ;;  %v4793_v48 = vsel %vm20_vm5, %v13133_v34, %v13188_v44  ;;  %v7967_v18 = vor.u32 %v8580_v38, %v7966_v30  ;;  %v8571_v34 = vld [vmem:[%s13666_s2 + $0x1c] sm:$0xf0]  ;;  %v8630_v11 = vld [vmem:[%s13666_s2 + $0x1f4] sm:$0xf0] }
 0x4a3   :  { %v4802_v59 = vld.sshfl [vmem:[#allocation1 + $0x18] sm:$0xff pattern:$0x75316420] }
 0x4a4   :  { %6046 = vmatpush.bf16.msra.mxu1 %v8123_v37  ;;  %v7998_v37 = vld [vmem:[%s13666_s2 + $0x88] sm:$0xf] }
 0x4a5   :  { %6034 = vmatpush.bf16.msra.mxu0 %v8087_v40  ;;  %v7999_v56 = vor.u32 %v8588_v57, %v7998_v37  ;;  %v4800_v40 = vld.sshfl [vmem:[#allocation1 + $0x8] sm:$0xff pattern:$0x75316420]  ;;  %v8626_v37 = vld [vmem:[%s13666_s2 + $0x1dc] sm:$0xf]  ;;  %v4795_v57 = vsel %vm20_vm5, %v13165_v22, %v13229_v5 }
 0x4a6   :  { %6072 = vmatpush.bf16.msra.mxu3 %v8131_v43  ;;  %6060 = vmatpush.bf16.msra.mxu2 %v8095_v26  ;;  %v8584_v43 = vld [vmem:[%s13666_s2 + $0x8c] sm:$0xf]  ;;  %v7960_v26 = vld [vmem:[%s13666_s2 + $0x60] sm:$0xf0]  ;;  %v8617_v22 = vld [vmem:[%s13666_s2 + $0x194] sm:$0xf] }
 0x4a7   :  { %v8003_v9 = vor.u32 %v8584_v43, %v8000_v53  ;;  %v7963_v19 = vor.u32 %v8575_v61, %v7960_v26  ;;  %v8176_v53 = vld [vmem:[%s13666_s2 + $0x1f8] sm:$0xf0]  ;;  %v8622_v61 = vld [vmem:[%s13666_s2 + $0x1b4] sm:$0xf0] }
 0x4a8   :  { %6047 = vmatpush.bf16.msra.mxu1 %v8091_v54  ;;  %v7959_v54 = vor.u32 %v8579_v25, %v7958_v29  ;;  %v8136_v29 = vld [vmem:[%s13666_s2 + $0x1b0] sm:$0xf0]  ;;  %v8142_v25 = vld [vmem:[%s13666_s2 + $0x198] sm:$0xf] }
 0x4a9   :  { %6035 = vmatpush.bf16.msra.mxu0 %v8055_v13  ;;  %v8576_v13 = vld [vmem:[%s13666_s2 + $0x4c] sm:$0xf]  ;;  %v8139_v38 = vor.u32 %v8617_v22, %v8136_v29  ;;  %v8594_v29 = vld [vmem:[%s13666_s2 + $0xdc] sm:$0xf] }
 0x4aa   :  { %6073 = vmatpush.bf16.msra.mxu3 %v8099_v50  ;;  %6061 = vmatpush.bf16.msra.mxu2 %v8063_v2  ;;  %v4792_v50 = vsel %vm20_vm5, %v13131_v15, %v13186_v42  ;;  %v7971_v21 = vor.u32 %v8576_v13, %v7968_v63  ;;  %v7926_v15 = vld [vmem:[%s13666_s2] sm:$0xf]  ;;  %v8567_v42 = vld [vmem:[%s13666_s2 + $0x4] sm:$0xf]  ;;  %v4808_v2 = vadd.f32 %v4800_v40, %v4793_v48  ;;  %v8621_v40 = vld [vmem:[%s13666_s2 + $0x1ac] sm:$0xf0] }
 0x4ab   :  { %v4807_v44 = vadd.f32 %v4799_v27, %v4792_v50  ;;  %v7931_v12 = vor.u32 %v8567_v42, %v7928_v32  ;;  %v8134_v27 = vld [vmem:[%s13666_s2 + $0x190] sm:$0xf]  ;;  %v8143_v50 = vor.u32 %v8622_v61, %v8142_v25  ;;  %v8618_v48 = vld [vmem:[%s13666_s2 + $0x19c] sm:$0xf] }
 0x4ac   :  { %6048 = vmatpush.bf16.msra.mxu1 %v8059_v39  ;;  %v8135_v5 = vor.u32 %v8621_v40, %v8134_v27  ;;  %v8112_v32 = vld [vmem:[%s13666_s2 + $0x178] sm:$0xf0]  ;;  %v8046_v27 = vld [vmem:[%s13666_s2 + $0xd8] sm:$0xf] }
 0x4ad   :  { %6036 = vmatpush.bf16.msra.mxu0 %v8023_v28  ;;  %v8048_v25 = vld [vmem:[%s13666_s2 + $0xf8] sm:$0xf0] }
 0x4ae   :  { %6074 = vmatpush.bf16.msra.mxu3 %v8067_v33  ;;  %6062 = vmatpush.bf16.msra.mxu2 %v8031_v1  ;;  %v7927_v33 = vor.u32 %v8571_v34, %v7926_v15  ;;  %v7936_v1 = vld [vmem:[%s13666_s2 + $0x28] sm:$0xf0]  ;;  %v8609_v15 = vld [vmem:[%s13666_s2 + $0x154] sm:$0xf] }
 0x4b0   :  { %6049 = vmatpush.bf16.msra.mxu1 %v8027_v31  ;;  %v8568_v31 = vld [vmem:[%s13666_s2 + $0xc] sm:$0xf] }
 0x4b1   :  { %6037 = vmatpush.bf16.msra.mxu0 %v7991_v49  ;;  %v7939_v0 = vor.u32 %v8568_v31, %v7936_v1  ;;  %v8174_v49 = vld [vmem:[%s13666_s2 + $0x1d8] sm:$0xf]  ;;  %v8605_v31 = vld [vmem:[%s13666_s2 + $0x12c] sm:$0xf0]  ;;  %v8601_v1 = vld [vmem:[%s13666_s2 + $0x114] sm:$0xf] }
 0x4b2   :  { %6075 = vmatpush.bf16.msra.mxu3 %v8035_v60  ;;  %6063 = vmatpush.bf16.msra.mxu2 %v7999_v56  ;;  %v8175_v43 = vor.u32 %v8630_v11, %v8174_v49  ;;  %v8038_v11 = vld [vmem:[%s13666_s2 + $0xd0] sm:$0xf] }
 0x4b4   :  { %6050 = vmatpush.bf16.msra.mxu1 %v7995_v14 }
 0x4b5   :  { %6038 = vmatpush.bf16.msra.mxu0 %v7959_v54  ;;  %v4810_v54 = vadd.f32 %v4802_v59, %v4795_v57 }
 0x4b6   :  { %6076 = vmatpush.bf16.msra.mxu3 %v8003_v9  ;;  %6064 = vmatpush.bf16.msra.mxu2 %v7967_v18  ;;  %v8179_v9 = vor.u32 %v8626_v37, %v8176_v53 }
 0x4b8   :  { %6051 = vmatpush.bf16.msra.mxu1 %v7963_v19  ;;  %v8144_v19 = vld [vmem:[%s13666_s2 + $0x1b8] sm:$0xf0] }
 0x4b9   :  { %6039 = vmatpush.bf16.msra.mxu0 %v7927_v33  ;;  %v8610_v33 = vld [vmem:[%s13666_s2 + $0x15c] sm:$0xf] }
 0x4ba   :  { %6077 = vmatpush.bf16.msra.mxu3 %v7971_v21  ;;  %6065 = vmatpush.bf16.msra.mxu2 %v7935_v16  ;;  %v8147_v21 = vor.u32 %v8618_v48, %v8144_v19  ;;  %v8070_v16 = vld [vmem:[%s13666_s2 + $0x110] sm:$0xf]  ;;  %v8585_v19 = vld [vmem:[%s13666_s2 + $0x94] sm:$0xf] }
 0x4bc   :  { %6052 = vmatpush.bf16.msra.mxu1 %v7931_v12  ;;  %v4794_v12 = vsel %vm20_vm5, %v13167_v20, %v13231_v55  ;;  %v8072_v20 = vld [vmem:[%s13666_s2 + $0x130] sm:$0xf0]  ;;  %v8078_v55 = vld [vmem:[%s13666_s2 + $0x118] sm:$0xf] }
 0x4be   :  { %6078 = vmatpush.bf16.msra.mxu3 %v7939_v0  ;;  %6110 = vmatpush.bf16.msrb.mxu2 %v8175_v43  ;;  %v8593_v43 = vld [vmem:[%s13666_s2 + $0xd4] sm:$0xf] }
 0x4c2   :  { %6123 = vmatpush.bf16.msrb.mxu3 %v8179_v9  ;;  %6111 = vmatpush.bf16.msrb.mxu2 %v8143_v50  ;;  %v8040_v9 = vld [vmem:[%s13666_s2 + $0xf0] sm:$0xf0] }
 0x4c3   :  { %v8043_v22 = vor.u32 %v8593_v43, %v8040_v9 }
 0x4c6   :  { %6124 = vmatpush.bf16.msrb.mxu3 %v8147_v21 }
 0x4f2   :  { %v13242_v45 = vpop.f32.mrf.mxu0  ;;  %v13244_v41 = vpop.f32.mrf.mxu1 }
 0x4f9   :  { %v13285_v58 = vpop.f32.mrf.mxu2  ;;  %v13287_v52 = vpop.f32.mrf.mxu3 }
 0x4fa   :  { %v5207_v10 = vpop.f32.mrf.mxu0  ;;  %v5220_v24 = vpop.f32.mrf.mxu1 }
 0x4fb   :  { %v8171_v24 = vor.u32 %v8625_v36, %v8168_v23  ;;  %v8606_v36 = vld [vmem:[%s13666_s2 + $0x134] sm:$0xf0]  ;;  %v8602_v23 = vld [vmem:[%s13666_s2 + $0x11c] sm:$0xf] }
 0x4fc   :  { %v8079_v57 = vor.u32 %v8606_v36, %v8078_v55  ;;  %v7984_v36 = vld [vmem:[%s13666_s2 + $0x78] sm:$0xf0] }
 0x4fd   :  { %6097 = vmatpush.bf16.msrb.mxu1 %v8171_v24 }
 0x501   :  { %v5233_v46 = vpop.f32.mrf.mxu2  ;;  %v5246_v39 = vpop.f32.mrf.mxu3  ;;  %6098 = vmatpush.bf16.msrb.mxu1 %v8139_v38  ;;  %v8589_v38 = vld [vmem:[%s13666_s2 + $0xac] sm:$0xf0] }
 0x502   :  { %v5257_v3 = vpop.f32.mrf.mxu0  ;;  %v5270_v51 = vpop.f32.mrf.mxu1  ;;  %v8102_v46 = vld [vmem:[%s13666_s2 + $0x150] sm:$0xf] }
 0x503   :  { %v5300_v28 = vsel %vm20_vm5, %v13242_v45, %v5257_v3  ;;  %v5301_v62 = vsel %vm20_vm5, %v13244_v41, %v5270_v51  ;;  %v8629_v41 = vld [vmem:[%s13666_s2 + $0x1ec] sm:$0xf0] }
 0x504   :  { %v5304_v45 = vadd.f32 %v5300_v28, %v4807_v44  ;;  %v5305_v60 = vadd.f32 %v5301_v62, %v4808_v2  ;;  %v8167_v10 = vor.u32 %v8629_v41, %v8166_v7  ;;  %v8613_v39 = vld [vmem:[%s13666_s2 + $0x16c] sm:$0xf0]  ;;  %v8110_v44 = vld [vmem:[%s13666_s2 + $0x158] sm:$0xf]  ;;  %v8115_v28 = vor.u32 %v8610_v33, %v8112_v32 }
 0x505   :  { %v8103_v42 = vor.u32 %v8613_v39, %v8102_v46  ;;  %v8614_v2 = vld [vmem:[%s13666_s2 + $0x174] sm:$0xf0]  ;;  %v8075_v41 = vor.u32 %v8601_v1, %v8072_v20  ;;  %v8586_v39 = vld [vmem:[%s13666_s2 + $0x9c] sm:$0xf] }
 0x506   :  { %v7905_v14 = vmul.f32 -1.442695, %v5304_v45  ;;  %v7906_v56 = vmul.f32 -1.442695, %v5305_v60  ;;  %6084 = vmatpush.bf16.msrb.mxu0 %v8167_v10  ;;  %v8111_v51 = vor.u32 %v8614_v2, %v8110_v44  ;;  %v8071_v45 = vor.u32 %v8605_v31, %v8070_v16  ;;  %6125 = vmatpush.bf16.msrb.mxu3 %v8115_v28  ;;  %v8590_v46 = vld [vmem:[%s13666_s2 + $0xb4] sm:$0xf0] }
 0x507   :  { %v4809_v10 = vadd.f32 %v4801_v35, %v4794_v12  ;;  %v7974_v2 = vld [vmem:[%s13666_s2 + $0x50] sm:$0xf]  ;;  %v7976_v16 = vld [vmem:[%s13666_s2 + $0x70] sm:$0xf0]  ;;  %v8578_v20 = vld [vmem:[%s13666_s2 + $0x5c] sm:$0xf] }
 0x508   :  { %8730 = vpow2.f32 %v7905_v14  ;;  %6112 = vmatpush.bf16.msrb.mxu2 %v8111_v51  ;;  %v8581_v35 = vld [vmem:[%s13666_s2 + $0x6c] sm:$0xf0] }
 0x509   :  { %8732 = vpow2.f32 %v7906_v56  ;;  %v5283_v26 = vpop.f32.mrf.mxu2  ;;  %v5296_v30 = vpop.f32.mrf.mxu3  ;;  %v8597_v56 = vld [vmem:[%s13666_s2 + $0xec] sm:$0xf0]  ;;  %v7975_v12 = vor.u32 %v8581_v35, %v7974_v2 }
 0x50a   :  { %v5303_v18 = vsel %vm20_vm5, %v13287_v52, %v5296_v30  ;;  %v5259_v13 = vpop.f32.mrf.mxu0  ;;  %v5272_v63 = vpop.f32.mrf.mxu1  ;;  %6085 = vmatpush.bf16.msrb.mxu0 %v8135_v5  ;;  %v8104_v52 = vld [vmem:[%s13666_s2 + $0x170] sm:$0xf0]  ;;  %v5302_v0 = vsel %vm20_vm5, %v13285_v58, %v5283_v26  ;;  %v8080_v58 = vld [vmem:[%s13666_s2 + $0x138] sm:$0xf0]  ;;  %v8039_v53 = vor.u32 %v8597_v56, %v8038_v11  ;;  %v8598_v5 = vld [vmem:[%s13666_s2 + $0xf4] sm:$0xf0]  ;;  %v8051_v26 = vor.u32 %v8594_v29, %v8048_v25 }
 0x50b   :  { %v5307_v34 = vadd.f32 %v5303_v18, %v4810_v54  ;;  %v8107_v3 = vor.u32 %v8609_v15, %v8104_v52  ;;  %v5306_v37 = vadd.f32 %v5302_v0, %v4809_v10  ;;  %v8083_v14 = vor.u32 %v8602_v23, %v8080_v58  ;;  %v8006_v30 = vld [vmem:[%s13666_s2 + $0x90] sm:$0xf]  ;;  %v8008_v18 = vld [vmem:[%s13666_s2 + $0xb0] sm:$0xf0]  ;;  %v8014_v13 = vld [vmem:[%s13666_s2 + $0x98] sm:$0xf] }
 0x50c   :  { %6113 = vmatpush.bf16.msrb.mxu2 %v8079_v57  ;;  %v8047_v54 = vor.u32 %v8598_v5, %v8046_v27  ;;  %v8007_v48 = vor.u32 %v8589_v38, %v8006_v30  ;;  %v8016_v15 = vld [vmem:[%s13666_s2 + $0xb8] sm:$0xf0]  ;;  %v8011_v51 = vor.u32 %v8585_v19, %v8008_v18  ;;  %v8015_v33 = vor.u32 %v8590_v46, %v8014_v13  ;;  %v7942_v57 = vld [vmem:[%s13666_s2 + $0x10] sm:$0xf]  ;;  %v8569_v56 = vld [vmem:[%s13666_s2 + $0x14] sm:$0xf] }
 0x50d   :  { %v7907_v17 = vmul.f32 -1.442695, %v5307_v34  ;;  %6099 = vmatpush.bf16.msrb.mxu1 %v8107_v3  ;;  %6126 = vmatpush.bf16.msrb.mxu3 %v8083_v14  ;;  %v8019_v32 = vor.u32 %v8586_v39, %v8016_v15  ;;  %v7987_v58 = vor.u32 %v8578_v20, %v7984_v36  ;;  %v8573_v14 = vld [vmem:[%s13666_s2 + $0x2c] sm:$0xf0]  ;;  %v7944_v27 = vld [vmem:[%s13666_s2 + $0x30] sm:$0xf0] }
 0x50e   :  { %v8731_v62 = vpop.eup %8730  ;;  %6086 = vmatpush.bf16.msrb.mxu0 %v8103_v42  ;;  %v7943_v9 = vor.u32 %v8573_v14, %v7942_v57  ;;  %v7947_v25 = vor.u32 %v8569_v56, %v7944_v27 }
 0x50f   :  { %v8733_v7 = vpop.eup %8732  ;;  %v13467_v59 = vadd.f32 1.0, %v8731_v62  ;;  %8734 = vpow2.f32 %v7907_v17  ;;  %v8577_v17 = vld [vmem:[%s13666_s2 + $0x54] sm:$0xf] }
 0x510   :  { %v13475_v60 = vadd.f32 1.0, %v8733_v7  ;;  %6114 = vmatpush.bf16.msrb.mxu2 %v8047_v54  ;;  %v7979_v1 = vor.u32 %v8577_v17, %v7976_v16  ;;  %v7982_v7 = vld [vmem:[%s13666_s2 + $0x58] sm:$0xf] }
 0x511   :  { %8736 = vrcp.f32 %v13467_v59  ;;  %v5285_v24 = vpop.f32.mrf.mxu2  ;;  %v5298_v49 = vpop.f32.mrf.mxu3  ;;  %6100 = vmatpush.bf16.msrb.mxu1 %v8075_v41  ;;  %v5321_v52 = vand.u32 2147483647, %v13467_v59  ;;  %v5323_v44 = vand.u32 2147483648, %v13467_v59  ;;  %6127 = vmatpush.bf16.msrb.mxu3 %v8051_v26  ;;  %vm5317_vm2 = vweird.f32 %v13467_v59  ;;  %v8574_v54 = vld [vmem:[%s13666_s2 + $0x34] sm:$0xf0] }
 0x512   :  { %8738 = vrcp.f32 %v13475_v60  ;;  %6087 = vmatpush.bf16.msrb.mxu0 %v8071_v45  ;;  %v5342_v42 = vand.u32 2147483648, %v13475_v60  ;;  %v5340_v62 = vand.u32 2147483647, %v13475_v60  ;;  %v8582_v45 = vld [vmem:[%s13666_s2 + $0x74] sm:$0xf0]  ;;  %vm5336_vm8 = vweird.f32 %v13475_v60 }
 0x513   :  { %8740 = vtanh.f32 %v5306_v37  ;;  %v7983_v41 = vor.u32 %v8582_v45, %v7982_v7  ;;  %vm13590_vm4 = vcmp.eq.f32.partialorder %v5321_v52, 8.507059e+37  ;;  %v8570_v26 = vld [vmem:[%s13666_s2 + $0x1c] sm:$0xf] }
 0x514   :  { %6115 = vmatpush.bf16.msrb.mxu2 %v8015_v33  ;;  %v5343_v43 = vor.u32 1.1754944e-38, %v5342_v42  ;;  %vm5341_vm10 = vcmp.eq.f32.partialorder %v5340_v62, 8.507059e+37  ;;  %v5505_v33 = vpop.f32.mrf.mxu1 }
 0x515   :  { %v8735_v40 = vpop.eup %8734  ;;  %6101 = vmatpush.bf16.msrb.mxu1 %v8043_v22  ;;  %6128 = vmatpush.bf16.msrb.mxu3 %v8019_v32 }
 0x516   :  { %v13515_v61 = vadd.f32 1.0, %v8735_v40  ;;  %6088 = vmatpush.bf16.msrb.mxu0 %v8039_v53  ;;  %v7950_v40 = vld [vmem:[%s13666_s2 + $0x18] sm:$0xf] }
 0x517   :  { %v13523_v50 = vpop.eup %8736 }
 0x518   :  { %v13534_v63 = vpop.eup %8738  ;;  %v5313_v21 = vmul.f32 %v13523_v50, %v13467_v59  ;;  %8742 = vrcp.f32 %v13515_v61  ;;  %vm5318_vm0 = vweird.f32 %v13523_v50  ;;  %v5324_v59 = vor.u32 1.1754944e-38, %v5323_v44  ;;  %6116 = vmatpush.bf16.msrb.mxu2 %v7983_v41 }
 0x519   :  { %v5332_v34 = vmul.f32 %v13534_v63, %v13475_v60  ;;  %6102 = vmatpush.bf16.msrb.mxu1 %v8011_v51  ;;  %v8741_v55 = vpop.eup %8740  ;;  %vm5337_vm1 = vweird.f32 %v13534_v63  ;;  %vm13586_vm3 = vmor %vm5317_vm2, %vm5318_vm0  ;;  %6129 = vmatpush.bf16.msrb.mxu3 %v7987_v58  ;;  %v5362_v46 = vand.u32 2147483648, %v13515_v61  ;;  %vm5356_vm12 = vweird.f32 %v13515_v61 }
 0x51a   :  { %v5314_v3 = vsub.f32 1.0, %v5313_v21  ;;  %6089 = vmatpush.bf16.msrb.mxu0 %v8007_v48  ;;  %vm13608_vm9 = vmor %vm5336_vm8, %vm5337_vm1  ;;  %v7952_v48 = vld [vmem:[%s13666_s2 + $0x38] sm:$0xf0]  ;;  %v5360_v39 = vand.u32 2147483647, %v13515_v61  ;;  %v5545_v32 = vpop.f32.mrf.mxu3  ;;  %v5525_v35 = vpop.f32.mrf.mxu2  ;;  %s8788_s2 = smov [#allocation2]  }
 0x51b   :  { %v5333_v28 = vsub.f32 1.0, %v5332_v34  ;;  %v7955_v13 = vor.u32 %v8570_v26, %v7952_v48  ;;  %v5363_v15 = vor.u32 1.1754944e-38, %v5362_v46  ;;  %s6225_s30 = sshll.u32 %s8788_s2, 4  ;;  %s6226_s30 = int_to_ptr.vmem [resolvable:$true] %s6225_s30 }
 0x51c   :  { %v5315_v31 = vmul.f32 %v13523_v50, %v5314_v3  ;;  %vm5361_vm14 = vcmp.eq.f32.partialorder %v5360_v39, 8.507059e+37 }
 0x51d   :  { %v5334_v0 = vmul.f32 %v13534_v63, %v5333_v28  ;;  %6103 = vmatpush.bf16.msrb.mxu1 %v7979_v1  ;;  %6130 = vmatpush.bf16.msrb.mxu3 %v7955_v13  ;;  %v5585_v28 = vpop.f32.mrf.mxu1 }
 0x51e   :  { %v8743_v23 = vpop.eup %8742  ;;  %v5316_v10 = vadd.f32 %v13523_v50, %v5315_v31  ;;  %6090 = vmatpush.bf16.msrb.mxu0 %v7975_v12 }
 0x51f   :  { %v5335_v11 = vadd.f32 %v13534_v63, %v5334_v0  ;;  %v5352_v37 = vmul.f32 %v8743_v23, %v13515_v61  ;;  %vm5357_vm11 = vweird.f32 %v8743_v23  ;;  %v5485_v61 = vpop.f32.mrf.mxu0 }
 0x520   :  { %v5320_v53 = vsel %vm13586_vm3, %v13523_v50, %v5316_v10  ;;  %v7951_v50 = vor.u32 %v8574_v54, %v7950_v40  ;;  %vm5358_vm13 = vmor %vm5356_vm12, %vm5357_vm11 }
 0x521   :  { %v5325_v22 = vsel %vm13590_vm4, %v5324_v59, %v5320_v53  ;;  %v5339_v5 = vsel %vm13608_vm9, %v13534_v63, %v5335_v11  ;;  %v5353_v29 = vsub.f32 1.0, %v5352_v37  ;;  %6104 = vmatpush.bf16.msrb.mxu1 %v7947_v25 }
 0x522   :  { %v5344_v30 = vsel %vm5341_vm10, %v5343_v43, %v5339_v5  ;;  %v5367_v38 = vmul.f32 %v8741_v55, %v5325_v22  ;;  %6091 = vmatpush.bf16.msrb.mxu0 %v7943_v9  ;;  %6117 = vmatpush.bf16.msrb.mxu2 %v7951_v50  ;;  %v5605_v12 = vpop.f32.mrf.mxu2  ;;  %v5629_v55 = vsel %vm20_vm5, %v5505_v33, %v5585_v28 }
 0x523   :  { %v5366_v19 = vmul.f32 %v5344_v30, %v13048_v47  ;;  %v5354_v18 = vmul.f32 %v8743_v23, %v5353_v29  ;;  %v5630_v48 = vsel %vm20_vm5, %v5525_v35, %v5605_v12 }
 0x524   :  { %v5625_v62 = vpop.f32.mrf.mxu3 }
 0x525   :  { %v13636_v63 = vadd.f32 %v5367_v38, %v5366_v19  ;;  %v5355_v21 = vadd.f32 %v8743_v23, %v5354_v18  ;;  %v5631_v14 = vsel %vm20_vm5, %v5545_v32, %v5625_v62 }
 0x527   :  { %8744 = vtanh.f32 %v13636_v63  ;;  %v5359_v47 = vsel %vm5358_vm13, %v8743_v23, %v5355_v21  ;;  %v5565_v17 = vpop.f32.mrf.mxu0 }
 0x528   :  { %v5364_v42 = vsel %vm5361_vm14, %v5363_v15, %v5359_v47 }
 0x52d   :  { %v8745_v34 = vpop.eup %8744 }
 0x52e   :  { %v5370_v52 = vmul.f32 %v8745_v34, %v5364_v42 }
 0x530   :  { %v5372_v44 = vrot.slane %v5370_v52, 1  ;;  %5374 = vst [vmem:[#allocation2 + $0x6] sm:$0x1] %v5370_v52  ;;  %v5647_v2 = vpack.c.bf16 %v5370_v52, %v5370_v52 }
 0x531   :  { %5376 = vst [vmem:[#allocation1] sm:$0xff] %v5370_v52 }
 0x532   :  { %5375 = vst [vmem:[#allocation2 + $0x16] sm:$0x1] %v5372_v44  ;;  %6040 = vmatmul.bf16.vlgmr.msra.gmra.mxu0 %v5647_v2  ;;  %6053 = vmatmul.bf16.vlgmr.msra.gmra.mxu1 %v5647_v2 }
 0x533   :  { %6066 = vmatmul.bf16.vlgmr.msra.gmra.mxu2 %v5647_v2  ;;  %6079 = vmatmul.bf16.vlgmr.msra.gmra.mxu3 %v5647_v2 }
 0x538   :  { %v5378_v3 = vld [vmem:[#allocation1 + $0x2] ss:$9 sm:$0xff] }
 0x539   :  { %v5380_v51 = vld [vmem:[#allocation1 + $0x3] ss:$9 sm:$0xff]  ;;  %5383 = vst [vmem:[#allocation2 + $0x9] sm:$0x1] %v5378_v3 }
 0x53a   :  { %5384 = vst [vmem:[#allocation2 + $0x19] sm:$0x1] %v5380_v51 }
 0x53b   :  { %5632 = vst [vmem:[#allocation1] ss:$2 sm:$0xff] %v9142_v4 }
 0x53c   :  { %5634 = vst [vmem:[#allocation1 + $0x10] ss:$2 sm:$0xff] %v9163_v8  ;;  %v5628_v8 = vsel %vm20_vm5, %v5485_v61, %v5565_v17 }
 0x542   :  { %6092 = vmatmul.bf16.vlgmr.msrb.gmra.mxu0 %v5647_v2  ;;  %6105 = vmatmul.bf16.vlgmr.msrb.gmra.mxu1 %v5647_v2  ;;  %v5635_v20 = vld.sshfl [vmem:[#allocation1] sm:$0xff pattern:$0x75316420]  ;;  %v5636_v0 = vld.sshfl [vmem:[#allocation1 + $0x8] sm:$0xff pattern:$0x75316420] }
 0x543   :  { %6118 = vmatmul.bf16.vlgmr.msrb.gmra.mxu2 %v5647_v2  ;;  %6131 = vmatmul.bf16.vlgmr.msrb.gmra.mxu3 %v5647_v2  ;;  %v5643_v23 = vadd.f32 %v5635_v20, %v5628_v8  ;;  %v5644_v10 = vadd.f32 %v5636_v0, %v5629_v55  ;;  %v5638_v57 = vld.sshfl [vmem:[#allocation1 + $0x18] sm:$0xff pattern:$0x75316420]  ;;  %v5637_v19 = vld.sshfl [vmem:[#allocation1 + $0x10] sm:$0xff pattern:$0x75316420] }
 0x544   :  { %v5646_v43 = vadd.f32 %v5638_v57, %v5631_v14  ;;  %v5645_v21 = vadd.f32 %v5637_v19, %v5630_v48 }
 0x5af   :  { %v6041_v16 = vpop.f32.mrf.mxu0  ;;  %v6054_v31 = vpop.f32.mrf.mxu1 }
 0x5b6   :  { %v6067_v1 = vpop.f32.mrf.mxu2  ;;  %v6080_v7 = vpop.f32.mrf.mxu3 }
 0x5b7   :  { %v6043_v45 = vpop.f32.mrf.mxu0  ;;  %v6056_v4 = vpop.f32.mrf.mxu1 }
 0x5be   :  { %v6069_v41 = vpop.f32.mrf.mxu2  ;;  %v6082_v36 = vpop.f32.mrf.mxu3 }
 0x5bf   :  { %v6093_v24 = vpop.f32.mrf.mxu0  ;;  %v6106_v49 = vpop.f32.mrf.mxu1 }
 0x5c0   :  { %v6136_v59 = vsel %vm20_vm5, %v6041_v16, %v6093_v24  ;;  %v6137_v58 = vsel %vm20_vm5, %v6054_v31, %v6106_v49 }
 0x5c1   :  { %v6140_v11 = vadd.f32 %v6136_v59, %v5643_v23  ;;  %v6141_v37 = vadd.f32 %v6137_v58, %v5644_v10 }
 0x5c3   :  { %v8180_v56 = vmul.f32 -1.442695, %v6140_v11  ;;  %v8181_v60 = vmul.f32 -1.442695, %v6141_v37 }
 0x5c5   :  { %8746 = vpow2.f32 %v8180_v56 }
 0x5c6   :  { %8748 = vpow2.f32 %v8181_v60  ;;  %v6119_v53 = vpop.f32.mrf.mxu2  ;;  %v6132_v9 = vpop.f32.mrf.mxu3 }
 0x5c7   :  { %v6139_v27 = vsel %vm20_vm5, %v6080_v7, %v6132_v9  ;;  %v6095_v40 = vpop.f32.mrf.mxu0  ;;  %v6108_v22 = vpop.f32.mrf.mxu1  ;;  %v6138_v18 = vsel %vm20_vm5, %v6067_v1, %v6119_v53 }
 0x5c8   :  { %v6143_v5 = vadd.f32 %v6139_v27, %v5646_v43  ;;  %v6142_v47 = vadd.f32 %v6138_v18, %v5645_v21 }
 0x5ca   :  { %v8182_v29 = vmul.f32 -1.442695, %v6143_v5 }
 0x5cb   :  { %v8747_v25 = vpop.eup %8746 }
 0x5cc   :  { %v8749_v54 = vpop.eup %8748  ;;  %v6147_v26 = vadd.f32 1.0, %v8747_v25  ;;  %8750 = vpow2.f32 %v8182_v29 }
 0x5cd   :  { %v6166_v30 = vadd.f32 1.0, %v8749_v54 }
 0x5ce   :  { %8752 = vrcp.f32 %v6147_v26  ;;  %v6121_v38 = vpop.f32.mrf.mxu2  ;;  %v6134_v50 = vpop.f32.mrf.mxu3  ;;  %v6159_v2 = vand.u32 2147483648, %v6147_v26  ;;  %v6157_v61 = vand.u32 2147483647, %v6147_v26  ;;  %vm6153_vm5 = vweird.f32 %v6147_v26 }
 0x5cf   :  { %8754 = vrcp.f32 %v6166_v30  ;;  %v6178_v3 = vand.u32 2147483648, %v6166_v30  ;;  %v6176_v6 = vand.u32 2147483647, %v6166_v30  ;;  %vm6172_vm7 = vweird.f32 %v6166_v30 }
 0x5d0   :  { %v6160_v17 = vor.u32 1.1754944e-38, %v6159_v2  ;;  %vm6158_vm2 = vcmp.eq.f32.partialorder %v6157_v61, 8.507059e+37 }
 0x5d1   :  { %v6179_v12 = vor.u32 1.1754944e-38, %v6178_v3  ;;  %vm6177_vm3 = vcmp.eq.f32.partialorder %v6176_v6, 8.507059e+37 }
 0x5d2   :  { %v8751_v13 = vpop.eup %8750 }
 0x5d3   :  { %v6186_v46 = vadd.f32 1.0, %v8751_v13 }
 0x5d4   :  { %v8753_v39 = vpop.eup %8752 }
 0x5d5   :  { %v8755_v15 = vpop.eup %8754  ;;  %v6149_v34 = vmul.f32 %v8753_v39, %v6147_v26  ;;  %8756 = vrcp.f32 %v6186_v46  ;;  %vm6154_vm15 = vweird.f32 %v8753_v39  ;;  %v6198_v36 = vand.u32 2147483648, %v6186_v46 }
 0x5d6   :  { %v6168_v42 = vmul.f32 %v8755_v15, %v6166_v30  ;;  %8758 = vtanh.f32 %v6142_v47  ;;  %vm6173_vm6 = vweird.f32 %v8755_v15  ;;  %vm6155_vm0 = vmor %vm6153_vm5, %vm6154_vm15  ;;  %vm6192_vm8 = vweird.f32 %v6186_v46 }
 0x5d7   :  { %v6150_v52 = vsub.f32 1.0, %v6149_v34  ;;  %vm6174_vm1 = vmor %vm6172_vm7, %vm6173_vm6  ;;  %v6196_v23 = vand.u32 2147483647, %v6186_v46  ;;  %v6199_v24 = vor.u32 1.1754944e-38, %v6198_v36 }
 0x5d8   :  { %v6169_v44 = vsub.f32 1.0, %v6168_v42 }
 0x5d9   :  { %v6151_v51 = vmul.f32 %v8753_v39, %v6150_v52  ;;  %vm6197_vm10 = vcmp.eq.f32.partialorder %v6196_v23, 8.507059e+37 }
 0x5da   :  { %v6170_v33 = vmul.f32 %v8755_v15, %v6169_v44 }
 0x5db   :  { %v8757_v32 = vpop.eup %8756  ;;  %v6152_v35 = vadd.f32 %v8753_v39, %v6151_v51 }
 0x5dc   :  { %v6171_v28 = vadd.f32 %v8755_v15, %v6170_v33  ;;  %v6188_v62 = vmul.f32 %v8757_v32, %v6186_v46  ;;  %v8759_v31 = vpop.eup %8758  ;;  %vm6193_vm4 = vweird.f32 %v8757_v32 }
 0x5dd   :  { %v6156_v16 = vsel %vm6155_vm0, %v8753_v39, %v6152_v35  ;;  %vm6194_vm9 = vmor %vm6192_vm8, %vm6193_vm4 }
 0x5de   :  { %v6161_v1 = vsel %vm6158_vm2, %v6160_v17, %v6156_v16  ;;  %v6175_v7 = vsel %vm6174_vm1, %v8755_v15, %v6171_v28  ;;  %v6189_v45 = vsub.f32 1.0, %v6188_v62 }
 0x5df   :  { %v6180_v4 = vsel %vm6177_vm3, %v6179_v12, %v6175_v7  ;;  %v6203_v8 = vmul.f32 %v8759_v31, %v6161_v1 }
 0x5e0   :  { %v6202_v20 = vmul.f32 %v6180_v4, %v13636_v63  ;;  %v6190_v55 = vmul.f32 %v8757_v32, %v6189_v45 }
 0x5e2   :  { %v6204_v0 = vadd.f32 %v6203_v8, %v6202_v20  ;;  %v6191_v41 = vadd.f32 %v8757_v32, %v6190_v55 }
 0x5e4   :  { %8760 = vtanh.f32 %v6204_v0  ;;  %v6195_v10 = vsel %vm6194_vm9, %v8757_v32, %v6191_v41 }
 0x5e5   :  { %v6200_v59 = vsel %vm6197_vm10, %v6199_v24, %v6195_v10 }
 0x5ea   :  { %v8761_v49 = vpop.eup %8760 }
 0x5eb   :  { %v6206_v58 = vmul.f32 %v8761_v49, %v6200_v59 }
 0x5ed   :  { %v6208_v11 = vrot.slane %v6206_v58, 1  ;;  %6210 = vst [vmem:[#allocation2 + $0x7] sm:$0x1] %v6206_v58 }
 0x5ee   :  { %6212 = vst [vmem:[#allocation1] sm:$0xff] %v6206_v58 }
 0x5ef   :  { %6211 = vst [vmem:[#allocation2 + $0x17] sm:$0x1] %v6208_v11 }
 0x5f5   :  { %v6214_v63 = vld [vmem:[#allocation1 + $0x2] ss:$9 sm:$0xff] }
 0x5f6   :  { %v6216_v37 = vld [vmem:[#allocation1 + $0x3] ss:$9 sm:$0xff]  ;;  %6219 = vst [vmem:[#allocation2 + $0x8] sm:$0x1] %v6214_v63 }
 0x5f7   :  { %6220 = vst [vmem:[#allocation2 + $0x18] sm:$0x1] %v6216_v37 }
 0x5f8   :  { %6233 = dma.vmem_to_hbm [thread:$0]  %s6226_s30, 512, %s6228_s7, [#allocation3], %s8789_s8, %s8789_s8, %s8790_s1  }
 0x5f9   :  { %8786 = dma.done.wait [#allocation3], 512  }
 0x5fa   :  { %8787 = vsyncadd [#allocation3], 4294966784 }
 0x5fb   :  { %6238 = vsyncpa [#allocation3], 1 }

</bundles_post_ra>
